<compile_context>
chip_gen: v6e
topology: v6e:2x2x1
jax: 0.10.0
libtpu: 0.0.40
codegen_flags: <defaults>
</compile_context>

<pallas_src>
import math
import jax
import jax.numpy as jnp
from jax import lax
from jax.experimental import pallas as pl
from jax.experimental.pallas import tpu as pltpu  # noqa: F401  (kept for TPU-specific tuning hooks)

# ----------------- configuration (synthetic "data" hyper-params) -----------------
CHAR_VOCAB, CHAR_EMB, CHAR_HID = 30, 8, 16          # char BiLSTM: 8 hidden per direction
WORD_VOCAB, WORD_EMB = 50, 16
HIDDEN = 32                                          # data.HP_hidden_dim
OBJ_VOCAB, OBJ_EMB = 20, 12
HEADS = 4                                            # data.HP_multi_head
HEAD_DIM = HIDDEN // HEADS
FF = HIDDEN * 4
LAYERS = 1                                           # data.HP_SGA_layer (mega kernel assumes 1)
LABELS = 6                                           # data.label_alphabet_size
NTAG = LABELS + 2                                    # hidden2tag out dim == CRF tag space
B, SENT, WORDLEN, NOBJ = 2, 8, 6, 8                  # NOBJ == SENT (required by text+obj add)


# =============================== fused BiLSTM kernel ===============================
# Both directions and all four gate matmuls are fused into a single (2N, E+H) x
# (E+H, 8H) dot per timestep.  Weight layout: rows 0:E input weights, rows E:E+H hidden
# weights; cols 0:4H forward gates (i,f,g,o order), cols 4H:8H backward gates.
# Hidden/cell state carried stacked as (2N, H): rows 0:N forward, rows N:2N backward
# (the backward rows consume x[T-1-t]).  Padded steps are mask-gated (packed-sequence
# semantics: carried state frozen, emitted output zero).

def _make_bilstm_kernel(return_seq):
    def kernel(x_ref, m_ref, w_ref, b_ref, *out_refs):
        if return_seq:
            hseq_ref, hfin_ref = out_refs
        else:
            (hfin_ref,) = out_refs
        T, N, _ = x_ref.shape
        H = w_ref.shape[1] // 8

        w = w_ref[...]                                    # (E+H, 8H)
        bias = b_ref[...]                                 # (1, 8H)
        is_fwd = lax.broadcasted_iota(jnp.int32, (2 * N, 1), 0) < N   # (2N, 1)

        h = jnp.zeros((2 * N, H), jnp.float32)
        c = jnp.zeros((2 * N, H), jnp.float32)
        seq_f = [None] * T
        seq_b = [None] * T

        for t in range(T):                                # fully unrolled (T <= 8)
            tb = T - 1 - t
            x2 = jnp.concatenate([x_ref[t], x_ref[tb]], axis=0)       # (2N, E)
            m2 = jnp.concatenate([m_ref[t], m_ref[tb]], axis=0)       # (2N, 1)
            inp = jnp.concatenate([x2, h], axis=-1)                   # (2N, E+H)
            z = jnp.dot(inp, w, preferred_element_type=jnp.float32) + bias   # (2N, 8H)
            zg = jnp.where(is_fwd, z[:, 0:4 * H], z[:, 4 * H:8 * H])  # (2N, 4H)
            i_g = jax.nn.sigmoid(zg[:, 0:H])
            f_g = jax.nn.sigmoid(zg[:, H:2 * H])
            g_g = jnp.tanh(zg[:, 2 * H:3 * H])
            o_g = jax.nn.sigmoid(zg[:, 3 * H:4 * H])
            c_new = f_g * c + i_g * g_g
            h_new = o_g * jnp.tanh(c_new)
            h = m2 * h_new + (1.0 - m2) * h
            c = m2 * c_new + (1.0 - m2) * c
            if return_seq:
                out = m2 * h_new                                      # zeros at padding
                seq_f[t] = out[0:N]
                seq_b[tb] = out[N:2 * N]

        if return_seq:
            # single consolidated store: (T*N, 2H) assembled from 2-D concats only
            hseq2d = jnp.concatenate([jnp.concatenate(seq_f, axis=0),
                                      jnp.concatenate(seq_b, axis=0)], axis=-1)
            hseq_ref[...] = hseq2d.astype(hseq_ref.dtype)
        hfin_ref[...] = jnp.concatenate([h[0:N], h[N:2 * N]], axis=-1).astype(hfin_ref.dtype)

    return kernel


def pallas_bilstm(x_seq, mask_seq, w_comb, b_comb, return_seq):
    """x_seq: (T,N,E), mask_seq: (T,N,1), w_comb: (E+H, 8H), b_comb: (1, 8H)."""
    T, N, _ = x_seq.shape
    H = w_comb.shape[1] // 8
    kernel = _make_bilstm_kernel(return_seq)
    if return_seq:
        out_shape = (jax.ShapeDtypeStruct((T * N, 2 * H), jnp.float32),
                     jax.ShapeDtypeStruct((N, 2 * H), jnp.float32))
        hseq2d, hfin = pl.pallas_call(kernel, out_shape=out_shape)(
            x_seq, mask_seq, w_comb, b_comb)
        return hseq2d.reshape(T, N, 2 * H), hfin
    out_shape = jax.ShapeDtypeStruct((N, 2 * H), jnp.float32)
    return pl.pallas_call(kernel, out_shape=out_shape)(x_seq, mask_seq, w_comb, b_comb)


# ===================== fused MCA encoder/decoder + BN + hidden2tag ==================
# Batch is flattened to (B*L, H); per-batch attention is reproduced with masks that
# combine key padding with a block-diagonal "same batch" constraint.  Per-head work
# uses head-lane masks instead of lane slicing / concatenation:
#   s_h = (q * mask_h) @ K^T    (masked lanes contribute 0 to the contraction)
#   att += softmax(s_h) @ (v * mask_h)   (head output lands in its own lane range)

def _ln(x, g, b):
    # MCAN custom LayerNorm uses eps=1e-6
    mu = jnp.mean(x, axis=-1, keepdims=True)
    var = jnp.mean((x - mu) ** 2, axis=-1, keepdims=True)
    return (x - mu) * lax.rsqrt(var + 1e-6) * g + b


def _mha_ln(xq, ykv, mask, head_masks, wq, bq, wkv, bkv, wo, bo, g, beta):
    Hd = xq.shape[-1]
    scale = 1.0 / math.sqrt(Hd // HEADS)
    q = jnp.dot(xq, wq, preferred_element_type=jnp.float32) + bq           # (Lq, H)
    kv = jnp.dot(ykv, wkv, preferred_element_type=jnp.float32) + bkv       # (Lk, 2H)
    k = kv[:, 0:Hd]
    v = kv[:, Hd:2 * Hd]
    kT = k.T                                                               # hoisted once
    att = None
    for h in range(HEADS):
        hm = head_masks[h]                                                 # (1, H)
        s = jnp.dot(q * hm, kT, preferred_element_type=jnp.float32) * scale  # (Lq, Lk)
        s = jnp.where(mask > 0.5, jnp.float32(-1e9), s)
        s = s - jnp.max(s, axis=-1, keepdims=True)
        e = jnp.exp(s)
        p = e / jnp.sum(e, axis=-1, keepdims=True)
        pv = jnp.dot(p, v * hm, preferred_element_type=jnp.float32)        # head lanes only
        att = pv if att is None else att + pv
    proj = jnp.dot(att, wo, preferred_element_type=jnp.float32) + bo
    return _ln(xq + proj, g, beta)


def _ffn_ln(x, w1, b1, w2, b2, g, beta):
    hmid = jnp.maximum(jnp.dot(x, w1, preferred_element_type=jnp.float32) + b1, 0.0)
    y = jnp.dot(hmid, w2, preferred_element_type=jnp.float32) + b2
    return _ln(x + y, g, beta)


def _mca_head_kernel(text_ref, objemb_ref, tmask_ref, omask_ref, xmask_ref,
                     olw_ref, olb_ref,
                     sqw, sqb, skvw, skvb, sow, sob, sl1g, sl1b,
                     sw1, sb1, sw2, sb2, sl2g, sl2b,
                     aqw, aqb, akvw, akvb, aow, aob, dl1g, dl1b,
                     cqw, cqb, ckvw, ckvb, cow, cob, dl2g, dl2b,
                     dw1, db1, dw2, db2, dl3g, dl3b,
                     bng, bnb, tagw, tagb,
                     out_ref):
    lane = lax.broadcasted_iota(jnp.int32, (1, HIDDEN), 1)
    head_masks = [((lane >= h * HEAD_DIM) & (lane < (h + 1) * HEAD_DIM)).astype(jnp.float32)
                  for h in range(HEADS)]

    text = text_ref[...]                                  # (B*SENT, H)
    tmask = tmask_ref[...]
    omask = omask_ref[...]
    xmask = xmask_ref[...]

    # --- MCA encoder: one SA layer on text ---
    enc = _mha_ln(text, text, tmask, head_masks, sqw[...], sqb[...], skvw[...], skvb[...],
                  sow[...], sob[...], sl1g[...], sl1b[...])
    enc = _ffn_ln(enc, sw1[...], sb1[...], sw2[...], sb2[...], sl2g[...], sl2b[...])

    # --- object Linear (folded in) ---
    obj = jnp.dot(objemb_ref[...], olw_ref[...],
                  preferred_element_type=jnp.float32) + olb_ref[...]       # (B*NOBJ, H)

    # --- MCA decoder: one SGA layer (obj self-attn, obj->text cross-attn, FFN) ---
    obj = _mha_ln(obj, obj, omask, head_masks, aqw[...], aqb[...], akvw[...], akvb[...],
                  aow[...], aob[...], dl1g[...], dl1b[...])
    obj = _mha_ln(obj, enc, xmask, head_masks, cqw[...], cqb[...], ckvw[...], ckvb[...],
                  cow[...], cob[...], dl2g[...], dl2b[...])
    obj = _ffn_ln(obj, dw1[...], db1[...], dw2[...], db2[...], dl3g[...], dl3b[...])

    # --- residual add + BatchNorm1d (training-mode batch stats, biased var) + hidden2tag ---
    x = text + obj
    mu = jnp.mean(x, axis=0, keepdims=True)
    var = jnp.mean((x - mu) ** 2, axis=0, keepdims=True)
    xn = (x - mu) * lax.rsqrt(var + 1e-5) * bng[...] + bnb[...]
    out_ref[...] = (jnp.dot(xn, tagw[...], preferred_element_type=jnp.float32)
                    + tagb[...]).astype(out_ref.dtype)


def pallas_mca_head(text_flat, obj_embs_flat, tmask, omask, xmask, params):
    assert LAYERS == 1  # mega kernel is fused for the single-layer configuration
    enc = params['mca']['enc'][0]
    dec = params['mca']['dec'][0]
    BT = text_flat.shape[0]
    return pl.pallas_call(
        _mca_head_kernel,
        out_shape=jax.ShapeDtypeStruct((BT, NTAG), jnp.float32),
    )(text_flat, obj_embs_flat, tmask, omask, xmask,
      params['obj_lin_w'], params['obj_lin_b'],
      enc['mhatt']['wq'], enc['mhatt']['bq'], enc['mhatt']['wkv'], enc['mhatt']['bkv'],
      enc['mhatt']['wo'], enc['mhatt']['bo'], enc['ln1_g'], enc['ln1_b'],
      enc['ffn']['w1'], enc['ffn']['b1'], enc['ffn']['w2'], enc['ffn']['b2'],
      enc['ln2_g'], enc['ln2_b'],
      dec['mhatt1']['wq'], dec['mhatt1']['bq'], dec['mhatt1']['wkv'], dec['mhatt1']['bkv'],
      dec['mhatt1']['wo'], dec['mhatt1']['bo'], dec['ln1_g'], dec['ln1_b'],
      dec['mhatt2']['wq'], dec['mhatt2']['bq'], dec['mhatt2']['wkv'], dec['mhatt2']['bkv'],
      dec['mhatt2']['wo'], dec['mhatt2']['bo'], dec['ln2_g'], dec['ln2_b'],
      dec['ffn']['w1'], dec['ffn']['b1'], dec['ffn']['w2'], dec['ffn']['b2'],
      dec['ln3_g'], dec['ln3_b'],
      params['bn_g'], params['bn_b'], params['tag_w'], params['tag_b'])


# =============================== CRF viterbi decode (Pallas) ========================
# NCRF++ semantics: transitions[from, to]; START = NTAG-2, STOP = NTAG-1.
# Forward recursion uses max over the previous-tag (sublane) axis; argmax is done with
# an iota+min trick; the data-dependent backtrack gather is a one-hot lane reduction.
# The (1,T)->(T,1) reorientation of the partition uses a diag-select + lane-sum (no
# explicit transpose needed).

def _viterbi_kernel(feats_ref, trans_ref, valid_ref, islast_ref, out_ref):
    Bb, L, T = feats_ref.shape
    START, STOP = T - 2, T - 1
    trans = trans_ref[...]                                               # (T, T)
    sub_iota = lax.broadcasted_iota(jnp.int32, (T, T), 0).astype(jnp.float32)
    diag = (lax.broadcasted_iota(jnp.int32, (T, T), 0)
            == lax.broadcasted_iota(jnp.int32, (T, T), 1))
    lane_t = lax.broadcasted_iota(jnp.int32, (1, T), 1).astype(jnp.float32)
    lane_l = lax.broadcasted_iota(jnp.int32, (1, L), 1).astype(jnp.float32)
    BIG = jnp.float32(T)

    def row_to_col(r):                                   # (1,T) -> (T,1) without transpose
        return jnp.sum(jnp.where(diag, r, 0.0), axis=1, keepdims=True)

    for b in range(Bb):                                  # B = 2, static unroll
        feats_b = feats_ref[b]                           # (L, T)
        valid = valid_ref[pl.ds(b, 1), :]                # (1, L)  1.0 at valid steps
        islast = islast_ref[pl.ds(b, 1), :]              # (1, L)  1.0 at step length-1

        part = feats_b[0:1, :] + trans[START:START + 1, :]               # (1, T)
        hist = [part]
        bps = [None] * (L - 1)
        for t in range(1, L):
            cur = row_to_col(part) + trans + feats_b[t:t + 1, :]         # (Tprev, Tcur)
            new_part = jnp.max(cur, axis=0, keepdims=True)               # (1, T)
            bp = jnp.min(jnp.where(cur >= new_part, sub_iota, BIG),
                         axis=0, keepdims=True)                          # argmax over prev
            bp = jnp.where(valid[:, t:t + 1] > 0.5, bp, 0.0)             # zero at padding
            hist.append(new_part)
            bps[t - 1] = bp
            part = new_part

        # partition at the last valid position
        last_part = hist[0] * islast[:, 0:1]
        for t in range(1, L):
            last_part = last_part + hist[t] * islast[:, t:t + 1]
        last_vals = row_to_col(last_part) + trans                        # (Tprev, Tcur)
        mx = jnp.max(last_vals, axis=0, keepdims=True)
        last_bp = jnp.min(jnp.where(last_vals >= mx, sub_iota, BIG),
                          axis=0, keepdims=True)                         # (1, T)
        ptr = jnp.sum(jnp.where(lane_t == jnp.float32(STOP), last_bp, 0.0),
                      axis=1, keepdims=True)                             # (1, 1)

        dec = jnp.where(lane_l == jnp.float32(L - 1),
                        jnp.broadcast_to(ptr, (1, L)),
                        jnp.zeros((1, L), jnp.float32))
        for t in range(L - 2, -1, -1):
            # insert the best-last pointer at position length-1, then gather bp[ptr]
            bp_t = jnp.where(islast[:, t:t + 1] > 0.5,
                             jnp.broadcast_to(ptr, (1, T)), bps[t])
            ptr = jnp.sum(jnp.where(lane_t == ptr, bp_t, 0.0), axis=1, keepdims=True)
            dec = jnp.where(lane_l == jnp.float32(t), jnp.broadcast_to(ptr, (1, L)), dec)

        out_ref[pl.ds(b, 1), :] = dec.astype(jnp.int32)


def pallas_viterbi(feats, transitions, valid_f, islast_f):
    Bb, L, _ = feats.shape
    return pl.pallas_call(
        _viterbi_kernel,
        out_shape=jax.ShapeDtypeStruct((Bb, L), jnp.int32),
    )(feats, transitions, valid_f, islast_f)


# =============================== full forward ======================================

def forward(params, word_inputs, word_seq_lengths, char_inputs, char_seq_lengths,
            char_seq_recover, mask, object_inputs):
    batch_size, sent_len = word_inputs.shape
    _, word_len = char_inputs.shape
    n_obj = object_inputs.shape[1]

    # ---- char BiLSTM (final hidden states only; per-step outputs never consumed) ----
    char_embeds = params['char_emb'][char_inputs]                          # (CB, WL, CE)
    char_x = jnp.transpose(char_embeds, (1, 0, 2))                         # (WL, CB, CE)
    char_m = (jnp.arange(word_len)[:, None]
              < char_seq_lengths[None, :]).astype(jnp.float32)[:, :, None]
    char_final = pallas_bilstm(char_x, char_m, params['char_lstm_w'],
                               params['char_lstm_b'], return_seq=False)    # (CB, CHAR_HID)
    char_features = char_final[char_seq_recover].reshape(batch_size, sent_len, CHAR_HID)

    # ---- word BiLSTM ----
    word_embs = params['word_emb'][word_inputs]                            # (B, SENT, WE)
    word_represent = jnp.concatenate([word_embs, char_features], axis=2)
    wx = jnp.transpose(word_represent, (1, 0, 2))                          # (SENT, B, WE+CH)
    wm = (jnp.arange(sent_len)[:, None]
          < word_seq_lengths[None, :]).astype(jnp.float32)[:, :, None]
    w_hseq, _ = pallas_bilstm(wx, wm, params['word_lstm_w'],
                              params['word_lstm_b'], return_seq=True)      # (SENT, B, HIDDEN)
    text_flat = jnp.transpose(w_hseq, (1, 0, 2)).reshape(-1, HIDDEN)       # (B*SENT, HIDDEN)

    # ---- attention masks (flattened batch; 1.0 = masked key) ----
    bt = jnp.repeat(jnp.arange(batch_size), sent_len)
    bo = jnp.repeat(jnp.arange(batch_size), n_obj)
    tpad = (word_inputs == 0).reshape(-1)
    opad = (object_inputs == 0).reshape(-1)
    tmask = ((bt[:, None] != bt[None, :]) | tpad[None, :]).astype(jnp.float32)
    omask = ((bo[:, None] != bo[None, :]) | opad[None, :]).astype(jnp.float32)
    xmask = ((bo[:, None] != bt[None, :]) | tpad[None, :]).astype(jnp.float32)

    # ---- object embedding + fused (obj Linear + SA + SGA + BN + hidden2tag) kernel ----
    obj_embs = params['obj_emb'][object_inputs].reshape(-1, OBJ_EMB)       # (B*NOBJ, OE)
    outs = pallas_mca_head(text_flat, obj_embs, tmask, omask, xmask, params)
    outs = outs.reshape(batch_size, sent_len, NTAG)

    # ---- CRF viterbi decode (Pallas) ----
    lengths = jnp.sum(mask.astype(jnp.int32), axis=1)
    pos = jnp.arange(sent_len)
    valid_f = mask.astype(jnp.float32)
    islast_f = (pos[None, :] == (lengths - 1)[:, None]).astype(jnp.float32)
    tag_seq = pallas_viterbi(outs, params['transitions'], valid_f, islast_f)
    return tag_seq


# =============================== parameter init ====================================

def init_params(key):
    kit = iter(jax.random.split(key, 128))

    def rnd(shape, scale=0.1):
        return jax.random.normal(next(kit), shape, jnp.float32) * scale

    def lstm_params(e, h):
        # fused layout: rows 0:e input weights, rows e:e+h hidden weights;
        # cols 0:4h forward gates (i,f,g,o), cols 4h:8h backward gates
        return rnd((e + h, 8 * h)), rnd((1, 8 * h))

    def mhatt_params():
        return {'wq': rnd((HIDDEN, HIDDEN)), 'bq': rnd((1, HIDDEN)),
                'wkv': rnd((HIDDEN, 2 * HIDDEN)), 'bkv': rnd((1, 2 * HIDDEN)),
                'wo': rnd((HIDDEN, HIDDEN)), 'bo': rnd((1, HIDDEN))}

    def ffn_params():
        return {'w1': rnd((HIDDEN, FF)), 'b1': rnd((1, FF)),
                'w2': rnd((FF, HIDDEN)), 'b2': rnd((1, HIDDEN))}

    def ln():
        return jnp.ones((1, HIDDEN), jnp.float32), jnp.zeros((1, HIDDEN), jnp.float32)

    def sa_params():
        g1, b1 = ln(); g2, b2 = ln()
        return {'mhatt': mhatt_params(), 'ffn': ffn_params(),
                'ln1_g': g1, 'ln1_b': b1, 'ln2_g': g2, 'ln2_b': b2}

    def sga_params():
        g1, b1 = ln(); g2, b2 = ln(); g3, b3 = ln()
        return {'mhatt1': mhatt_params(), 'mhatt2': mhatt_params(), 'ffn': ffn_params(),
                'ln1_g': g1, 'ln1_b': b1, 'ln2_g': g2, 'ln2_b': b2, 'ln3_g': g3, 'ln3_b': b3}

    char_w, char_b = lstm_params(CHAR_EMB, CHAR_HID // 2)
    word_w, word_b = lstm_params(WORD_EMB + CHAR_HID, HIDDEN // 2)

    transitions = rnd((NTAG, NTAG), 1.0)
    transitions = transitions.at[:, NTAG - 2].set(-10000.0)   # nothing transitions into START
    transitions = transitions.at[NTAG - 1, :].set(-10000.0)   # nothing transitions out of STOP

    return {
        'char_emb': rnd((CHAR_VOCAB, CHAR_EMB), 0.5),
        'word_emb': rnd((WORD_VOCAB, WORD_EMB), 0.5),
        'obj_emb': rnd((OBJ_VOCAB, OBJ_EMB), 0.5),
        'char_lstm_w': char_w, 'char_lstm_b': char_b,
        'word_lstm_w': word_w, 'word_lstm_b': word_b,
        'obj_lin_w': rnd((OBJ_EMB, HIDDEN)), 'obj_lin_b': rnd((1, HIDDEN)),
        'mca': {'enc': [sa_params() for _ in range(LAYERS)],
                'dec': [sga_params() for _ in range(LAYERS)]},
        'bn_g': jnp.ones((1, HIDDEN), jnp.float32), 'bn_b': jnp.zeros((1, HIDDEN), jnp.float32),
        'tag_w': rnd((HIDDEN, NTAG)), 'tag_b': rnd((1, NTAG)),
        'transitions': transitions,
    }


# =============================== main ==============================================

if __name__ == "__main__":
    key = jax.random.PRNGKey(0)
    kp, kd = jax.random.split(key)
    params = init_params(kp)
    ks = jax.random.split(kd, 8)

    # word-level inputs (sorted descending lengths, 0 == pad)
    word_seq_lengths = jnp.array([SENT, SENT - 2], dtype=jnp.int32)
    word_ids = jax.random.randint(ks[0], (B, SENT), 1, WORD_VOCAB, dtype=jnp.int32)
    pos = jnp.arange(SENT)[None, :]
    word_inputs = jnp.where(pos < word_seq_lengths[:, None], word_ids, 0)
    mask = (pos < word_seq_lengths[:, None])                       # (B, SENT) CRF mask

    # char-level inputs
    char_seq_lengths = jax.random.randint(ks[1], (B * SENT,), 1, WORDLEN + 1, dtype=jnp.int32)
    char_ids = jax.random.randint(ks[2], (B * SENT, WORDLEN), 1, CHAR_VOCAB, dtype=jnp.int32)
    cpos = jnp.arange(WORDLEN)[None, :]
    char_inputs = jnp.where(cpos < char_seq_lengths[:, None], char_ids, 0)
    char_seq_recover = jax.random.permutation(ks[3], B * SENT).astype(jnp.int32)

    # object inputs (0 == padded object)
    object_inputs = jax.random.randint(ks[4], (B, NOBJ), 1, OBJ_VOCAB, dtype=jnp.int32)
    object_inputs = object_inputs.at[1, NOBJ - 2:].set(0)

    fwd = jax.jit(forward)
    tag_seq = fwd(params, word_inputs, word_seq_lengths, char_inputs, char_seq_lengths,
                  char_seq_recover, mask, object_inputs)
    tag_seq = jax.block_until_ready(tag_seq)
    assert tag_seq.shape == (B, SENT)
    print("KERNEL_OK")
</pallas_src>

<mosaic_0001>
module attributes {stable_mosaic.version = 11 : i64} {
  func.func @kernel(%arg0: memref<6x16x8xf32, #tpu.memory_space<vmem>>, %arg1: memref<6x16x1xf32, #tpu.memory_space<vmem>>, %arg2: memref<16x64xf32, #tpu.memory_space<vmem>>, %arg3: memref<1x64xf32, #tpu.memory_space<vmem>>, %arg4: memref<16x16xf32, #tpu.memory_space<vmem>>) attributes {dimension_semantics = [], scalar_prefetch = 0 : i64, scratch_operands = 0 : i64, tpu.core_type = #tpu.core_type<tc>} {
    %c0 = arith.constant 0 : index
    %c0_0 = arith.constant 0 : index
    %0 = vector.load %arg2[%c0, %c0_0] : memref<16x64xf32, #tpu.memory_space<vmem>>, vector<16x64xf32>
    %c0_1 = arith.constant 0 : index
    %c0_2 = arith.constant 0 : index
    %1 = vector.load %arg3[%c0_1, %c0_2] : memref<1x64xf32, #tpu.memory_space<vmem>>, vector<1x64xf32>
    %2 = tpu.iota {dimensions = array<i32: 0>} : vector<32x1xi32>
    %c16_i32 = arith.constant 16 : i32
    %3 = vector.broadcast %c16_i32 : i32 to vector<32x1xi32>
    %4 = arith.cmpi slt, %2, %3 : vector<32x1xi32>
    %cst = arith.constant 0.000000e+00 : f32
    %5 = vector.broadcast %cst : f32 to vector<32x8xf32>
    %cst_3 = arith.constant 0.000000e+00 : f32
    %6 = vector.broadcast %cst_3 : f32 to vector<32x8xf32>
    %c0_4 = arith.constant 0 : index
    %c0_5 = arith.constant 0 : index
    %c0_6 = arith.constant 0 : index
    %7 = vector.load %arg0[%c0_4, %c0_5, %c0_6] : memref<6x16x8xf32, #tpu.memory_space<vmem>>, vector<1x16x8xf32>
    %8 = vector.shape_cast %7 : vector<1x16x8xf32> to vector<16x8xf32>
    %c5 = arith.constant 5 : index
    %c0_7 = arith.constant 0 : index
    %c0_8 = arith.constant 0 : index
    %9 = vector.load %arg0[%c5, %c0_7, %c0_8] : memref<6x16x8xf32, #tpu.memory_space<vmem>>, vector<1x16x8xf32>
    %10 = vector.shape_cast %9 : vector<1x16x8xf32> to vector<16x8xf32>
    %11 = tpu.concatenate %8, %10 in 0 : vector<16x8xf32>, vector<16x8xf32> -> vector<32x8xf32>
    %c0_9 = arith.constant 0 : index
    %c0_10 = arith.constant 0 : index
    %c0_11 = arith.constant 0 : index
    %12 = vector.load %arg1[%c0_9, %c0_10, %c0_11] : memref<6x16x1xf32, #tpu.memory_space<vmem>>, vector<1x16x1xf32>
    %13 = vector.shape_cast %12 : vector<1x16x1xf32> to vector<16x1xf32>
    %c5_12 = arith.constant 5 : index
    %c0_13 = arith.constant 0 : index
    %c0_14 = arith.constant 0 : index
    %14 = vector.load %arg1[%c5_12, %c0_13, %c0_14] : memref<6x16x1xf32, #tpu.memory_space<vmem>>, vector<1x16x1xf32>
    %15 = vector.shape_cast %14 : vector<1x16x1xf32> to vector<16x1xf32>
    %16 = tpu.concatenate %13, %15 in 0 : vector<16x1xf32>, vector<16x1xf32> -> vector<32x1xf32>
    %17 = tpu.concatenate %11, %5 in 1 : vector<32x8xf32>, vector<32x8xf32> -> vector<32x16xf32>
    %cst_15 = arith.constant dense<0.000000e+00> : vector<32x64xf32>
    %18 = tpu.matmul %17, %0, %cst_15 {dimension_numbers = #tpu.dot_dimension_numbers<[1], [0], [0], [1], [0, 0, 1, 1], [], []>} : vector<32x16xf32>, vector<16x64xf32>, vector<32x64xf32> -> vector<32x64xf32>
    %19 = vector.broadcast %1 : vector<1x64xf32> to vector<32x64xf32>
    %20 = arith.addf %18, %19 : vector<32x64xf32>
    %21 = vector.extract_strided_slice %20 {offsets = [0, 0], sizes = [32, 32], strides = [1, 1]} : vector<32x64xf32> to vector<32x32xf32>
    %22 = vector.extract_strided_slice %20 {offsets = [0, 32], sizes = [32, 32], strides = [1, 1]} : vector<32x64xf32> to vector<32x32xf32>
    %23 = vector.shape_cast %4 : vector<32x1xi1> to vector<32x1xi1>
    %24 = vector.broadcast %23 : vector<32x1xi1> to vector<32x32xi1>
    %25 = arith.select %24, %21, %22 : vector<32x32xi1>, vector<32x32xf32>
    %26 = vector.extract_strided_slice %25 {offsets = [0, 0], sizes = [32, 8], strides = [1, 1]} : vector<32x32xf32> to vector<32x8xf32>
    %27 = arith.negf %26 : vector<32x8xf32>
    %28 = math.exp %27 : vector<32x8xf32>
    %cst_16 = arith.constant 1.000000e+00 : f32
    %29 = vector.broadcast %cst_16 : f32 to vector<32x8xf32>
    %30 = arith.addf %29, %28 : vector<32x8xf32>
    %31 = arith.divf %29, %30 : vector<32x8xf32>
    %32 = vector.extract_strided_slice %25 {offsets = [0, 8], sizes = [32, 8], strides = [1, 1]} : vector<32x32xf32> to vector<32x8xf32>
    %33 = arith.negf %32 : vector<32x8xf32>
    %34 = math.exp %33 : vector<32x8xf32>
    %cst_17 = arith.constant 1.000000e+00 : f32
    %35 = vector.broadcast %cst_17 : f32 to vector<32x8xf32>
    %36 = arith.addf %35, %34 : vector<32x8xf32>
    %37 = arith.divf %35, %36 : vector<32x8xf32>
    %38 = vector.extract_strided_slice %25 {offsets = [0, 16], sizes = [32, 8], strides = [1, 1]} : vector<32x32xf32> to vector<32x8xf32>
    %39 = math.tanh %38 : vector<32x8xf32>
    %40 = vector.extract_strided_slice %25 {offsets = [0, 24], sizes = [32, 8], strides = [1, 1]} : vector<32x32xf32> to vector<32x8xf32>
    %41 = arith.negf %40 : vector<32x8xf32>
    %42 = math.exp %41 : vector<32x8xf32>
    %cst_18 = arith.constant 1.000000e+00 : f32
    %43 = vector.broadcast %cst_18 : f32 to vector<32x8xf32>
    %44 = arith.addf %43, %42 : vector<32x8xf32>
    %45 = arith.divf %43, %44 : vector<32x8xf32>
    %46 = arith.mulf %37, %6 : vector<32x8xf32>
    %47 = arith.mulf %31, %39 : vector<32x8xf32>
    %48 = arith.addf %46, %47 : vector<32x8xf32>
    %49 = math.tanh %48 : vector<32x8xf32>
    %50 = arith.mulf %45, %49 : vector<32x8xf32>
    %51 = vector.broadcast %16 : vector<32x1xf32> to vector<32x8xf32>
    %52 = arith.mulf %51, %50 : vector<32x8xf32>
    %cst_19 = arith.constant 1.000000e+00 : f32
    %53 = vector.broadcast %cst_19 : f32 to vector<32x1xf32>
    %54 = arith.subf %53, %16 : vector<32x1xf32>
    %55 = vector.broadcast %54 : vector<32x1xf32> to vector<32x8xf32>
    %56 = arith.mulf %55, %5 : vector<32x8xf32>
    %57 = arith.addf %52, %56 : vector<32x8xf32>
    %58 = vector.broadcast %16 : vector<32x1xf32> to vector<32x8xf32>
    %59 = arith.mulf %58, %48 : vector<32x8xf32>
    %cst_20 = arith.constant 1.000000e+00 : f32
    %60 = vector.broadcast %cst_20 : f32 to vector<32x1xf32>
    %61 = arith.subf %60, %16 : vector<32x1xf32>
    %62 = vector.broadcast %61 : vector<32x1xf32> to vector<32x8xf32>
    %63 = arith.mulf %62, %6 : vector<32x8xf32>
    %64 = arith.addf %59, %63 : vector<32x8xf32>
    %c1 = arith.constant 1 : index
    %c0_21 = arith.constant 0 : index
    %c0_22 = arith.constant 0 : index
    %65 = vector.load %arg0[%c1, %c0_21, %c0_22] : memref<6x16x8xf32, #tpu.memory_space<vmem>>, vector<1x16x8xf32>
    %66 = vector.shape_cast %65 : vector<1x16x8xf32> to vector<16x8xf32>
    %c4 = arith.constant 4 : index
    %c0_23 = arith.constant 0 : index
    %c0_24 = arith.constant 0 : index
    %67 = vector.load %arg0[%c4, %c0_23, %c0_24] : memref<6x16x8xf32, #tpu.memory_space<vmem>>, vector<1x16x8xf32>
    %68 = vector.shape_cast %67 : vector<1x16x8xf32> to vector<16x8xf32>
    %69 = tpu.concatenate %66, %68 in 0 : vector<16x8xf32>, vector<16x8xf32> -> vector<32x8xf32>
    %c1_25 = arith.constant 1 : index
    %c0_26 = arith.constant 0 : index
    %c0_27 = arith.constant 0 : index
    %70 = vector.load %arg1[%c1_25, %c0_26, %c0_27] : memref<6x16x1xf32, #tpu.memory_space<vmem>>, vector<1x16x1xf32>
    %71 = vector.shape_cast %70 : vector<1x16x1xf32> to vector<16x1xf32>
    %c4_28 = arith.constant 4 : index
    %c0_29 = arith.constant 0 : index
    %c0_30 = arith.constant 0 : index
    %72 = vector.load %arg1[%c4_28, %c0_29, %c0_30] : memref<6x16x1xf32, #tpu.memory_space<vmem>>, vector<1x16x1xf32>
    %73 = vector.shape_cast %72 : vector<1x16x1xf32> to vector<16x1xf32>
    %74 = tpu.concatenate %71, %73 in 0 : vector<16x1xf32>, vector<16x1xf32> -> vector<32x1xf32>
    %75 = tpu.concatenate %69, %57 in 1 : vector<32x8xf32>, vector<32x8xf32> -> vector<32x16xf32>
    %cst_31 = arith.constant dense<0.000000e+00> : vector<32x64xf32>
    %76 = tpu.matmul %75, %0, %cst_31 {dimension_numbers = #tpu.dot_dimension_numbers<[1], [0], [0], [1], [0, 0, 1, 1], [], []>} : vector<32x16xf32>, vector<16x64xf32>, vector<32x64xf32> -> vector<32x64xf32>
    %77 = vector.broadcast %1 : vector<1x64xf32> to vector<32x64xf32>
    %78 = arith.addf %76, %77 : vector<32x64xf32>
    %79 = vector.extract_strided_slice %78 {offsets = [0, 0], sizes = [32, 32], strides = [1, 1]} : vector<32x64xf32> to vector<32x32xf32>
    %80 = vector.extract_strided_slice %78 {offsets = [0, 32], sizes = [32, 32], strides = [1, 1]} : vector<32x64xf32> to vector<32x32xf32>
    %81 = vector.shape_cast %4 : vector<32x1xi1> to vector<32x1xi1>
    %82 = vector.broadcast %81 : vector<32x1xi1> to vector<32x32xi1>
    %83 = arith.select %82, %79, %80 : vector<32x32xi1>, vector<32x32xf32>
    %84 = vector.extract_strided_slice %83 {offsets = [0, 0], sizes = [32, 8], strides = [1, 1]} : vector<32x32xf32> to vector<32x8xf32>
    %85 = arith.negf %84 : vector<32x8xf32>
    %86 = math.exp %85 : vector<32x8xf32>
    %cst_32 = arith.constant 1.000000e+00 : f32
    %87 = vector.broadcast %cst_32 : f32 to vector<32x8xf32>
    %88 = arith.addf %87, %86 : vector<32x8xf32>
    %89 = arith.divf %87, %88 : vector<32x8xf32>
    %90 = vector.extract_strided_slice %83 {offsets = [0, 8], sizes = [32, 8], strides = [1, 1]} : vector<32x32xf32> to vector<32x8xf32>
    %91 = arith.negf %90 : vector<32x8xf32>
    %92 = math.exp %91 : vector<32x8xf32>
    %cst_33 = arith.constant 1.000000e+00 : f32
    %93 = vector.broadcast %cst_33 : f32 to vector<32x8xf32>
    %94 = arith.addf %93, %92 : vector<32x8xf32>
    %95 = arith.divf %93, %94 : vector<32x8xf32>
    %96 = vector.extract_strided_slice %83 {offsets = [0, 16], sizes = [32, 8], strides = [1, 1]} : vector<32x32xf32> to vector<32x8xf32>
    %97 = math.tanh %96 : vector<32x8xf32>
    %98 = vector.extract_strided_slice %83 {offsets = [0, 24], sizes = [32, 8], strides = [1, 1]} : vector<32x32xf32> to vector<32x8xf32>
    %99 = arith.negf %98 : vector<32x8xf32>
    %100 = math.exp %99 : vector<32x8xf32>
    %cst_34 = arith.constant 1.000000e+00 : f32
    %101 = vector.broadcast %cst_34 : f32 to vector<32x8xf32>
    %102 = arith.addf %101, %100 : vector<32x8xf32>
    %103 = arith.divf %101, %102 : vector<32x8xf32>
    %104 = arith.mulf %95, %64 : vector<32x8xf32>
    %105 = arith.mulf %89, %97 : vector<32x8xf32>
    %106 = arith.addf %104, %105 : vector<32x8xf32>
    %107 = math.tanh %106 : vector<32x8xf32>
    %108 = arith.mulf %103, %107 : vector<32x8xf32>
    %109 = vector.broadcast %74 : vector<32x1xf32> to vector<32x8xf32>
    %110 = arith.mulf %109, %108 : vector<32x8xf32>
    %cst_35 = arith.constant 1.000000e+00 : f32
    %111 = vector.broadcast %cst_35 : f32 to vector<32x1xf32>
    %112 = arith.subf %111, %74 : vector<32x1xf32>
    %113 = vector.broadcast %112 : vector<32x1xf32> to vector<32x8xf32>
    %114 = arith.mulf %113, %57 : vector<32x8xf32>
    %115 = arith.addf %110, %114 : vector<32x8xf32>
    %116 = vector.broadcast %74 : vector<32x1xf32> to vector<32x8xf32>
    %117 = arith.mulf %116, %106 : vector<32x8xf32>
    %cst_36 = arith.constant 1.000000e+00 : f32
    %118 = vector.broadcast %cst_36 : f32 to vector<32x1xf32>
    %119 = arith.subf %118, %74 : vector<32x1xf32>
    %120 = vector.broadcast %119 : vector<32x1xf32> to vector<32x8xf32>
    %121 = arith.mulf %120, %64 : vector<32x8xf32>
    %122 = arith.addf %117, %121 : vector<32x8xf32>
    %c2 = arith.constant 2 : index
    %c0_37 = arith.constant 0 : index
    %c0_38 = arith.constant 0 : index
    %123 = vector.load %arg0[%c2, %c0_37, %c0_38] : memref<6x16x8xf32, #tpu.memory_space<vmem>>, vector<1x16x8xf32>
    %124 = vector.shape_cast %123 : vector<1x16x8xf32> to vector<16x8xf32>
    %c3 = arith.constant 3 : index
    %c0_39 = arith.constant 0 : index
    %c0_40 = arith.constant 0 : index
    %125 = vector.load %arg0[%c3, %c0_39, %c0_40] : memref<6x16x8xf32, #tpu.memory_space<vmem>>, vector<1x16x8xf32>
    %126 = vector.shape_cast %125 : vector<1x16x8xf32> to vector<16x8xf32>
    %127 = tpu.concatenate %124, %126 in 0 : vector<16x8xf32>, vector<16x8xf32> -> vector<32x8xf32>
    %c2_41 = arith.constant 2 : index
    %c0_42 = arith.constant 0 : index
    %c0_43 = arith.constant 0 : index
    %128 = vector.load %arg1[%c2_41, %c0_42, %c0_43] : memref<6x16x1xf32, #tpu.memory_space<vmem>>, vector<1x16x1xf32>
    %129 = vector.shape_cast %128 : vector<1x16x1xf32> to vector<16x1xf32>
    %c3_44 = arith.constant 3 : index
    %c0_45 = arith.constant 0 : index
    %c0_46 = arith.constant 0 : index
    %130 = vector.load %arg1[%c3_44, %c0_45, %c0_46] : memref<6x16x1xf32, #tpu.memory_space<vmem>>, vector<1x16x1xf32>
    %131 = vector.shape_cast %130 : vector<1x16x1xf32> to vector<16x1xf32>
    %132 = tpu.concatenate %129, %131 in 0 : vector<16x1xf32>, vector<16x1xf32> -> vector<32x1xf32>
    %133 = tpu.concatenate %127, %115 in 1 : vector<32x8xf32>, vector<32x8xf32> -> vector<32x16xf32>
    %cst_47 = arith.constant dense<0.000000e+00> : vector<32x64xf32>
    %134 = tpu.matmul %133, %0, %cst_47 {dimension_numbers = #tpu.dot_dimension_numbers<[1], [0], [0], [1], [0, 0, 1, 1], [], []>} : vector<32x16xf32>, vector<16x64xf32>, vector<32x64xf32> -> vector<32x64xf32>
    %135 = vector.broadcast %1 : vector<1x64xf32> to vector<32x64xf32>
    %136 = arith.addf %134, %135 : vector<32x64xf32>
    %137 = vector.extract_strided_slice %136 {offsets = [0, 0], sizes = [32, 32], strides = [1, 1]} : vector<32x64xf32> to vector<32x32xf32>
    %138 = vector.extract_strided_slice %136 {offsets = [0, 32], sizes = [32, 32], strides = [1, 1]} : vector<32x64xf32> to vector<32x32xf32>
    %139 = vector.shape_cast %4 : vector<32x1xi1> to vector<32x1xi1>
    %140 = vector.broadcast %139 : vector<32x1xi1> to vector<32x32xi1>
    %141 = arith.select %140, %137, %138 : vector<32x32xi1>, vector<32x32xf32>
    %142 = vector.extract_strided_slice %141 {offsets = [0, 0], sizes = [32, 8], strides = [1, 1]} : vector<32x32xf32> to vector<32x8xf32>
    %143 = arith.negf %142 : vector<32x8xf32>
    %144 = math.exp %143 : vector<32x8xf32>
    %cst_48 = arith.constant 1.000000e+00 : f32
    %145 = vector.broadcast %cst_48 : f32 to vector<32x8xf32>
    %146 = arith.addf %145, %144 : vector<32x8xf32>
    %147 = arith.divf %145, %146 : vector<32x8xf32>
    %148 = vector.extract_strided_slice %141 {offsets = [0, 8], sizes = [32, 8], strides = [1, 1]} : vector<32x32xf32> to vector<32x8xf32>
    %149 = arith.negf %148 : vector<32x8xf32>
    %150 = math.exp %149 : vector<32x8xf32>
    %cst_49 = arith.constant 1.000000e+00 : f32
    %151 = vector.broadcast %cst_49 : f32 to vector<32x8xf32>
    %152 = arith.addf %151, %150 : vector<32x8xf32>
    %153 = arith.divf %151, %152 : vector<32x8xf32>
    %154 = vector.extract_strided_slice %141 {offsets = [0, 16], sizes = [32, 8], strides = [1, 1]} : vector<32x32xf32> to vector<32x8xf32>
    %155 = math.tanh %154 : vector<32x8xf32>
    %156 = vector.extract_strided_slice %141 {offsets = [0, 24], sizes = [32, 8], strides = [1, 1]} : vector<32x32xf32> to vector<32x8xf32>
    %157 = arith.negf %156 : vector<32x8xf32>
    %158 = math.exp %157 : vector<32x8xf32>
    %cst_50 = arith.constant 1.000000e+00 : f32
    %159 = vector.broadcast %cst_50 : f32 to vector<32x8xf32>
    %160 = arith.addf %159, %158 : vector<32x8xf32>
    %161 = arith.divf %159, %160 : vector<32x8xf32>
    %162 = arith.mulf %153, %122 : vector<32x8xf32>
    %163 = arith.mulf %147, %155 : vector<32x8xf32>
    %164 = arith.addf %162, %163 : vector<32x8xf32>
    %165 = math.tanh %164 : vector<32x8xf32>
    %166 = arith.mulf %161, %165 : vector<32x8xf32>
    %167 = vector.broadcast %132 : vector<32x1xf32> to vector<32x8xf32>
    %168 = arith.mulf %167, %166 : vector<32x8xf32>
    %cst_51 = arith.constant 1.000000e+00 : f32
    %169 = vector.broadcast %cst_51 : f32 to vector<32x1xf32>
    %170 = arith.subf %169, %132 : vector<32x1xf32>
    %171 = vector.broadcast %170 : vector<32x1xf32> to vector<32x8xf32>
    %172 = arith.mulf %171, %115 : vector<32x8xf32>
    %173 = arith.addf %168, %172 : vector<32x8xf32>
    %174 = vector.broadcast %132 : vector<32x1xf32> to vector<32x8xf32>
    %175 = arith.mulf %174, %164 : vector<32x8xf32>
    %cst_52 = arith.constant 1.000000e+00 : f32
    %176 = vector.broadcast %cst_52 : f32 to vector<32x1xf32>
    %177 = arith.subf %176, %132 : vector<32x1xf32>
    %178 = vector.broadcast %177 : vector<32x1xf32> to vector<32x8xf32>
    %179 = arith.mulf %178, %122 : vector<32x8xf32>
    %180 = arith.addf %175, %179 : vector<32x8xf32>
    %c3_53 = arith.constant 3 : index
    %c0_54 = arith.constant 0 : index
    %c0_55 = arith.constant 0 : index
    %181 = vector.load %arg0[%c3_53, %c0_54, %c0_55] : memref<6x16x8xf32, #tpu.memory_space<vmem>>, vector<1x16x8xf32>
    %182 = vector.shape_cast %181 : vector<1x16x8xf32> to vector<16x8xf32>
    %c2_56 = arith.constant 2 : index
    %c0_57 = arith.constant 0 : index
    %c0_58 = arith.constant 0 : index
    %183 = vector.load %arg0[%c2_56, %c0_57, %c0_58] : memref<6x16x8xf32, #tpu.memory_space<vmem>>, vector<1x16x8xf32>
    %184 = vector.shape_cast %183 : vector<1x16x8xf32> to vector<16x8xf32>
    %185 = tpu.concatenate %182, %184 in 0 : vector<16x8xf32>, vector<16x8xf32> -> vector<32x8xf32>
    %c3_59 = arith.constant 3 : index
    %c0_60 = arith.constant 0 : index
    %c0_61 = arith.constant 0 : index
    %186 = vector.load %arg1[%c3_59, %c0_60, %c0_61] : memref<6x16x1xf32, #tpu.memory_space<vmem>>, vector<1x16x1xf32>
    %187 = vector.shape_cast %186 : vector<1x16x1xf32> to vector<16x1xf32>
    %c2_62 = arith.constant 2 : index
    %c0_63 = arith.constant 0 : index
    %c0_64 = arith.constant 0 : index
    %188 = vector.load %arg1[%c2_62, %c0_63, %c0_64] : memref<6x16x1xf32, #tpu.memory_space<vmem>>, vector<1x16x1xf32>
    %189 = vector.shape_cast %188 : vector<1x16x1xf32> to vector<16x1xf32>
    %190 = tpu.concatenate %187, %189 in 0 : vector<16x1xf32>, vector<16x1xf32> -> vector<32x1xf32>
    %191 = tpu.concatenate %185, %173 in 1 : vector<32x8xf32>, vector<32x8xf32> -> vector<32x16xf32>
    %cst_65 = arith.constant dense<0.000000e+00> : vector<32x64xf32>
    %192 = tpu.matmul %191, %0, %cst_65 {dimension_numbers = #tpu.dot_dimension_numbers<[1], [0], [0], [1], [0, 0, 1, 1], [], []>} : vector<32x16xf32>, vector<16x64xf32>, vector<32x64xf32> -> vector<32x64xf32>
    %193 = vector.broadcast %1 : vector<1x64xf32> to vector<32x64xf32>
    %194 = arith.addf %192, %193 : vector<32x64xf32>
    %195 = vector.extract_strided_slice %194 {offsets = [0, 0], sizes = [32, 32], strides = [1, 1]} : vector<32x64xf32> to vector<32x32xf32>
    %196 = vector.extract_strided_slice %194 {offsets = [0, 32], sizes = [32, 32], strides = [1, 1]} : vector<32x64xf32> to vector<32x32xf32>
    %197 = vector.shape_cast %4 : vector<32x1xi1> to vector<32x1xi1>
    %198 = vector.broadcast %197 : vector<32x1xi1> to vector<32x32xi1>
    %199 = arith.select %198, %195, %196 : vector<32x32xi1>, vector<32x32xf32>
    %200 = vector.extract_strided_slice %199 {offsets = [0, 0], sizes = [32, 8], strides = [1, 1]} : vector<32x32xf32> to vector<32x8xf32>
    %201 = arith.negf %200 : vector<32x8xf32>
    %202 = math.exp %201 : vector<32x8xf32>
    %cst_66 = arith.constant 1.000000e+00 : f32
    %203 = vector.broadcast %cst_66 : f32 to vector<32x8xf32>
    %204 = arith.addf %203, %202 : vector<32x8xf32>
    %205 = arith.divf %203, %204 : vector<32x8xf32>
    %206 = vector.extract_strided_slice %199 {offsets = [0, 8], sizes = [32, 8], strides = [1, 1]} : vector<32x32xf32> to vector<32x8xf32>
    %207 = arith.negf %206 : vector<32x8xf32>
    %208 = math.exp %207 : vector<32x8xf32>
    %cst_67 = arith.constant 1.000000e+00 : f32
    %209 = vector.broadcast %cst_67 : f32 to vector<32x8xf32>
    %210 = arith.addf %209, %208 : vector<32x8xf32>
    %211 = arith.divf %209, %210 : vector<32x8xf32>
    %212 = vector.extract_strided_slice %199 {offsets = [0, 16], sizes = [32, 8], strides = [1, 1]} : vector<32x32xf32> to vector<32x8xf32>
    %213 = math.tanh %212 : vector<32x8xf32>
    %214 = vector.extract_strided_slice %199 {offsets = [0, 24], sizes = [32, 8], strides = [1, 1]} : vector<32x32xf32> to vector<32x8xf32>
    %215 = arith.negf %214 : vector<32x8xf32>
    %216 = math.exp %215 : vector<32x8xf32>
    %cst_68 = arith.constant 1.000000e+00 : f32
    %217 = vector.broadcast %cst_68 : f32 to vector<32x8xf32>
    %218 = arith.addf %217, %216 : vector<32x8xf32>
    %219 = arith.divf %217, %218 : vector<32x8xf32>
    %220 = arith.mulf %211, %180 : vector<32x8xf32>
    %221 = arith.mulf %205, %213 : vector<32x8xf32>
    %222 = arith.addf %220, %221 : vector<32x8xf32>
    %223 = math.tanh %222 : vector<32x8xf32>
    %224 = arith.mulf %219, %223 : vector<32x8xf32>
    %225 = vector.broadcast %190 : vector<32x1xf32> to vector<32x8xf32>
    %226 = arith.mulf %225, %224 : vector<32x8xf32>
    %cst_69 = arith.constant 1.000000e+00 : f32
    %227 = vector.broadcast %cst_69 : f32 to vector<32x1xf32>
    %228 = arith.subf %227, %190 : vector<32x1xf32>
    %229 = vector.broadcast %228 : vector<32x1xf32> to vector<32x8xf32>
    %230 = arith.mulf %229, %173 : vector<32x8xf32>
    %231 = arith.addf %226, %230 : vector<32x8xf32>
    %232 = vector.broadcast %190 : vector<32x1xf32> to vector<32x8xf32>
    %233 = arith.mulf %232, %222 : vector<32x8xf32>
    %cst_70 = arith.constant 1.000000e+00 : f32
    %234 = vector.broadcast %cst_70 : f32 to vector<32x1xf32>
    %235 = arith.subf %234, %190 : vector<32x1xf32>
    %236 = vector.broadcast %235 : vector<32x1xf32> to vector<32x8xf32>
    %237 = arith.mulf %236, %180 : vector<32x8xf32>
    %238 = arith.addf %233, %237 : vector<32x8xf32>
    %c4_71 = arith.constant 4 : index
    %c0_72 = arith.constant 0 : index
    %c0_73 = arith.constant 0 : index
    %239 = vector.load %arg0[%c4_71, %c0_72, %c0_73] : memref<6x16x8xf32, #tpu.memory_space<vmem>>, vector<1x16x8xf32>
    %240 = vector.shape_cast %239 : vector<1x16x8xf32> to vector<16x8xf32>
    %c1_74 = arith.constant 1 : index
    %c0_75 = arith.constant 0 : index
    %c0_76 = arith.constant 0 : index
    %241 = vector.load %arg0[%c1_74, %c0_75, %c0_76] : memref<6x16x8xf32, #tpu.memory_space<vmem>>, vector<1x16x8xf32>
    %242 = vector.shape_cast %241 : vector<1x16x8xf32> to vector<16x8xf32>
    %243 = tpu.concatenate %240, %242 in 0 : vector<16x8xf32>, vector<16x8xf32> -> vector<32x8xf32>
    %c4_77 = arith.constant 4 : index
    %c0_78 = arith.constant 0 : index
    %c0_79 = arith.constant 0 : index
    %244 = vector.load %arg1[%c4_77, %c0_78, %c0_79] : memref<6x16x1xf32, #tpu.memory_space<vmem>>, vector<1x16x1xf32>
    %245 = vector.shape_cast %244 : vector<1x16x1xf32> to vector<16x1xf32>
    %c1_80 = arith.constant 1 : index
    %c0_81 = arith.constant 0 : index
    %c0_82 = arith.constant 0 : index
    %246 = vector.load %arg1[%c1_80, %c0_81, %c0_82] : memref<6x16x1xf32, #tpu.memory_space<vmem>>, vector<1x16x1xf32>
    %247 = vector.shape_cast %246 : vector<1x16x1xf32> to vector<16x1xf32>
    %248 = tpu.concatenate %245, %247 in 0 : vector<16x1xf32>, vector<16x1xf32> -> vector<32x1xf32>
    %249 = tpu.concatenate %243, %231 in 1 : vector<32x8xf32>, vector<32x8xf32> -> vector<32x16xf32>
    %cst_83 = arith.constant dense<0.000000e+00> : vector<32x64xf32>
    %250 = tpu.matmul %249, %0, %cst_83 {dimension_numbers = #tpu.dot_dimension_numbers<[1], [0], [0], [1], [0, 0, 1, 1], [], []>} : vector<32x16xf32>, vector<16x64xf32>, vector<32x64xf32> -> vector<32x64xf32>
    %251 = vector.broadcast %1 : vector<1x64xf32> to vector<32x64xf32>
    %252 = arith.addf %250, %251 : vector<32x64xf32>
    %253 = vector.extract_strided_slice %252 {offsets = [0, 0], sizes = [32, 32], strides = [1, 1]} : vector<32x64xf32> to vector<32x32xf32>
    %254 = vector.extract_strided_slice %252 {offsets = [0, 32], sizes = [32, 32], strides = [1, 1]} : vector<32x64xf32> to vector<32x32xf32>
    %255 = vector.shape_cast %4 : vector<32x1xi1> to vector<32x1xi1>
    %256 = vector.broadcast %255 : vector<32x1xi1> to vector<32x32xi1>
    %257 = arith.select %256, %253, %254 : vector<32x32xi1>, vector<32x32xf32>
    %258 = vector.extract_strided_slice %257 {offsets = [0, 0], sizes = [32, 8], strides = [1, 1]} : vector<32x32xf32> to vector<32x8xf32>
    %259 = arith.negf %258 : vector<32x8xf32>
    %260 = math.exp %259 : vector<32x8xf32>
    %cst_84 = arith.constant 1.000000e+00 : f32
    %261 = vector.broadcast %cst_84 : f32 to vector<32x8xf32>
    %262 = arith.addf %261, %260 : vector<32x8xf32>
    %263 = arith.divf %261, %262 : vector<32x8xf32>
    %264 = vector.extract_strided_slice %257 {offsets = [0, 8], sizes = [32, 8], strides = [1, 1]} : vector<32x32xf32> to vector<32x8xf32>
    %265 = arith.negf %264 : vector<32x8xf32>
    %266 = math.exp %265 : vector<32x8xf32>
    %cst_85 = arith.constant 1.000000e+00 : f32
    %267 = vector.broadcast %cst_85 : f32 to vector<32x8xf32>
    %268 = arith.addf %267, %266 : vector<32x8xf32>
    %269 = arith.divf %267, %268 : vector<32x8xf32>
    %270 = vector.extract_strided_slice %257 {offsets = [0, 16], sizes = [32, 8], strides = [1, 1]} : vector<32x32xf32> to vector<32x8xf32>
    %271 = math.tanh %270 : vector<32x8xf32>
    %272 = vector.extract_strided_slice %257 {offsets = [0, 24], sizes = [32, 8], strides = [1, 1]} : vector<32x32xf32> to vector<32x8xf32>
    %273 = arith.negf %272 : vector<32x8xf32>
    %274 = math.exp %273 : vector<32x8xf32>
    %cst_86 = arith.constant 1.000000e+00 : f32
    %275 = vector.broadcast %cst_86 : f32 to vector<32x8xf32>
    %276 = arith.addf %275, %274 : vector<32x8xf32>
    %277 = arith.divf %275, %276 : vector<32x8xf32>
    %278 = arith.mulf %269, %238 : vector<32x8xf32>
    %279 = arith.mulf %263, %271 : vector<32x8xf32>
    %280 = arith.addf %278, %279 : vector<32x8xf32>
    %281 = math.tanh %280 : vector<32x8xf32>
    %282 = arith.mulf %277, %281 : vector<32x8xf32>
    %283 = vector.broadcast %248 : vector<32x1xf32> to vector<32x8xf32>
    %284 = arith.mulf %283, %282 : vector<32x8xf32>
    %cst_87 = arith.constant 1.000000e+00 : f32
    %285 = vector.broadcast %cst_87 : f32 to vector<32x1xf32>
    %286 = arith.subf %285, %248 : vector<32x1xf32>
    %287 = vector.broadcast %286 : vector<32x1xf32> to vector<32x8xf32>
    %288 = arith.mulf %287, %231 : vector<32x8xf32>
    %289 = arith.addf %284, %288 : vector<32x8xf32>
    %290 = vector.broadcast %248 : vector<32x1xf32> to vector<32x8xf32>
    %291 = arith.mulf %290, %280 : vector<32x8xf32>
    %cst_88 = arith.constant 1.000000e+00 : f32
    %292 = vector.broadcast %cst_88 : f32 to vector<32x1xf32>
    %293 = arith.subf %292, %248 : vector<32x1xf32>
    %294 = vector.broadcast %293 : vector<32x1xf32> to vector<32x8xf32>
    %295 = arith.mulf %294, %238 : vector<32x8xf32>
    %296 = arith.addf %291, %295 : vector<32x8xf32>
    %c5_89 = arith.constant 5 : index
    %c0_90 = arith.constant 0 : index
    %c0_91 = arith.constant 0 : index
    %297 = vector.load %arg0[%c5_89, %c0_90, %c0_91] : memref<6x16x8xf32, #tpu.memory_space<vmem>>, vector<1x16x8xf32>
    %298 = vector.shape_cast %297 : vector<1x16x8xf32> to vector<16x8xf32>
    %c0_92 = arith.constant 0 : index
    %c0_93 = arith.constant 0 : index
    %c0_94 = arith.constant 0 : index
    %299 = vector.load %arg0[%c0_92, %c0_93, %c0_94] : memref<6x16x8xf32, #tpu.memory_space<vmem>>, vector<1x16x8xf32>
    %300 = vector.shape_cast %299 : vector<1x16x8xf32> to vector<16x8xf32>
    %301 = tpu.concatenate %298, %300 in 0 : vector<16x8xf32>, vector<16x8xf32> -> vector<32x8xf32>
    %c5_95 = arith.constant 5 : index
    %c0_96 = arith.constant 0 : index
    %c0_97 = arith.constant 0 : index
    %302 = vector.load %arg1[%c5_95, %c0_96, %c0_97] : memref<6x16x1xf32, #tpu.memory_space<vmem>>, vector<1x16x1xf32>
    %303 = vector.shape_cast %302 : vector<1x16x1xf32> to vector<16x1xf32>
    %c0_98 = arith.constant 0 : index
    %c0_99 = arith.constant 0 : index
    %c0_100 = arith.constant 0 : index
    %304 = vector.load %arg1[%c0_98, %c0_99, %c0_100] : memref<6x16x1xf32, #tpu.memory_space<vmem>>, vector<1x16x1xf32>
    %305 = vector.shape_cast %304 : vector<1x16x1xf32> to vector<16x1xf32>
    %306 = tpu.concatenate %303, %305 in 0 : vector<16x1xf32>, vector<16x1xf32> -> vector<32x1xf32>
    %307 = tpu.concatenate %301, %289 in 1 : vector<32x8xf32>, vector<32x8xf32> -> vector<32x16xf32>
    %cst_101 = arith.constant dense<0.000000e+00> : vector<32x64xf32>
    %308 = tpu.matmul %307, %0, %cst_101 {dimension_numbers = #tpu.dot_dimension_numbers<[1], [0], [0], [1], [0, 0, 1, 1], [], []>} : vector<32x16xf32>, vector<16x64xf32>, vector<32x64xf32> -> vector<32x64xf32>
    %309 = vector.broadcast %1 : vector<1x64xf32> to vector<32x64xf32>
    %310 = arith.addf %308, %309 : vector<32x64xf32>
    %311 = vector.extract_strided_slice %310 {offsets = [0, 0], sizes = [32, 32], strides = [1, 1]} : vector<32x64xf32> to vector<32x32xf32>
    %312 = vector.extract_strided_slice %310 {offsets = [0, 32], sizes = [32, 32], strides = [1, 1]} : vector<32x64xf32> to vector<32x32xf32>
    %313 = vector.shape_cast %4 : vector<32x1xi1> to vector<32x1xi1>
    %314 = vector.broadcast %313 : vector<32x1xi1> to vector<32x32xi1>
    %315 = arith.select %314, %311, %312 : vector<32x32xi1>, vector<32x32xf32>
    %316 = vector.extract_strided_slice %315 {offsets = [0, 0], sizes = [32, 8], strides = [1, 1]} : vector<32x32xf32> to vector<32x8xf32>
    %317 = arith.negf %316 : vector<32x8xf32>
    %318 = math.exp %317 : vector<32x8xf32>
    %cst_102 = arith.constant 1.000000e+00 : f32
    %319 = vector.broadcast %cst_102 : f32 to vector<32x8xf32>
    %320 = arith.addf %319, %318 : vector<32x8xf32>
    %321 = arith.divf %319, %320 : vector<32x8xf32>
    %322 = vector.extract_strided_slice %315 {offsets = [0, 8], sizes = [32, 8], strides = [1, 1]} : vector<32x32xf32> to vector<32x8xf32>
    %323 = arith.negf %322 : vector<32x8xf32>
    %324 = math.exp %323 : vector<32x8xf32>
    %cst_103 = arith.constant 1.000000e+00 : f32
    %325 = vector.broadcast %cst_103 : f32 to vector<32x8xf32>
    %326 = arith.addf %325, %324 : vector<32x8xf32>
    %327 = arith.divf %325, %326 : vector<32x8xf32>
    %328 = vector.extract_strided_slice %315 {offsets = [0, 16], sizes = [32, 8], strides = [1, 1]} : vector<32x32xf32> to vector<32x8xf32>
    %329 = math.tanh %328 : vector<32x8xf32>
    %330 = vector.extract_strided_slice %315 {offsets = [0, 24], sizes = [32, 8], strides = [1, 1]} : vector<32x32xf32> to vector<32x8xf32>
    %331 = arith.negf %330 : vector<32x8xf32>
    %332 = math.exp %331 : vector<32x8xf32>
    %cst_104 = arith.constant 1.000000e+00 : f32
    %333 = vector.broadcast %cst_104 : f32 to vector<32x8xf32>
    %334 = arith.addf %333, %332 : vector<32x8xf32>
    %335 = arith.divf %333, %334 : vector<32x8xf32>
    %336 = arith.mulf %327, %296 : vector<32x8xf32>
    %337 = arith.mulf %321, %329 : vector<32x8xf32>
    %338 = arith.addf %336, %337 : vector<32x8xf32>
    %339 = math.tanh %338 : vector<32x8xf32>
    %340 = arith.mulf %335, %339 : vector<32x8xf32>
    %341 = vector.broadcast %306 : vector<32x1xf32> to vector<32x8xf32>
    %342 = arith.mulf %341, %340 : vector<32x8xf32>
    %cst_105 = arith.constant 1.000000e+00 : f32
    %343 = vector.broadcast %cst_105 : f32 to vector<32x1xf32>
    %344 = arith.subf %343, %306 : vector<32x1xf32>
    %345 = vector.broadcast %344 : vector<32x1xf32> to vector<32x8xf32>
    %346 = arith.mulf %345, %289 : vector<32x8xf32>
    %347 = arith.addf %342, %346 : vector<32x8xf32>
    %348 = vector.extract_strided_slice %347 {offsets = [0, 0], sizes = [16, 8], strides = [1, 1]} : vector<32x8xf32> to vector<16x8xf32>
    %349 = vector.extract_strided_slice %347 {offsets = [16, 0], sizes = [16, 8], strides = [1, 1]} : vector<32x8xf32> to vector<16x8xf32>
    %350 = tpu.concatenate %348, %349 in 1 : vector<16x8xf32>, vector<16x8xf32> -> vector<16x16xf32>
    %c0_106 = arith.constant 0 : index
    %c0_107 = arith.constant 0 : index
    %351 = vector.load %arg4[%c0_106, %c0_107] : memref<16x16xf32, #tpu.memory_space<vmem>>, vector<16x16xf32>
    tpu.vector_store %arg4[%c0_106, %c0_107], %350 {strides = array<i32>} : memref<16x16xf32, #tpu.memory_space<vmem>>, vector<16x16xf32>,
    return
  }
}

module attributes {stable_mosaic.version = 11 : i64} {
  func.func @kernel(%arg0: memref<8x2x32xf32, #tpu.memory_space<vmem>>, %arg1: memref<8x2x1xf32, #tpu.memory_space<vmem>>, %arg2: memref<48x128xf32, #tpu.memory_space<vmem>>, %arg3: memref<1x128xf32, #tpu.memory_space<vmem>>, %arg4: memref<16x32xf32, #tpu.memory_space<vmem>>, %arg5: memref<2x32xf32, #tpu.memory_space<vmem>>) attributes {dimension_semantics = [], scalar_prefetch = 0 : i64, scratch_operands = 0 : i64, tpu.core_type = #tpu.core_type<tc>} {
    %c0 = arith.constant 0 : index
    %c0_0 = arith.constant 0 : index
    %0 = vector.load %arg2[%c0, %c0_0] : memref<48x128xf32, #tpu.memory_space<vmem>>, vector<48x128xf32>
    %c0_1 = arith.constant 0 : index
    %c0_2 = arith.constant 0 : index
    %1 = vector.load %arg3[%c0_1, %c0_2] : memref<1x128xf32, #tpu.memory_space<vmem>>, vector<1x128xf32>
    %2 = tpu.iota {dimensions = array<i32: 0>} : vector<4x1xi32>
    %c2_i32 = arith.constant 2 : i32
    %3 = vector.broadcast %c2_i32 : i32 to vector<4x1xi32>
    %4 = arith.cmpi slt, %2, %3 : vector<4x1xi32>
    %cst = arith.constant 0.000000e+00 : f32
    %5 = vector.broadcast %cst : f32 to vector<4x16xf32>
    %cst_3 = arith.constant 0.000000e+00 : f32
    %6 = vector.broadcast %cst_3 : f32 to vector<4x16xf32>
    %c0_4 = arith.constant 0 : index
    %c0_5 = arith.constant 0 : index
    %c0_6 = arith.constant 0 : index
    %7 = vector.load %arg0[%c0_4, %c0_5, %c0_6] : memref<8x2x32xf32, #tpu.memory_space<vmem>>, vector<1x2x32xf32>
    %8 = vector.shape_cast %7 : vector<1x2x32xf32> to vector<2x32xf32>
    %c7 = arith.constant 7 : index
    %c0_7 = arith.constant 0 : index
    %c0_8 = arith.constant 0 : index
    %9 = vector.load %arg0[%c7, %c0_7, %c0_8] : memref<8x2x32xf32, #tpu.memory_space<vmem>>, vector<1x2x32xf32>
    %10 = vector.shape_cast %9 : vector<1x2x32xf32> to vector<2x32xf32>
    %11 = tpu.concatenate %8, %10 in 0 : vector<2x32xf32>, vector<2x32xf32> -> vector<4x32xf32>
    %c0_9 = arith.constant 0 : index
    %c0_10 = arith.constant 0 : index
    %c0_11 = arith.constant 0 : index
    %12 = vector.load %arg1[%c0_9, %c0_10, %c0_11] : memref<8x2x1xf32, #tpu.memory_space<vmem>>, vector<1x2x1xf32>
    %13 = vector.shape_cast %12 : vector<1x2x1xf32> to vector<2x1xf32>
    %c7_12 = arith.constant 7 : index
    %c0_13 = arith.constant 0 : index
    %c0_14 = arith.constant 0 : index
    %14 = vector.load %arg1[%c7_12, %c0_13, %c0_14] : memref<8x2x1xf32, #tpu.memory_space<vmem>>, vector<1x2x1xf32>
    %15 = vector.shape_cast %14 : vector<1x2x1xf32> to vector<2x1xf32>
    %16 = tpu.concatenate %13, %15 in 0 : vector<2x1xf32>, vector<2x1xf32> -> vector<4x1xf32>
    %17 = tpu.concatenate %11, %5 in 1 : vector<4x32xf32>, vector<4x16xf32> -> vector<4x48xf32>
    %cst_15 = arith.constant dense<0.000000e+00> : vector<4x128xf32>
    %18 = tpu.matmul %17, %0, %cst_15 {dimension_numbers = #tpu.dot_dimension_numbers<[1], [0], [0], [1], [0, 0, 1, 1], [], []>} : vector<4x48xf32>, vector<48x128xf32>, vector<4x128xf32> -> vector<4x128xf32>
    %19 = vector.broadcast %1 : vector<1x128xf32> to vector<4x128xf32>
    %20 = arith.addf %18, %19 : vector<4x128xf32>
    %21 = vector.extract_strided_slice %20 {offsets = [0, 0], sizes = [4, 64], strides = [1, 1]} : vector<4x128xf32> to vector<4x64xf32>
    %22 = vector.extract_strided_slice %20 {offsets = [0, 64], sizes = [4, 64], strides = [1, 1]} : vector<4x128xf32> to vector<4x64xf32>
    %23 = vector.shape_cast %4 : vector<4x1xi1> to vector<4x1xi1>
    %24 = vector.broadcast %23 : vector<4x1xi1> to vector<4x64xi1>
    %25 = arith.select %24, %21, %22 : vector<4x64xi1>, vector<4x64xf32>
    %26 = vector.extract_strided_slice %25 {offsets = [0, 0], sizes = [4, 16], strides = [1, 1]} : vector<4x64xf32> to vector<4x16xf32>
    %27 = arith.negf %26 : vector<4x16xf32>
    %28 = math.exp %27 : vector<4x16xf32>
    %cst_16 = arith.constant 1.000000e+00 : f32
    %29 = vector.broadcast %cst_16 : f32 to vector<4x16xf32>
    %30 = arith.addf %29, %28 : vector<4x16xf32>
    %31 = arith.divf %29, %30 : vector<4x16xf32>
    %32 = vector.extract_strided_slice %25 {offsets = [0, 16], sizes = [4, 16], strides = [1, 1]} : vector<4x64xf32> to vector<4x16xf32>
    %33 = arith.negf %32 : vector<4x16xf32>
    %34 = math.exp %33 : vector<4x16xf32>
    %cst_17 = arith.constant 1.000000e+00 : f32
    %35 = vector.broadcast %cst_17 : f32 to vector<4x16xf32>
    %36 = arith.addf %35, %34 : vector<4x16xf32>
    %37 = arith.divf %35, %36 : vector<4x16xf32>
    %38 = vector.extract_strided_slice %25 {offsets = [0, 32], sizes = [4, 16], strides = [1, 1]} : vector<4x64xf32> to vector<4x16xf32>
    %39 = math.tanh %38 : vector<4x16xf32>
    %40 = vector.extract_strided_slice %25 {offsets = [0, 48], sizes = [4, 16], strides = [1, 1]} : vector<4x64xf32> to vector<4x16xf32>
    %41 = arith.negf %40 : vector<4x16xf32>
    %42 = math.exp %41 : vector<4x16xf32>
    %cst_18 = arith.constant 1.000000e+00 : f32
    %43 = vector.broadcast %cst_18 : f32 to vector<4x16xf32>
    %44 = arith.addf %43, %42 : vector<4x16xf32>
    %45 = arith.divf %43, %44 : vector<4x16xf32>
    %46 = arith.mulf %37, %6 : vector<4x16xf32>
    %47 = arith.mulf %31, %39 : vector<4x16xf32>
    %48 = arith.addf %46, %47 : vector<4x16xf32>
    %49 = math.tanh %48 : vector<4x16xf32>
    %50 = arith.mulf %45, %49 : vector<4x16xf32>
    %51 = vector.broadcast %16 : vector<4x1xf32> to vector<4x16xf32>
    %52 = arith.mulf %51, %50 : vector<4x16xf32>
    %cst_19 = arith.constant 1.000000e+00 : f32
    %53 = vector.broadcast %cst_19 : f32 to vector<4x1xf32>
    %54 = arith.subf %53, %16 : vector<4x1xf32>
    %55 = vector.broadcast %54 : vector<4x1xf32> to vector<4x16xf32>
    %56 = arith.mulf %55, %5 : vector<4x16xf32>
    %57 = arith.addf %52, %56 : vector<4x16xf32>
    %58 = vector.broadcast %16 : vector<4x1xf32> to vector<4x16xf32>
    %59 = arith.mulf %58, %48 : vector<4x16xf32>
    %cst_20 = arith.constant 1.000000e+00 : f32
    %60 = vector.broadcast %cst_20 : f32 to vector<4x1xf32>
    %61 = arith.subf %60, %16 : vector<4x1xf32>
    %62 = vector.broadcast %61 : vector<4x1xf32> to vector<4x16xf32>
    %63 = arith.mulf %62, %6 : vector<4x16xf32>
    %64 = arith.addf %59, %63 : vector<4x16xf32>
    %65 = vector.broadcast %16 : vector<4x1xf32> to vector<4x16xf32>
    %66 = arith.mulf %65, %50 : vector<4x16xf32>
    %67 = vector.extract_strided_slice %66 {offsets = [0, 0], sizes = [2, 16], strides = [1, 1]} : vector<4x16xf32> to vector<2x16xf32>
    %68 = vector.extract_strided_slice %66 {offsets = [2, 0], sizes = [2, 16], strides = [1, 1]} : vector<4x16xf32> to vector<2x16xf32>
    %c1 = arith.constant 1 : index
    %c0_21 = arith.constant 0 : index
    %c0_22 = arith.constant 0 : index
    %69 = vector.load %arg0[%c1, %c0_21, %c0_22] : memref<8x2x32xf32, #tpu.memory_space<vmem>>, vector<1x2x32xf32>
    %70 = vector.shape_cast %69 : vector<1x2x32xf32> to vector<2x32xf32>
    %c6 = arith.constant 6 : index
    %c0_23 = arith.constant 0 : index
    %c0_24 = arith.constant 0 : index
    %71 = vector.load %arg0[%c6, %c0_23, %c0_24] : memref<8x2x32xf32, #tpu.memory_space<vmem>>, vector<1x2x32xf32>
    %72 = vector.shape_cast %71 : vector<1x2x32xf32> to vector<2x32xf32>
    %73 = tpu.concatenate %70, %72 in 0 : vector<2x32xf32>, vector<2x32xf32> -> vector<4x32xf32>
    %c1_25 = arith.constant 1 : index
    %c0_26 = arith.constant 0 : index
    %c0_27 = arith.constant 0 : index
    %74 = vector.load %arg1[%c1_25, %c0_26, %c0_27] : memref<8x2x1xf32, #tpu.memory_space<vmem>>, vector<1x2x1xf32>
    %75 = vector.shape_cast %74 : vector<1x2x1xf32> to vector<2x1xf32>
    %c6_28 = arith.constant 6 : index
    %c0_29 = arith.constant 0 : index
    %c0_30 = arith.constant 0 : index
    %76 = vector.load %arg1[%c6_28, %c0_29, %c0_30] : memref<8x2x1xf32, #tpu.memory_space<vmem>>, vector<1x2x1xf32>
    %77 = vector.shape_cast %76 : vector<1x2x1xf32> to vector<2x1xf32>
    %78 = tpu.concatenate %75, %77 in 0 : vector<2x1xf32>, vector<2x1xf32> -> vector<4x1xf32>
    %79 = tpu.concatenate %73, %57 in 1 : vector<4x32xf32>, vector<4x16xf32> -> vector<4x48xf32>
    %cst_31 = arith.constant dense<0.000000e+00> : vector<4x128xf32>
    %80 = tpu.matmul %79, %0, %cst_31 {dimension_numbers = #tpu.dot_dimension_numbers<[1], [0], [0], [1], [0, 0, 1, 1], [], []>} : vector<4x48xf32>, vector<48x128xf32>, vector<4x128xf32> -> vector<4x128xf32>
    %81 = vector.broadcast %1 : vector<1x128xf32> to vector<4x128xf32>
    %82 = arith.addf %80, %81 : vector<4x128xf32>
    %83 = vector.extract_strided_slice %82 {offsets = [0, 0], sizes = [4, 64], strides = [1, 1]} : vector<4x128xf32> to vector<4x64xf32>
    %84 = vector.extract_strided_slice %82 {offsets = [0, 64], sizes = [4, 64], strides = [1, 1]} : vector<4x128xf32> to vector<4x64xf32>
    %85 = vector.shape_cast %4 : vector<4x1xi1> to vector<4x1xi1>
    %86 = vector.broadcast %85 : vector<4x1xi1> to vector<4x64xi1>
    %87 = arith.select %86, %83, %84 : vector<4x64xi1>, vector<4x64xf32>
    %88 = vector.extract_strided_slice %87 {offsets = [0, 0], sizes = [4, 16], strides = [1, 1]} : vector<4x64xf32> to vector<4x16xf32>
    %89 = arith.negf %88 : vector<4x16xf32>
    %90 = math.exp %89 : vector<4x16xf32>
    %cst_32 = arith.constant 1.000000e+00 : f32
    %91 = vector.broadcast %cst_32 : f32 to vector<4x16xf32>
    %92 = arith.addf %91, %90 : vector<4x16xf32>
    %93 = arith.divf %91, %92 : vector<4x16xf32>
    %94 = vector.extract_strided_slice %87 {offsets = [0, 16], sizes = [4, 16], strides = [1, 1]} : vector<4x64xf32> to vector<4x16xf32>
    %95 = arith.negf %94 : vector<4x16xf32>
    %96 = math.exp %95 : vector<4x16xf32>
    %cst_33 = arith.constant 1.000000e+00 : f32
    %97 = vector.broadcast %cst_33 : f32 to vector<4x16xf32>
    %98 = arith.addf %97, %96 : vector<4x16xf32>
    %99 = arith.divf %97, %98 : vector<4x16xf32>
    %100 = vector.extract_strided_slice %87 {offsets = [0, 32], sizes = [4, 16], strides = [1, 1]} : vector<4x64xf32> to vector<4x16xf32>
    %101 = math.tanh %100 : vector<4x16xf32>
    %102 = vector.extract_strided_slice %87 {offsets = [0, 48], sizes = [4, 16], strides = [1, 1]} : vector<4x64xf32> to vector<4x16xf32>
    %103 = arith.negf %102 : vector<4x16xf32>
    %104 = math.exp %103 : vector<4x16xf32>
    %cst_34 = arith.constant 1.000000e+00 : f32
    %105 = vector.broadcast %cst_34 : f32 to vector<4x16xf32>
    %106 = arith.addf %105, %104 : vector<4x16xf32>
    %107 = arith.divf %105, %106 : vector<4x16xf32>
    %108 = arith.mulf %99, %64 : vector<4x16xf32>
    %109 = arith.mulf %93, %101 : vector<4x16xf32>
    %110 = arith.addf %108, %109 : vector<4x16xf32>
    %111 = math.tanh %110 : vector<4x16xf32>
    %112 = arith.mulf %107, %111 : vector<4x16xf32>
    %113 = vector.broadcast %78 : vector<4x1xf32> to vector<4x16xf32>
    %114 = arith.mulf %113, %112 : vector<4x16xf32>
    %cst_35 = arith.constant 1.000000e+00 : f32
    %115 = vector.broadcast %cst_35 : f32 to vector<4x1xf32>
    %116 = arith.subf %115, %78 : vector<4x1xf32>
    %117 = vector.broadcast %116 : vector<4x1xf32> to vector<4x16xf32>
    %118 = arith.mulf %117, %57 : vector<4x16xf32>
    %119 = arith.addf %114, %118 : vector<4x16xf32>
    %120 = vector.broadcast %78 : vector<4x1xf32> to vector<4x16xf32>
    %121 = arith.mulf %120, %110 : vector<4x16xf32>
    %cst_36 = arith.constant 1.000000e+00 : f32
    %122 = vector.broadcast %cst_36 : f32 to vector<4x1xf32>
    %123 = arith.subf %122, %78 : vector<4x1xf32>
    %124 = vector.broadcast %123 : vector<4x1xf32> to vector<4x16xf32>
    %125 = arith.mulf %124, %64 : vector<4x16xf32>
    %126 = arith.addf %121, %125 : vector<4x16xf32>
    %127 = vector.broadcast %78 : vector<4x1xf32> to vector<4x16xf32>
    %128 = arith.mulf %127, %112 : vector<4x16xf32>
    %129 = vector.extract_strided_slice %128 {offsets = [0, 0], sizes = [2, 16], strides = [1, 1]} : vector<4x16xf32> to vector<2x16xf32>
    %130 = vector.extract_strided_slice %128 {offsets = [2, 0], sizes = [2, 16], strides = [1, 1]} : vector<4x16xf32> to vector<2x16xf32>
    %c2 = arith.constant 2 : index
    %c0_37 = arith.constant 0 : index
    %c0_38 = arith.constant 0 : index
    %131 = vector.load %arg0[%c2, %c0_37, %c0_38] : memref<8x2x32xf32, #tpu.memory_space<vmem>>, vector<1x2x32xf32>
    %132 = vector.shape_cast %131 : vector<1x2x32xf32> to vector<2x32xf32>
    %c5 = arith.constant 5 : index
    %c0_39 = arith.constant 0 : index
    %c0_40 = arith.constant 0 : index
    %133 = vector.load %arg0[%c5, %c0_39, %c0_40] : memref<8x2x32xf32, #tpu.memory_space<vmem>>, vector<1x2x32xf32>
    %134 = vector.shape_cast %133 : vector<1x2x32xf32> to vector<2x32xf32>
    %135 = tpu.concatenate %132, %134 in 0 : vector<2x32xf32>, vector<2x32xf32> -> vector<4x32xf32>
    %c2_41 = arith.constant 2 : index
    %c0_42 = arith.constant 0 : index
    %c0_43 = arith.constant 0 : index
    %136 = vector.load %arg1[%c2_41, %c0_42, %c0_43] : memref<8x2x1xf32, #tpu.memory_space<vmem>>, vector<1x2x1xf32>
    %137 = vector.shape_cast %136 : vector<1x2x1xf32> to vector<2x1xf32>
    %c5_44 = arith.constant 5 : index
    %c0_45 = arith.constant 0 : index
    %c0_46 = arith.constant 0 : index
    %138 = vector.load %arg1[%c5_44, %c0_45, %c0_46] : memref<8x2x1xf32, #tpu.memory_space<vmem>>, vector<1x2x1xf32>
    %139 = vector.shape_cast %138 : vector<1x2x1xf32> to vector<2x1xf32>
    %140 = tpu.concatenate %137, %139 in 0 : vector<2x1xf32>, vector<2x1xf32> -> vector<4x1xf32>
    %141 = tpu.concatenate %135, %119 in 1 : vector<4x32xf32>, vector<4x16xf32> -> vector<4x48xf32>
    %cst_47 = arith.constant dense<0.000000e+00> : vector<4x128xf32>
    %142 = tpu.matmul %141, %0, %cst_47 {dimension_numbers = #tpu.dot_dimension_numbers<[1], [0], [0], [1], [0, 0, 1, 1], [], []>} : vector<4x48xf32>, vector<48x128xf32>, vector<4x128xf32> -> vector<4x128xf32>
    %143 = vector.broadcast %1 : vector<1x128xf32> to vector<4x128xf32>
    %144 = arith.addf %142, %143 : vector<4x128xf32>
    %145 = vector.extract_strided_slice %144 {offsets = [0, 0], sizes = [4, 64], strides = [1, 1]} : vector<4x128xf32> to vector<4x64xf32>
    %146 = vector.extract_strided_slice %144 {offsets = [0, 64], sizes = [4, 64], strides = [1, 1]} : vector<4x128xf32> to vector<4x64xf32>
    %147 = vector.shape_cast %4 : vector<4x1xi1> to vector<4x1xi1>
    %148 = vector.broadcast %147 : vector<4x1xi1> to vector<4x64xi1>
    %149 = arith.select %148, %145, %146 : vector<4x64xi1>, vector<4x64xf32>
    %150 = vector.extract_strided_slice %149 {offsets = [0, 0], sizes = [4, 16], strides = [1, 1]} : vector<4x64xf32> to vector<4x16xf32>
    %151 = arith.negf %150 : vector<4x16xf32>
    %152 = math.exp %151 : vector<4x16xf32>
    %cst_48 = arith.constant 1.000000e+00 : f32
    %153 = vector.broadcast %cst_48 : f32 to vector<4x16xf32>
    %154 = arith.addf %153, %152 : vector<4x16xf32>
    %155 = arith.divf %153, %154 : vector<4x16xf32>
    %156 = vector.extract_strided_slice %149 {offsets = [0, 16], sizes = [4, 16], strides = [1, 1]} : vector<4x64xf32> to vector<4x16xf32>
    %157 = arith.negf %156 : vector<4x16xf32>
    %158 = math.exp %157 : vector<4x16xf32>
    %cst_49 = arith.constant 1.000000e+00 : f32
    %159 = vector.broadcast %cst_49 : f32 to vector<4x16xf32>
    %160 = arith.addf %159, %158 : vector<4x16xf32>
    %161 = arith.divf %159, %160 : vector<4x16xf32>
    %162 = vector.extract_strided_slice %149 {offsets = [0, 32], sizes = [4, 16], strides = [1, 1]} : vector<4x64xf32> to vector<4x16xf32>
    %163 = math.tanh %162 : vector<4x16xf32>
    %164 = vector.extract_strided_slice %149 {offsets = [0, 48], sizes = [4, 16], strides = [1, 1]} : vector<4x64xf32> to vector<4x16xf32>
    %165 = arith.negf %164 : vector<4x16xf32>
    %166 = math.exp %165 : vector<4x16xf32>
    %cst_50 = arith.constant 1.000000e+00 : f32
    %167 = vector.broadcast %cst_50 : f32 to vector<4x16xf32>
    %168 = arith.addf %167, %166 : vector<4x16xf32>
    %169 = arith.divf %167, %168 : vector<4x16xf32>
    %170 = arith.mulf %161, %126 : vector<4x16xf32>
    %171 = arith.mulf %155, %163 : vector<4x16xf32>
    %172 = arith.addf %170, %171 : vector<4x16xf32>
    %173 = math.tanh %172 : vector<4x16xf32>
    %174 = arith.mulf %169, %173 : vector<4x16xf32>
    %175 = vector.broadcast %140 : vector<4x1xf32> to vector<4x16xf32>
    %176 = arith.mulf %175, %174 : vector<4x16xf32>
    %cst_51 = arith.constant 1.000000e+00 : f32
    %177 = vector.broadcast %cst_51 : f32 to vector<4x1xf32>
    %178 = arith.subf %177, %140 : vector<4x1xf32>
    %179 = vector.broadcast %178 : vector<4x1xf32> to vector<4x16xf32>
    %180 = arith.mulf %179, %119 : vector<4x16xf32>
    %181 = arith.addf %176, %180 : vector<4x16xf32>
    %182 = vector.broadcast %140 : vector<4x1xf32> to vector<4x16xf32>
    %183 = arith.mulf %182, %172 : vector<4x16xf32>
    %cst_52 = arith.constant 1.000000e+00 : f32
    %184 = vector.broadcast %cst_52 : f32 to vector<4x1xf32>
    %185 = arith.subf %184, %140 : vector<4x1xf32>
    %186 = vector.broadcast %185 : vector<4x1xf32> to vector<4x16xf32>
    %187 = arith.mulf %186, %126 : vector<4x16xf32>
    %188 = arith.addf %183, %187 : vector<4x16xf32>
    %189 = vector.broadcast %140 : vector<4x1xf32> to vector<4x16xf32>
    %190 = arith.mulf %189, %174 : vector<4x16xf32>
    %191 = vector.extract_strided_slice %190 {offsets = [0, 0], sizes = [2, 16], strides = [1, 1]} : vector<4x16xf32> to vector<2x16xf32>
    %192 = vector.extract_strided_slice %190 {offsets = [2, 0], sizes = [2, 16], strides = [1, 1]} : vector<4x16xf32> to vector<2x16xf32>
    %c3 = arith.constant 3 : index
    %c0_53 = arith.constant 0 : index
    %c0_54 = arith.constant 0 : index
    %193 = vector.load %arg0[%c3, %c0_53, %c0_54] : memref<8x2x32xf32, #tpu.memory_space<vmem>>, vector<1x2x32xf32>
    %194 = vector.shape_cast %193 : vector<1x2x32xf32> to vector<2x32xf32>
    %c4 = arith.constant 4 : index
    %c0_55 = arith.constant 0 : index
    %c0_56 = arith.constant 0 : index
    %195 = vector.load %arg0[%c4, %c0_55, %c0_56] : memref<8x2x32xf32, #tpu.memory_space<vmem>>, vector<1x2x32xf32>
    %196 = vector.shape_cast %195 : vector<1x2x32xf32> to vector<2x32xf32>
    %197 = tpu.concatenate %194, %196 in 0 : vector<2x32xf32>, vector<2x32xf32> -> vector<4x32xf32>
    %c3_57 = arith.constant 3 : index
    %c0_58 = arith.constant 0 : index
    %c0_59 = arith.constant 0 : index
    %198 = vector.load %arg1[%c3_57, %c0_58, %c0_59] : memref<8x2x1xf32, #tpu.memory_space<vmem>>, vector<1x2x1xf32>
    %199 = vector.shape_cast %198 : vector<1x2x1xf32> to vector<2x1xf32>
    %c4_60 = arith.constant 4 : index
    %c0_61 = arith.constant 0 : index
    %c0_62 = arith.constant 0 : index
    %200 = vector.load %arg1[%c4_60, %c0_61, %c0_62] : memref<8x2x1xf32, #tpu.memory_space<vmem>>, vector<1x2x1xf32>
    %201 = vector.shape_cast %200 : vector<1x2x1xf32> to vector<2x1xf32>
    %202 = tpu.concatenate %199, %201 in 0 : vector<2x1xf32>, vector<2x1xf32> -> vector<4x1xf32>
    %203 = tpu.concatenate %197, %181 in 1 : vector<4x32xf32>, vector<4x16xf32> -> vector<4x48xf32>
    %cst_63 = arith.constant dense<0.000000e+00> : vector<4x128xf32>
    %204 = tpu.matmul %203, %0, %cst_63 {dimension_numbers = #tpu.dot_dimension_numbers<[1], [0], [0], [1], [0, 0, 1, 1], [], []>} : vector<4x48xf32>, vector<48x128xf32>, vector<4x128xf32> -> vector<4x128xf32>
    %205 = vector.broadcast %1 : vector<1x128xf32> to vector<4x128xf32>
    %206 = arith.addf %204, %205 : vector<4x128xf32>
    %207 = vector.extract_strided_slice %206 {offsets = [0, 0], sizes = [4, 64], strides = [1, 1]} : vector<4x128xf32> to vector<4x64xf32>
    %208 = vector.extract_strided_slice %206 {offsets = [0, 64], sizes = [4, 64], strides = [1, 1]} : vector<4x128xf32> to vector<4x64xf32>
    %209 = vector.shape_cast %4 : vector<4x1xi1> to vector<4x1xi1>
    %210 = vector.broadcast %209 : vector<4x1xi1> to vector<4x64xi1>
    %211 = arith.select %210, %207, %208 : vector<4x64xi1>, vector<4x64xf32>
    %212 = vector.extract_strided_slice %211 {offsets = [0, 0], sizes = [4, 16], strides = [1, 1]} : vector<4x64xf32> to vector<4x16xf32>
    %213 = arith.negf %212 : vector<4x16xf32>
    %214 = math.exp %213 : vector<4x16xf32>
    %cst_64 = arith.constant 1.000000e+00 : f32
    %215 = vector.broadcast %cst_64 : f32 to vector<4x16xf32>
    %216 = arith.addf %215, %214 : vector<4x16xf32>
    %217 = arith.divf %215, %216 : vector<4x16xf32>
    %218 = vector.extract_strided_slice %211 {offsets = [0, 16], sizes = [4, 16], strides = [1, 1]} : vector<4x64xf32> to vector<4x16xf32>
    %219 = arith.negf %218 : vector<4x16xf32>
    %220 = math.exp %219 : vector<4x16xf32>
    %cst_65 = arith.constant 1.000000e+00 : f32
    %221 = vector.broadcast %cst_65 : f32 to vector<4x16xf32>
    %222 = arith.addf %221, %220 : vector<4x16xf32>
    %223 = arith.divf %221, %222 : vector<4x16xf32>
    %224 = vector.extract_strided_slice %211 {offsets = [0, 32], sizes = [4, 16], strides = [1, 1]} : vector<4x64xf32> to vector<4x16xf32>
    %225 = math.tanh %224 : vector<4x16xf32>
    %226 = vector.extract_strided_slice %211 {offsets = [0, 48], sizes = [4, 16], strides = [1, 1]} : vector<4x64xf32> to vector<4x16xf32>
    %227 = arith.negf %226 : vector<4x16xf32>
    %228 = math.exp %227 : vector<4x16xf32>
    %cst_66 = arith.constant 1.000000e+00 : f32
    %229 = vector.broadcast %cst_66 : f32 to vector<4x16xf32>
    %230 = arith.addf %229, %228 : vector<4x16xf32>
    %231 = arith.divf %229, %230 : vector<4x16xf32>
    %232 = arith.mulf %223, %188 : vector<4x16xf32>
    %233 = arith.mulf %217, %225 : vector<4x16xf32>
    %234 = arith.addf %232, %233 : vector<4x16xf32>
    %235 = math.tanh %234 : vector<4x16xf32>
    %236 = arith.mulf %231, %235 : vector<4x16xf32>
    %237 = vector.broadcast %202 : vector<4x1xf32> to vector<4x16xf32>
    %238 = arith.mulf %237, %236 : vector<4x16xf32>
    %cst_67 = arith.constant 1.000000e+00 : f32
    %239 = vector.broadcast %cst_67 : f32 to vector<4x1xf32>
    %240 = arith.subf %239, %202 : vector<4x1xf32>
    %241 = vector.broadcast %240 : vector<4x1xf32> to vector<4x16xf32>
    %242 = arith.mulf %241, %181 : vector<4x16xf32>
    %243 = arith.addf %238, %242 : vector<4x16xf32>
    %244 = vector.broadcast %202 : vector<4x1xf32> to vector<4x16xf32>
    %245 = arith.mulf %244, %234 : vector<4x16xf32>
    %cst_68 = arith.constant 1.000000e+00 : f32
    %246 = vector.broadcast %cst_68 : f32 to vector<4x1xf32>
    %247 = arith.subf %246, %202 : vector<4x1xf32>
    %248 = vector.broadcast %247 : vector<4x1xf32> to vector<4x16xf32>
    %249 = arith.mulf %248, %188 : vector<4x16xf32>
    %250 = arith.addf %245, %249 : vector<4x16xf32>
    %251 = vector.broadcast %202 : vector<4x1xf32> to vector<4x16xf32>
    %252 = arith.mulf %251, %236 : vector<4x16xf32>
    %253 = vector.extract_strided_slice %252 {offsets = [0, 0], sizes = [2, 16], strides = [1, 1]} : vector<4x16xf32> to vector<2x16xf32>
    %254 = vector.extract_strided_slice %252 {offsets = [2, 0], sizes = [2, 16], strides = [1, 1]} : vector<4x16xf32> to vector<2x16xf32>
    %c4_69 = arith.constant 4 : index
    %c0_70 = arith.constant 0 : index
    %c0_71 = arith.constant 0 : index
    %255 = vector.load %arg0[%c4_69, %c0_70, %c0_71] : memref<8x2x32xf32, #tpu.memory_space<vmem>>, vector<1x2x32xf32>
    %256 = vector.shape_cast %255 : vector<1x2x32xf32> to vector<2x32xf32>
    %c3_72 = arith.constant 3 : index
    %c0_73 = arith.constant 0 : index
    %c0_74 = arith.constant 0 : index
    %257 = vector.load %arg0[%c3_72, %c0_73, %c0_74] : memref<8x2x32xf32, #tpu.memory_space<vmem>>, vector<1x2x32xf32>
    %258 = vector.shape_cast %257 : vector<1x2x32xf32> to vector<2x32xf32>
    %259 = tpu.concatenate %256, %258 in 0 : vector<2x32xf32>, vector<2x32xf32> -> vector<4x32xf32>
    %c4_75 = arith.constant 4 : index
    %c0_76 = arith.constant 0 : index
    %c0_77 = arith.constant 0 : index
    %260 = vector.load %arg1[%c4_75, %c0_76, %c0_77] : memref<8x2x1xf32, #tpu.memory_space<vmem>>, vector<1x2x1xf32>
    %261 = vector.shape_cast %260 : vector<1x2x1xf32> to vector<2x1xf32>
    %c3_78 = arith.constant 3 : index
    %c0_79 = arith.constant 0 : index
    %c0_80 = arith.constant 0 : index
    %262 = vector.load %arg1[%c3_78, %c0_79, %c0_80] : memref<8x2x1xf32, #tpu.memory_space<vmem>>, vector<1x2x1xf32>
    %263 = vector.shape_cast %262 : vector<1x2x1xf32> to vector<2x1xf32>
    %264 = tpu.concatenate %261, %263 in 0 : vector<2x1xf32>, vector<2x1xf32> -> vector<4x1xf32>
    %265 = tpu.concatenate %259, %243 in 1 : vector<4x32xf32>, vector<4x16xf32> -> vector<4x48xf32>
    %cst_81 = arith.constant dense<0.000000e+00> : vector<4x128xf32>
    %266 = tpu.matmul %265, %0, %cst_81 {dimension_numbers = #tpu.dot_dimension_numbers<[1], [0], [0], [1], [0, 0, 1, 1], [], []>} : vector<4x48xf32>, vector<48x128xf32>, vector<4x128xf32> -> vector<4x128xf32>
    %267 = vector.broadcast %1 : vector<1x128xf32> to vector<4x128xf32>
    %268 = arith.addf %266, %267 : vector<4x128xf32>
    %269 = vector.extract_strided_slice %268 {offsets = [0, 0], sizes = [4, 64], strides = [1, 1]} : vector<4x128xf32> to vector<4x64xf32>
    %270 = vector.extract_strided_slice %268 {offsets = [0, 64], sizes = [4, 64], strides = [1, 1]} : vector<4x128xf32> to vector<4x64xf32>
    %271 = vector.shape_cast %4 : vector<4x1xi1> to vector<4x1xi1>
    %272 = vector.broadcast %271 : vector<4x1xi1> to vector<4x64xi1>
    %273 = arith.select %272, %269, %270 : vector<4x64xi1>, vector<4x64xf32>
    %274 = vector.extract_strided_slice %273 {offsets = [0, 0], sizes = [4, 16], strides = [1, 1]} : vector<4x64xf32> to vector<4x16xf32>
    %275 = arith.negf %274 : vector<4x16xf32>
    %276 = math.exp %275 : vector<4x16xf32>
    %cst_82 = arith.constant 1.000000e+00 : f32
    %277 = vector.broadcast %cst_82 : f32 to vector<4x16xf32>
    %278 = arith.addf %277, %276 : vector<4x16xf32>
    %279 = arith.divf %277, %278 : vector<4x16xf32>
    %280 = vector.extract_strided_slice %273 {offsets = [0, 16], sizes = [4, 16], strides = [1, 1]} : vector<4x64xf32> to vector<4x16xf32>
    %281 = arith.negf %280 : vector<4x16xf32>
    %282 = math.exp %281 : vector<4x16xf32>
    %cst_83 = arith.constant 1.000000e+00 : f32
    %283 = vector.broadcast %cst_83 : f32 to vector<4x16xf32>
    %284 = arith.addf %283, %282 : vector<4x16xf32>
    %285 = arith.divf %283, %284 : vector<4x16xf32>
    %286 = vector.extract_strided_slice %273 {offsets = [0, 32], sizes = [4, 16], strides = [1, 1]} : vector<4x64xf32> to vector<4x16xf32>
    %287 = math.tanh %286 : vector<4x16xf32>
    %288 = vector.extract_strided_slice %273 {offsets = [0, 48], sizes = [4, 16], strides = [1, 1]} : vector<4x64xf32> to vector<4x16xf32>
    %289 = arith.negf %288 : vector<4x16xf32>
    %290 = math.exp %289 : vector<4x16xf32>
    %cst_84 = arith.constant 1.000000e+00 : f32
    %291 = vector.broadcast %cst_84 : f32 to vector<4x16xf32>
    %292 = arith.addf %291, %290 : vector<4x16xf32>
    %293 = arith.divf %291, %292 : vector<4x16xf32>
    %294 = arith.mulf %285, %250 : vector<4x16xf32>
    %295 = arith.mulf %279, %287 : vector<4x16xf32>
    %296 = arith.addf %294, %295 : vector<4x16xf32>
    %297 = math.tanh %296 : vector<4x16xf32>
    %298 = arith.mulf %293, %297 : vector<4x16xf32>
    %299 = vector.broadcast %264 : vector<4x1xf32> to vector<4x16xf32>
    %300 = arith.mulf %299, %298 : vector<4x16xf32>
    %cst_85 = arith.constant 1.000000e+00 : f32
    %301 = vector.broadcast %cst_85 : f32 to vector<4x1xf32>
    %302 = arith.subf %301, %264 : vector<4x1xf32>
    %303 = vector.broadcast %302 : vector<4x1xf32> to vector<4x16xf32>
    %304 = arith.mulf %303, %243 : vector<4x16xf32>
    %305 = arith.addf %300, %304 : vector<4x16xf32>
    %306 = vector.broadcast %264 : vector<4x1xf32> to vector<4x16xf32>
    %307 = arith.mulf %306, %296 : vector<4x16xf32>
    %cst_86 = arith.constant 1.000000e+00 : f32
    %308 = vector.broadcast %cst_86 : f32 to vector<4x1xf32>
    %309 = arith.subf %308, %264 : vector<4x1xf32>
    %310 = vector.broadcast %309 : vector<4x1xf32> to vector<4x16xf32>
    %311 = arith.mulf %310, %250 : vector<4x16xf32>
    %312 = arith.addf %307, %311 : vector<4x16xf32>
    %313 = vector.broadcast %264 : vector<4x1xf32> to vector<4x16xf32>
    %314 = arith.mulf %313, %298 : vector<4x16xf32>
    %315 = vector.extract_strided_slice %314 {offsets = [0, 0], sizes = [2, 16], strides = [1, 1]} : vector<4x16xf32> to vector<2x16xf32>
    %316 = vector.extract_strided_slice %314 {offsets = [2, 0], sizes = [2, 16], strides = [1, 1]} : vector<4x16xf32> to vector<2x16xf32>
    %c5_87 = arith.constant 5 : index
    %c0_88 = arith.constant 0 : index
    %c0_89 = arith.constant 0 : index
    %317 = vector.load %arg0[%c5_87, %c0_88, %c0_89] : memref<8x2x32xf32, #tpu.memory_space<vmem>>, vector<1x2x32xf32>
    %318 = vector.shape_cast %317 : vector<1x2x32xf32> to vector<2x32xf32>
    %c2_90 = arith.constant 2 : index
    %c0_91 = arith.constant 0 : index
    %c0_92 = arith.constant 0 : index
    %319 = vector.load %arg0[%c2_90, %c0_91, %c0_92] : memref<8x2x32xf32, #tpu.memory_space<vmem>>, vector<1x2x32xf32>
    %320 = vector.shape_cast %319 : vector<1x2x32xf32> to vector<2x32xf32>
    %321 = tpu.concatenate %318, %320 in 0 : vector<2x32xf32>, vector<2x32xf32> -> vector<4x32xf32>
    %c5_93 = arith.constant 5 : index
    %c0_94 = arith.constant 0 : index
    %c0_95 = arith.constant 0 : index
    %322 = vector.load %arg1[%c5_93, %c0_94, %c0_95] : memref<8x2x1xf32, #tpu.memory_space<vmem>>, vector<1x2x1xf32>
    %323 = vector.shape_cast %322 : vector<1x2x1xf32> to vector<2x1xf32>
    %c2_96 = arith.constant 2 : index
    %c0_97 = arith.constant 0 : index
    %c0_98 = arith.constant 0 : index
    %324 = vector.load %arg1[%c2_96, %c0_97, %c0_98] : memref<8x2x1xf32, #tpu.memory_space<vmem>>, vector<1x2x1xf32>
    %325 = vector.shape_cast %324 : vector<1x2x1xf32> to vector<2x1xf32>
    %326 = tpu.concatenate %323, %325 in 0 : vector<2x1xf32>, vector<2x1xf32> -> vector<4x1xf32>
    %327 = tpu.concatenate %321, %305 in 1 : vector<4x32xf32>, vector<4x16xf32> -> vector<4x48xf32>
    %cst_99 = arith.constant dense<0.000000e+00> : vector<4x128xf32>
    %328 = tpu.matmul %327, %0, %cst_99 {dimension_numbers = #tpu.dot_dimension_numbers<[1], [0], [0], [1], [0, 0, 1, 1], [], []>} : vector<4x48xf32>, vector<48x128xf32>, vector<4x128xf32> -> vector<4x128xf32>
    %329 = vector.broadcast %1 : vector<1x128xf32> to vector<4x128xf32>
    %330 = arith.addf %328, %329 : vector<4x128xf32>
    %331 = vector.extract_strided_slice %330 {offsets = [0, 0], sizes = [4, 64], strides = [1, 1]} : vector<4x128xf32> to vector<4x64xf32>
    %332 = vector.extract_strided_slice %330 {offsets = [0, 64], sizes = [4, 64], strides = [1, 1]} : vector<4x128xf32> to vector<4x64xf32>
    %333 = vector.shape_cast %4 : vector<4x1xi1> to vector<4x1xi1>
    %334 = vector.broadcast %333 : vector<4x1xi1> to vector<4x64xi1>
    %335 = arith.select %334, %331, %332 : vector<4x64xi1>, vector<4x64xf32>
    %336 = vector.extract_strided_slice %335 {offsets = [0, 0], sizes = [4, 16], strides = [1, 1]} : vector<4x64xf32> to vector<4x16xf32>
    %337 = arith.negf %336 : vector<4x16xf32>
    %338 = math.exp %337 : vector<4x16xf32>
    %cst_100 = arith.constant 1.000000e+00 : f32
    %339 = vector.broadcast %cst_100 : f32 to vector<4x16xf32>
    %340 = arith.addf %339, %338 : vector<4x16xf32>
    %341 = arith.divf %339, %340 : vector<4x16xf32>
    %342 = vector.extract_strided_slice %335 {offsets = [0, 16], sizes = [4, 16], strides = [1, 1]} : vector<4x64xf32> to vector<4x16xf32>
    %343 = arith.negf %342 : vector<4x16xf32>
    %344 = math.exp %343 : vector<4x16xf32>
    %cst_101 = arith.constant 1.000000e+00 : f32
    %345 = vector.broadcast %cst_101 : f32 to vector<4x16xf32>
    %346 = arith.addf %345, %344 : vector<4x16xf32>
    %347 = arith.divf %345, %346 : vector<4x16xf32>
    %348 = vector.extract_strided_slice %335 {offsets = [0, 32], sizes = [4, 16], strides = [1, 1]} : vector<4x64xf32> to vector<4x16xf32>
    %349 = math.tanh %348 : vector<4x16xf32>
    %350 = vector.extract_strided_slice %335 {offsets = [0, 48], sizes = [4, 16], strides = [1, 1]} : vector<4x64xf32> to vector<4x16xf32>
    %351 = arith.negf %350 : vector<4x16xf32>
    %352 = math.exp %351 : vector<4x16xf32>
    %cst_102 = arith.constant 1.000000e+00 : f32
    %353 = vector.broadcast %cst_102 : f32 to vector<4x16xf32>
    %354 = arith.addf %353, %352 : vector<4x16xf32>
    %355 = arith.divf %353, %354 : vector<4x16xf32>
    %356 = arith.mulf %347, %312 : vector<4x16xf32>
    %357 = arith.mulf %341, %349 : vector<4x16xf32>
    %358 = arith.addf %356, %357 : vector<4x16xf32>
    %359 = math.tanh %358 : vector<4x16xf32>
    %360 = arith.mulf %355, %359 : vector<4x16xf32>
    %361 = vector.broadcast %326 : vector<4x1xf32> to vector<4x16xf32>
    %362 = arith.mulf %361, %360 : vector<4x16xf32>
    %cst_103 = arith.constant 1.000000e+00 : f32
    %363 = vector.broadcast %cst_103 : f32 to vector<4x1xf32>
    %364 = arith.subf %363, %326 : vector<4x1xf32>
    %365 = vector.broadcast %364 : vector<4x1xf32> to vector<4x16xf32>
    %366 = arith.mulf %365, %305 : vector<4x16xf32>
    %367 = arith.addf %362, %366 : vector<4x16xf32>
    %368 = vector.broadcast %326 : vector<4x1xf32> to vector<4x16xf32>
    %369 = arith.mulf %368, %358 : vector<4x16xf32>
    %cst_104 = arith.constant 1.000000e+00 : f32
    %370 = vector.broadcast %cst_104 : f32 to vector<4x1xf32>
    %371 = arith.subf %370, %326 : vector<4x1xf32>
    %372 = vector.broadcast %371 : vector<4x1xf32> to vector<4x16xf32>
    %373 = arith.mulf %372, %312 : vector<4x16xf32>
    %374 = arith.addf %369, %373 : vector<4x16xf32>
    %375 = vector.broadcast %326 : vector<4x1xf32> to vector<4x16xf32>
    %376 = arith.mulf %375, %360 : vector<4x16xf32>
    %377 = vector.extract_strided_slice %376 {offsets = [0, 0], sizes = [2, 16], strides = [1, 1]} : vector<4x16xf32> to vector<2x16xf32>
    %378 = vector.extract_strided_slice %376 {offsets = [2, 0], sizes = [2, 16], strides = [1, 1]} : vector<4x16xf32> to vector<2x16xf32>
    %c6_105 = arith.constant 6 : index
    %c0_106 = arith.constant 0 : index
    %c0_107 = arith.constant 0 : index
    %379 = vector.load %arg0[%c6_105, %c0_106, %c0_107] : memref<8x2x32xf32, #tpu.memory_space<vmem>>, vector<1x2x32xf32>
    %380 = vector.shape_cast %379 : vector<1x2x32xf32> to vector<2x32xf32>
    %c1_108 = arith.constant 1 : index
    %c0_109 = arith.constant 0 : index
    %c0_110 = arith.constant 0 : index
    %381 = vector.load %arg0[%c1_108, %c0_109, %c0_110] : memref<8x2x32xf32, #tpu.memory_space<vmem>>, vector<1x2x32xf32>
    %382 = vector.shape_cast %381 : vector<1x2x32xf32> to vector<2x32xf32>
    %383 = tpu.concatenate %380, %382 in 0 : vector<2x32xf32>, vector<2x32xf32> -> vector<4x32xf32>
    %c6_111 = arith.constant 6 : index
    %c0_112 = arith.constant 0 : index
    %c0_113 = arith.constant 0 : index
    %384 = vector.load %arg1[%c6_111, %c0_112, %c0_113] : memref<8x2x1xf32, #tpu.memory_space<vmem>>, vector<1x2x1xf32>
    %385 = vector.shape_cast %384 : vector<1x2x1xf32> to vector<2x1xf32>
    %c1_114 = arith.constant 1 : index
    %c0_115 = arith.constant 0 : index
    %c0_116 = arith.constant 0 : index
    %386 = vector.load %arg1[%c1_114, %c0_115, %c0_116] : memref<8x2x1xf32, #tpu.memory_space<vmem>>, vector<1x2x1xf32>
    %387 = vector.shape_cast %386 : vector<1x2x1xf32> to vector<2x1xf32>
    %388 = tpu.concatenate %385, %387 in 0 : vector<2x1xf32>, vector<2x1xf32> -> vector<4x1xf32>
    %389 = tpu.concatenate %383, %367 in 1 : vector<4x32xf32>, vector<4x16xf32> -> vector<4x48xf32>
    %cst_117 = arith.constant dense<0.000000e+00> : vector<4x128xf32>
    %390 = tpu.matmul %389, %0, %cst_117 {dimension_numbers = #tpu.dot_dimension_numbers<[1], [0], [0], [1], [0, 0, 1, 1], [], []>} : vector<4x48xf32>, vector<48x128xf32>, vector<4x128xf32> -> vector<4x128xf32>
    %391 = vector.broadcast %1 : vector<1x128xf32> to vector<4x128xf32>
    %392 = arith.addf %390, %391 : vector<4x128xf32>
    %393 = vector.extract_strided_slice %392 {offsets = [0, 0], sizes = [4, 64], strides = [1, 1]} : vector<4x128xf32> to vector<4x64xf32>
    %394 = vector.extract_strided_slice %392 {offsets = [0, 64], sizes = [4, 64], strides = [1, 1]} : vector<4x128xf32> to vector<4x64xf32>
    %395 = vector.shape_cast %4 : vector<4x1xi1> to vector<4x1xi1>
    %396 = vector.broadcast %395 : vector<4x1xi1> to vector<4x64xi1>
    %397 = arith.select %396, %393, %394 : vector<4x64xi1>, vector<4x64xf32>
    %398 = vector.extract_strided_slice %397 {offsets = [0, 0], sizes = [4, 16], strides = [1, 1]} : vector<4x64xf32> to vector<4x16xf32>
    %399 = arith.negf %398 : vector<4x16xf32>
    %400 = math.exp %399 : vector<4x16xf32>
    %cst_118 = arith.constant 1.000000e+00 : f32
    %401 = vector.broadcast %cst_118 : f32 to vector<4x16xf32>
    %402 = arith.addf %401, %400 : vector<4x16xf32>
    %403 = arith.divf %401, %402 : vector<4x16xf32>
    %404 = vector.extract_strided_slice %397 {offsets = [0, 16], sizes = [4, 16], strides = [1, 1]} : vector<4x64xf32> to vector<4x16xf32>
    %405 = arith.negf %404 : vector<4x16xf32>
    %406 = math.exp %405 : vector<4x16xf32>
    %cst_119 = arith.constant 1.000000e+00 : f32
    %407 = vector.broadcast %cst_119 : f32 to vector<4x16xf32>
    %408 = arith.addf %407, %406 : vector<4x16xf32>
    %409 = arith.divf %407, %408 : vector<4x16xf32>
    %410 = vector.extract_strided_slice %397 {offsets = [0, 32], sizes = [4, 16], strides = [1, 1]} : vector<4x64xf32> to vector<4x16xf32>
    %411 = math.tanh %410 : vector<4x16xf32>
    %412 = vector.extract_strided_slice %397 {offsets = [0, 48], sizes = [4, 16], strides = [1, 1]} : vector<4x64xf32> to vector<4x16xf32>
    %413 = arith.negf %412 : vector<4x16xf32>
    %414 = math.exp %413 : vector<4x16xf32>
    %cst_120 = arith.constant 1.000000e+00 : f32
    %415 = vector.broadcast %cst_120 : f32 to vector<4x16xf32>
    %416 = arith.addf %415, %414 : vector<4x16xf32>
    %417 = arith.divf %415, %416 : vector<4x16xf32>
    %418 = arith.mulf %409, %374 : vector<4x16xf32>
    %419 = arith.mulf %403, %411 : vector<4x16xf32>
    %420 = arith.addf %418, %419 : vector<4x16xf32>
    %421 = math.tanh %420 : vector<4x16xf32>
    %422 = arith.mulf %417, %421 : vector<4x16xf32>
    %423 = vector.broadcast %388 : vector<4x1xf32> to vector<4x16xf32>
    %424 = arith.mulf %423, %422 : vector<4x16xf32>
    %cst_121 = arith.constant 1.000000e+00 : f32
    %425 = vector.broadcast %cst_121 : f32 to vector<4x1xf32>
    %426 = arith.subf %425, %388 : vector<4x1xf32>
    %427 = vector.broadcast %426 : vector<4x1xf32> to vector<4x16xf32>
    %428 = arith.mulf %427, %367 : vector<4x16xf32>
    %429 = arith.addf %424, %428 : vector<4x16xf32>
    %430 = vector.broadcast %388 : vector<4x1xf32> to vector<4x16xf32>
    %431 = arith.mulf %430, %420 : vector<4x16xf32>
    %cst_122 = arith.constant 1.000000e+00 : f32
    %432 = vector.broadcast %cst_122 : f32 to vector<4x1xf32>
    %433 = arith.subf %432, %388 : vector<4x1xf32>
    %434 = vector.broadcast %433 : vector<4x1xf32> to vector<4x16xf32>
    %435 = arith.mulf %434, %374 : vector<4x16xf32>
    %436 = arith.addf %431, %435 : vector<4x16xf32>
    %437 = vector.broadcast %388 : vector<4x1xf32> to vector<4x16xf32>
    %438 = arith.mulf %437, %422 : vector<4x16xf32>
    %439 = vector.extract_strided_slice %438 {offsets = [0, 0], sizes = [2, 16], strides = [1, 1]} : vector<4x16xf32> to vector<2x16xf32>
    %440 = vector.extract_strided_slice %438 {offsets = [2, 0], sizes = [2, 16], strides = [1, 1]} : vector<4x16xf32> to vector<2x16xf32>
    %c7_123 = arith.constant 7 : index
    %c0_124 = arith.constant 0 : index
    %c0_125 = arith.constant 0 : index
    %441 = vector.load %arg0[%c7_123, %c0_124, %c0_125] : memref<8x2x32xf32, #tpu.memory_space<vmem>>, vector<1x2x32xf32>
    %442 = vector.shape_cast %441 : vector<1x2x32xf32> to vector<2x32xf32>
    %c0_126 = arith.constant 0 : index
    %c0_127 = arith.constant 0 : index
    %c0_128 = arith.constant 0 : index
    %443 = vector.load %arg0[%c0_126, %c0_127, %c0_128] : memref<8x2x32xf32, #tpu.memory_space<vmem>>, vector<1x2x32xf32>
    %444 = vector.shape_cast %443 : vector<1x2x32xf32> to vector<2x32xf32>
    %445 = tpu.concatenate %442, %444 in 0 : vector<2x32xf32>, vector<2x32xf32> -> vector<4x32xf32>
    %c7_129 = arith.constant 7 : index
    %c0_130 = arith.constant 0 : index
    %c0_131 = arith.constant 0 : index
    %446 = vector.load %arg1[%c7_129, %c0_130, %c0_131] : memref<8x2x1xf32, #tpu.memory_space<vmem>>, vector<1x2x1xf32>
    %447 = vector.shape_cast %446 : vector<1x2x1xf32> to vector<2x1xf32>
    %c0_132 = arith.constant 0 : index
    %c0_133 = arith.constant 0 : index
    %c0_134 = arith.constant 0 : index
    %448 = vector.load %arg1[%c0_132, %c0_133, %c0_134] : memref<8x2x1xf32, #tpu.memory_space<vmem>>, vector<1x2x1xf32>
    %449 = vector.shape_cast %448 : vector<1x2x1xf32> to vector<2x1xf32>
    %450 = tpu.concatenate %447, %449 in 0 : vector<2x1xf32>, vector<2x1xf32> -> vector<4x1xf32>
    %451 = tpu.concatenate %445, %429 in 1 : vector<4x32xf32>, vector<4x16xf32> -> vector<4x48xf32>
    %cst_135 = arith.constant dense<0.000000e+00> : vector<4x128xf32>
    %452 = tpu.matmul %451, %0, %cst_135 {dimension_numbers = #tpu.dot_dimension_numbers<[1], [0], [0], [1], [0, 0, 1, 1], [], []>} : vector<4x48xf32>, vector<48x128xf32>, vector<4x128xf32> -> vector<4x128xf32>
    %453 = vector.broadcast %1 : vector<1x128xf32> to vector<4x128xf32>
    %454 = arith.addf %452, %453 : vector<4x128xf32>
    %455 = vector.extract_strided_slice %454 {offsets = [0, 0], sizes = [4, 64], strides = [1, 1]} : vector<4x128xf32> to vector<4x64xf32>
    %456 = vector.extract_strided_slice %454 {offsets = [0, 64], sizes = [4, 64], strides = [1, 1]} : vector<4x128xf32> to vector<4x64xf32>
    %457 = vector.shape_cast %4 : vector<4x1xi1> to vector<4x1xi1>
    %458 = vector.broadcast %457 : vector<4x1xi1> to vector<4x64xi1>
    %459 = arith.select %458, %455, %456 : vector<4x64xi1>, vector<4x64xf32>
    %460 = vector.extract_strided_slice %459 {offsets = [0, 0], sizes = [4, 16], strides = [1, 1]} : vector<4x64xf32> to vector<4x16xf32>
    %461 = arith.negf %460 : vector<4x16xf32>
    %462 = math.exp %461 : vector<4x16xf32>
    %cst_136 = arith.constant 1.000000e+00 : f32
    %463 = vector.broadcast %cst_136 : f32 to vector<4x16xf32>
    %464 = arith.addf %463, %462 : vector<4x16xf32>
    %465 = arith.divf %463, %464 : vector<4x16xf32>
    %466 = vector.extract_strided_slice %459 {offsets = [0, 16], sizes = [4, 16], strides = [1, 1]} : vector<4x64xf32> to vector<4x16xf32>
    %467 = arith.negf %466 : vector<4x16xf32>
    %468 = math.exp %467 : vector<4x16xf32>
    %cst_137 = arith.constant 1.000000e+00 : f32
    %469 = vector.broadcast %cst_137 : f32 to vector<4x16xf32>
    %470 = arith.addf %469, %468 : vector<4x16xf32>
    %471 = arith.divf %469, %470 : vector<4x16xf32>
    %472 = vector.extract_strided_slice %459 {offsets = [0, 32], sizes = [4, 16], strides = [1, 1]} : vector<4x64xf32> to vector<4x16xf32>
    %473 = math.tanh %472 : vector<4x16xf32>
    %474 = vector.extract_strided_slice %459 {offsets = [0, 48], sizes = [4, 16], strides = [1, 1]} : vector<4x64xf32> to vector<4x16xf32>
    %475 = arith.negf %474 : vector<4x16xf32>
    %476 = math.exp %475 : vector<4x16xf32>
    %cst_138 = arith.constant 1.000000e+00 : f32
    %477 = vector.broadcast %cst_138 : f32 to vector<4x16xf32>
    %478 = arith.addf %477, %476 : vector<4x16xf32>
    %479 = arith.divf %477, %478 : vector<4x16xf32>
    %480 = arith.mulf %471, %436 : vector<4x16xf32>
    %481 = arith.mulf %465, %473 : vector<4x16xf32>
    %482 = arith.addf %480, %481 : vector<4x16xf32>
    %483 = math.tanh %482 : vector<4x16xf32>
    %484 = arith.mulf %479, %483 : vector<4x16xf32>
    %485 = vector.broadcast %450 : vector<4x1xf32> to vector<4x16xf32>
    %486 = arith.mulf %485, %484 : vector<4x16xf32>
    %cst_139 = arith.constant 1.000000e+00 : f32
    %487 = vector.broadcast %cst_139 : f32 to vector<4x1xf32>
    %488 = arith.subf %487, %450 : vector<4x1xf32>
    %489 = vector.broadcast %488 : vector<4x1xf32> to vector<4x16xf32>
    %490 = arith.mulf %489, %429 : vector<4x16xf32>
    %491 = arith.addf %486, %490 : vector<4x16xf32>
    %492 = vector.broadcast %450 : vector<4x1xf32> to vector<4x16xf32>
    %493 = arith.mulf %492, %484 : vector<4x16xf32>
    %494 = vector.extract_strided_slice %493 {offsets = [0, 0], sizes = [2, 16], strides = [1, 1]} : vector<4x16xf32> to vector<2x16xf32>
    %495 = vector.extract_strided_slice %493 {offsets = [2, 0], sizes = [2, 16], strides = [1, 1]} : vector<4x16xf32> to vector<2x16xf32>
    %496 = tpu.concatenate %67, %129, %191, %253, %315, %377, %439, %494 in 0 : vector<2x16xf32>, vector<2x16xf32>, vector<2x16xf32>, vector<2x16xf32>, vector<2x16xf32>, vector<2x16xf32>, vector<2x16xf32>, vector<2x16xf32> -> vector<16x16xf32>
    %497 = tpu.concatenate %495, %440, %378, %316, %254, %192, %130, %68 in 0 : vector<2x16xf32>, vector<2x16xf32>, vector<2x16xf32>, vector<2x16xf32>, vector<2x16xf32>, vector<2x16xf32>, vector<2x16xf32>, vector<2x16xf32> -> vector<16x16xf32>
    %498 = tpu.concatenate %496, %497 in 1 : vector<16x16xf32>, vector<16x16xf32> -> vector<16x32xf32>
    %c0_140 = arith.constant 0 : index
    %c0_141 = arith.constant 0 : index
    %499 = vector.load %arg4[%c0_140, %c0_141] : memref<16x32xf32, #tpu.memory_space<vmem>>, vector<16x32xf32>
    tpu.vector_store %arg4[%c0_140, %c0_141], %498 {strides = array<i32>} : memref<16x32xf32, #tpu.memory_space<vmem>>, vector<16x32xf32>,
    %500 = vector.extract_strided_slice %491 {offsets = [0, 0], sizes = [2, 16], strides = [1, 1]} : vector<4x16xf32> to vector<2x16xf32>
    %501 = vector.extract_strided_slice %491 {offsets = [2, 0], sizes = [2, 16], strides = [1, 1]} : vector<4x16xf32> to vector<2x16xf32>
    %502 = tpu.concatenate %500, %501 in 1 : vector<2x16xf32>, vector<2x16xf32> -> vector<2x32xf32>
    %c0_142 = arith.constant 0 : index
    %c0_143 = arith.constant 0 : index
    %503 = vector.load %arg5[%c0_142, %c0_143] : memref<2x32xf32, #tpu.memory_space<vmem>>, vector<2x32xf32>
    tpu.vector_store %arg5[%c0_142, %c0_143], %502 {strides = array<i32>} : memref<2x32xf32, #tpu.memory_space<vmem>>, vector<2x32xf32>,
    return
  }
}

module attributes {stable_mosaic.version = 11 : i64} {
  func.func @_mca_head_kernel(%arg0: memref<16x32xf32, #tpu.memory_space<vmem>>, %arg1: memref<16x12xf32, #tpu.memory_space<vmem>>, %arg2: memref<16x16xf32, #tpu.memory_space<vmem>>, %arg3: memref<16x16xf32, #tpu.memory_space<vmem>>, %arg4: memref<16x16xf32, #tpu.memory_space<vmem>>, %arg5: memref<12x32xf32, #tpu.memory_space<vmem>>, %arg6: memref<1x32xf32, #tpu.memory_space<vmem>>, %arg7: memref<32x32xf32, #tpu.memory_space<vmem>>, %arg8: memref<1x32xf32, #tpu.memory_space<vmem>>, %arg9: memref<32x64xf32, #tpu.memory_space<vmem>>, %arg10: memref<1x64xf32, #tpu.memory_space<vmem>>, %arg11: memref<32x32xf32, #tpu.memory_space<vmem>>, %arg12: memref<1x32xf32, #tpu.memory_space<vmem>>, %arg13: memref<1x32xf32, #tpu.memory_space<vmem>>, %arg14: memref<1x32xf32, #tpu.memory_space<vmem>>, %arg15: memref<32x128xf32, #tpu.memory_space<vmem>>, %arg16: memref<1x128xf32, #tpu.memory_space<vmem>>, %arg17: memref<128x32xf32, #tpu.memory_space<vmem>>, %arg18: memref<1x32xf32, #tpu.memory_space<vmem>>, %arg19: memref<1x32xf32, #tpu.memory_space<vmem>>, %arg20: memref<1x32xf32, #tpu.memory_space<vmem>>, %arg21: memref<32x32xf32, #tpu.memory_space<vmem>>, %arg22: memref<1x32xf32, #tpu.memory_space<vmem>>, %arg23: memref<32x64xf32, #tpu.memory_space<vmem>>, %arg24: memref<1x64xf32, #tpu.memory_space<vmem>>, %arg25: memref<32x32xf32, #tpu.memory_space<vmem>>, %arg26: memref<1x32xf32, #tpu.memory_space<vmem>>, %arg27: memref<1x32xf32, #tpu.memory_space<vmem>>, %arg28: memref<1x32xf32, #tpu.memory_space<vmem>>, %arg29: memref<32x32xf32, #tpu.memory_space<vmem>>, %arg30: memref<1x32xf32, #tpu.memory_space<vmem>>, %arg31: memref<32x64xf32, #tpu.memory_space<vmem>>, %arg32: memref<1x64xf32, #tpu.memory_space<vmem>>, %arg33: memref<32x32xf32, #tpu.memory_space<vmem>>, %arg34: memref<1x32xf32, #tpu.memory_space<vmem>>, %arg35: memref<1x32xf32, #tpu.memory_space<vmem>>, %arg36: memref<1x32xf32, #tpu.memory_space<vmem>>, %arg37: memref<32x128xf32, #tpu.memory_space<vmem>>, %arg38: memref<1x128xf32, #tpu.memory_space<vmem>>, %arg39: memref<128x32xf32, #tpu.memory_space<vmem>>, %arg40: memref<1x32xf32, #tpu.memory_space<vmem>>, %arg41: memref<1x32xf32, #tpu.memory_space<vmem>>, %arg42: memref<1x32xf32, #tpu.memory_space<vmem>>, %arg43: memref<1x32xf32, #tpu.memory_space<vmem>>, %arg44: memref<1x32xf32, #tpu.memory_space<vmem>>, %arg45: memref<32x8xf32, #tpu.memory_space<vmem>>, %arg46: memref<1x8xf32, #tpu.memory_space<vmem>>, %arg47: memref<16x8xf32, #tpu.memory_space<vmem>>) attributes {dimension_semantics = [], scalar_prefetch = 0 : i64, scratch_operands = 0 : i64, tpu.core_type = #tpu.core_type<tc>} {
    %0 = tpu.iota {dimensions = array<i32: 1>} : vector<1x32xi32>
    %c0_i32 = arith.constant 0 : i32
    %1 = vector.broadcast %c0_i32 : i32 to vector<1x32xi32>
    %2 = arith.cmpi sge, %0, %1 : vector<1x32xi32>
    %c8_i32 = arith.constant 8 : i32
    %3 = vector.broadcast %c8_i32 : i32 to vector<1x32xi32>
    %4 = arith.cmpi slt, %0, %3 : vector<1x32xi32>
    %5 = arith.andi %2, %4 : vector<1x32xi1>
    %6 = arith.extui %5 : vector<1x32xi1> to vector<1x32xi32>
    %7 = arith.sitofp %6 : vector<1x32xi32> to vector<1x32xf32>
    %c8_i32_0 = arith.constant 8 : i32
    %8 = vector.broadcast %c8_i32_0 : i32 to vector<1x32xi32>
    %9 = arith.cmpi sge, %0, %8 : vector<1x32xi32>
    %c16_i32 = arith.constant 16 : i32
    %10 = vector.broadcast %c16_i32 : i32 to vector<1x32xi32>
    %11 = arith.cmpi slt, %0, %10 : vector<1x32xi32>
    %12 = arith.andi %9, %11 : vector<1x32xi1>
    %13 = arith.extui %12 : vector<1x32xi1> to vector<1x32xi32>
    %14 = arith.sitofp %13 : vector<1x32xi32> to vector<1x32xf32>
    %c16_i32_1 = arith.constant 16 : i32
    %15 = vector.broadcast %c16_i32_1 : i32 to vector<1x32xi32>
    %16 = arith.cmpi sge, %0, %15 : vector<1x32xi32>
    %c24_i32 = arith.constant 24 : i32
    %17 = vector.broadcast %c24_i32 : i32 to vector<1x32xi32>
    %18 = arith.cmpi slt, %0, %17 : vector<1x32xi32>
    %19 = arith.andi %16, %18 : vector<1x32xi1>
    %20 = arith.extui %19 : vector<1x32xi1> to vector<1x32xi32>
    %21 = arith.sitofp %20 : vector<1x32xi32> to vector<1x32xf32>
    %c24_i32_2 = arith.constant 24 : i32
    %22 = vector.broadcast %c24_i32_2 : i32 to vector<1x32xi32>
    %23 = arith.cmpi sge, %0, %22 : vector<1x32xi32>
    %c32_i32 = arith.constant 32 : i32
    %24 = vector.broadcast %c32_i32 : i32 to vector<1x32xi32>
    %25 = arith.cmpi slt, %0, %24 : vector<1x32xi32>
    %26 = arith.andi %23, %25 : vector<1x32xi1>
    %27 = arith.extui %26 : vector<1x32xi1> to vector<1x32xi32>
    %28 = arith.sitofp %27 : vector<1x32xi32> to vector<1x32xf32>
    %c0 = arith.constant 0 : index
    %c0_3 = arith.constant 0 : index
    %29 = vector.load %arg0[%c0, %c0_3] : memref<16x32xf32, #tpu.memory_space<vmem>>, vector<16x32xf32>
    %c0_4 = arith.constant 0 : index
    %c0_5 = arith.constant 0 : index
    %30 = vector.load %arg2[%c0_4, %c0_5] : memref<16x16xf32, #tpu.memory_space<vmem>>, vector<16x16xf32>
    %c0_6 = arith.constant 0 : index
    %c0_7 = arith.constant 0 : index
    %31 = vector.load %arg3[%c0_6, %c0_7] : memref<16x16xf32, #tpu.memory_space<vmem>>, vector<16x16xf32>
    %c0_8 = arith.constant 0 : index
    %c0_9 = arith.constant 0 : index
    %32 = vector.load %arg4[%c0_8, %c0_9] : memref<16x16xf32, #tpu.memory_space<vmem>>, vector<16x16xf32>
    %c0_10 = arith.constant 0 : index
    %c0_11 = arith.constant 0 : index
    %33 = vector.load %arg7[%c0_10, %c0_11] : memref<32x32xf32, #tpu.memory_space<vmem>>, vector<32x32xf32>
    %c0_12 = arith.constant 0 : index
    %c0_13 = arith.constant 0 : index
    %34 = vector.load %arg8[%c0_12, %c0_13] : memref<1x32xf32, #tpu.memory_space<vmem>>, vector<1x32xf32>
    %c0_14 = arith.constant 0 : index
    %c0_15 = arith.constant 0 : index
    %35 = vector.load %arg9[%c0_14, %c0_15] : memref<32x64xf32, #tpu.memory_space<vmem>>, vector<32x64xf32>
    %c0_16 = arith.constant 0 : index
    %c0_17 = arith.constant 0 : index
    %36 = vector.load %arg10[%c0_16, %c0_17] : memref<1x64xf32, #tpu.memory_space<vmem>>, vector<1x64xf32>
    %c0_18 = arith.constant 0 : index
    %c0_19 = arith.constant 0 : index
    %37 = vector.load %arg11[%c0_18, %c0_19] : memref<32x32xf32, #tpu.memory_space<vmem>>, vector<32x32xf32>
    %c0_20 = arith.constant 0 : index
    %c0_21 = arith.constant 0 : index
    %38 = vector.load %arg12[%c0_20, %c0_21] : memref<1x32xf32, #tpu.memory_space<vmem>>, vector<1x32xf32>
    %c0_22 = arith.constant 0 : index
    %c0_23 = arith.constant 0 : index
    %39 = vector.load %arg13[%c0_22, %c0_23] : memref<1x32xf32, #tpu.memory_space<vmem>>, vector<1x32xf32>
    %c0_24 = arith.constant 0 : index
    %c0_25 = arith.constant 0 : index
    %40 = vector.load %arg14[%c0_24, %c0_25] : memref<1x32xf32, #tpu.memory_space<vmem>>, vector<1x32xf32>
    %cst = arith.constant dense<0.000000e+00> : vector<16x32xf32>
    %41 = tpu.matmul %29, %33, %cst {dimension_numbers = #tpu.dot_dimension_numbers<[1], [0], [0], [1], [0, 0, 1, 1], [], []>} : vector<16x32xf32>, vector<32x32xf32>, vector<16x32xf32> -> vector<16x32xf32>
    %42 = vector.broadcast %34 : vector<1x32xf32> to vector<16x32xf32>
    %43 = arith.addf %41, %42 : vector<16x32xf32>
    %cst_26 = arith.constant dense<0.000000e+00> : vector<16x64xf32>
    %44 = tpu.matmul %29, %35, %cst_26 {dimension_numbers = #tpu.dot_dimension_numbers<[1], [0], [0], [1], [0, 0, 1, 1], [], []>} : vector<16x32xf32>, vector<32x64xf32>, vector<16x64xf32> -> vector<16x64xf32>
    %45 = vector.broadcast %36 : vector<1x64xf32> to vector<16x64xf32>
    %46 = arith.addf %44, %45 : vector<16x64xf32>
    %47 = vector.extract_strided_slice %46 {offsets = [0, 0], sizes = [16, 32], strides = [1, 1]} : vector<16x64xf32> to vector<16x32xf32>
    %48 = vector.extract_strided_slice %46 {offsets = [0, 32], sizes = [16, 32], strides = [1, 1]} : vector<16x64xf32> to vector<16x32xf32>
    %49 = tpu.transpose %47, [1, 0] : vector<16x32xf32> -> vector<32x16xf32>
    %50 = vector.broadcast %7 : vector<1x32xf32> to vector<16x32xf32>
    %51 = arith.mulf %43, %50 : vector<16x32xf32>
    %cst_27 = arith.constant dense<0.000000e+00> : vector<16x16xf32>
    %52 = tpu.matmul %51, %49, %cst_27 {dimension_numbers = #tpu.dot_dimension_numbers<[1], [0], [0], [1], [0, 0, 1, 1], [], []>} : vector<16x32xf32>, vector<32x16xf32>, vector<16x16xf32> -> vector<16x16xf32>
    %cst_28 = arith.constant 0.353553385 : f32
    %53 = vector.broadcast %cst_28 : f32 to vector<16x16xf32>
    %54 = arith.mulf %52, %53 : vector<16x16xf32>
    %cst_29 = arith.constant 5.000000e-01 : f32
    %55 = vector.broadcast %cst_29 : f32 to vector<16x16xf32>
    %56 = arith.cmpf ogt, %30, %55 : vector<16x16xf32>
    %cst_30 = arith.constant -1.000000e+09 : f32
    %57 = vector.broadcast %cst_30 : f32 to vector<16x16xf32>
    %58 = arith.select %56, %57, %54 : vector<16x16xi1>, vector<16x16xf32>
    %cst_31 = arith.constant dense<0xFF800000> : vector<16xf32>
    %59 = vector.multi_reduction <maximumf>, %58, %cst_31 [1] : vector<16x16xf32> to vector<16xf32>
    %60 = vector.shape_cast %59 : vector<16xf32> to vector<16x1xf32>
    %61 = vector.broadcast %60 : vector<16x1xf32> to vector<16x16xf32>
    %62 = arith.subf %58, %61 : vector<16x16xf32>
    %63 = math.exp %62 : vector<16x16xf32>
    %cst_32 = arith.constant dense<0.000000e+00> : vector<16xf32>
    %64 = vector.multi_reduction <add>, %63, %cst_32 [1] : vector<16x16xf32> to vector<16xf32>
    %65 = vector.shape_cast %64 : vector<16xf32> to vector<16x1xf32>
    %66 = vector.broadcast %65 : vector<16x1xf32> to vector<16x16xf32>
    %67 = arith.divf %63, %66 : vector<16x16xf32>
    %68 = vector.broadcast %7 : vector<1x32xf32> to vector<16x32xf32>
    %69 = arith.mulf %48, %68 : vector<16x32xf32>
    %cst_33 = arith.constant dense<0.000000e+00> : vector<16x32xf32>
    %70 = tpu.matmul %67, %69, %cst_33 {dimension_numbers = #tpu.dot_dimension_numbers<[1], [0], [0], [1], [0, 0, 1, 1], [], []>} : vector<16x16xf32>, vector<16x32xf32>, vector<16x32xf32> -> vector<16x32xf32>
    %71 = vector.broadcast %14 : vector<1x32xf32> to vector<16x32xf32>
    %72 = arith.mulf %43, %71 : vector<16x32xf32>
    %cst_34 = arith.constant dense<0.000000e+00> : vector<16x16xf32>
    %73 = tpu.matmul %72, %49, %cst_34 {dimension_numbers = #tpu.dot_dimension_numbers<[1], [0], [0], [1], [0, 0, 1, 1], [], []>} : vector<16x32xf32>, vector<32x16xf32>, vector<16x16xf32> -> vector<16x16xf32>
    %cst_35 = arith.constant 0.353553385 : f32
    %74 = vector.broadcast %cst_35 : f32 to vector<16x16xf32>
    %75 = arith.mulf %73, %74 : vector<16x16xf32>
    %cst_36 = arith.constant 5.000000e-01 : f32
    %76 = vector.broadcast %cst_36 : f32 to vector<16x16xf32>
    %77 = arith.cmpf ogt, %30, %76 : vector<16x16xf32>
    %cst_37 = arith.constant -1.000000e+09 : f32
    %78 = vector.broadcast %cst_37 : f32 to vector<16x16xf32>
    %79 = arith.select %77, %78, %75 : vector<16x16xi1>, vector<16x16xf32>
    %cst_38 = arith.constant dense<0xFF800000> : vector<16xf32>
    %80 = vector.multi_reduction <maximumf>, %79, %cst_38 [1] : vector<16x16xf32> to vector<16xf32>
    %81 = vector.shape_cast %80 : vector<16xf32> to vector<16x1xf32>
    %82 = vector.broadcast %81 : vector<16x1xf32> to vector<16x16xf32>
    %83 = arith.subf %79, %82 : vector<16x16xf32>
    %84 = math.exp %83 : vector<16x16xf32>
    %cst_39 = arith.constant dense<0.000000e+00> : vector<16xf32>
    %85 = vector.multi_reduction <add>, %84, %cst_39 [1] : vector<16x16xf32> to vector<16xf32>
    %86 = vector.shape_cast %85 : vector<16xf32> to vector<16x1xf32>
    %87 = vector.broadcast %86 : vector<16x1xf32> to vector<16x16xf32>
    %88 = arith.divf %84, %87 : vector<16x16xf32>
    %89 = vector.broadcast %14 : vector<1x32xf32> to vector<16x32xf32>
    %90 = arith.mulf %48, %89 : vector<16x32xf32>
    %cst_40 = arith.constant dense<0.000000e+00> : vector<16x32xf32>
    %91 = tpu.matmul %88, %90, %cst_40 {dimension_numbers = #tpu.dot_dimension_numbers<[1], [0], [0], [1], [0, 0, 1, 1], [], []>} : vector<16x16xf32>, vector<16x32xf32>, vector<16x32xf32> -> vector<16x32xf32>
    %92 = arith.addf %70, %91 : vector<16x32xf32>
    %93 = vector.broadcast %21 : vector<1x32xf32> to vector<16x32xf32>
    %94 = arith.mulf %43, %93 : vector<16x32xf32>
    %cst_41 = arith.constant dense<0.000000e+00> : vector<16x16xf32>
    %95 = tpu.matmul %94, %49, %cst_41 {dimension_numbers = #tpu.dot_dimension_numbers<[1], [0], [0], [1], [0, 0, 1, 1], [], []>} : vector<16x32xf32>, vector<32x16xf32>, vector<16x16xf32> -> vector<16x16xf32>
    %cst_42 = arith.constant 0.353553385 : f32
    %96 = vector.broadcast %cst_42 : f32 to vector<16x16xf32>
    %97 = arith.mulf %95, %96 : vector<16x16xf32>
    %cst_43 = arith.constant 5.000000e-01 : f32
    %98 = vector.broadcast %cst_43 : f32 to vector<16x16xf32>
    %99 = arith.cmpf ogt, %30, %98 : vector<16x16xf32>
    %cst_44 = arith.constant -1.000000e+09 : f32
    %100 = vector.broadcast %cst_44 : f32 to vector<16x16xf32>
    %101 = arith.select %99, %100, %97 : vector<16x16xi1>, vector<16x16xf32>
    %cst_45 = arith.constant dense<0xFF800000> : vector<16xf32>
    %102 = vector.multi_reduction <maximumf>, %101, %cst_45 [1] : vector<16x16xf32> to vector<16xf32>
    %103 = vector.shape_cast %102 : vector<16xf32> to vector<16x1xf32>
    %104 = vector.broadcast %103 : vector<16x1xf32> to vector<16x16xf32>
    %105 = arith.subf %101, %104 : vector<16x16xf32>
    %106 = math.exp %105 : vector<16x16xf32>
    %cst_46 = arith.constant dense<0.000000e+00> : vector<16xf32>
    %107 = vector.multi_reduction <add>, %106, %cst_46 [1] : vector<16x16xf32> to vector<16xf32>
    %108 = vector.shape_cast %107 : vector<16xf32> to vector<16x1xf32>
    %109 = vector.broadcast %108 : vector<16x1xf32> to vector<16x16xf32>
    %110 = arith.divf %106, %109 : vector<16x16xf32>
    %111 = vector.broadcast %21 : vector<1x32xf32> to vector<16x32xf32>
    %112 = arith.mulf %48, %111 : vector<16x32xf32>
    %cst_47 = arith.constant dense<0.000000e+00> : vector<16x32xf32>
    %113 = tpu.matmul %110, %112, %cst_47 {dimension_numbers = #tpu.dot_dimension_numbers<[1], [0], [0], [1], [0, 0, 1, 1], [], []>} : vector<16x16xf32>, vector<16x32xf32>, vector<16x32xf32> -> vector<16x32xf32>
    %114 = arith.addf %92, %113 : vector<16x32xf32>
    %115 = vector.broadcast %28 : vector<1x32xf32> to vector<16x32xf32>
    %116 = arith.mulf %43, %115 : vector<16x32xf32>
    %cst_48 = arith.constant dense<0.000000e+00> : vector<16x16xf32>
    %117 = tpu.matmul %116, %49, %cst_48 {dimension_numbers = #tpu.dot_dimension_numbers<[1], [0], [0], [1], [0, 0, 1, 1], [], []>} : vector<16x32xf32>, vector<32x16xf32>, vector<16x16xf32> -> vector<16x16xf32>
    %cst_49 = arith.constant 0.353553385 : f32
    %118 = vector.broadcast %cst_49 : f32 to vector<16x16xf32>
    %119 = arith.mulf %117, %118 : vector<16x16xf32>
    %cst_50 = arith.constant 5.000000e-01 : f32
    %120 = vector.broadcast %cst_50 : f32 to vector<16x16xf32>
    %121 = arith.cmpf ogt, %30, %120 : vector<16x16xf32>
    %cst_51 = arith.constant -1.000000e+09 : f32
    %122 = vector.broadcast %cst_51 : f32 to vector<16x16xf32>
    %123 = arith.select %121, %122, %119 : vector<16x16xi1>, vector<16x16xf32>
    %cst_52 = arith.constant dense<0xFF800000> : vector<16xf32>
    %124 = vector.multi_reduction <maximumf>, %123, %cst_52 [1] : vector<16x16xf32> to vector<16xf32>
    %125 = vector.shape_cast %124 : vector<16xf32> to vector<16x1xf32>
    %126 = vector.broadcast %125 : vector<16x1xf32> to vector<16x16xf32>
    %127 = arith.subf %123, %126 : vector<16x16xf32>
    %128 = math.exp %127 : vector<16x16xf32>
    %cst_53 = arith.constant dense<0.000000e+00> : vector<16xf32>
    %129 = vector.multi_reduction <add>, %128, %cst_53 [1] : vector<16x16xf32> to vector<16xf32>
    %130 = vector.shape_cast %129 : vector<16xf32> to vector<16x1xf32>
    %131 = vector.broadcast %130 : vector<16x1xf32> to vector<16x16xf32>
    %132 = arith.divf %128, %131 : vector<16x16xf32>
    %133 = vector.broadcast %28 : vector<1x32xf32> to vector<16x32xf32>
    %134 = arith.mulf %48, %133 : vector<16x32xf32>
    %cst_54 = arith.constant dense<0.000000e+00> : vector<16x32xf32>
    %135 = tpu.matmul %132, %134, %cst_54 {dimension_numbers = #tpu.dot_dimension_numbers<[1], [0], [0], [1], [0, 0, 1, 1], [], []>} : vector<16x16xf32>, vector<16x32xf32>, vector<16x32xf32> -> vector<16x32xf32>
    %136 = arith.addf %114, %135 : vector<16x32xf32>
    %cst_55 = arith.constant dense<0.000000e+00> : vector<16x32xf32>
    %137 = tpu.matmul %136, %37, %cst_55 {dimension_numbers = #tpu.dot_dimension_numbers<[1], [0], [0], [1], [0, 0, 1, 1], [], []>} : vector<16x32xf32>, vector<32x32xf32>, vector<16x32xf32> -> vector<16x32xf32>
    %138 = vector.broadcast %38 : vector<1x32xf32> to vector<16x32xf32>
    %139 = arith.addf %137, %138 : vector<16x32xf32>
    %140 = arith.addf %29, %139 : vector<16x32xf32>
    %cst_56 = arith.constant dense<0.000000e+00> : vector<16xf32>
    %141 = vector.multi_reduction <add>, %140, %cst_56 [1] : vector<16x32xf32> to vector<16xf32>
    %142 = vector.shape_cast %141 : vector<16xf32> to vector<16x1xf32>
    %cst_57 = arith.constant 3.200000e+01 : f32
    %143 = vector.broadcast %cst_57 : f32 to vector<16x1xf32>
    %144 = arith.divf %142, %143 : vector<16x1xf32>
    %145 = vector.broadcast %144 : vector<16x1xf32> to vector<16x32xf32>
    %146 = arith.subf %140, %145 : vector<16x32xf32>
    %147 = arith.mulf %146, %146 : vector<16x32xf32>
    %cst_58 = arith.constant dense<0.000000e+00> : vector<16xf32>
    %148 = vector.multi_reduction <add>, %147, %cst_58 [1] : vector<16x32xf32> to vector<16xf32>
    %149 = vector.shape_cast %148 : vector<16xf32> to vector<16x1xf32>
    %cst_59 = arith.constant 3.200000e+01 : f32
    %150 = vector.broadcast %cst_59 : f32 to vector<16x1xf32>
    %151 = arith.divf %149, %150 : vector<16x1xf32>
    %152 = vector.broadcast %144 : vector<16x1xf32> to vector<16x32xf32>
    %153 = arith.subf %140, %152 : vector<16x32xf32>
    %cst_60 = arith.constant 9.99999997E-7 : f32
    %154 = vector.broadcast %cst_60 : f32 to vector<16x1xf32>
    %155 = arith.addf %151, %154 : vector<16x1xf32>
    %156 = math.rsqrt %155 : vector<16x1xf32>
    %157 = vector.broadcast %156 : vector<16x1xf32> to vector<16x32xf32>
    %158 = arith.mulf %153, %157 : vector<16x32xf32>
    %159 = vector.broadcast %39 : vector<1x32xf32> to vector<16x32xf32>
    %160 = arith.mulf %158, %159 : vector<16x32xf32>
    %161 = vector.broadcast %40 : vector<1x32xf32> to vector<16x32xf32>
    %162 = arith.addf %160, %161 : vector<16x32xf32>
    %c0_61 = arith.constant 0 : index
    %c0_62 = arith.constant 0 : index
    %163 = vector.load %arg15[%c0_61, %c0_62] : memref<32x128xf32, #tpu.memory_space<vmem>>, vector<32x128xf32>
    %c0_63 = arith.constant 0 : index
    %c0_64 = arith.constant 0 : index
    %164 = vector.load %arg16[%c0_63, %c0_64] : memref<1x128xf32, #tpu.memory_space<vmem>>, vector<1x128xf32>
    %c0_65 = arith.constant 0 : index
    %c0_66 = arith.constant 0 : index
    %165 = vector.load %arg17[%c0_65, %c0_66] : memref<128x32xf32, #tpu.memory_space<vmem>>, vector<128x32xf32>
    %c0_67 = arith.constant 0 : index
    %c0_68 = arith.constant 0 : index
    %166 = vector.load %arg18[%c0_67, %c0_68] : memref<1x32xf32, #tpu.memory_space<vmem>>, vector<1x32xf32>
    %c0_69 = arith.constant 0 : index
    %c0_70 = arith.constant 0 : index
    %167 = vector.load %arg19[%c0_69, %c0_70] : memref<1x32xf32, #tpu.memory_space<vmem>>, vector<1x32xf32>
    %c0_71 = arith.constant 0 : index
    %c0_72 = arith.constant 0 : index
    %168 = vector.load %arg20[%c0_71, %c0_72] : memref<1x32xf32, #tpu.memory_space<vmem>>, vector<1x32xf32>
    %cst_73 = arith.constant dense<0.000000e+00> : vector<16x128xf32>
    %169 = tpu.matmul %162, %163, %cst_73 {dimension_numbers = #tpu.dot_dimension_numbers<[1], [0], [0], [1], [0, 0, 1, 1], [], []>} : vector<16x32xf32>, vector<32x128xf32>, vector<16x128xf32> -> vector<16x128xf32>
    %170 = vector.broadcast %164 : vector<1x128xf32> to vector<16x128xf32>
    %171 = arith.addf %169, %170 : vector<16x128xf32>
    %cst_74 = arith.constant 0.000000e+00 : f32
    %172 = vector.broadcast %cst_74 : f32 to vector<16x128xf32>
    %173 = arith.maximumf %171, %172 : vector<16x128xf32>
    %cst_75 = arith.constant dense<0.000000e+00> : vector<16x32xf32>
    %174 = tpu.matmul %173, %165, %cst_75 {dimension_numbers = #tpu.dot_dimension_numbers<[1], [0], [0], [1], [0, 0, 1, 1], [], []>} : vector<16x128xf32>, vector<128x32xf32>, vector<16x32xf32> -> vector<16x32xf32>
    %175 = vector.broadcast %166 : vector<1x32xf32> to vector<16x32xf32>
    %176 = arith.addf %174, %175 : vector<16x32xf32>
    %177 = arith.addf %162, %176 : vector<16x32xf32>
    %cst_76 = arith.constant dense<0.000000e+00> : vector<16xf32>
    %178 = vector.multi_reduction <add>, %177, %cst_76 [1] : vector<16x32xf32> to vector<16xf32>
    %179 = vector.shape_cast %178 : vector<16xf32> to vector<16x1xf32>
    %cst_77 = arith.constant 3.200000e+01 : f32
    %180 = vector.broadcast %cst_77 : f32 to vector<16x1xf32>
    %181 = arith.divf %179, %180 : vector<16x1xf32>
    %182 = vector.broadcast %181 : vector<16x1xf32> to vector<16x32xf32>
    %183 = arith.subf %177, %182 : vector<16x32xf32>
    %184 = arith.mulf %183, %183 : vector<16x32xf32>
    %cst_78 = arith.constant dense<0.000000e+00> : vector<16xf32>
    %185 = vector.multi_reduction <add>, %184, %cst_78 [1] : vector<16x32xf32> to vector<16xf32>
    %186 = vector.shape_cast %185 : vector<16xf32> to vector<16x1xf32>
    %cst_79 = arith.constant 3.200000e+01 : f32
    %187 = vector.broadcast %cst_79 : f32 to vector<16x1xf32>
    %188 = arith.divf %186, %187 : vector<16x1xf32>
    %189 = vector.broadcast %181 : vector<16x1xf32> to vector<16x32xf32>
    %190 = arith.subf %177, %189 : vector<16x32xf32>
    %cst_80 = arith.constant 9.99999997E-7 : f32
    %191 = vector.broadcast %cst_80 : f32 to vector<16x1xf32>
    %192 = arith.addf %188, %191 : vector<16x1xf32>
    %193 = math.rsqrt %192 : vector<16x1xf32>
    %194 = vector.broadcast %193 : vector<16x1xf32> to vector<16x32xf32>
    %195 = arith.mulf %190, %194 : vector<16x32xf32>
    %196 = vector.broadcast %167 : vector<1x32xf32> to vector<16x32xf32>
    %197 = arith.mulf %195, %196 : vector<16x32xf32>
    %198 = vector.broadcast %168 : vector<1x32xf32> to vector<16x32xf32>
    %199 = arith.addf %197, %198 : vector<16x32xf32>
    %c0_81 = arith.constant 0 : index
    %c0_82 = arith.constant 0 : index
    %200 = vector.load %arg1[%c0_81, %c0_82] : memref<16x12xf32, #tpu.memory_space<vmem>>, vector<16x12xf32>
    %c0_83 = arith.constant 0 : index
    %c0_84 = arith.constant 0 : index
    %201 = vector.load %arg5[%c0_83, %c0_84] : memref<12x32xf32, #tpu.memory_space<vmem>>, vector<12x32xf32>
    %cst_85 = arith.constant dense<0.000000e+00> : vector<16x32xf32>
    %202 = tpu.matmul %200, %201, %cst_85 {dimension_numbers = #tpu.dot_dimension_numbers<[1], [0], [0], [1], [0, 0, 1, 1], [], []>} : vector<16x12xf32>, vector<12x32xf32>, vector<16x32xf32> -> vector<16x32xf32>
    %c0_86 = arith.constant 0 : index
    %c0_87 = arith.constant 0 : index
    %203 = vector.load %arg6[%c0_86, %c0_87] : memref<1x32xf32, #tpu.memory_space<vmem>>, vector<1x32xf32>
    %204 = vector.broadcast %203 : vector<1x32xf32> to vector<16x32xf32>
    %205 = arith.addf %202, %204 : vector<16x32xf32>
    %c0_88 = arith.constant 0 : index
    %c0_89 = arith.constant 0 : index
    %206 = vector.load %arg21[%c0_88, %c0_89] : memref<32x32xf32, #tpu.memory_space<vmem>>, vector<32x32xf32>
    %c0_90 = arith.constant 0 : index
    %c0_91 = arith.constant 0 : index
    %207 = vector.load %arg22[%c0_90, %c0_91] : memref<1x32xf32, #tpu.memory_space<vmem>>, vector<1x32xf32>
    %c0_92 = arith.constant 0 : index
    %c0_93 = arith.constant 0 : index
    %208 = vector.load %arg23[%c0_92, %c0_93] : memref<32x64xf32, #tpu.memory_space<vmem>>, vector<32x64xf32>
    %c0_94 = arith.constant 0 : index
    %c0_95 = arith.constant 0 : index
    %209 = vector.load %arg24[%c0_94, %c0_95] : memref<1x64xf32, #tpu.memory_space<vmem>>, vector<1x64xf32>
    %c0_96 = arith.constant 0 : index
    %c0_97 = arith.constant 0 : index
    %210 = vector.load %arg25[%c0_96, %c0_97] : memref<32x32xf32, #tpu.memory_space<vmem>>, vector<32x32xf32>
    %c0_98 = arith.constant 0 : index
    %c0_99 = arith.constant 0 : index
    %211 = vector.load %arg26[%c0_98, %c0_99] : memref<1x32xf32, #tpu.memory_space<vmem>>, vector<1x32xf32>
    %c0_100 = arith.constant 0 : index
    %c0_101 = arith.constant 0 : index
    %212 = vector.load %arg27[%c0_100, %c0_101] : memref<1x32xf32, #tpu.memory_space<vmem>>, vector<1x32xf32>
    %c0_102 = arith.constant 0 : index
    %c0_103 = arith.constant 0 : index
    %213 = vector.load %arg28[%c0_102, %c0_103] : memref<1x32xf32, #tpu.memory_space<vmem>>, vector<1x32xf32>
    %cst_104 = arith.constant dense<0.000000e+00> : vector<16x32xf32>
    %214 = tpu.matmul %205, %206, %cst_104 {dimension_numbers = #tpu.dot_dimension_numbers<[1], [0], [0], [1], [0, 0, 1, 1], [], []>} : vector<16x32xf32>, vector<32x32xf32>, vector<16x32xf32> -> vector<16x32xf32>
    %215 = vector.broadcast %207 : vector<1x32xf32> to vector<16x32xf32>
    %216 = arith.addf %214, %215 : vector<16x32xf32>
    %cst_105 = arith.constant dense<0.000000e+00> : vector<16x64xf32>
    %217 = tpu.matmul %205, %208, %cst_105 {dimension_numbers = #tpu.dot_dimension_numbers<[1], [0], [0], [1], [0, 0, 1, 1], [], []>} : vector<16x32xf32>, vector<32x64xf32>, vector<16x64xf32> -> vector<16x64xf32>
    %218 = vector.broadcast %209 : vector<1x64xf32> to vector<16x64xf32>
    %219 = arith.addf %217, %218 : vector<16x64xf32>
    %220 = vector.extract_strided_slice %219 {offsets = [0, 0], sizes = [16, 32], strides = [1, 1]} : vector<16x64xf32> to vector<16x32xf32>
    %221 = vector.extract_strided_slice %219 {offsets = [0, 32], sizes = [16, 32], strides = [1, 1]} : vector<16x64xf32> to vector<16x32xf32>
    %222 = tpu.transpose %220, [1, 0] : vector<16x32xf32> -> vector<32x16xf32>
    %223 = vector.broadcast %7 : vector<1x32xf32> to vector<16x32xf32>
    %224 = arith.mulf %216, %223 : vector<16x32xf32>
    %cst_106 = arith.constant dense<0.000000e+00> : vector<16x16xf32>
    %225 = tpu.matmul %224, %222, %cst_106 {dimension_numbers = #tpu.dot_dimension_numbers<[1], [0], [0], [1], [0, 0, 1, 1], [], []>} : vector<16x32xf32>, vector<32x16xf32>, vector<16x16xf32> -> vector<16x16xf32>
    %cst_107 = arith.constant 0.353553385 : f32
    %226 = vector.broadcast %cst_107 : f32 to vector<16x16xf32>
    %227 = arith.mulf %225, %226 : vector<16x16xf32>
    %cst_108 = arith.constant 5.000000e-01 : f32
    %228 = vector.broadcast %cst_108 : f32 to vector<16x16xf32>
    %229 = arith.cmpf ogt, %31, %228 : vector<16x16xf32>
    %cst_109 = arith.constant -1.000000e+09 : f32
    %230 = vector.broadcast %cst_109 : f32 to vector<16x16xf32>
    %231 = arith.select %229, %230, %227 : vector<16x16xi1>, vector<16x16xf32>
    %cst_110 = arith.constant dense<0xFF800000> : vector<16xf32>
    %232 = vector.multi_reduction <maximumf>, %231, %cst_110 [1] : vector<16x16xf32> to vector<16xf32>
    %233 = vector.shape_cast %232 : vector<16xf32> to vector<16x1xf32>
    %234 = vector.broadcast %233 : vector<16x1xf32> to vector<16x16xf32>
    %235 = arith.subf %231, %234 : vector<16x16xf32>
    %236 = math.exp %235 : vector<16x16xf32>
    %cst_111 = arith.constant dense<0.000000e+00> : vector<16xf32>
    %237 = vector.multi_reduction <add>, %236, %cst_111 [1] : vector<16x16xf32> to vector<16xf32>
    %238 = vector.shape_cast %237 : vector<16xf32> to vector<16x1xf32>
    %239 = vector.broadcast %238 : vector<16x1xf32> to vector<16x16xf32>
    %240 = arith.divf %236, %239 : vector<16x16xf32>
    %241 = vector.broadcast %7 : vector<1x32xf32> to vector<16x32xf32>
    %242 = arith.mulf %221, %241 : vector<16x32xf32>
    %cst_112 = arith.constant dense<0.000000e+00> : vector<16x32xf32>
    %243 = tpu.matmul %240, %242, %cst_112 {dimension_numbers = #tpu.dot_dimension_numbers<[1], [0], [0], [1], [0, 0, 1, 1], [], []>} : vector<16x16xf32>, vector<16x32xf32>, vector<16x32xf32> -> vector<16x32xf32>
    %244 = vector.broadcast %14 : vector<1x32xf32> to vector<16x32xf32>
    %245 = arith.mulf %216, %244 : vector<16x32xf32>
    %cst_113 = arith.constant dense<0.000000e+00> : vector<16x16xf32>
    %246 = tpu.matmul %245, %222, %cst_113 {dimension_numbers = #tpu.dot_dimension_numbers<[1], [0], [0], [1], [0, 0, 1, 1], [], []>} : vector<16x32xf32>, vector<32x16xf32>, vector<16x16xf32> -> vector<16x16xf32>
    %cst_114 = arith.constant 0.353553385 : f32
    %247 = vector.broadcast %cst_114 : f32 to vector<16x16xf32>
    %248 = arith.mulf %246, %247 : vector<16x16xf32>
    %cst_115 = arith.constant 5.000000e-01 : f32
    %249 = vector.broadcast %cst_115 : f32 to vector<16x16xf32>
    %250 = arith.cmpf ogt, %31, %249 : vector<16x16xf32>
    %cst_116 = arith.constant -1.000000e+09 : f32
    %251 = vector.broadcast %cst_116 : f32 to vector<16x16xf32>
    %252 = arith.select %250, %251, %248 : vector<16x16xi1>, vector<16x16xf32>
    %cst_117 = arith.constant dense<0xFF800000> : vector<16xf32>
    %253 = vector.multi_reduction <maximumf>, %252, %cst_117 [1] : vector<16x16xf32> to vector<16xf32>
    %254 = vector.shape_cast %253 : vector<16xf32> to vector<16x1xf32>
    %255 = vector.broadcast %254 : vector<16x1xf32> to vector<16x16xf32>
    %256 = arith.subf %252, %255 : vector<16x16xf32>
    %257 = math.exp %256 : vector<16x16xf32>
    %cst_118 = arith.constant dense<0.000000e+00> : vector<16xf32>
    %258 = vector.multi_reduction <add>, %257, %cst_118 [1] : vector<16x16xf32> to vector<16xf32>
    %259 = vector.shape_cast %258 : vector<16xf32> to vector<16x1xf32>
    %260 = vector.broadcast %259 : vector<16x1xf32> to vector<16x16xf32>
    %261 = arith.divf %257, %260 : vector<16x16xf32>
    %262 = vector.broadcast %14 : vector<1x32xf32> to vector<16x32xf32>
    %263 = arith.mulf %221, %262 : vector<16x32xf32>
    %cst_119 = arith.constant dense<0.000000e+00> : vector<16x32xf32>
    %264 = tpu.matmul %261, %263, %cst_119 {dimension_numbers = #tpu.dot_dimension_numbers<[1], [0], [0], [1], [0, 0, 1, 1], [], []>} : vector<16x16xf32>, vector<16x32xf32>, vector<16x32xf32> -> vector<16x32xf32>
    %265 = arith.addf %243, %264 : vector<16x32xf32>
    %266 = vector.broadcast %21 : vector<1x32xf32> to vector<16x32xf32>
    %267 = arith.mulf %216, %266 : vector<16x32xf32>
    %cst_120 = arith.constant dense<0.000000e+00> : vector<16x16xf32>
    %268 = tpu.matmul %267, %222, %cst_120 {dimension_numbers = #tpu.dot_dimension_numbers<[1], [0], [0], [1], [0, 0, 1, 1], [], []>} : vector<16x32xf32>, vector<32x16xf32>, vector<16x16xf32> -> vector<16x16xf32>
    %cst_121 = arith.constant 0.353553385 : f32
    %269 = vector.broadcast %cst_121 : f32 to vector<16x16xf32>
    %270 = arith.mulf %268, %269 : vector<16x16xf32>
    %cst_122 = arith.constant 5.000000e-01 : f32
    %271 = vector.broadcast %cst_122 : f32 to vector<16x16xf32>
    %272 = arith.cmpf ogt, %31, %271 : vector<16x16xf32>
    %cst_123 = arith.constant -1.000000e+09 : f32
    %273 = vector.broadcast %cst_123 : f32 to vector<16x16xf32>
    %274 = arith.select %272, %273, %270 : vector<16x16xi1>, vector<16x16xf32>
    %cst_124 = arith.constant dense<0xFF800000> : vector<16xf32>
    %275 = vector.multi_reduction <maximumf>, %274, %cst_124 [1] : vector<16x16xf32> to vector<16xf32>
    %276 = vector.shape_cast %275 : vector<16xf32> to vector<16x1xf32>
    %277 = vector.broadcast %276 : vector<16x1xf32> to vector<16x16xf32>
    %278 = arith.subf %274, %277 : vector<16x16xf32>
    %279 = math.exp %278 : vector<16x16xf32>
    %cst_125 = arith.constant dense<0.000000e+00> : vector<16xf32>
    %280 = vector.multi_reduction <add>, %279, %cst_125 [1] : vector<16x16xf32> to vector<16xf32>
    %281 = vector.shape_cast %280 : vector<16xf32> to vector<16x1xf32>
    %282 = vector.broadcast %281 : vector<16x1xf32> to vector<16x16xf32>
    %283 = arith.divf %279, %282 : vector<16x16xf32>
    %284 = vector.broadcast %21 : vector<1x32xf32> to vector<16x32xf32>
    %285 = arith.mulf %221, %284 : vector<16x32xf32>
    %cst_126 = arith.constant dense<0.000000e+00> : vector<16x32xf32>
    %286 = tpu.matmul %283, %285, %cst_126 {dimension_numbers = #tpu.dot_dimension_numbers<[1], [0], [0], [1], [0, 0, 1, 1], [], []>} : vector<16x16xf32>, vector<16x32xf32>, vector<16x32xf32> -> vector<16x32xf32>
    %287 = arith.addf %265, %286 : vector<16x32xf32>
    %288 = vector.broadcast %28 : vector<1x32xf32> to vector<16x32xf32>
    %289 = arith.mulf %216, %288 : vector<16x32xf32>
    %cst_127 = arith.constant dense<0.000000e+00> : vector<16x16xf32>
    %290 = tpu.matmul %289, %222, %cst_127 {dimension_numbers = #tpu.dot_dimension_numbers<[1], [0], [0], [1], [0, 0, 1, 1], [], []>} : vector<16x32xf32>, vector<32x16xf32>, vector<16x16xf32> -> vector<16x16xf32>
    %cst_128 = arith.constant 0.353553385 : f32
    %291 = vector.broadcast %cst_128 : f32 to vector<16x16xf32>
    %292 = arith.mulf %290, %291 : vector<16x16xf32>
    %cst_129 = arith.constant 5.000000e-01 : f32
    %293 = vector.broadcast %cst_129 : f32 to vector<16x16xf32>
    %294 = arith.cmpf ogt, %31, %293 : vector<16x16xf32>
    %cst_130 = arith.constant -1.000000e+09 : f32
    %295 = vector.broadcast %cst_130 : f32 to vector<16x16xf32>
    %296 = arith.select %294, %295, %292 : vector<16x16xi1>, vector<16x16xf32>
    %cst_131 = arith.constant dense<0xFF800000> : vector<16xf32>
    %297 = vector.multi_reduction <maximumf>, %296, %cst_131 [1] : vector<16x16xf32> to vector<16xf32>
    %298 = vector.shape_cast %297 : vector<16xf32> to vector<16x1xf32>
    %299 = vector.broadcast %298 : vector<16x1xf32> to vector<16x16xf32>
    %300 = arith.subf %296, %299 : vector<16x16xf32>
    %301 = math.exp %300 : vector<16x16xf32>
    %cst_132 = arith.constant dense<0.000000e+00> : vector<16xf32>
    %302 = vector.multi_reduction <add>, %301, %cst_132 [1] : vector<16x16xf32> to vector<16xf32>
    %303 = vector.shape_cast %302 : vector<16xf32> to vector<16x1xf32>
    %304 = vector.broadcast %303 : vector<16x1xf32> to vector<16x16xf32>
    %305 = arith.divf %301, %304 : vector<16x16xf32>
    %306 = vector.broadcast %28 : vector<1x32xf32> to vector<16x32xf32>
    %307 = arith.mulf %221, %306 : vector<16x32xf32>
    %cst_133 = arith.constant dense<0.000000e+00> : vector<16x32xf32>
    %308 = tpu.matmul %305, %307, %cst_133 {dimension_numbers = #tpu.dot_dimension_numbers<[1], [0], [0], [1], [0, 0, 1, 1], [], []>} : vector<16x16xf32>, vector<16x32xf32>, vector<16x32xf32> -> vector<16x32xf32>
    %309 = arith.addf %287, %308 : vector<16x32xf32>
    %cst_134 = arith.constant dense<0.000000e+00> : vector<16x32xf32>
    %310 = tpu.matmul %309, %210, %cst_134 {dimension_numbers = #tpu.dot_dimension_numbers<[1], [0], [0], [1], [0, 0, 1, 1], [], []>} : vector<16x32xf32>, vector<32x32xf32>, vector<16x32xf32> -> vector<16x32xf32>
    %311 = vector.broadcast %211 : vector<1x32xf32> to vector<16x32xf32>
    %312 = arith.addf %310, %311 : vector<16x32xf32>
    %313 = arith.addf %205, %312 : vector<16x32xf32>
    %cst_135 = arith.constant dense<0.000000e+00> : vector<16xf32>
    %314 = vector.multi_reduction <add>, %313, %cst_135 [1] : vector<16x32xf32> to vector<16xf32>
    %315 = vector.shape_cast %314 : vector<16xf32> to vector<16x1xf32>
    %cst_136 = arith.constant 3.200000e+01 : f32
    %316 = vector.broadcast %cst_136 : f32 to vector<16x1xf32>
    %317 = arith.divf %315, %316 : vector<16x1xf32>
    %318 = vector.broadcast %317 : vector<16x1xf32> to vector<16x32xf32>
    %319 = arith.subf %313, %318 : vector<16x32xf32>
    %320 = arith.mulf %319, %319 : vector<16x32xf32>
    %cst_137 = arith.constant dense<0.000000e+00> : vector<16xf32>
    %321 = vector.multi_reduction <add>, %320, %cst_137 [1] : vector<16x32xf32> to vector<16xf32>
    %322 = vector.shape_cast %321 : vector<16xf32> to vector<16x1xf32>
    %cst_138 = arith.constant 3.200000e+01 : f32
    %323 = vector.broadcast %cst_138 : f32 to vector<16x1xf32>
    %324 = arith.divf %322, %323 : vector<16x1xf32>
    %325 = vector.broadcast %317 : vector<16x1xf32> to vector<16x32xf32>
    %326 = arith.subf %313, %325 : vector<16x32xf32>
    %cst_139 = arith.constant 9.99999997E-7 : f32
    %327 = vector.broadcast %cst_139 : f32 to vector<16x1xf32>
    %328 = arith.addf %324, %327 : vector<16x1xf32>
    %329 = math.rsqrt %328 : vector<16x1xf32>
    %330 = vector.broadcast %329 : vector<16x1xf32> to vector<16x32xf32>
    %331 = arith.mulf %326, %330 : vector<16x32xf32>
    %332 = vector.broadcast %212 : vector<1x32xf32> to vector<16x32xf32>
    %333 = arith.mulf %331, %332 : vector<16x32xf32>
    %334 = vector.broadcast %213 : vector<1x32xf32> to vector<16x32xf32>
    %335 = arith.addf %333, %334 : vector<16x32xf32>
    %c0_140 = arith.constant 0 : index
    %c0_141 = arith.constant 0 : index
    %336 = vector.load %arg29[%c0_140, %c0_141] : memref<32x32xf32, #tpu.memory_space<vmem>>, vector<32x32xf32>
    %c0_142 = arith.constant 0 : index
    %c0_143 = arith.constant 0 : index
    %337 = vector.load %arg30[%c0_142, %c0_143] : memref<1x32xf32, #tpu.memory_space<vmem>>, vector<1x32xf32>
    %c0_144 = arith.constant 0 : index
    %c0_145 = arith.constant 0 : index
    %338 = vector.load %arg31[%c0_144, %c0_145] : memref<32x64xf32, #tpu.memory_space<vmem>>, vector<32x64xf32>
    %c0_146 = arith.constant 0 : index
    %c0_147 = arith.constant 0 : index
    %339 = vector.load %arg32[%c0_146, %c0_147] : memref<1x64xf32, #tpu.memory_space<vmem>>, vector<1x64xf32>
    %c0_148 = arith.constant 0 : index
    %c0_149 = arith.constant 0 : index
    %340 = vector.load %arg33[%c0_148, %c0_149] : memref<32x32xf32, #tpu.memory_space<vmem>>, vector<32x32xf32>
    %c0_150 = arith.constant 0 : index
    %c0_151 = arith.constant 0 : index
    %341 = vector.load %arg34[%c0_150, %c0_151] : memref<1x32xf32, #tpu.memory_space<vmem>>, vector<1x32xf32>
    %c0_152 = arith.constant 0 : index
    %c0_153 = arith.constant 0 : index
    %342 = vector.load %arg35[%c0_152, %c0_153] : memref<1x32xf32, #tpu.memory_space<vmem>>, vector<1x32xf32>
    %c0_154 = arith.constant 0 : index
    %c0_155 = arith.constant 0 : index
    %343 = vector.load %arg36[%c0_154, %c0_155] : memref<1x32xf32, #tpu.memory_space<vmem>>, vector<1x32xf32>
    %cst_156 = arith.constant dense<0.000000e+00> : vector<16x32xf32>
    %344 = tpu.matmul %335, %336, %cst_156 {dimension_numbers = #tpu.dot_dimension_numbers<[1], [0], [0], [1], [0, 0, 1, 1], [], []>} : vector<16x32xf32>, vector<32x32xf32>, vector<16x32xf32> -> vector<16x32xf32>
    %345 = vector.broadcast %337 : vector<1x32xf32> to vector<16x32xf32>
    %346 = arith.addf %344, %345 : vector<16x32xf32>
    %cst_157 = arith.constant dense<0.000000e+00> : vector<16x64xf32>
    %347 = tpu.matmul %199, %338, %cst_157 {dimension_numbers = #tpu.dot_dimension_numbers<[1], [0], [0], [1], [0, 0, 1, 1], [], []>} : vector<16x32xf32>, vector<32x64xf32>, vector<16x64xf32> -> vector<16x64xf32>
    %348 = vector.broadcast %339 : vector<1x64xf32> to vector<16x64xf32>
    %349 = arith.addf %347, %348 : vector<16x64xf32>
    %350 = vector.extract_strided_slice %349 {offsets = [0, 0], sizes = [16, 32], strides = [1, 1]} : vector<16x64xf32> to vector<16x32xf32>
    %351 = vector.extract_strided_slice %349 {offsets = [0, 32], sizes = [16, 32], strides = [1, 1]} : vector<16x64xf32> to vector<16x32xf32>
    %352 = tpu.transpose %350, [1, 0] : vector<16x32xf32> -> vector<32x16xf32>
    %353 = vector.broadcast %7 : vector<1x32xf32> to vector<16x32xf32>
    %354 = arith.mulf %346, %353 : vector<16x32xf32>
    %cst_158 = arith.constant dense<0.000000e+00> : vector<16x16xf32>
    %355 = tpu.matmul %354, %352, %cst_158 {dimension_numbers = #tpu.dot_dimension_numbers<[1], [0], [0], [1], [0, 0, 1, 1], [], []>} : vector<16x32xf32>, vector<32x16xf32>, vector<16x16xf32> -> vector<16x16xf32>
    %cst_159 = arith.constant 0.353553385 : f32
    %356 = vector.broadcast %cst_159 : f32 to vector<16x16xf32>
    %357 = arith.mulf %355, %356 : vector<16x16xf32>
    %cst_160 = arith.constant 5.000000e-01 : f32
    %358 = vector.broadcast %cst_160 : f32 to vector<16x16xf32>
    %359 = arith.cmpf ogt, %32, %358 : vector<16x16xf32>
    %cst_161 = arith.constant -1.000000e+09 : f32
    %360 = vector.broadcast %cst_161 : f32 to vector<16x16xf32>
    %361 = arith.select %359, %360, %357 : vector<16x16xi1>, vector<16x16xf32>
    %cst_162 = arith.constant dense<0xFF800000> : vector<16xf32>
    %362 = vector.multi_reduction <maximumf>, %361, %cst_162 [1] : vector<16x16xf32> to vector<16xf32>
    %363 = vector.shape_cast %362 : vector<16xf32> to vector<16x1xf32>
    %364 = vector.broadcast %363 : vector<16x1xf32> to vector<16x16xf32>
    %365 = arith.subf %361, %364 : vector<16x16xf32>
    %366 = math.exp %365 : vector<16x16xf32>
    %cst_163 = arith.constant dense<0.000000e+00> : vector<16xf32>
    %367 = vector.multi_reduction <add>, %366, %cst_163 [1] : vector<16x16xf32> to vector<16xf32>
    %368 = vector.shape_cast %367 : vector<16xf32> to vector<16x1xf32>
    %369 = vector.broadcast %368 : vector<16x1xf32> to vector<16x16xf32>
    %370 = arith.divf %366, %369 : vector<16x16xf32>
    %371 = vector.broadcast %7 : vector<1x32xf32> to vector<16x32xf32>
    %372 = arith.mulf %351, %371 : vector<16x32xf32>
    %cst_164 = arith.constant dense<0.000000e+00> : vector<16x32xf32>
    %373 = tpu.matmul %370, %372, %cst_164 {dimension_numbers = #tpu.dot_dimension_numbers<[1], [0], [0], [1], [0, 0, 1, 1], [], []>} : vector<16x16xf32>, vector<16x32xf32>, vector<16x32xf32> -> vector<16x32xf32>
    %374 = vector.broadcast %14 : vector<1x32xf32> to vector<16x32xf32>
    %375 = arith.mulf %346, %374 : vector<16x32xf32>
    %cst_165 = arith.constant dense<0.000000e+00> : vector<16x16xf32>
    %376 = tpu.matmul %375, %352, %cst_165 {dimension_numbers = #tpu.dot_dimension_numbers<[1], [0], [0], [1], [0, 0, 1, 1], [], []>} : vector<16x32xf32>, vector<32x16xf32>, vector<16x16xf32> -> vector<16x16xf32>
    %cst_166 = arith.constant 0.353553385 : f32
    %377 = vector.broadcast %cst_166 : f32 to vector<16x16xf32>
    %378 = arith.mulf %376, %377 : vector<16x16xf32>
    %cst_167 = arith.constant 5.000000e-01 : f32
    %379 = vector.broadcast %cst_167 : f32 to vector<16x16xf32>
    %380 = arith.cmpf ogt, %32, %379 : vector<16x16xf32>
    %cst_168 = arith.constant -1.000000e+09 : f32
    %381 = vector.broadcast %cst_168 : f32 to vector<16x16xf32>
    %382 = arith.select %380, %381, %378 : vector<16x16xi1>, vector<16x16xf32>
    %cst_169 = arith.constant dense<0xFF800000> : vector<16xf32>
    %383 = vector.multi_reduction <maximumf>, %382, %cst_169 [1] : vector<16x16xf32> to vector<16xf32>
    %384 = vector.shape_cast %383 : vector<16xf32> to vector<16x1xf32>
    %385 = vector.broadcast %384 : vector<16x1xf32> to vector<16x16xf32>
    %386 = arith.subf %382, %385 : vector<16x16xf32>
    %387 = math.exp %386 : vector<16x16xf32>
    %cst_170 = arith.constant dense<0.000000e+00> : vector<16xf32>
    %388 = vector.multi_reduction <add>, %387, %cst_170 [1] : vector<16x16xf32> to vector<16xf32>
    %389 = vector.shape_cast %388 : vector<16xf32> to vector<16x1xf32>
    %390 = vector.broadcast %389 : vector<16x1xf32> to vector<16x16xf32>
    %391 = arith.divf %387, %390 : vector<16x16xf32>
    %392 = vector.broadcast %14 : vector<1x32xf32> to vector<16x32xf32>
    %393 = arith.mulf %351, %392 : vector<16x32xf32>
    %cst_171 = arith.constant dense<0.000000e+00> : vector<16x32xf32>
    %394 = tpu.matmul %391, %393, %cst_171 {dimension_numbers = #tpu.dot_dimension_numbers<[1], [0], [0], [1], [0, 0, 1, 1], [], []>} : vector<16x16xf32>, vector<16x32xf32>, vector<16x32xf32> -> vector<16x32xf32>
    %395 = arith.addf %373, %394 : vector<16x32xf32>
    %396 = vector.broadcast %21 : vector<1x32xf32> to vector<16x32xf32>
    %397 = arith.mulf %346, %396 : vector<16x32xf32>
    %cst_172 = arith.constant dense<0.000000e+00> : vector<16x16xf32>
    %398 = tpu.matmul %397, %352, %cst_172 {dimension_numbers = #tpu.dot_dimension_numbers<[1], [0], [0], [1], [0, 0, 1, 1], [], []>} : vector<16x32xf32>, vector<32x16xf32>, vector<16x16xf32> -> vector<16x16xf32>
    %cst_173 = arith.constant 0.353553385 : f32
    %399 = vector.broadcast %cst_173 : f32 to vector<16x16xf32>
    %400 = arith.mulf %398, %399 : vector<16x16xf32>
    %cst_174 = arith.constant 5.000000e-01 : f32
    %401 = vector.broadcast %cst_174 : f32 to vector<16x16xf32>
    %402 = arith.cmpf ogt, %32, %401 : vector<16x16xf32>
    %cst_175 = arith.constant -1.000000e+09 : f32
    %403 = vector.broadcast %cst_175 : f32 to vector<16x16xf32>
    %404 = arith.select %402, %403, %400 : vector<16x16xi1>, vector<16x16xf32>
    %cst_176 = arith.constant dense<0xFF800000> : vector<16xf32>
    %405 = vector.multi_reduction <maximumf>, %404, %cst_176 [1] : vector<16x16xf32> to vector<16xf32>
    %406 = vector.shape_cast %405 : vector<16xf32> to vector<16x1xf32>
    %407 = vector.broadcast %406 : vector<16x1xf32> to vector<16x16xf32>
    %408 = arith.subf %404, %407 : vector<16x16xf32>
    %409 = math.exp %408 : vector<16x16xf32>
    %cst_177 = arith.constant dense<0.000000e+00> : vector<16xf32>
    %410 = vector.multi_reduction <add>, %409, %cst_177 [1] : vector<16x16xf32> to vector<16xf32>
    %411 = vector.shape_cast %410 : vector<16xf32> to vector<16x1xf32>
    %412 = vector.broadcast %411 : vector<16x1xf32> to vector<16x16xf32>
    %413 = arith.divf %409, %412 : vector<16x16xf32>
    %414 = vector.broadcast %21 : vector<1x32xf32> to vector<16x32xf32>
    %415 = arith.mulf %351, %414 : vector<16x32xf32>
    %cst_178 = arith.constant dense<0.000000e+00> : vector<16x32xf32>
    %416 = tpu.matmul %413, %415, %cst_178 {dimension_numbers = #tpu.dot_dimension_numbers<[1], [0], [0], [1], [0, 0, 1, 1], [], []>} : vector<16x16xf32>, vector<16x32xf32>, vector<16x32xf32> -> vector<16x32xf32>
    %417 = arith.addf %395, %416 : vector<16x32xf32>
    %418 = vector.broadcast %28 : vector<1x32xf32> to vector<16x32xf32>
    %419 = arith.mulf %346, %418 : vector<16x32xf32>
    %cst_179 = arith.constant dense<0.000000e+00> : vector<16x16xf32>
    %420 = tpu.matmul %419, %352, %cst_179 {dimension_numbers = #tpu.dot_dimension_numbers<[1], [0], [0], [1], [0, 0, 1, 1], [], []>} : vector<16x32xf32>, vector<32x16xf32>, vector<16x16xf32> -> vector<16x16xf32>
    %cst_180 = arith.constant 0.353553385 : f32
    %421 = vector.broadcast %cst_180 : f32 to vector<16x16xf32>
    %422 = arith.mulf %420, %421 : vector<16x16xf32>
    %cst_181 = arith.constant 5.000000e-01 : f32
    %423 = vector.broadcast %cst_181 : f32 to vector<16x16xf32>
    %424 = arith.cmpf ogt, %32, %423 : vector<16x16xf32>
    %cst_182 = arith.constant -1.000000e+09 : f32
    %425 = vector.broadcast %cst_182 : f32 to vector<16x16xf32>
    %426 = arith.select %424, %425, %422 : vector<16x16xi1>, vector<16x16xf32>
    %cst_183 = arith.constant dense<0xFF800000> : vector<16xf32>
    %427 = vector.multi_reduction <maximumf>, %426, %cst_183 [1] : vector<16x16xf32> to vector<16xf32>
    %428 = vector.shape_cast %427 : vector<16xf32> to vector<16x1xf32>
    %429 = vector.broadcast %428 : vector<16x1xf32> to vector<16x16xf32>
    %430 = arith.subf %426, %429 : vector<16x16xf32>
    %431 = math.exp %430 : vector<16x16xf32>
    %cst_184 = arith.constant dense<0.000000e+00> : vector<16xf32>
    %432 = vector.multi_reduction <add>, %431, %cst_184 [1] : vector<16x16xf32> to vector<16xf32>
    %433 = vector.shape_cast %432 : vector<16xf32> to vector<16x1xf32>
    %434 = vector.broadcast %433 : vector<16x1xf32> to vector<16x16xf32>
    %435 = arith.divf %431, %434 : vector<16x16xf32>
    %436 = vector.broadcast %28 : vector<1x32xf32> to vector<16x32xf32>
    %437 = arith.mulf %351, %436 : vector<16x32xf32>
    %cst_185 = arith.constant dense<0.000000e+00> : vector<16x32xf32>
    %438 = tpu.matmul %435, %437, %cst_185 {dimension_numbers = #tpu.dot_dimension_numbers<[1], [0], [0], [1], [0, 0, 1, 1], [], []>} : vector<16x16xf32>, vector<16x32xf32>, vector<16x32xf32> -> vector<16x32xf32>
    %439 = arith.addf %417, %438 : vector<16x32xf32>
    %cst_186 = arith.constant dense<0.000000e+00> : vector<16x32xf32>
    %440 = tpu.matmul %439, %340, %cst_186 {dimension_numbers = #tpu.dot_dimension_numbers<[1], [0], [0], [1], [0, 0, 1, 1], [], []>} : vector<16x32xf32>, vector<32x32xf32>, vector<16x32xf32> -> vector<16x32xf32>
    %441 = vector.broadcast %341 : vector<1x32xf32> to vector<16x32xf32>
    %442 = arith.addf %440, %441 : vector<16x32xf32>
    %443 = arith.addf %335, %442 : vector<16x32xf32>
    %cst_187 = arith.constant dense<0.000000e+00> : vector<16xf32>
    %444 = vector.multi_reduction <add>, %443, %cst_187 [1] : vector<16x32xf32> to vector<16xf32>
    %445 = vector.shape_cast %444 : vector<16xf32> to vector<16x1xf32>
    %cst_188 = arith.constant 3.200000e+01 : f32
    %446 = vector.broadcast %cst_188 : f32 to vector<16x1xf32>
    %447 = arith.divf %445, %446 : vector<16x1xf32>
    %448 = vector.broadcast %447 : vector<16x1xf32> to vector<16x32xf32>
    %449 = arith.subf %443, %448 : vector<16x32xf32>
    %450 = arith.mulf %449, %449 : vector<16x32xf32>
    %cst_189 = arith.constant dense<0.000000e+00> : vector<16xf32>
    %451 = vector.multi_reduction <add>, %450, %cst_189 [1] : vector<16x32xf32> to vector<16xf32>
    %452 = vector.shape_cast %451 : vector<16xf32> to vector<16x1xf32>
    %cst_190 = arith.constant 3.200000e+01 : f32
    %453 = vector.broadcast %cst_190 : f32 to vector<16x1xf32>
    %454 = arith.divf %452, %453 : vector<16x1xf32>
    %455 = vector.broadcast %447 : vector<16x1xf32> to vector<16x32xf32>
    %456 = arith.subf %443, %455 : vector<16x32xf32>
    %cst_191 = arith.constant 9.99999997E-7 : f32
    %457 = vector.broadcast %cst_191 : f32 to vector<16x1xf32>
    %458 = arith.addf %454, %457 : vector<16x1xf32>
    %459 = math.rsqrt %458 : vector<16x1xf32>
    %460 = vector.broadcast %459 : vector<16x1xf32> to vector<16x32xf32>
    %461 = arith.mulf %456, %460 : vector<16x32xf32>
    %462 = vector.broadcast %342 : vector<1x32xf32> to vector<16x32xf32>
    %463 = arith.mulf %461, %462 : vector<16x32xf32>
    %464 = vector.broadcast %343 : vector<1x32xf32> to vector<16x32xf32>
    %465 = arith.addf %463, %464 : vector<16x32xf32>
    %c0_192 = arith.constant 0 : index
    %c0_193 = arith.constant 0 : index
    %466 = vector.load %arg37[%c0_192, %c0_193] : memref<32x128xf32, #tpu.memory_space<vmem>>, vector<32x128xf32>
    %c0_194 = arith.constant 0 : index
    %c0_195 = arith.constant 0 : index
    %467 = vector.load %arg38[%c0_194, %c0_195] : memref<1x128xf32, #tpu.memory_space<vmem>>, vector<1x128xf32>
    %c0_196 = arith.constant 0 : index
    %c0_197 = arith.constant 0 : index
    %468 = vector.load %arg39[%c0_196, %c0_197] : memref<128x32xf32, #tpu.memory_space<vmem>>, vector<128x32xf32>
    %c0_198 = arith.constant 0 : index
    %c0_199 = arith.constant 0 : index
    %469 = vector.load %arg40[%c0_198, %c0_199] : memref<1x32xf32, #tpu.memory_space<vmem>>, vector<1x32xf32>
    %c0_200 = arith.constant 0 : index
    %c0_201 = arith.constant 0 : index
    %470 = vector.load %arg41[%c0_200, %c0_201] : memref<1x32xf32, #tpu.memory_space<vmem>>, vector<1x32xf32>
    %c0_202 = arith.constant 0 : index
    %c0_203 = arith.constant 0 : index
    %471 = vector.load %arg42[%c0_202, %c0_203] : memref<1x32xf32, #tpu.memory_space<vmem>>, vector<1x32xf32>
    %cst_204 = arith.constant dense<0.000000e+00> : vector<16x128xf32>
    %472 = tpu.matmul %465, %466, %cst_204 {dimension_numbers = #tpu.dot_dimension_numbers<[1], [0], [0], [1], [0, 0, 1, 1], [], []>} : vector<16x32xf32>, vector<32x128xf32>, vector<16x128xf32> -> vector<16x128xf32>
    %473 = vector.broadcast %467 : vector<1x128xf32> to vector<16x128xf32>
    %474 = arith.addf %472, %473 : vector<16x128xf32>
    %cst_205 = arith.constant 0.000000e+00 : f32
    %475 = vector.broadcast %cst_205 : f32 to vector<16x128xf32>
    %476 = arith.maximumf %474, %475 : vector<16x128xf32>
    %cst_206 = arith.constant dense<0.000000e+00> : vector<16x32xf32>
    %477 = tpu.matmul %476, %468, %cst_206 {dimension_numbers = #tpu.dot_dimension_numbers<[1], [0], [0], [1], [0, 0, 1, 1], [], []>} : vector<16x128xf32>, vector<128x32xf32>, vector<16x32xf32> -> vector<16x32xf32>
    %478 = vector.broadcast %469 : vector<1x32xf32> to vector<16x32xf32>
    %479 = arith.addf %477, %478 : vector<16x32xf32>
    %480 = arith.addf %465, %479 : vector<16x32xf32>
    %cst_207 = arith.constant dense<0.000000e+00> : vector<16xf32>
    %481 = vector.multi_reduction <add>, %480, %cst_207 [1] : vector<16x32xf32> to vector<16xf32>
    %482 = vector.shape_cast %481 : vector<16xf32> to vector<16x1xf32>
    %cst_208 = arith.constant 3.200000e+01 : f32
    %483 = vector.broadcast %cst_208 : f32 to vector<16x1xf32>
    %484 = arith.divf %482, %483 : vector<16x1xf32>
    %485 = vector.broadcast %484 : vector<16x1xf32> to vector<16x32xf32>
    %486 = arith.subf %480, %485 : vector<16x32xf32>
    %487 = arith.mulf %486, %486 : vector<16x32xf32>
    %cst_209 = arith.constant dense<0.000000e+00> : vector<16xf32>
    %488 = vector.multi_reduction <add>, %487, %cst_209 [1] : vector<16x32xf32> to vector<16xf32>
    %489 = vector.shape_cast %488 : vector<16xf32> to vector<16x1xf32>
    %cst_210 = arith.constant 3.200000e+01 : f32
    %490 = vector.broadcast %cst_210 : f32 to vector<16x1xf32>
    %491 = arith.divf %489, %490 : vector<16x1xf32>
    %492 = vector.broadcast %484 : vector<16x1xf32> to vector<16x32xf32>
    %493 = arith.subf %480, %492 : vector<16x32xf32>
    %cst_211 = arith.constant 9.99999997E-7 : f32
    %494 = vector.broadcast %cst_211 : f32 to vector<16x1xf32>
    %495 = arith.addf %491, %494 : vector<16x1xf32>
    %496 = math.rsqrt %495 : vector<16x1xf32>
    %497 = vector.broadcast %496 : vector<16x1xf32> to vector<16x32xf32>
    %498 = arith.mulf %493, %497 : vector<16x32xf32>
    %499 = vector.broadcast %470 : vector<1x32xf32> to vector<16x32xf32>
    %500 = arith.mulf %498, %499 : vector<16x32xf32>
    %501 = vector.broadcast %471 : vector<1x32xf32> to vector<16x32xf32>
    %502 = arith.addf %500, %501 : vector<16x32xf32>
    %503 = arith.addf %29, %502 : vector<16x32xf32>
    %cst_212 = arith.constant dense<0.000000e+00> : vector<32xf32>
    %504 = vector.multi_reduction <add>, %503, %cst_212 [0] : vector<16x32xf32> to vector<32xf32>
    %505 = vector.shape_cast %504 : vector<32xf32> to vector<1x32xf32>
    %cst_213 = arith.constant 1.600000e+01 : f32
    %506 = vector.broadcast %cst_213 : f32 to vector<1x32xf32>
    %507 = arith.divf %505, %506 : vector<1x32xf32>
    %508 = vector.broadcast %507 : vector<1x32xf32> to vector<16x32xf32>
    %509 = arith.subf %503, %508 : vector<16x32xf32>
    %510 = arith.mulf %509, %509 : vector<16x32xf32>
    %cst_214 = arith.constant dense<0.000000e+00> : vector<32xf32>
    %511 = vector.multi_reduction <add>, %510, %cst_214 [0] : vector<16x32xf32> to vector<32xf32>
    %512 = vector.shape_cast %511 : vector<32xf32> to vector<1x32xf32>
    %cst_215 = arith.constant 1.600000e+01 : f32
    %513 = vector.broadcast %cst_215 : f32 to vector<1x32xf32>
    %514 = arith.divf %512, %513 : vector<1x32xf32>
    %515 = vector.broadcast %507 : vector<1x32xf32> to vector<16x32xf32>
    %516 = arith.subf %503, %515 : vector<16x32xf32>
    %cst_216 = arith.constant 9.99999974E-6 : f32
    %517 = vector.broadcast %cst_216 : f32 to vector<1x32xf32>
    %518 = arith.addf %514, %517 : vector<1x32xf32>
    %519 = math.rsqrt %518 : vector<1x32xf32>
    %520 = vector.broadcast %519 : vector<1x32xf32> to vector<16x32xf32>
    %521 = arith.mulf %516, %520 : vector<16x32xf32>
    %c0_217 = arith.constant 0 : index
    %c0_218 = arith.constant 0 : index
    %522 = vector.load %arg43[%c0_217, %c0_218] : memref<1x32xf32, #tpu.memory_space<vmem>>, vector<1x32xf32>
    %523 = vector.broadcast %522 : vector<1x32xf32> to vector<16x32xf32>
    %524 = arith.mulf %521, %523 : vector<16x32xf32>
    %c0_219 = arith.constant 0 : index
    %c0_220 = arith.constant 0 : index
    %525 = vector.load %arg44[%c0_219, %c0_220] : memref<1x32xf32, #tpu.memory_space<vmem>>, vector<1x32xf32>
    %526 = vector.broadcast %525 : vector<1x32xf32> to vector<16x32xf32>
    %527 = arith.addf %524, %526 : vector<16x32xf32>
    %c0_221 = arith.constant 0 : index
    %c0_222 = arith.constant 0 : index
    %528 = vector.load %arg45[%c0_221, %c0_222] : memref<32x8xf32, #tpu.memory_space<vmem>>, vector<32x8xf32>
    %cst_223 = arith.constant dense<0.000000e+00> : vector<16x8xf32>
    %529 = tpu.matmul %527, %528, %cst_223 {dimension_numbers = #tpu.dot_dimension_numbers<[1], [0], [0], [1], [0, 0, 1, 1], [], []>} : vector<16x32xf32>, vector<32x8xf32>, vector<16x8xf32> -> vector<16x8xf32>
    %c0_224 = arith.constant 0 : index
    %c0_225 = arith.constant 0 : index
    %530 = vector.load %arg46[%c0_224, %c0_225] : memref<1x8xf32, #tpu.memory_space<vmem>>, vector<1x8xf32>
    %531 = vector.broadcast %530 : vector<1x8xf32> to vector<16x8xf32>
    %532 = arith.addf %529, %531 : vector<16x8xf32>
    %c0_226 = arith.constant 0 : index
    %c0_227 = arith.constant 0 : index
    %533 = vector.load %arg47[%c0_226, %c0_227] : memref<16x8xf32, #tpu.memory_space<vmem>>, vector<16x8xf32>
    tpu.vector_store %arg47[%c0_226, %c0_227], %532 {strides = array<i32>} : memref<16x8xf32, #tpu.memory_space<vmem>>, vector<16x8xf32>,
    return
  }
}

module attributes {stable_mosaic.version = 11 : i64} {
  func.func @_viterbi_kernel(%arg0: memref<2x8x8xf32, #tpu.memory_space<vmem>>, %arg1: memref<8x8xf32, #tpu.memory_space<vmem>>, %arg2: memref<2x8xf32, #tpu.memory_space<vmem>>, %arg3: memref<2x8xf32, #tpu.memory_space<vmem>>, %arg4: memref<2x8xi32, #tpu.memory_space<vmem>>) attributes {dimension_semantics = [], scalar_prefetch = 0 : i64, scratch_operands = 0 : i64, tpu.core_type = #tpu.core_type<tc>} {
    %c0 = arith.constant 0 : index
    %c0_0 = arith.constant 0 : index
    %0 = vector.load %arg1[%c0, %c0_0] : memref<8x8xf32, #tpu.memory_space<vmem>>, vector<8x8xf32>
    %1 = tpu.iota {dimensions = array<i32: 0>} : vector<8x8xi32>
    %2 = arith.sitofp %1 : vector<8x8xi32> to vector<8x8xf32>
    %3 = tpu.iota {dimensions = array<i32: 0>} : vector<8x8xi32>
    %4 = tpu.iota {dimensions = array<i32: 1>} : vector<8x8xi32>
    %5 = arith.cmpi eq, %3, %4 : vector<8x8xi32>
    %6 = tpu.iota {dimensions = array<i32: 1>} : vector<1x8xi32>
    %7 = arith.sitofp %6 : vector<1x8xi32> to vector<1x8xf32>
    %8 = tpu.iota {dimensions = array<i32: 1>} : vector<1x8xi32>
    %9 = arith.sitofp %8 : vector<1x8xi32> to vector<1x8xf32>
    %c0_1 = arith.constant 0 : index
    %c0_2 = arith.constant 0 : index
    %c0_3 = arith.constant 0 : index
    %10 = vector.load %arg0[%c0_1, %c0_2, %c0_3] : memref<2x8x8xf32, #tpu.memory_space<vmem>>, vector<1x8x8xf32>
    %11 = vector.shape_cast %10 : vector<1x8x8xf32> to vector<8x8xf32>
    %c0_4 = arith.constant 0 : index
    %c0_5 = arith.constant 0 : index
    %12 = vector.load %arg2[%c0_4, %c0_5] : memref<2x8xf32, #tpu.memory_space<vmem>>, vector<1x8xf32>
    %c0_6 = arith.constant 0 : index
    %c0_7 = arith.constant 0 : index
    %13 = vector.load %arg3[%c0_6, %c0_7] : memref<2x8xf32, #tpu.memory_space<vmem>>, vector<1x8xf32>
    %14 = vector.extract_strided_slice %11 {offsets = [0, 0], sizes = [1, 8], strides = [1, 1]} : vector<8x8xf32> to vector<1x8xf32>
    %15 = vector.extract_strided_slice %0 {offsets = [6, 0], sizes = [1, 8], strides = [1, 1]} : vector<8x8xf32> to vector<1x8xf32>
    %16 = arith.addf %14, %15 : vector<1x8xf32>
    %cst = arith.constant 0.000000e+00 : f32
    %17 = vector.shape_cast %16 : vector<1x8xf32> to vector<1x8xf32>
    %18 = vector.broadcast %17 : vector<1x8xf32> to vector<8x8xf32>
    %19 = vector.broadcast %cst : f32 to vector<8x8xf32>
    %20 = arith.select %5, %18, %19 : vector<8x8xi1>, vector<8x8xf32>
    %cst_8 = arith.constant dense<0.000000e+00> : vector<8xf32>
    %21 = vector.multi_reduction <add>, %20, %cst_8 [1] : vector<8x8xf32> to vector<8xf32>
    %22 = vector.shape_cast %21 : vector<8xf32> to vector<8x1xf32>
    %23 = vector.broadcast %22 : vector<8x1xf32> to vector<8x8xf32>
    %24 = arith.addf %23, %0 : vector<8x8xf32>
    %25 = vector.extract_strided_slice %11 {offsets = [1, 0], sizes = [1, 8], strides = [1, 1]} : vector<8x8xf32> to vector<1x8xf32>
    %26 = vector.broadcast %25 : vector<1x8xf32> to vector<8x8xf32>
    %27 = arith.addf %24, %26 : vector<8x8xf32>
    %cst_9 = arith.constant dense<0xFF800000> : vector<8xf32>
    %28 = vector.multi_reduction <maximumf>, %27, %cst_9 [0] : vector<8x8xf32> to vector<8xf32>
    %29 = vector.shape_cast %28 : vector<8xf32> to vector<1x8xf32>
    %30 = vector.broadcast %29 : vector<1x8xf32> to vector<8x8xf32>
    %31 = arith.cmpf oge, %27, %30 : vector<8x8xf32>
    %cst_10 = arith.constant 8.000000e+00 : f32
    %32 = vector.broadcast %cst_10 : f32 to vector<8x8xf32>
    %33 = arith.select %31, %2, %32 : vector<8x8xi1>, vector<8x8xf32>
    %cst_11 = arith.constant dense<0x7F800000> : vector<8xf32>
    %34 = vector.multi_reduction <minimumf>, %33, %cst_11 [0] : vector<8x8xf32> to vector<8xf32>
    %35 = vector.shape_cast %34 : vector<8xf32> to vector<1x8xf32>
    %36 = vector.extract_strided_slice %12 {offsets = [0, 1], sizes = [1, 1], strides = [1, 1]} : vector<1x8xf32> to vector<1x1xf32>
    %cst_12 = arith.constant 5.000000e-01 : f32
    %37 = vector.broadcast %cst_12 : f32 to vector<1x1xf32>
    %38 = arith.cmpf ogt, %36, %37 : vector<1x1xf32>
    %cst_13 = arith.constant 0.000000e+00 : f32
    %39 = vector.shape_cast %38 : vector<1x1xi1> to vector<1x1xi1>
    %40 = vector.broadcast %39 : vector<1x1xi1> to vector<1x8xi1>
    %41 = vector.broadcast %cst_13 : f32 to vector<1x8xf32>
    %42 = arith.select %40, %35, %41 : vector<1x8xi1>, vector<1x8xf32>
    %cst_14 = arith.constant 0.000000e+00 : f32
    %43 = vector.shape_cast %29 : vector<1x8xf32> to vector<1x8xf32>
    %44 = vector.broadcast %43 : vector<1x8xf32> to vector<8x8xf32>
    %45 = vector.broadcast %cst_14 : f32 to vector<8x8xf32>
    %46 = arith.select %5, %44, %45 : vector<8x8xi1>, vector<8x8xf32>
    %cst_15 = arith.constant dense<0.000000e+00> : vector<8xf32>
    %47 = vector.multi_reduction <add>, %46, %cst_15 [1] : vector<8x8xf32> to vector<8xf32>
    %48 = vector.shape_cast %47 : vector<8xf32> to vector<8x1xf32>
    %49 = vector.broadcast %48 : vector<8x1xf32> to vector<8x8xf32>
    %50 = arith.addf %49, %0 : vector<8x8xf32>
    %51 = vector.extract_strided_slice %11 {offsets = [2, 0], sizes = [1, 8], strides = [1, 1]} : vector<8x8xf32> to vector<1x8xf32>
    %52 = vector.broadcast %51 : vector<1x8xf32> to vector<8x8xf32>
    %53 = arith.addf %50, %52 : vector<8x8xf32>
    %cst_16 = arith.constant dense<0xFF800000> : vector<8xf32>
    %54 = vector.multi_reduction <maximumf>, %53, %cst_16 [0] : vector<8x8xf32> to vector<8xf32>
    %55 = vector.shape_cast %54 : vector<8xf32> to vector<1x8xf32>
    %56 = vector.broadcast %55 : vector<1x8xf32> to vector<8x8xf32>
    %57 = arith.cmpf oge, %53, %56 : vector<8x8xf32>
    %cst_17 = arith.constant 8.000000e+00 : f32
    %58 = vector.broadcast %cst_17 : f32 to vector<8x8xf32>
    %59 = arith.select %57, %2, %58 : vector<8x8xi1>, vector<8x8xf32>
    %cst_18 = arith.constant dense<0x7F800000> : vector<8xf32>
    %60 = vector.multi_reduction <minimumf>, %59, %cst_18 [0] : vector<8x8xf32> to vector<8xf32>
    %61 = vector.shape_cast %60 : vector<8xf32> to vector<1x8xf32>
    %62 = vector.extract_strided_slice %12 {offsets = [0, 2], sizes = [1, 1], strides = [1, 1]} : vector<1x8xf32> to vector<1x1xf32>
    %cst_19 = arith.constant 5.000000e-01 : f32
    %63 = vector.broadcast %cst_19 : f32 to vector<1x1xf32>
    %64 = arith.cmpf ogt, %62, %63 : vector<1x1xf32>
    %cst_20 = arith.constant 0.000000e+00 : f32
    %65 = vector.shape_cast %64 : vector<1x1xi1> to vector<1x1xi1>
    %66 = vector.broadcast %65 : vector<1x1xi1> to vector<1x8xi1>
    %67 = vector.broadcast %cst_20 : f32 to vector<1x8xf32>
    %68 = arith.select %66, %61, %67 : vector<1x8xi1>, vector<1x8xf32>
    %cst_21 = arith.constant 0.000000e+00 : f32
    %69 = vector.shape_cast %55 : vector<1x8xf32> to vector<1x8xf32>
    %70 = vector.broadcast %69 : vector<1x8xf32> to vector<8x8xf32>
    %71 = vector.broadcast %cst_21 : f32 to vector<8x8xf32>
    %72 = arith.select %5, %70, %71 : vector<8x8xi1>, vector<8x8xf32>
    %cst_22 = arith.constant dense<0.000000e+00> : vector<8xf32>
    %73 = vector.multi_reduction <add>, %72, %cst_22 [1] : vector<8x8xf32> to vector<8xf32>
    %74 = vector.shape_cast %73 : vector<8xf32> to vector<8x1xf32>
    %75 = vector.broadcast %74 : vector<8x1xf32> to vector<8x8xf32>
    %76 = arith.addf %75, %0 : vector<8x8xf32>
    %77 = vector.extract_strided_slice %11 {offsets = [3, 0], sizes = [1, 8], strides = [1, 1]} : vector<8x8xf32> to vector<1x8xf32>
    %78 = vector.broadcast %77 : vector<1x8xf32> to vector<8x8xf32>
    %79 = arith.addf %76, %78 : vector<8x8xf32>
    %cst_23 = arith.constant dense<0xFF800000> : vector<8xf32>
    %80 = vector.multi_reduction <maximumf>, %79, %cst_23 [0] : vector<8x8xf32> to vector<8xf32>
    %81 = vector.shape_cast %80 : vector<8xf32> to vector<1x8xf32>
    %82 = vector.broadcast %81 : vector<1x8xf32> to vector<8x8xf32>
    %83 = arith.cmpf oge, %79, %82 : vector<8x8xf32>
    %cst_24 = arith.constant 8.000000e+00 : f32
    %84 = vector.broadcast %cst_24 : f32 to vector<8x8xf32>
    %85 = arith.select %83, %2, %84 : vector<8x8xi1>, vector<8x8xf32>
    %cst_25 = arith.constant dense<0x7F800000> : vector<8xf32>
    %86 = vector.multi_reduction <minimumf>, %85, %cst_25 [0] : vector<8x8xf32> to vector<8xf32>
    %87 = vector.shape_cast %86 : vector<8xf32> to vector<1x8xf32>
    %88 = vector.extract_strided_slice %12 {offsets = [0, 3], sizes = [1, 1], strides = [1, 1]} : vector<1x8xf32> to vector<1x1xf32>
    %cst_26 = arith.constant 5.000000e-01 : f32
    %89 = vector.broadcast %cst_26 : f32 to vector<1x1xf32>
    %90 = arith.cmpf ogt, %88, %89 : vector<1x1xf32>
    %cst_27 = arith.constant 0.000000e+00 : f32
    %91 = vector.shape_cast %90 : vector<1x1xi1> to vector<1x1xi1>
    %92 = vector.broadcast %91 : vector<1x1xi1> to vector<1x8xi1>
    %93 = vector.broadcast %cst_27 : f32 to vector<1x8xf32>
    %94 = arith.select %92, %87, %93 : vector<1x8xi1>, vector<1x8xf32>
    %cst_28 = arith.constant 0.000000e+00 : f32
    %95 = vector.shape_cast %81 : vector<1x8xf32> to vector<1x8xf32>
    %96 = vector.broadcast %95 : vector<1x8xf32> to vector<8x8xf32>
    %97 = vector.broadcast %cst_28 : f32 to vector<8x8xf32>
    %98 = arith.select %5, %96, %97 : vector<8x8xi1>, vector<8x8xf32>
    %cst_29 = arith.constant dense<0.000000e+00> : vector<8xf32>
    %99 = vector.multi_reduction <add>, %98, %cst_29 [1] : vector<8x8xf32> to vector<8xf32>
    %100 = vector.shape_cast %99 : vector<8xf32> to vector<8x1xf32>
    %101 = vector.broadcast %100 : vector<8x1xf32> to vector<8x8xf32>
    %102 = arith.addf %101, %0 : vector<8x8xf32>
    %103 = vector.extract_strided_slice %11 {offsets = [4, 0], sizes = [1, 8], strides = [1, 1]} : vector<8x8xf32> to vector<1x8xf32>
    %104 = vector.broadcast %103 : vector<1x8xf32> to vector<8x8xf32>
    %105 = arith.addf %102, %104 : vector<8x8xf32>
    %cst_30 = arith.constant dense<0xFF800000> : vector<8xf32>
    %106 = vector.multi_reduction <maximumf>, %105, %cst_30 [0] : vector<8x8xf32> to vector<8xf32>
    %107 = vector.shape_cast %106 : vector<8xf32> to vector<1x8xf32>
    %108 = vector.broadcast %107 : vector<1x8xf32> to vector<8x8xf32>
    %109 = arith.cmpf oge, %105, %108 : vector<8x8xf32>
    %cst_31 = arith.constant 8.000000e+00 : f32
    %110 = vector.broadcast %cst_31 : f32 to vector<8x8xf32>
    %111 = arith.select %109, %2, %110 : vector<8x8xi1>, vector<8x8xf32>
    %cst_32 = arith.constant dense<0x7F800000> : vector<8xf32>
    %112 = vector.multi_reduction <minimumf>, %111, %cst_32 [0] : vector<8x8xf32> to vector<8xf32>
    %113 = vector.shape_cast %112 : vector<8xf32> to vector<1x8xf32>
    %114 = vector.extract_strided_slice %12 {offsets = [0, 4], sizes = [1, 1], strides = [1, 1]} : vector<1x8xf32> to vector<1x1xf32>
    %cst_33 = arith.constant 5.000000e-01 : f32
    %115 = vector.broadcast %cst_33 : f32 to vector<1x1xf32>
    %116 = arith.cmpf ogt, %114, %115 : vector<1x1xf32>
    %cst_34 = arith.constant 0.000000e+00 : f32
    %117 = vector.shape_cast %116 : vector<1x1xi1> to vector<1x1xi1>
    %118 = vector.broadcast %117 : vector<1x1xi1> to vector<1x8xi1>
    %119 = vector.broadcast %cst_34 : f32 to vector<1x8xf32>
    %120 = arith.select %118, %113, %119 : vector<1x8xi1>, vector<1x8xf32>
    %cst_35 = arith.constant 0.000000e+00 : f32
    %121 = vector.shape_cast %107 : vector<1x8xf32> to vector<1x8xf32>
    %122 = vector.broadcast %121 : vector<1x8xf32> to vector<8x8xf32>
    %123 = vector.broadcast %cst_35 : f32 to vector<8x8xf32>
    %124 = arith.select %5, %122, %123 : vector<8x8xi1>, vector<8x8xf32>
    %cst_36 = arith.constant dense<0.000000e+00> : vector<8xf32>
    %125 = vector.multi_reduction <add>, %124, %cst_36 [1] : vector<8x8xf32> to vector<8xf32>
    %126 = vector.shape_cast %125 : vector<8xf32> to vector<8x1xf32>
    %127 = vector.broadcast %126 : vector<8x1xf32> to vector<8x8xf32>
    %128 = arith.addf %127, %0 : vector<8x8xf32>
    %129 = vector.extract_strided_slice %11 {offsets = [5, 0], sizes = [1, 8], strides = [1, 1]} : vector<8x8xf32> to vector<1x8xf32>
    %130 = vector.broadcast %129 : vector<1x8xf32> to vector<8x8xf32>
    %131 = arith.addf %128, %130 : vector<8x8xf32>
    %cst_37 = arith.constant dense<0xFF800000> : vector<8xf32>
    %132 = vector.multi_reduction <maximumf>, %131, %cst_37 [0] : vector<8x8xf32> to vector<8xf32>
    %133 = vector.shape_cast %132 : vector<8xf32> to vector<1x8xf32>
    %134 = vector.broadcast %133 : vector<1x8xf32> to vector<8x8xf32>
    %135 = arith.cmpf oge, %131, %134 : vector<8x8xf32>
    %cst_38 = arith.constant 8.000000e+00 : f32
    %136 = vector.broadcast %cst_38 : f32 to vector<8x8xf32>
    %137 = arith.select %135, %2, %136 : vector<8x8xi1>, vector<8x8xf32>
    %cst_39 = arith.constant dense<0x7F800000> : vector<8xf32>
    %138 = vector.multi_reduction <minimumf>, %137, %cst_39 [0] : vector<8x8xf32> to vector<8xf32>
    %139 = vector.shape_cast %138 : vector<8xf32> to vector<1x8xf32>
    %140 = vector.extract_strided_slice %12 {offsets = [0, 5], sizes = [1, 1], strides = [1, 1]} : vector<1x8xf32> to vector<1x1xf32>
    %cst_40 = arith.constant 5.000000e-01 : f32
    %141 = vector.broadcast %cst_40 : f32 to vector<1x1xf32>
    %142 = arith.cmpf ogt, %140, %141 : vector<1x1xf32>
    %cst_41 = arith.constant 0.000000e+00 : f32
    %143 = vector.shape_cast %142 : vector<1x1xi1> to vector<1x1xi1>
    %144 = vector.broadcast %143 : vector<1x1xi1> to vector<1x8xi1>
    %145 = vector.broadcast %cst_41 : f32 to vector<1x8xf32>
    %146 = arith.select %144, %139, %145 : vector<1x8xi1>, vector<1x8xf32>
    %cst_42 = arith.constant 0.000000e+00 : f32
    %147 = vector.shape_cast %133 : vector<1x8xf32> to vector<1x8xf32>
    %148 = vector.broadcast %147 : vector<1x8xf32> to vector<8x8xf32>
    %149 = vector.broadcast %cst_42 : f32 to vector<8x8xf32>
    %150 = arith.select %5, %148, %149 : vector<8x8xi1>, vector<8x8xf32>
    %cst_43 = arith.constant dense<0.000000e+00> : vector<8xf32>
    %151 = vector.multi_reduction <add>, %150, %cst_43 [1] : vector<8x8xf32> to vector<8xf32>
    %152 = vector.shape_cast %151 : vector<8xf32> to vector<8x1xf32>
    %153 = vector.broadcast %152 : vector<8x1xf32> to vector<8x8xf32>
    %154 = arith.addf %153, %0 : vector<8x8xf32>
    %155 = vector.extract_strided_slice %11 {offsets = [6, 0], sizes = [1, 8], strides = [1, 1]} : vector<8x8xf32> to vector<1x8xf32>
    %156 = vector.broadcast %155 : vector<1x8xf32> to vector<8x8xf32>
    %157 = arith.addf %154, %156 : vector<8x8xf32>
    %cst_44 = arith.constant dense<0xFF800000> : vector<8xf32>
    %158 = vector.multi_reduction <maximumf>, %157, %cst_44 [0] : vector<8x8xf32> to vector<8xf32>
    %159 = vector.shape_cast %158 : vector<8xf32> to vector<1x8xf32>
    %160 = vector.broadcast %159 : vector<1x8xf32> to vector<8x8xf32>
    %161 = arith.cmpf oge, %157, %160 : vector<8x8xf32>
    %cst_45 = arith.constant 8.000000e+00 : f32
    %162 = vector.broadcast %cst_45 : f32 to vector<8x8xf32>
    %163 = arith.select %161, %2, %162 : vector<8x8xi1>, vector<8x8xf32>
    %cst_46 = arith.constant dense<0x7F800000> : vector<8xf32>
    %164 = vector.multi_reduction <minimumf>, %163, %cst_46 [0] : vector<8x8xf32> to vector<8xf32>
    %165 = vector.shape_cast %164 : vector<8xf32> to vector<1x8xf32>
    %166 = vector.extract_strided_slice %12 {offsets = [0, 6], sizes = [1, 1], strides = [1, 1]} : vector<1x8xf32> to vector<1x1xf32>
    %cst_47 = arith.constant 5.000000e-01 : f32
    %167 = vector.broadcast %cst_47 : f32 to vector<1x1xf32>
    %168 = arith.cmpf ogt, %166, %167 : vector<1x1xf32>
    %cst_48 = arith.constant 0.000000e+00 : f32
    %169 = vector.shape_cast %168 : vector<1x1xi1> to vector<1x1xi1>
    %170 = vector.broadcast %169 : vector<1x1xi1> to vector<1x8xi1>
    %171 = vector.broadcast %cst_48 : f32 to vector<1x8xf32>
    %172 = arith.select %170, %165, %171 : vector<1x8xi1>, vector<1x8xf32>
    %cst_49 = arith.constant 0.000000e+00 : f32
    %173 = vector.shape_cast %159 : vector<1x8xf32> to vector<1x8xf32>
    %174 = vector.broadcast %173 : vector<1x8xf32> to vector<8x8xf32>
    %175 = vector.broadcast %cst_49 : f32 to vector<8x8xf32>
    %176 = arith.select %5, %174, %175 : vector<8x8xi1>, vector<8x8xf32>
    %cst_50 = arith.constant dense<0.000000e+00> : vector<8xf32>
    %177 = vector.multi_reduction <add>, %176, %cst_50 [1] : vector<8x8xf32> to vector<8xf32>
    %178 = vector.shape_cast %177 : vector<8xf32> to vector<8x1xf32>
    %179 = vector.broadcast %178 : vector<8x1xf32> to vector<8x8xf32>
    %180 = arith.addf %179, %0 : vector<8x8xf32>
    %181 = vector.extract_strided_slice %11 {offsets = [7, 0], sizes = [1, 8], strides = [1, 1]} : vector<8x8xf32> to vector<1x8xf32>
    %182 = vector.broadcast %181 : vector<1x8xf32> to vector<8x8xf32>
    %183 = arith.addf %180, %182 : vector<8x8xf32>
    %cst_51 = arith.constant dense<0xFF800000> : vector<8xf32>
    %184 = vector.multi_reduction <maximumf>, %183, %cst_51 [0] : vector<8x8xf32> to vector<8xf32>
    %185 = vector.shape_cast %184 : vector<8xf32> to vector<1x8xf32>
    %186 = vector.broadcast %185 : vector<1x8xf32> to vector<8x8xf32>
    %187 = arith.cmpf oge, %183, %186 : vector<8x8xf32>
    %cst_52 = arith.constant 8.000000e+00 : f32
    %188 = vector.broadcast %cst_52 : f32 to vector<8x8xf32>
    %189 = arith.select %187, %2, %188 : vector<8x8xi1>, vector<8x8xf32>
    %cst_53 = arith.constant dense<0x7F800000> : vector<8xf32>
    %190 = vector.multi_reduction <minimumf>, %189, %cst_53 [0] : vector<8x8xf32> to vector<8xf32>
    %191 = vector.shape_cast %190 : vector<8xf32> to vector<1x8xf32>
    %192 = vector.extract_strided_slice %12 {offsets = [0, 7], sizes = [1, 1], strides = [1, 1]} : vector<1x8xf32> to vector<1x1xf32>
    %cst_54 = arith.constant 5.000000e-01 : f32
    %193 = vector.broadcast %cst_54 : f32 to vector<1x1xf32>
    %194 = arith.cmpf ogt, %192, %193 : vector<1x1xf32>
    %cst_55 = arith.constant 0.000000e+00 : f32
    %195 = vector.shape_cast %194 : vector<1x1xi1> to vector<1x1xi1>
    %196 = vector.broadcast %195 : vector<1x1xi1> to vector<1x8xi1>
    %197 = vector.broadcast %cst_55 : f32 to vector<1x8xf32>
    %198 = arith.select %196, %191, %197 : vector<1x8xi1>, vector<1x8xf32>
    %199 = vector.extract_strided_slice %13 {offsets = [0, 0], sizes = [1, 1], strides = [1, 1]} : vector<1x8xf32> to vector<1x1xf32>
    %200 = vector.broadcast %199 : vector<1x1xf32> to vector<1x8xf32>
    %201 = arith.mulf %16, %200 : vector<1x8xf32>
    %202 = vector.extract_strided_slice %13 {offsets = [0, 1], sizes = [1, 1], strides = [1, 1]} : vector<1x8xf32> to vector<1x1xf32>
    %203 = vector.broadcast %202 : vector<1x1xf32> to vector<1x8xf32>
    %204 = arith.mulf %29, %203 : vector<1x8xf32>
    %205 = arith.addf %201, %204 : vector<1x8xf32>
    %206 = vector.extract_strided_slice %13 {offsets = [0, 2], sizes = [1, 1], strides = [1, 1]} : vector<1x8xf32> to vector<1x1xf32>
    %207 = vector.broadcast %206 : vector<1x1xf32> to vector<1x8xf32>
    %208 = arith.mulf %55, %207 : vector<1x8xf32>
    %209 = arith.addf %205, %208 : vector<1x8xf32>
    %210 = vector.extract_strided_slice %13 {offsets = [0, 3], sizes = [1, 1], strides = [1, 1]} : vector<1x8xf32> to vector<1x1xf32>
    %211 = vector.broadcast %210 : vector<1x1xf32> to vector<1x8xf32>
    %212 = arith.mulf %81, %211 : vector<1x8xf32>
    %213 = arith.addf %209, %212 : vector<1x8xf32>
    %214 = vector.extract_strided_slice %13 {offsets = [0, 4], sizes = [1, 1], strides = [1, 1]} : vector<1x8xf32> to vector<1x1xf32>
    %215 = vector.broadcast %214 : vector<1x1xf32> to vector<1x8xf32>
    %216 = arith.mulf %107, %215 : vector<1x8xf32>
    %217 = arith.addf %213, %216 : vector<1x8xf32>
    %218 = vector.extract_strided_slice %13 {offsets = [0, 5], sizes = [1, 1], strides = [1, 1]} : vector<1x8xf32> to vector<1x1xf32>
    %219 = vector.broadcast %218 : vector<1x1xf32> to vector<1x8xf32>
    %220 = arith.mulf %133, %219 : vector<1x8xf32>
    %221 = arith.addf %217, %220 : vector<1x8xf32>
    %222 = vector.extract_strided_slice %13 {offsets = [0, 6], sizes = [1, 1], strides = [1, 1]} : vector<1x8xf32> to vector<1x1xf32>
    %223 = vector.broadcast %222 : vector<1x1xf32> to vector<1x8xf32>
    %224 = arith.mulf %159, %223 : vector<1x8xf32>
    %225 = arith.addf %221, %224 : vector<1x8xf32>
    %226 = vector.extract_strided_slice %13 {offsets = [0, 7], sizes = [1, 1], strides = [1, 1]} : vector<1x8xf32> to vector<1x1xf32>
    %227 = vector.broadcast %226 : vector<1x1xf32> to vector<1x8xf32>
    %228 = arith.mulf %185, %227 : vector<1x8xf32>
    %229 = arith.addf %225, %228 : vector<1x8xf32>
    %cst_56 = arith.constant 0.000000e+00 : f32
    %230 = vector.shape_cast %229 : vector<1x8xf32> to vector<1x8xf32>
    %231 = vector.broadcast %230 : vector<1x8xf32> to vector<8x8xf32>
    %232 = vector.broadcast %cst_56 : f32 to vector<8x8xf32>
    %233 = arith.select %5, %231, %232 : vector<8x8xi1>, vector<8x8xf32>
    %cst_57 = arith.constant dense<0.000000e+00> : vector<8xf32>
    %234 = vector.multi_reduction <add>, %233, %cst_57 [1] : vector<8x8xf32> to vector<8xf32>
    %235 = vector.shape_cast %234 : vector<8xf32> to vector<8x1xf32>
    %236 = vector.broadcast %235 : vector<8x1xf32> to vector<8x8xf32>
    %237 = arith.addf %236, %0 : vector<8x8xf32>
    %cst_58 = arith.constant dense<0xFF800000> : vector<8xf32>
    %238 = vector.multi_reduction <maximumf>, %237, %cst_58 [0] : vector<8x8xf32> to vector<8xf32>
    %239 = vector.shape_cast %238 : vector<8xf32> to vector<1x8xf32>
    %240 = vector.broadcast %239 : vector<1x8xf32> to vector<8x8xf32>
    %241 = arith.cmpf oge, %237, %240 : vector<8x8xf32>
    %cst_59 = arith.constant 8.000000e+00 : f32
    %242 = vector.broadcast %cst_59 : f32 to vector<8x8xf32>
    %243 = arith.select %241, %2, %242 : vector<8x8xi1>, vector<8x8xf32>
    %cst_60 = arith.constant dense<0x7F800000> : vector<8xf32>
    %244 = vector.multi_reduction <minimumf>, %243, %cst_60 [0] : vector<8x8xf32> to vector<8xf32>
    %245 = vector.shape_cast %244 : vector<8xf32> to vector<1x8xf32>
    %cst_61 = arith.constant 7.000000e+00 : f32
    %246 = vector.broadcast %cst_61 : f32 to vector<1x8xf32>
    %247 = arith.cmpf oeq, %7, %246 : vector<1x8xf32>
    %cst_62 = arith.constant 0.000000e+00 : f32
    %248 = vector.broadcast %cst_62 : f32 to vector<1x8xf32>
    %249 = arith.select %247, %245, %248 : vector<1x8xi1>, vector<1x8xf32>
    %cst_63 = arith.constant dense<0.000000e+00> : vector<1xf32>
    %250 = vector.multi_reduction <add>, %249, %cst_63 [1] : vector<1x8xf32> to vector<1xf32>
    %251 = vector.shape_cast %250 : vector<1xf32> to vector<1x1xf32>
    %cst_64 = arith.constant 7.000000e+00 : f32
    %252 = vector.broadcast %cst_64 : f32 to vector<1x8xf32>
    %253 = arith.cmpf oeq, %9, %252 : vector<1x8xf32>
    %254 = vector.shape_cast %251 : vector<1x1xf32> to vector<1x1xf32>
    %255 = vector.broadcast %254 : vector<1x1xf32> to vector<1x8xf32>
    %cst_65 = arith.constant 0.000000e+00 : f32
    %256 = vector.broadcast %cst_65 : f32 to vector<1x8xf32>
    %257 = arith.select %253, %255, %256 : vector<1x8xi1>, vector<1x8xf32>
    %258 = vector.extract_strided_slice %13 {offsets = [0, 6], sizes = [1, 1], strides = [1, 1]} : vector<1x8xf32> to vector<1x1xf32>
    %cst_66 = arith.constant 5.000000e-01 : f32
    %259 = vector.broadcast %cst_66 : f32 to vector<1x1xf32>
    %260 = arith.cmpf ogt, %258, %259 : vector<1x1xf32>
    %261 = vector.shape_cast %251 : vector<1x1xf32> to vector<1x1xf32>
    %262 = vector.broadcast %261 : vector<1x1xf32> to vector<1x8xf32>
    %263 = vector.shape_cast %260 : vector<1x1xi1> to vector<1x1xi1>
    %264 = vector.broadcast %263 : vector<1x1xi1> to vector<1x8xi1>
    %265 = arith.select %264, %262, %198 : vector<1x8xi1>, vector<1x8xf32>
    %266 = vector.broadcast %251 : vector<1x1xf32> to vector<1x8xf32>
    %267 = arith.cmpf oeq, %7, %266 : vector<1x8xf32>
    %cst_67 = arith.constant 0.000000e+00 : f32
    %268 = vector.broadcast %cst_67 : f32 to vector<1x8xf32>
    %269 = arith.select %267, %265, %268 : vector<1x8xi1>, vector<1x8xf32>
    %cst_68 = arith.constant dense<0.000000e+00> : vector<1xf32>
    %270 = vector.multi_reduction <add>, %269, %cst_68 [1] : vector<1x8xf32> to vector<1xf32>
    %271 = vector.shape_cast %270 : vector<1xf32> to vector<1x1xf32>
    %cst_69 = arith.constant 6.000000e+00 : f32
    %272 = vector.broadcast %cst_69 : f32 to vector<1x8xf32>
    %273 = arith.cmpf oeq, %9, %272 : vector<1x8xf32>
    %274 = vector.shape_cast %271 : vector<1x1xf32> to vector<1x1xf32>
    %275 = vector.broadcast %274 : vector<1x1xf32> to vector<1x8xf32>
    %276 = arith.select %273, %275, %257 : vector<1x8xi1>, vector<1x8xf32>
    %277 = vector.extract_strided_slice %13 {offsets = [0, 5], sizes = [1, 1], strides = [1, 1]} : vector<1x8xf32> to vector<1x1xf32>
    %cst_70 = arith.constant 5.000000e-01 : f32
    %278 = vector.broadcast %cst_70 : f32 to vector<1x1xf32>
    %279 = arith.cmpf ogt, %277, %278 : vector<1x1xf32>
    %280 = vector.shape_cast %271 : vector<1x1xf32> to vector<1x1xf32>
    %281 = vector.broadcast %280 : vector<1x1xf32> to vector<1x8xf32>
    %282 = vector.shape_cast %279 : vector<1x1xi1> to vector<1x1xi1>
    %283 = vector.broadcast %282 : vector<1x1xi1> to vector<1x8xi1>
    %284 = arith.select %283, %281, %172 : vector<1x8xi1>, vector<1x8xf32>
    %285 = vector.broadcast %271 : vector<1x1xf32> to vector<1x8xf32>
    %286 = arith.cmpf oeq, %7, %285 : vector<1x8xf32>
    %cst_71 = arith.constant 0.000000e+00 : f32
    %287 = vector.broadcast %cst_71 : f32 to vector<1x8xf32>
    %288 = arith.select %286, %284, %287 : vector<1x8xi1>, vector<1x8xf32>
    %cst_72 = arith.constant dense<0.000000e+00> : vector<1xf32>
    %289 = vector.multi_reduction <add>, %288, %cst_72 [1] : vector<1x8xf32> to vector<1xf32>
    %290 = vector.shape_cast %289 : vector<1xf32> to vector<1x1xf32>
    %cst_73 = arith.constant 5.000000e+00 : f32
    %291 = vector.broadcast %cst_73 : f32 to vector<1x8xf32>
    %292 = arith.cmpf oeq, %9, %291 : vector<1x8xf32>
    %293 = vector.shape_cast %290 : vector<1x1xf32> to vector<1x1xf32>
    %294 = vector.broadcast %293 : vector<1x1xf32> to vector<1x8xf32>
    %295 = arith.select %292, %294, %276 : vector<1x8xi1>, vector<1x8xf32>
    %296 = vector.extract_strided_slice %13 {offsets = [0, 4], sizes = [1, 1], strides = [1, 1]} : vector<1x8xf32> to vector<1x1xf32>
    %cst_74 = arith.constant 5.000000e-01 : f32
    %297 = vector.broadcast %cst_74 : f32 to vector<1x1xf32>
    %298 = arith.cmpf ogt, %296, %297 : vector<1x1xf32>
    %299 = vector.shape_cast %290 : vector<1x1xf32> to vector<1x1xf32>
    %300 = vector.broadcast %299 : vector<1x1xf32> to vector<1x8xf32>
    %301 = vector.shape_cast %298 : vector<1x1xi1> to vector<1x1xi1>
    %302 = vector.broadcast %301 : vector<1x1xi1> to vector<1x8xi1>
    %303 = arith.select %302, %300, %146 : vector<1x8xi1>, vector<1x8xf32>
    %304 = vector.broadcast %290 : vector<1x1xf32> to vector<1x8xf32>
    %305 = arith.cmpf oeq, %7, %304 : vector<1x8xf32>
    %cst_75 = arith.constant 0.000000e+00 : f32
    %306 = vector.broadcast %cst_75 : f32 to vector<1x8xf32>
    %307 = arith.select %305, %303, %306 : vector<1x8xi1>, vector<1x8xf32>
    %cst_76 = arith.constant dense<0.000000e+00> : vector<1xf32>
    %308 = vector.multi_reduction <add>, %307, %cst_76 [1] : vector<1x8xf32> to vector<1xf32>
    %309 = vector.shape_cast %308 : vector<1xf32> to vector<1x1xf32>
    %cst_77 = arith.constant 4.000000e+00 : f32
    %310 = vector.broadcast %cst_77 : f32 to vector<1x8xf32>
    %311 = arith.cmpf oeq, %9, %310 : vector<1x8xf32>
    %312 = vector.shape_cast %309 : vector<1x1xf32> to vector<1x1xf32>
    %313 = vector.broadcast %312 : vector<1x1xf32> to vector<1x8xf32>
    %314 = arith.select %311, %313, %295 : vector<1x8xi1>, vector<1x8xf32>
    %315 = vector.extract_strided_slice %13 {offsets = [0, 3], sizes = [1, 1], strides = [1, 1]} : vector<1x8xf32> to vector<1x1xf32>
    %cst_78 = arith.constant 5.000000e-01 : f32
    %316 = vector.broadcast %cst_78 : f32 to vector<1x1xf32>
    %317 = arith.cmpf ogt, %315, %316 : vector<1x1xf32>
    %318 = vector.shape_cast %309 : vector<1x1xf32> to vector<1x1xf32>
    %319 = vector.broadcast %318 : vector<1x1xf32> to vector<1x8xf32>
    %320 = vector.shape_cast %317 : vector<1x1xi1> to vector<1x1xi1>
    %321 = vector.broadcast %320 : vector<1x1xi1> to vector<1x8xi1>
    %322 = arith.select %321, %319, %120 : vector<1x8xi1>, vector<1x8xf32>
    %323 = vector.broadcast %309 : vector<1x1xf32> to vector<1x8xf32>
    %324 = arith.cmpf oeq, %7, %323 : vector<1x8xf32>
    %cst_79 = arith.constant 0.000000e+00 : f32
    %325 = vector.broadcast %cst_79 : f32 to vector<1x8xf32>
    %326 = arith.select %324, %322, %325 : vector<1x8xi1>, vector<1x8xf32>
    %cst_80 = arith.constant dense<0.000000e+00> : vector<1xf32>
    %327 = vector.multi_reduction <add>, %326, %cst_80 [1] : vector<1x8xf32> to vector<1xf32>
    %328 = vector.shape_cast %327 : vector<1xf32> to vector<1x1xf32>
    %cst_81 = arith.constant 3.000000e+00 : f32
    %329 = vector.broadcast %cst_81 : f32 to vector<1x8xf32>
    %330 = arith.cmpf oeq, %9, %329 : vector<1x8xf32>
    %331 = vector.shape_cast %328 : vector<1x1xf32> to vector<1x1xf32>
    %332 = vector.broadcast %331 : vector<1x1xf32> to vector<1x8xf32>
    %333 = arith.select %330, %332, %314 : vector<1x8xi1>, vector<1x8xf32>
    %334 = vector.extract_strided_slice %13 {offsets = [0, 2], sizes = [1, 1], strides = [1, 1]} : vector<1x8xf32> to vector<1x1xf32>
    %cst_82 = arith.constant 5.000000e-01 : f32
    %335 = vector.broadcast %cst_82 : f32 to vector<1x1xf32>
    %336 = arith.cmpf ogt, %334, %335 : vector<1x1xf32>
    %337 = vector.shape_cast %328 : vector<1x1xf32> to vector<1x1xf32>
    %338 = vector.broadcast %337 : vector<1x1xf32> to vector<1x8xf32>
    %339 = vector.shape_cast %336 : vector<1x1xi1> to vector<1x1xi1>
    %340 = vector.broadcast %339 : vector<1x1xi1> to vector<1x8xi1>
    %341 = arith.select %340, %338, %94 : vector<1x8xi1>, vector<1x8xf32>
    %342 = vector.broadcast %328 : vector<1x1xf32> to vector<1x8xf32>
    %343 = arith.cmpf oeq, %7, %342 : vector<1x8xf32>
    %cst_83 = arith.constant 0.000000e+00 : f32
    %344 = vector.broadcast %cst_83 : f32 to vector<1x8xf32>
    %345 = arith.select %343, %341, %344 : vector<1x8xi1>, vector<1x8xf32>
    %cst_84 = arith.constant dense<0.000000e+00> : vector<1xf32>
    %346 = vector.multi_reduction <add>, %345, %cst_84 [1] : vector<1x8xf32> to vector<1xf32>
    %347 = vector.shape_cast %346 : vector<1xf32> to vector<1x1xf32>
    %cst_85 = arith.constant 2.000000e+00 : f32
    %348 = vector.broadcast %cst_85 : f32 to vector<1x8xf32>
    %349 = arith.cmpf oeq, %9, %348 : vector<1x8xf32>
    %350 = vector.shape_cast %347 : vector<1x1xf32> to vector<1x1xf32>
    %351 = vector.broadcast %350 : vector<1x1xf32> to vector<1x8xf32>
    %352 = arith.select %349, %351, %333 : vector<1x8xi1>, vector<1x8xf32>
    %353 = vector.extract_strided_slice %13 {offsets = [0, 1], sizes = [1, 1], strides = [1, 1]} : vector<1x8xf32> to vector<1x1xf32>
    %cst_86 = arith.constant 5.000000e-01 : f32
    %354 = vector.broadcast %cst_86 : f32 to vector<1x1xf32>
    %355 = arith.cmpf ogt, %353, %354 : vector<1x1xf32>
    %356 = vector.shape_cast %347 : vector<1x1xf32> to vector<1x1xf32>
    %357 = vector.broadcast %356 : vector<1x1xf32> to vector<1x8xf32>
    %358 = vector.shape_cast %355 : vector<1x1xi1> to vector<1x1xi1>
    %359 = vector.broadcast %358 : vector<1x1xi1> to vector<1x8xi1>
    %360 = arith.select %359, %357, %68 : vector<1x8xi1>, vector<1x8xf32>
    %361 = vector.broadcast %347 : vector<1x1xf32> to vector<1x8xf32>
    %362 = arith.cmpf oeq, %7, %361 : vector<1x8xf32>
    %cst_87 = arith.constant 0.000000e+00 : f32
    %363 = vector.broadcast %cst_87 : f32 to vector<1x8xf32>
    %364 = arith.select %362, %360, %363 : vector<1x8xi1>, vector<1x8xf32>
    %cst_88 = arith.constant dense<0.000000e+00> : vector<1xf32>
    %365 = vector.multi_reduction <add>, %364, %cst_88 [1] : vector<1x8xf32> to vector<1xf32>
    %366 = vector.shape_cast %365 : vector<1xf32> to vector<1x1xf32>
    %cst_89 = arith.constant 1.000000e+00 : f32
    %367 = vector.broadcast %cst_89 : f32 to vector<1x8xf32>
    %368 = arith.cmpf oeq, %9, %367 : vector<1x8xf32>
    %369 = vector.shape_cast %366 : vector<1x1xf32> to vector<1x1xf32>
    %370 = vector.broadcast %369 : vector<1x1xf32> to vector<1x8xf32>
    %371 = arith.select %368, %370, %352 : vector<1x8xi1>, vector<1x8xf32>
    %372 = vector.extract_strided_slice %13 {offsets = [0, 0], sizes = [1, 1], strides = [1, 1]} : vector<1x8xf32> to vector<1x1xf32>
    %cst_90 = arith.constant 5.000000e-01 : f32
    %373 = vector.broadcast %cst_90 : f32 to vector<1x1xf32>
    %374 = arith.cmpf ogt, %372, %373 : vector<1x1xf32>
    %375 = vector.shape_cast %366 : vector<1x1xf32> to vector<1x1xf32>
    %376 = vector.broadcast %375 : vector<1x1xf32> to vector<1x8xf32>
    %377 = vector.shape_cast %374 : vector<1x1xi1> to vector<1x1xi1>
    %378 = vector.broadcast %377 : vector<1x1xi1> to vector<1x8xi1>
    %379 = arith.select %378, %376, %42 : vector<1x8xi1>, vector<1x8xf32>
    %380 = vector.broadcast %366 : vector<1x1xf32> to vector<1x8xf32>
    %381 = arith.cmpf oeq, %7, %380 : vector<1x8xf32>
    %cst_91 = arith.constant 0.000000e+00 : f32
    %382 = vector.broadcast %cst_91 : f32 to vector<1x8xf32>
    %383 = arith.select %381, %379, %382 : vector<1x8xi1>, vector<1x8xf32>
    %cst_92 = arith.constant dense<0.000000e+00> : vector<1xf32>
    %384 = vector.multi_reduction <add>, %383, %cst_92 [1] : vector<1x8xf32> to vector<1xf32>
    %385 = vector.shape_cast %384 : vector<1xf32> to vector<1x1xf32>
    %cst_93 = arith.constant 0.000000e+00 : f32
    %386 = vector.broadcast %cst_93 : f32 to vector<1x8xf32>
    %387 = arith.cmpf oeq, %9, %386 : vector<1x8xf32>
    %388 = vector.shape_cast %385 : vector<1x1xf32> to vector<1x1xf32>
    %389 = vector.broadcast %388 : vector<1x1xf32> to vector<1x8xf32>
    %390 = arith.select %387, %389, %371 : vector<1x8xi1>, vector<1x8xf32>
    %391 = arith.fptosi %390 : vector<1x8xf32> to vector<1x8xi32>
    %c0_94 = arith.constant 0 : index
    %c0_95 = arith.constant 0 : index
    %392 = vector.load %arg4[%c0_94, %c0_95] : memref<2x8xi32, #tpu.memory_space<vmem>>, vector<1x8xi32>
    tpu.vector_store %arg4[%c0_94, %c0_95], %391 {strides = array<i32>} : memref<2x8xi32, #tpu.memory_space<vmem>>, vector<1x8xi32>,
    %c1 = arith.constant 1 : index
    %c0_96 = arith.constant 0 : index
    %c0_97 = arith.constant 0 : index
    %393 = vector.load %arg0[%c1, %c0_96, %c0_97] : memref<2x8x8xf32, #tpu.memory_space<vmem>>, vector<1x8x8xf32>
    %394 = vector.shape_cast %393 : vector<1x8x8xf32> to vector<8x8xf32>
    %c1_98 = arith.constant 1 : index
    %c0_99 = arith.constant 0 : index
    %395 = vector.load %arg2[%c1_98, %c0_99] : memref<2x8xf32, #tpu.memory_space<vmem>>, vector<1x8xf32>
    %c1_100 = arith.constant 1 : index
    %c0_101 = arith.constant 0 : index
    %396 = vector.load %arg3[%c1_100, %c0_101] : memref<2x8xf32, #tpu.memory_space<vmem>>, vector<1x8xf32>
    %397 = vector.extract_strided_slice %394 {offsets = [0, 0], sizes = [1, 8], strides = [1, 1]} : vector<8x8xf32> to vector<1x8xf32>
    %398 = vector.extract_strided_slice %0 {offsets = [6, 0], sizes = [1, 8], strides = [1, 1]} : vector<8x8xf32> to vector<1x8xf32>
    %399 = arith.addf %397, %398 : vector<1x8xf32>
    %cst_102 = arith.constant 0.000000e+00 : f32
    %400 = vector.shape_cast %399 : vector<1x8xf32> to vector<1x8xf32>
    %401 = vector.broadcast %400 : vector<1x8xf32> to vector<8x8xf32>
    %402 = vector.broadcast %cst_102 : f32 to vector<8x8xf32>
    %403 = arith.select %5, %401, %402 : vector<8x8xi1>, vector<8x8xf32>
    %cst_103 = arith.constant dense<0.000000e+00> : vector<8xf32>
    %404 = vector.multi_reduction <add>, %403, %cst_103 [1] : vector<8x8xf32> to vector<8xf32>
    %405 = vector.shape_cast %404 : vector<8xf32> to vector<8x1xf32>
    %406 = vector.broadcast %405 : vector<8x1xf32> to vector<8x8xf32>
    %407 = arith.addf %406, %0 : vector<8x8xf32>
    %408 = vector.extract_strided_slice %394 {offsets = [1, 0], sizes = [1, 8], strides = [1, 1]} : vector<8x8xf32> to vector<1x8xf32>
    %409 = vector.broadcast %408 : vector<1x8xf32> to vector<8x8xf32>
    %410 = arith.addf %407, %409 : vector<8x8xf32>
    %cst_104 = arith.constant dense<0xFF800000> : vector<8xf32>
    %411 = vector.multi_reduction <maximumf>, %410, %cst_104 [0] : vector<8x8xf32> to vector<8xf32>
    %412 = vector.shape_cast %411 : vector<8xf32> to vector<1x8xf32>
    %413 = vector.broadcast %412 : vector<1x8xf32> to vector<8x8xf32>
    %414 = arith.cmpf oge, %410, %413 : vector<8x8xf32>
    %cst_105 = arith.constant 8.000000e+00 : f32
    %415 = vector.broadcast %cst_105 : f32 to vector<8x8xf32>
    %416 = arith.select %414, %2, %415 : vector<8x8xi1>, vector<8x8xf32>
    %cst_106 = arith.constant dense<0x7F800000> : vector<8xf32>
    %417 = vector.multi_reduction <minimumf>, %416, %cst_106 [0] : vector<8x8xf32> to vector<8xf32>
    %418 = vector.shape_cast %417 : vector<8xf32> to vector<1x8xf32>
    %419 = vector.extract_strided_slice %395 {offsets = [0, 1], sizes = [1, 1], strides = [1, 1]} : vector<1x8xf32> to vector<1x1xf32>
    %cst_107 = arith.constant 5.000000e-01 : f32
    %420 = vector.broadcast %cst_107 : f32 to vector<1x1xf32>
    %421 = arith.cmpf ogt, %419, %420 : vector<1x1xf32>
    %cst_108 = arith.constant 0.000000e+00 : f32
    %422 = vector.shape_cast %421 : vector<1x1xi1> to vector<1x1xi1>
    %423 = vector.broadcast %422 : vector<1x1xi1> to vector<1x8xi1>
    %424 = vector.broadcast %cst_108 : f32 to vector<1x8xf32>
    %425 = arith.select %423, %418, %424 : vector<1x8xi1>, vector<1x8xf32>
    %cst_109 = arith.constant 0.000000e+00 : f32
    %426 = vector.shape_cast %412 : vector<1x8xf32> to vector<1x8xf32>
    %427 = vector.broadcast %426 : vector<1x8xf32> to vector<8x8xf32>
    %428 = vector.broadcast %cst_109 : f32 to vector<8x8xf32>
    %429 = arith.select %5, %427, %428 : vector<8x8xi1>, vector<8x8xf32>
    %cst_110 = arith.constant dense<0.000000e+00> : vector<8xf32>
    %430 = vector.multi_reduction <add>, %429, %cst_110 [1] : vector<8x8xf32> to vector<8xf32>
    %431 = vector.shape_cast %430 : vector<8xf32> to vector<8x1xf32>
    %432 = vector.broadcast %431 : vector<8x1xf32> to vector<8x8xf32>
    %433 = arith.addf %432, %0 : vector<8x8xf32>
    %434 = vector.extract_strided_slice %394 {offsets = [2, 0], sizes = [1, 8], strides = [1, 1]} : vector<8x8xf32> to vector<1x8xf32>
    %435 = vector.broadcast %434 : vector<1x8xf32> to vector<8x8xf32>
    %436 = arith.addf %433, %435 : vector<8x8xf32>
    %cst_111 = arith.constant dense<0xFF800000> : vector<8xf32>
    %437 = vector.multi_reduction <maximumf>, %436, %cst_111 [0] : vector<8x8xf32> to vector<8xf32>
    %438 = vector.shape_cast %437 : vector<8xf32> to vector<1x8xf32>
    %439 = vector.broadcast %438 : vector<1x8xf32> to vector<8x8xf32>
    %440 = arith.cmpf oge, %436, %439 : vector<8x8xf32>
    %cst_112 = arith.constant 8.000000e+00 : f32
    %441 = vector.broadcast %cst_112 : f32 to vector<8x8xf32>
    %442 = arith.select %440, %2, %441 : vector<8x8xi1>, vector<8x8xf32>
    %cst_113 = arith.constant dense<0x7F800000> : vector<8xf32>
    %443 = vector.multi_reduction <minimumf>, %442, %cst_113 [0] : vector<8x8xf32> to vector<8xf32>
    %444 = vector.shape_cast %443 : vector<8xf32> to vector<1x8xf32>
    %445 = vector.extract_strided_slice %395 {offsets = [0, 2], sizes = [1, 1], strides = [1, 1]} : vector<1x8xf32> to vector<1x1xf32>
    %cst_114 = arith.constant 5.000000e-01 : f32
    %446 = vector.broadcast %cst_114 : f32 to vector<1x1xf32>
    %447 = arith.cmpf ogt, %445, %446 : vector<1x1xf32>
    %cst_115 = arith.constant 0.000000e+00 : f32
    %448 = vector.shape_cast %447 : vector<1x1xi1> to vector<1x1xi1>
    %449 = vector.broadcast %448 : vector<1x1xi1> to vector<1x8xi1>
    %450 = vector.broadcast %cst_115 : f32 to vector<1x8xf32>
    %451 = arith.select %449, %444, %450 : vector<1x8xi1>, vector<1x8xf32>
    %cst_116 = arith.constant 0.000000e+00 : f32
    %452 = vector.shape_cast %438 : vector<1x8xf32> to vector<1x8xf32>
    %453 = vector.broadcast %452 : vector<1x8xf32> to vector<8x8xf32>
    %454 = vector.broadcast %cst_116 : f32 to vector<8x8xf32>
    %455 = arith.select %5, %453, %454 : vector<8x8xi1>, vector<8x8xf32>
    %cst_117 = arith.constant dense<0.000000e+00> : vector<8xf32>
    %456 = vector.multi_reduction <add>, %455, %cst_117 [1] : vector<8x8xf32> to vector<8xf32>
    %457 = vector.shape_cast %456 : vector<8xf32> to vector<8x1xf32>
    %458 = vector.broadcast %457 : vector<8x1xf32> to vector<8x8xf32>
    %459 = arith.addf %458, %0 : vector<8x8xf32>
    %460 = vector.extract_strided_slice %394 {offsets = [3, 0], sizes = [1, 8], strides = [1, 1]} : vector<8x8xf32> to vector<1x8xf32>
    %461 = vector.broadcast %460 : vector<1x8xf32> to vector<8x8xf32>
    %462 = arith.addf %459, %461 : vector<8x8xf32>
    %cst_118 = arith.constant dense<0xFF800000> : vector<8xf32>
    %463 = vector.multi_reduction <maximumf>, %462, %cst_118 [0] : vector<8x8xf32> to vector<8xf32>
    %464 = vector.shape_cast %463 : vector<8xf32> to vector<1x8xf32>
    %465 = vector.broadcast %464 : vector<1x8xf32> to vector<8x8xf32>
    %466 = arith.cmpf oge, %462, %465 : vector<8x8xf32>
    %cst_119 = arith.constant 8.000000e+00 : f32
    %467 = vector.broadcast %cst_119 : f32 to vector<8x8xf32>
    %468 = arith.select %466, %2, %467 : vector<8x8xi1>, vector<8x8xf32>
    %cst_120 = arith.constant dense<0x7F800000> : vector<8xf32>
    %469 = vector.multi_reduction <minimumf>, %468, %cst_120 [0] : vector<8x8xf32> to vector<8xf32>
    %470 = vector.shape_cast %469 : vector<8xf32> to vector<1x8xf32>
    %471 = vector.extract_strided_slice %395 {offsets = [0, 3], sizes = [1, 1], strides = [1, 1]} : vector<1x8xf32> to vector<1x1xf32>
    %cst_121 = arith.constant 5.000000e-01 : f32
    %472 = vector.broadcast %cst_121 : f32 to vector<1x1xf32>
    %473 = arith.cmpf ogt, %471, %472 : vector<1x1xf32>
    %cst_122 = arith.constant 0.000000e+00 : f32
    %474 = vector.shape_cast %473 : vector<1x1xi1> to vector<1x1xi1>
    %475 = vector.broadcast %474 : vector<1x1xi1> to vector<1x8xi1>
    %476 = vector.broadcast %cst_122 : f32 to vector<1x8xf32>
    %477 = arith.select %475, %470, %476 : vector<1x8xi1>, vector<1x8xf32>
    %cst_123 = arith.constant 0.000000e+00 : f32
    %478 = vector.shape_cast %464 : vector<1x8xf32> to vector<1x8xf32>
    %479 = vector.broadcast %478 : vector<1x8xf32> to vector<8x8xf32>
    %480 = vector.broadcast %cst_123 : f32 to vector<8x8xf32>
    %481 = arith.select %5, %479, %480 : vector<8x8xi1>, vector<8x8xf32>
    %cst_124 = arith.constant dense<0.000000e+00> : vector<8xf32>
    %482 = vector.multi_reduction <add>, %481, %cst_124 [1] : vector<8x8xf32> to vector<8xf32>
    %483 = vector.shape_cast %482 : vector<8xf32> to vector<8x1xf32>
    %484 = vector.broadcast %483 : vector<8x1xf32> to vector<8x8xf32>
    %485 = arith.addf %484, %0 : vector<8x8xf32>
    %486 = vector.extract_strided_slice %394 {offsets = [4, 0], sizes = [1, 8], strides = [1, 1]} : vector<8x8xf32> to vector<1x8xf32>
    %487 = vector.broadcast %486 : vector<1x8xf32> to vector<8x8xf32>
    %488 = arith.addf %485, %487 : vector<8x8xf32>
    %cst_125 = arith.constant dense<0xFF800000> : vector<8xf32>
    %489 = vector.multi_reduction <maximumf>, %488, %cst_125 [0] : vector<8x8xf32> to vector<8xf32>
    %490 = vector.shape_cast %489 : vector<8xf32> to vector<1x8xf32>
    %491 = vector.broadcast %490 : vector<1x8xf32> to vector<8x8xf32>
    %492 = arith.cmpf oge, %488, %491 : vector<8x8xf32>
    %cst_126 = arith.constant 8.000000e+00 : f32
    %493 = vector.broadcast %cst_126 : f32 to vector<8x8xf32>
    %494 = arith.select %492, %2, %493 : vector<8x8xi1>, vector<8x8xf32>
    %cst_127 = arith.constant dense<0x7F800000> : vector<8xf32>
    %495 = vector.multi_reduction <minimumf>, %494, %cst_127 [0] : vector<8x8xf32> to vector<8xf32>
    %496 = vector.shape_cast %495 : vector<8xf32> to vector<1x8xf32>
    %497 = vector.extract_strided_slice %395 {offsets = [0, 4], sizes = [1, 1], strides = [1, 1]} : vector<1x8xf32> to vector<1x1xf32>
    %cst_128 = arith.constant 5.000000e-01 : f32
    %498 = vector.broadcast %cst_128 : f32 to vector<1x1xf32>
    %499 = arith.cmpf ogt, %497, %498 : vector<1x1xf32>
    %cst_129 = arith.constant 0.000000e+00 : f32
    %500 = vector.shape_cast %499 : vector<1x1xi1> to vector<1x1xi1>
    %501 = vector.broadcast %500 : vector<1x1xi1> to vector<1x8xi1>
    %502 = vector.broadcast %cst_129 : f32 to vector<1x8xf32>
    %503 = arith.select %501, %496, %502 : vector<1x8xi1>, vector<1x8xf32>
    %cst_130 = arith.constant 0.000000e+00 : f32
    %504 = vector.shape_cast %490 : vector<1x8xf32> to vector<1x8xf32>
    %505 = vector.broadcast %504 : vector<1x8xf32> to vector<8x8xf32>
    %506 = vector.broadcast %cst_130 : f32 to vector<8x8xf32>
    %507 = arith.select %5, %505, %506 : vector<8x8xi1>, vector<8x8xf32>
    %cst_131 = arith.constant dense<0.000000e+00> : vector<8xf32>
    %508 = vector.multi_reduction <add>, %507, %cst_131 [1] : vector<8x8xf32> to vector<8xf32>
    %509 = vector.shape_cast %508 : vector<8xf32> to vector<8x1xf32>
    %510 = vector.broadcast %509 : vector<8x1xf32> to vector<8x8xf32>
    %511 = arith.addf %510, %0 : vector<8x8xf32>
    %512 = vector.extract_strided_slice %394 {offsets = [5, 0], sizes = [1, 8], strides = [1, 1]} : vector<8x8xf32> to vector<1x8xf32>
    %513 = vector.broadcast %512 : vector<1x8xf32> to vector<8x8xf32>
    %514 = arith.addf %511, %513 : vector<8x8xf32>
    %cst_132 = arith.constant dense<0xFF800000> : vector<8xf32>
    %515 = vector.multi_reduction <maximumf>, %514, %cst_132 [0] : vector<8x8xf32> to vector<8xf32>
    %516 = vector.shape_cast %515 : vector<8xf32> to vector<1x8xf32>
    %517 = vector.broadcast %516 : vector<1x8xf32> to vector<8x8xf32>
    %518 = arith.cmpf oge, %514, %517 : vector<8x8xf32>
    %cst_133 = arith.constant 8.000000e+00 : f32
    %519 = vector.broadcast %cst_133 : f32 to vector<8x8xf32>
    %520 = arith.select %518, %2, %519 : vector<8x8xi1>, vector<8x8xf32>
    %cst_134 = arith.constant dense<0x7F800000> : vector<8xf32>
    %521 = vector.multi_reduction <minimumf>, %520, %cst_134 [0] : vector<8x8xf32> to vector<8xf32>
    %522 = vector.shape_cast %521 : vector<8xf32> to vector<1x8xf32>
    %523 = vector.extract_strided_slice %395 {offsets = [0, 5], sizes = [1, 1], strides = [1, 1]} : vector<1x8xf32> to vector<1x1xf32>
    %cst_135 = arith.constant 5.000000e-01 : f32
    %524 = vector.broadcast %cst_135 : f32 to vector<1x1xf32>
    %525 = arith.cmpf ogt, %523, %524 : vector<1x1xf32>
    %cst_136 = arith.constant 0.000000e+00 : f32
    %526 = vector.shape_cast %525 : vector<1x1xi1> to vector<1x1xi1>
    %527 = vector.broadcast %526 : vector<1x1xi1> to vector<1x8xi1>
    %528 = vector.broadcast %cst_136 : f32 to vector<1x8xf32>
    %529 = arith.select %527, %522, %528 : vector<1x8xi1>, vector<1x8xf32>
    %cst_137 = arith.constant 0.000000e+00 : f32
    %530 = vector.shape_cast %516 : vector<1x8xf32> to vector<1x8xf32>
    %531 = vector.broadcast %530 : vector<1x8xf32> to vector<8x8xf32>
    %532 = vector.broadcast %cst_137 : f32 to vector<8x8xf32>
    %533 = arith.select %5, %531, %532 : vector<8x8xi1>, vector<8x8xf32>
    %cst_138 = arith.constant dense<0.000000e+00> : vector<8xf32>
    %534 = vector.multi_reduction <add>, %533, %cst_138 [1] : vector<8x8xf32> to vector<8xf32>
    %535 = vector.shape_cast %534 : vector<8xf32> to vector<8x1xf32>
    %536 = vector.broadcast %535 : vector<8x1xf32> to vector<8x8xf32>
    %537 = arith.addf %536, %0 : vector<8x8xf32>
    %538 = vector.extract_strided_slice %394 {offsets = [6, 0], sizes = [1, 8], strides = [1, 1]} : vector<8x8xf32> to vector<1x8xf32>
    %539 = vector.broadcast %538 : vector<1x8xf32> to vector<8x8xf32>
    %540 = arith.addf %537, %539 : vector<8x8xf32>
    %cst_139 = arith.constant dense<0xFF800000> : vector<8xf32>
    %541 = vector.multi_reduction <maximumf>, %540, %cst_139 [0] : vector<8x8xf32> to vector<8xf32>
    %542 = vector.shape_cast %541 : vector<8xf32> to vector<1x8xf32>
    %543 = vector.broadcast %542 : vector<1x8xf32> to vector<8x8xf32>
    %544 = arith.cmpf oge, %540, %543 : vector<8x8xf32>
    %cst_140 = arith.constant 8.000000e+00 : f32
    %545 = vector.broadcast %cst_140 : f32 to vector<8x8xf32>
    %546 = arith.select %544, %2, %545 : vector<8x8xi1>, vector<8x8xf32>
    %cst_141 = arith.constant dense<0x7F800000> : vector<8xf32>
    %547 = vector.multi_reduction <minimumf>, %546, %cst_141 [0] : vector<8x8xf32> to vector<8xf32>
    %548 = vector.shape_cast %547 : vector<8xf32> to vector<1x8xf32>
    %549 = vector.extract_strided_slice %395 {offsets = [0, 6], sizes = [1, 1], strides = [1, 1]} : vector<1x8xf32> to vector<1x1xf32>
    %cst_142 = arith.constant 5.000000e-01 : f32
    %550 = vector.broadcast %cst_142 : f32 to vector<1x1xf32>
    %551 = arith.cmpf ogt, %549, %550 : vector<1x1xf32>
    %cst_143 = arith.constant 0.000000e+00 : f32
    %552 = vector.shape_cast %551 : vector<1x1xi1> to vector<1x1xi1>
    %553 = vector.broadcast %552 : vector<1x1xi1> to vector<1x8xi1>
    %554 = vector.broadcast %cst_143 : f32 to vector<1x8xf32>
    %555 = arith.select %553, %548, %554 : vector<1x8xi1>, vector<1x8xf32>
    %cst_144 = arith.constant 0.000000e+00 : f32
    %556 = vector.shape_cast %542 : vector<1x8xf32> to vector<1x8xf32>
    %557 = vector.broadcast %556 : vector<1x8xf32> to vector<8x8xf32>
    %558 = vector.broadcast %cst_144 : f32 to vector<8x8xf32>
    %559 = arith.select %5, %557, %558 : vector<8x8xi1>, vector<8x8xf32>
    %cst_145 = arith.constant dense<0.000000e+00> : vector<8xf32>
    %560 = vector.multi_reduction <add>, %559, %cst_145 [1] : vector<8x8xf32> to vector<8xf32>
    %561 = vector.shape_cast %560 : vector<8xf32> to vector<8x1xf32>
    %562 = vector.broadcast %561 : vector<8x1xf32> to vector<8x8xf32>
    %563 = arith.addf %562, %0 : vector<8x8xf32>
    %564 = vector.extract_strided_slice %394 {offsets = [7, 0], sizes = [1, 8], strides = [1, 1]} : vector<8x8xf32> to vector<1x8xf32>
    %565 = vector.broadcast %564 : vector<1x8xf32> to vector<8x8xf32>
    %566 = arith.addf %563, %565 : vector<8x8xf32>
    %cst_146 = arith.constant dense<0xFF800000> : vector<8xf32>
    %567 = vector.multi_reduction <maximumf>, %566, %cst_146 [0] : vector<8x8xf32> to vector<8xf32>
    %568 = vector.shape_cast %567 : vector<8xf32> to vector<1x8xf32>
    %569 = vector.broadcast %568 : vector<1x8xf32> to vector<8x8xf32>
    %570 = arith.cmpf oge, %566, %569 : vector<8x8xf32>
    %cst_147 = arith.constant 8.000000e+00 : f32
    %571 = vector.broadcast %cst_147 : f32 to vector<8x8xf32>
    %572 = arith.select %570, %2, %571 : vector<8x8xi1>, vector<8x8xf32>
    %cst_148 = arith.constant dense<0x7F800000> : vector<8xf32>
    %573 = vector.multi_reduction <minimumf>, %572, %cst_148 [0] : vector<8x8xf32> to vector<8xf32>
    %574 = vector.shape_cast %573 : vector<8xf32> to vector<1x8xf32>
    %575 = vector.extract_strided_slice %395 {offsets = [0, 7], sizes = [1, 1], strides = [1, 1]} : vector<1x8xf32> to vector<1x1xf32>
    %cst_149 = arith.constant 5.000000e-01 : f32
    %576 = vector.broadcast %cst_149 : f32 to vector<1x1xf32>
    %577 = arith.cmpf ogt, %575, %576 : vector<1x1xf32>
    %cst_150 = arith.constant 0.000000e+00 : f32
    %578 = vector.shape_cast %577 : vector<1x1xi1> to vector<1x1xi1>
    %579 = vector.broadcast %578 : vector<1x1xi1> to vector<1x8xi1>
    %580 = vector.broadcast %cst_150 : f32 to vector<1x8xf32>
    %581 = arith.select %579, %574, %580 : vector<1x8xi1>, vector<1x8xf32>
    %582 = vector.extract_strided_slice %396 {offsets = [0, 0], sizes = [1, 1], strides = [1, 1]} : vector<1x8xf32> to vector<1x1xf32>
    %583 = vector.broadcast %582 : vector<1x1xf32> to vector<1x8xf32>
    %584 = arith.mulf %399, %583 : vector<1x8xf32>
    %585 = vector.extract_strided_slice %396 {offsets = [0, 1], sizes = [1, 1], strides = [1, 1]} : vector<1x8xf32> to vector<1x1xf32>
    %586 = vector.broadcast %585 : vector<1x1xf32> to vector<1x8xf32>
    %587 = arith.mulf %412, %586 : vector<1x8xf32>
    %588 = arith.addf %584, %587 : vector<1x8xf32>
    %589 = vector.extract_strided_slice %396 {offsets = [0, 2], sizes = [1, 1], strides = [1, 1]} : vector<1x8xf32> to vector<1x1xf32>
    %590 = vector.broadcast %589 : vector<1x1xf32> to vector<1x8xf32>
    %591 = arith.mulf %438, %590 : vector<1x8xf32>
    %592 = arith.addf %588, %591 : vector<1x8xf32>
    %593 = vector.extract_strided_slice %396 {offsets = [0, 3], sizes = [1, 1], strides = [1, 1]} : vector<1x8xf32> to vector<1x1xf32>
    %594 = vector.broadcast %593 : vector<1x1xf32> to vector<1x8xf32>
    %595 = arith.mulf %464, %594 : vector<1x8xf32>
    %596 = arith.addf %592, %595 : vector<1x8xf32>
    %597 = vector.extract_strided_slice %396 {offsets = [0, 4], sizes = [1, 1], strides = [1, 1]} : vector<1x8xf32> to vector<1x1xf32>
    %598 = vector.broadcast %597 : vector<1x1xf32> to vector<1x8xf32>
    %599 = arith.mulf %490, %598 : vector<1x8xf32>
    %600 = arith.addf %596, %599 : vector<1x8xf32>
    %601 = vector.extract_strided_slice %396 {offsets = [0, 5], sizes = [1, 1], strides = [1, 1]} : vector<1x8xf32> to vector<1x1xf32>
    %602 = vector.broadcast %601 : vector<1x1xf32> to vector<1x8xf32>
    %603 = arith.mulf %516, %602 : vector<1x8xf32>
    %604 = arith.addf %600, %603 : vector<1x8xf32>
    %605 = vector.extract_strided_slice %396 {offsets = [0, 6], sizes = [1, 1], strides = [1, 1]} : vector<1x8xf32> to vector<1x1xf32>
    %606 = vector.broadcast %605 : vector<1x1xf32> to vector<1x8xf32>
    %607 = arith.mulf %542, %606 : vector<1x8xf32>
    %608 = arith.addf %604, %607 : vector<1x8xf32>
    %609 = vector.extract_strided_slice %396 {offsets = [0, 7], sizes = [1, 1], strides = [1, 1]} : vector<1x8xf32> to vector<1x1xf32>
    %610 = vector.broadcast %609 : vector<1x1xf32> to vector<1x8xf32>
    %611 = arith.mulf %568, %610 : vector<1x8xf32>
    %612 = arith.addf %608, %611 : vector<1x8xf32>
    %cst_151 = arith.constant 0.000000e+00 : f32
    %613 = vector.shape_cast %612 : vector<1x8xf32> to vector<1x8xf32>
    %614 = vector.broadcast %613 : vector<1x8xf32> to vector<8x8xf32>
    %615 = vector.broadcast %cst_151 : f32 to vector<8x8xf32>
    %616 = arith.select %5, %614, %615 : vector<8x8xi1>, vector<8x8xf32>
    %cst_152 = arith.constant dense<0.000000e+00> : vector<8xf32>
    %617 = vector.multi_reduction <add>, %616, %cst_152 [1] : vector<8x8xf32> to vector<8xf32>
    %618 = vector.shape_cast %617 : vector<8xf32> to vector<8x1xf32>
    %619 = vector.broadcast %618 : vector<8x1xf32> to vector<8x8xf32>
    %620 = arith.addf %619, %0 : vector<8x8xf32>
    %cst_153 = arith.constant dense<0xFF800000> : vector<8xf32>
    %621 = vector.multi_reduction <maximumf>, %620, %cst_153 [0] : vector<8x8xf32> to vector<8xf32>
    %622 = vector.shape_cast %621 : vector<8xf32> to vector<1x8xf32>
    %623 = vector.broadcast %622 : vector<1x8xf32> to vector<8x8xf32>
    %624 = arith.cmpf oge, %620, %623 : vector<8x8xf32>
    %cst_154 = arith.constant 8.000000e+00 : f32
    %625 = vector.broadcast %cst_154 : f32 to vector<8x8xf32>
    %626 = arith.select %624, %2, %625 : vector<8x8xi1>, vector<8x8xf32>
    %cst_155 = arith.constant dense<0x7F800000> : vector<8xf32>
    %627 = vector.multi_reduction <minimumf>, %626, %cst_155 [0] : vector<8x8xf32> to vector<8xf32>
    %628 = vector.shape_cast %627 : vector<8xf32> to vector<1x8xf32>
    %cst_156 = arith.constant 7.000000e+00 : f32
    %629 = vector.broadcast %cst_156 : f32 to vector<1x8xf32>
    %630 = arith.cmpf oeq, %7, %629 : vector<1x8xf32>
    %cst_157 = arith.constant 0.000000e+00 : f32
    %631 = vector.broadcast %cst_157 : f32 to vector<1x8xf32>
    %632 = arith.select %630, %628, %631 : vector<1x8xi1>, vector<1x8xf32>
    %cst_158 = arith.constant dense<0.000000e+00> : vector<1xf32>
    %633 = vector.multi_reduction <add>, %632, %cst_158 [1] : vector<1x8xf32> to vector<1xf32>
    %634 = vector.shape_cast %633 : vector<1xf32> to vector<1x1xf32>
    %cst_159 = arith.constant 7.000000e+00 : f32
    %635 = vector.broadcast %cst_159 : f32 to vector<1x8xf32>
    %636 = arith.cmpf oeq, %9, %635 : vector<1x8xf32>
    %637 = vector.shape_cast %634 : vector<1x1xf32> to vector<1x1xf32>
    %638 = vector.broadcast %637 : vector<1x1xf32> to vector<1x8xf32>
    %cst_160 = arith.constant 0.000000e+00 : f32
    %639 = vector.broadcast %cst_160 : f32 to vector<1x8xf32>
    %640 = arith.select %636, %638, %639 : vector<1x8xi1>, vector<1x8xf32>
    %641 = vector.extract_strided_slice %396 {offsets = [0, 6], sizes = [1, 1], strides = [1, 1]} : vector<1x8xf32> to vector<1x1xf32>
    %cst_161 = arith.constant 5.000000e-01 : f32
    %642 = vector.broadcast %cst_161 : f32 to vector<1x1xf32>
    %643 = arith.cmpf ogt, %641, %642 : vector<1x1xf32>
    %644 = vector.shape_cast %634 : vector<1x1xf32> to vector<1x1xf32>
    %645 = vector.broadcast %644 : vector<1x1xf32> to vector<1x8xf32>
    %646 = vector.shape_cast %643 : vector<1x1xi1> to vector<1x1xi1>
    %647 = vector.broadcast %646 : vector<1x1xi1> to vector<1x8xi1>
    %648 = arith.select %647, %645, %581 : vector<1x8xi1>, vector<1x8xf32>
    %649 = vector.broadcast %634 : vector<1x1xf32> to vector<1x8xf32>
    %650 = arith.cmpf oeq, %7, %649 : vector<1x8xf32>
    %cst_162 = arith.constant 0.000000e+00 : f32
    %651 = vector.broadcast %cst_162 : f32 to vector<1x8xf32>
    %652 = arith.select %650, %648, %651 : vector<1x8xi1>, vector<1x8xf32>
    %cst_163 = arith.constant dense<0.000000e+00> : vector<1xf32>
    %653 = vector.multi_reduction <add>, %652, %cst_163 [1] : vector<1x8xf32> to vector<1xf32>
    %654 = vector.shape_cast %653 : vector<1xf32> to vector<1x1xf32>
    %cst_164 = arith.constant 6.000000e+00 : f32
    %655 = vector.broadcast %cst_164 : f32 to vector<1x8xf32>
    %656 = arith.cmpf oeq, %9, %655 : vector<1x8xf32>
    %657 = vector.shape_cast %654 : vector<1x1xf32> to vector<1x1xf32>
    %658 = vector.broadcast %657 : vector<1x1xf32> to vector<1x8xf32>
    %659 = arith.select %656, %658, %640 : vector<1x8xi1>, vector<1x8xf32>
    %660 = vector.extract_strided_slice %396 {offsets = [0, 5], sizes = [1, 1], strides = [1, 1]} : vector<1x8xf32> to vector<1x1xf32>
    %cst_165 = arith.constant 5.000000e-01 : f32
    %661 = vector.broadcast %cst_165 : f32 to vector<1x1xf32>
    %662 = arith.cmpf ogt, %660, %661 : vector<1x1xf32>
    %663 = vector.shape_cast %654 : vector<1x1xf32> to vector<1x1xf32>
    %664 = vector.broadcast %663 : vector<1x1xf32> to vector<1x8xf32>
    %665 = vector.shape_cast %662 : vector<1x1xi1> to vector<1x1xi1>
    %666 = vector.broadcast %665 : vector<1x1xi1> to vector<1x8xi1>
    %667 = arith.select %666, %664, %555 : vector<1x8xi1>, vector<1x8xf32>
    %668 = vector.broadcast %654 : vector<1x1xf32> to vector<1x8xf32>
    %669 = arith.cmpf oeq, %7, %668 : vector<1x8xf32>
    %cst_166 = arith.constant 0.000000e+00 : f32
    %670 = vector.broadcast %cst_166 : f32 to vector<1x8xf32>
    %671 = arith.select %669, %667, %670 : vector<1x8xi1>, vector<1x8xf32>
    %cst_167 = arith.constant dense<0.000000e+00> : vector<1xf32>
    %672 = vector.multi_reduction <add>, %671, %cst_167 [1] : vector<1x8xf32> to vector<1xf32>
    %673 = vector.shape_cast %672 : vector<1xf32> to vector<1x1xf32>
    %cst_168 = arith.constant 5.000000e+00 : f32
    %674 = vector.broadcast %cst_168 : f32 to vector<1x8xf32>
    %675 = arith.cmpf oeq, %9, %674 : vector<1x8xf32>
    %676 = vector.shape_cast %673 : vector<1x1xf32> to vector<1x1xf32>
    %677 = vector.broadcast %676 : vector<1x1xf32> to vector<1x8xf32>
    %678 = arith.select %675, %677, %659 : vector<1x8xi1>, vector<1x8xf32>
    %679 = vector.extract_strided_slice %396 {offsets = [0, 4], sizes = [1, 1], strides = [1, 1]} : vector<1x8xf32> to vector<1x1xf32>
    %cst_169 = arith.constant 5.000000e-01 : f32
    %680 = vector.broadcast %cst_169 : f32 to vector<1x1xf32>
    %681 = arith.cmpf ogt, %679, %680 : vector<1x1xf32>
    %682 = vector.shape_cast %673 : vector<1x1xf32> to vector<1x1xf32>
    %683 = vector.broadcast %682 : vector<1x1xf32> to vector<1x8xf32>
    %684 = vector.shape_cast %681 : vector<1x1xi1> to vector<1x1xi1>
    %685 = vector.broadcast %684 : vector<1x1xi1> to vector<1x8xi1>
    %686 = arith.select %685, %683, %529 : vector<1x8xi1>, vector<1x8xf32>
    %687 = vector.broadcast %673 : vector<1x1xf32> to vector<1x8xf32>
    %688 = arith.cmpf oeq, %7, %687 : vector<1x8xf32>
    %cst_170 = arith.constant 0.000000e+00 : f32
    %689 = vector.broadcast %cst_170 : f32 to vector<1x8xf32>
    %690 = arith.select %688, %686, %689 : vector<1x8xi1>, vector<1x8xf32>
    %cst_171 = arith.constant dense<0.000000e+00> : vector<1xf32>
    %691 = vector.multi_reduction <add>, %690, %cst_171 [1] : vector<1x8xf32> to vector<1xf32>
    %692 = vector.shape_cast %691 : vector<1xf32> to vector<1x1xf32>
    %cst_172 = arith.constant 4.000000e+00 : f32
    %693 = vector.broadcast %cst_172 : f32 to vector<1x8xf32>
    %694 = arith.cmpf oeq, %9, %693 : vector<1x8xf32>
    %695 = vector.shape_cast %692 : vector<1x1xf32> to vector<1x1xf32>
    %696 = vector.broadcast %695 : vector<1x1xf32> to vector<1x8xf32>
    %697 = arith.select %694, %696, %678 : vector<1x8xi1>, vector<1x8xf32>
    %698 = vector.extract_strided_slice %396 {offsets = [0, 3], sizes = [1, 1], strides = [1, 1]} : vector<1x8xf32> to vector<1x1xf32>
    %cst_173 = arith.constant 5.000000e-01 : f32
    %699 = vector.broadcast %cst_173 : f32 to vector<1x1xf32>
    %700 = arith.cmpf ogt, %698, %699 : vector<1x1xf32>
    %701 = vector.shape_cast %692 : vector<1x1xf32> to vector<1x1xf32>
    %702 = vector.broadcast %701 : vector<1x1xf32> to vector<1x8xf32>
    %703 = vector.shape_cast %700 : vector<1x1xi1> to vector<1x1xi1>
    %704 = vector.broadcast %703 : vector<1x1xi1> to vector<1x8xi1>
    %705 = arith.select %704, %702, %503 : vector<1x8xi1>, vector<1x8xf32>
    %706 = vector.broadcast %692 : vector<1x1xf32> to vector<1x8xf32>
    %707 = arith.cmpf oeq, %7, %706 : vector<1x8xf32>
    %cst_174 = arith.constant 0.000000e+00 : f32
    %708 = vector.broadcast %cst_174 : f32 to vector<1x8xf32>
    %709 = arith.select %707, %705, %708 : vector<1x8xi1>, vector<1x8xf32>
    %cst_175 = arith.constant dense<0.000000e+00> : vector<1xf32>
    %710 = vector.multi_reduction <add>, %709, %cst_175 [1] : vector<1x8xf32> to vector<1xf32>
    %711 = vector.shape_cast %710 : vector<1xf32> to vector<1x1xf32>
    %cst_176 = arith.constant 3.000000e+00 : f32
    %712 = vector.broadcast %cst_176 : f32 to vector<1x8xf32>
    %713 = arith.cmpf oeq, %9, %712 : vector<1x8xf32>
    %714 = vector.shape_cast %711 : vector<1x1xf32> to vector<1x1xf32>
    %715 = vector.broadcast %714 : vector<1x1xf32> to vector<1x8xf32>
    %716 = arith.select %713, %715, %697 : vector<1x8xi1>, vector<1x8xf32>
    %717 = vector.extract_strided_slice %396 {offsets = [0, 2], sizes = [1, 1], strides = [1, 1]} : vector<1x8xf32> to vector<1x1xf32>
    %cst_177 = arith.constant 5.000000e-01 : f32
    %718 = vector.broadcast %cst_177 : f32 to vector<1x1xf32>
    %719 = arith.cmpf ogt, %717, %718 : vector<1x1xf32>
    %720 = vector.shape_cast %711 : vector<1x1xf32> to vector<1x1xf32>
    %721 = vector.broadcast %720 : vector<1x1xf32> to vector<1x8xf32>
    %722 = vector.shape_cast %719 : vector<1x1xi1> to vector<1x1xi1>
    %723 = vector.broadcast %722 : vector<1x1xi1> to vector<1x8xi1>
    %724 = arith.select %723, %721, %477 : vector<1x8xi1>, vector<1x8xf32>
    %725 = vector.broadcast %711 : vector<1x1xf32> to vector<1x8xf32>
    %726 = arith.cmpf oeq, %7, %725 : vector<1x8xf32>
    %cst_178 = arith.constant 0.000000e+00 : f32
    %727 = vector.broadcast %cst_178 : f32 to vector<1x8xf32>
    %728 = arith.select %726, %724, %727 : vector<1x8xi1>, vector<1x8xf32>
    %cst_179 = arith.constant dense<0.000000e+00> : vector<1xf32>
    %729 = vector.multi_reduction <add>, %728, %cst_179 [1] : vector<1x8xf32> to vector<1xf32>
    %730 = vector.shape_cast %729 : vector<1xf32> to vector<1x1xf32>
    %cst_180 = arith.constant 2.000000e+00 : f32
    %731 = vector.broadcast %cst_180 : f32 to vector<1x8xf32>
    %732 = arith.cmpf oeq, %9, %731 : vector<1x8xf32>
    %733 = vector.shape_cast %730 : vector<1x1xf32> to vector<1x1xf32>
    %734 = vector.broadcast %733 : vector<1x1xf32> to vector<1x8xf32>
    %735 = arith.select %732, %734, %716 : vector<1x8xi1>, vector<1x8xf32>
    %736 = vector.extract_strided_slice %396 {offsets = [0, 1], sizes = [1, 1], strides = [1, 1]} : vector<1x8xf32> to vector<1x1xf32>
    %cst_181 = arith.constant 5.000000e-01 : f32
    %737 = vector.broadcast %cst_181 : f32 to vector<1x1xf32>
    %738 = arith.cmpf ogt, %736, %737 : vector<1x1xf32>
    %739 = vector.shape_cast %730 : vector<1x1xf32> to vector<1x1xf32>
    %740 = vector.broadcast %739 : vector<1x1xf32> to vector<1x8xf32>
    %741 = vector.shape_cast %738 : vector<1x1xi1> to vector<1x1xi1>
    %742 = vector.broadcast %741 : vector<1x1xi1> to vector<1x8xi1>
    %743 = arith.select %742, %740, %451 : vector<1x8xi1>, vector<1x8xf32>
    %744 = vector.broadcast %730 : vector<1x1xf32> to vector<1x8xf32>
    %745 = arith.cmpf oeq, %7, %744 : vector<1x8xf32>
    %cst_182 = arith.constant 0.000000e+00 : f32
    %746 = vector.broadcast %cst_182 : f32 to vector<1x8xf32>
    %747 = arith.select %745, %743, %746 : vector<1x8xi1>, vector<1x8xf32>
    %cst_183 = arith.constant dense<0.000000e+00> : vector<1xf32>
    %748 = vector.multi_reduction <add>, %747, %cst_183 [1] : vector<1x8xf32> to vector<1xf32>
    %749 = vector.shape_cast %748 : vector<1xf32> to vector<1x1xf32>
    %cst_184 = arith.constant 1.000000e+00 : f32
    %750 = vector.broadcast %cst_184 : f32 to vector<1x8xf32>
    %751 = arith.cmpf oeq, %9, %750 : vector<1x8xf32>
    %752 = vector.shape_cast %749 : vector<1x1xf32> to vector<1x1xf32>
    %753 = vector.broadcast %752 : vector<1x1xf32> to vector<1x8xf32>
    %754 = arith.select %751, %753, %735 : vector<1x8xi1>, vector<1x8xf32>
    %755 = vector.extract_strided_slice %396 {offsets = [0, 0], sizes = [1, 1], strides = [1, 1]} : vector<1x8xf32> to vector<1x1xf32>
    %cst_185 = arith.constant 5.000000e-01 : f32
    %756 = vector.broadcast %cst_185 : f32 to vector<1x1xf32>
    %757 = arith.cmpf ogt, %755, %756 : vector<1x1xf32>
    %758 = vector.shape_cast %749 : vector<1x1xf32> to vector<1x1xf32>
    %759 = vector.broadcast %758 : vector<1x1xf32> to vector<1x8xf32>
    %760 = vector.shape_cast %757 : vector<1x1xi1> to vector<1x1xi1>
    %761 = vector.broadcast %760 : vector<1x1xi1> to vector<1x8xi1>
    %762 = arith.select %761, %759, %425 : vector<1x8xi1>, vector<1x8xf32>
    %763 = vector.broadcast %749 : vector<1x1xf32> to vector<1x8xf32>
    %764 = arith.cmpf oeq, %7, %763 : vector<1x8xf32>
    %cst_186 = arith.constant 0.000000e+00 : f32
    %765 = vector.broadcast %cst_186 : f32 to vector<1x8xf32>
    %766 = arith.select %764, %762, %765 : vector<1x8xi1>, vector<1x8xf32>
    %cst_187 = arith.constant dense<0.000000e+00> : vector<1xf32>
    %767 = vector.multi_reduction <add>, %766, %cst_187 [1] : vector<1x8xf32> to vector<1xf32>
    %768 = vector.shape_cast %767 : vector<1xf32> to vector<1x1xf32>
    %cst_188 = arith.constant 0.000000e+00 : f32
    %769 = vector.broadcast %cst_188 : f32 to vector<1x8xf32>
    %770 = arith.cmpf oeq, %9, %769 : vector<1x8xf32>
    %771 = vector.shape_cast %768 : vector<1x1xf32> to vector<1x1xf32>
    %772 = vector.broadcast %771 : vector<1x1xf32> to vector<1x8xf32>
    %773 = arith.select %770, %772, %754 : vector<1x8xi1>, vector<1x8xf32>
    %774 = arith.fptosi %773 : vector<1x8xf32> to vector<1x8xi32>
    %c1_189 = arith.constant 1 : index
    %c0_190 = arith.constant 0 : index
    %775 = vector.load %arg4[%c1_189, %c0_190] : memref<2x8xi32, #tpu.memory_space<vmem>>, vector<1x8xi32>
    tpu.vector_store %arg4[%c1_189, %c0_190], %774 {strides = array<i32>} : memref<2x8xi32, #tpu.memory_space<vmem>>, vector<1x8xi32>,
    return
  }
}

</mosaic_0001>

<bundles_post_ra>
// kernel: ne.22
= control target key start
LH: loop header
LB: loop body
LE: loop exit
PB: predicated region body
PF: predicated region fallthrough
CT: control target
= control target key end

     0   :  { %vm8_vm0 = vcmask 64512   ;;  %vm14_vm1 = vcmask 130112   ;;  %s42_s0 = inlined_call_operand.vmem [shape: s32[2,8], index: 0, kind: input, shape index: {}]   ;;  %s43_s1 = inlined_call_operand.vmem [shape: s32[16], index: 1, kind: output, shape index: {}]  }
   0x1   :  { %v5_v0 = vld [vmem:[%s42_s0] sm:$0x3]  ;;  %s25_s0 = smov 8  }
   0x2   :  { %6 = vst [vmem:[#allocation1] sm:$0x3] %v5_v0 }
   0x9   :  { %v11_v1 = vld [vmem:[#allocation1 + $0x1] sm:$0x1]   ;;  %v7_v2 = vld [vmem:[#allocation1] sm:$0x1]  }
   0xa   :  { %12 = vrot.lane.b32.xlu0 %v11_v1, %s25_s0  ;;  %9 = vst.msk [vmem:[#allocation0] sm:$0x1] %vm8_vm0, %v7_v2  }
  0x7c   :  { %v13_v3 = vpop.permute.xlu0 %12  }
  0x7d   :  { %15 = vst.msk [vmem:[#allocation0] sm:$0x1] %vm14_vm1, %v13_v3  }
  0x84   :  { %v20_v4 = vld [vmem:[#allocation0] sm:$0x1] }
  0x85   :  { %23 = vst [vmem:[%s43_s1] sm:$0x1] %v20_v4 }

// kernel: forward.5
= control target key start
LH: loop header
LB: loop body
LE: loop exit
PB: predicated region body
PF: predicated region fallthrough
CT: control target
= control target key end

     0   :  { %v1512_v1 = vmov 0.0   ;;  %vm1513_vm0 = vmmov 0   ;;  %s1966_s0 = inlined_call_operand.vmem [shape: f32[8,2,32], index: 0, kind: input, shape index: {}]   ;;  %s1967_s1 = inlined_call_operand.vmem [shape: f32[8,2,1], index: 1, kind: input, shape index: {}]   ;;  %s1968_s2 = inlined_call_operand.vmem [shape: f32[48,128], index: 2, kind: input, shape index: {}]   ;;  %s1969_s3 = inlined_call_operand.vmem [shape: f32[1,128], index: 3, kind: input, shape index: {}]   ;;  %s1970_s4 = inlined_call_operand.vmem [shape: f32[16,32], index: 4, kind: output, shape index: {0}]   ;;  %s1971_s5 = inlined_call_operand.hbm [shape: f32[2,32], index: 5, kind: output, shape index: {1}]  }
   0x1   :  { %v1555_v0 = vld [vmem:[%s1968_s2 + $0x28] sm:$0xff]  ;;  %1294 = vmatprep.subr.mxu0 %v1512_v1  ;;  %v1561_v2 = vld [vmem:[%s1968_s2 + $0x20] sm:$0xff]  ;;  %1306 = vmatprep.mubr.msk.f32.mxu0 %vm1513_vm0, %v1512_v1  ;;  %v1576_v4 = vld [vmem:[%s1968_s2 + $0x18] sm:$0xff] }
   0x2   :  { %1295 = vmatpush3.msra.mxu0 %v1555_v0  ;;  %v1569_v3 = vld [vmem:[%s1966_s0 + $0xe] sm:$0x3]  ;;  %1309 = vmatprep.subr.mxu1 %v1512_v1 }
   0x3   :  { %1296 = vmatprep.subr.mxu0 %v1512_v1  ;;  %v34_v5 = vrot.slane %v1569_v3, 6  ;;  %1310 = vmatpush3.msra.mxu1 %v1555_v0 }
   0x4   :  { %11 = vsyncpa [#allocation3], 0  ;;  %1297 = vmatpush3.msra.mxu0 %v1561_v2  ;;  %v1584_v6 = vld [vmem:[%s1966_s0] sm:$0x3]  ;;  %vm36_vm1 = vcmask 1041408   ;;  %1311 = vmatprep.subr.mxu1 %v1512_v1  ;;  %v1591_v7 = vld [vmem:[%s1968_s2 + $0x10] sm:$0xff]  ;;  %v27_v16 = vlaneseq }
   0x5   :  { %1298 = vmatprep.subr.mxu0 %v1512_v1  ;;  %1312 = vmatpush3.msra.mxu1 %v1561_v2  ;;  %v1600_v8 = vld [vmem:[%s1968_s2 + $0x8] sm:$0xff]  ;;  %v37_v9 = vsel %vm36_vm1, %v1584_v6, %v34_v5  ;;  %vm45_vm2 = vcmask 261120   ;;  %v1611_v10 = vld [vmem:[%s1968_s2] sm:$0xff]  ;;  %vm53_vm3 = vcmask 392192   ;;  %s1514_s10 = smov 64   ;;  %v1515_v20 = vmov 0  }
   0x6   :  { %1299 = vmatpush3.msra.mxu0 %v1576_v4  ;;  %1313 = vmatprep.subr.mxu1 %v1512_v1  ;;  %v46_v11 = vsel %vm45_vm2, %v37_v9, 0.0  ;;  %v1644_v12 = vld [vmem:[%s1969_s3] ss:$0 sm:$0xff]  ;;  %v1648_v17 = vshrl.u32 %v27_v16, 7  ;;  %v1656_v21 = vld [vmem:[%s1967_s1 + $0xe] sm:$0x3] }
   0x7   :  { %1300 = vmatprep.subr.mxu0 %v1512_v1  ;;  %1314 = vmatpush3.msra.mxu1 %v1576_v4  ;;  %v42_v22 = vrot.slane %v1656_v21, 6  ;;  %v1662_v23 = vld [vmem:[%s1967_s1] sm:$0x3]  ;;  %s1516_s14 = smov 96   ;;  %s1517_s15 = smov 16   ;;  %vm1138_vm5 = vcmask 1043456  }
   0x8   :  { %1301 = vmatpush3.msra.mxu0 %v1591_v7  ;;  %1315 = vmatprep.subr.mxu1 %v1512_v1  ;;  %vm29_vm4 = vcmp.lt.s32.totalorder %v1648_v17, 2  ;;  %s1518_s16 = smov 32   ;;  %s1519_s17 = smov 112   ;;  %v1676_v44 = vld [vmem:[%s1966_s0 + $0xc] sm:$0x3]  ;;  %vm1140_vm6 = vcmask 1045504  }
   0x9   :  { %1302 = vmatprep.subr.mxu0 %v1512_v1  ;;  %1316 = vmatpush3.msra.mxu1 %v1591_v7  ;;  %v44_v24 = vsel %vm36_vm1, %v1662_v23, %v42_v22  ;;  %v179_v45 = vrot.slane %v1676_v44, 6  ;;  %v1682_v46 = vld [vmem:[%s1966_s0 + $0x2] sm:$0x3]  ;;  %v1709_v55 = vld [vmem:[%s1967_s1 + $0xc] sm:$0x3]  ;;  %vm1173_vm7 = vcmask 130048  }
   0xa   :  { %1303 = vmatpush3.msra.mxu0 %v1600_v8  ;;  %1317 = vmatprep.subr.mxu1 %v1512_v1  ;;  %v164_v26 = vsub.f32 1.0, %v44_v24  ;;  %v187_v56 = vrot.slane %v1709_v55, 6  ;;  %v1715_v57 = vld [vmem:[%s1967_s1 + $0x2] sm:$0x3]  ;;  %vm1187_vm8 = vcmask 254976  }
   0xb   :  { %1304 = vmatprep.subr.mxu0 %v1512_v1  ;;  %1318 = vmatpush3.msra.mxu1 %v1600_v8  ;;  %v181_v47 = vsel %vm36_vm1, %v1682_v46, %v179_v45 }
   0xc   :  { %1305 = vmatpush3.msra.mxu0 %v1611_v10  ;;  %1319 = vmatprep.subr.mxu1 %v1512_v1  ;;  %v189_v59 = vsel %vm36_vm1, %v1715_v57, %v187_v56 }
   0xd   :  { %1307 = vmatmul.mubr.msk.f32.vlgmr.msra.gmra.mxu0 %vm53_vm3, %v46_v11  ;;  %1320 = vmatpush3.msra.mxu1 %v1611_v10  ;;  %v303_v11 = vsub.f32 1.0, %v189_v59 }
   0xe   :  { %1321 = vmatprep.mubr.msk.f32.mxu1 %vm1513_vm0, %v1512_v1  ;;  %1324 = vmatprep.subr.mxu0 %v1512_v1 }
   0xf   :  { %1325 = vmatpush3.msra.mxu0 %v1555_v0  ;;  %1336 = vmatprep.mubr.msk.f32.mxu0 %vm1513_vm0, %v1512_v1 }
  0x10   :  { %1326 = vmatprep.subr.mxu0 %v1512_v1  ;;  %1339 = vmatprep.subr.mxu1 %v1512_v1 }
  0x11   :  { %1327 = vmatpush3.msra.mxu0 %v1561_v2  ;;  %1425 = vset.pattern.permute.xlu0 %v1515_v20 }
  0x12   :  { %1328 = vmatprep.subr.mxu0 %v1512_v1  ;;  %1424 = vset.pattern.permute.xlu1 %v1515_v20 }
  0x13   :  { %1329 = vmatpush3.msra.mxu0 %v1576_v4 }
  0x14   :  { %1330 = vmatprep.subr.mxu0 %v1512_v1 }
  0x15   :  { %1331 = vmatpush3.msra.mxu0 %v1591_v7 }
  0x16   :  { %1332 = vmatprep.subr.mxu0 %v1512_v1 }
  0x17   :  { %1333 = vmatpush3.msra.mxu0 %v1600_v8 }
  0x18   :  { %1334 = vmatprep.subr.mxu0 %v1512_v1 }
  0x19   :  { %1335 = vmatpush3.msra.mxu0 %v1611_v10 }
  0x1a   :  { %1354 = vmatprep.subr.mxu0 %v1512_v1 }
  0xcd   :  { %v123_v13 = vpop.f32.mrf.mxu0 }
  0xce   :  { %v124_v14 = vadd.f32 %v1644_v12, %v123_v13 }
  0xcf   :  { %v1308_v15 = vpop.f32.mrf.mxu0 }
  0xd0   :  { %130 = vrot.lane.b32.xlu0 %v124_v14, %s1514_s10 }
 0x142   :  { %v131_v18 = vpop.permute.xlu0 %130 }
 0x143   :  { %v133_v19 = vsel %vm29_vm4, %v124_v14, %v131_v18 }
 0x144   :  { %1426 = vtanh.f32 %v133_v19  ;;  %v1211_v27 = vmul.f32 -1.442695, %v133_v19 }
 0x146   :  { %1428 = vpow2.f32 %v1211_v27 }
 0x151   :  { %v1427_v25 = vpop.eup %1426 }
 0x152   :  { %143 = vrot.lane.b32.xlu0 %v1427_v25, %s1516_s14 }
 0x153   :  { %v1429_v28 = vpop.eup %1428 }
 0x154   :  { %v137_v29 = vadd.f32 1.0, %v1429_v28 }
 0x156   :  { %167 = vperm.xlu0 %1425, %v164_v26   ;;  %1430 = vrcp.f32 %v137_v29  ;;  %v1729_v29 = vld [vmem:[%s1966_s0 + $0xa] sm:$0x3] }
 0x163   :  { %v1431_v30 = vpop.eup %1430 }
 0x164   :  { %v141_v33 = vmul.f32 0.0, %v1431_v30 }
 0x1c4   :  { %v144_v31 = vpop.permute.xlu0 %143 }
 0x1c5   :  { %v146_v32 = vmul.f32 %v1431_v30, %v144_v31  ;;  %v1735_v31 = vld [vmem:[%s1966_s0 + $0x4] sm:$0x3] }
 0x1c7   :  { %148 = vrot.lane.b32.xlu1 %v146_v32, %s1517_s15 }
 0x1cb   :  { %160 = vperm.xlu1 %1424, %v44_v24  }
 0x1d1   :  { %v168_v38 = vpop.permute.xlu0 %167 }
 0x1d2   :  { %v170_v41 = vmul.f32 0.0, %v168_v38 }
 0x239   :  { %v149_v34 = vpop.permute.xlu1 %148 }
 0x23a   :  { %v151_v35 = vadd.f32 %v149_v34, %v141_v33 }
 0x23c   :  { %1432 = vtanh.f32 %v151_v35 }
 0x246   :  { %v161_v37 = vpop.permute.xlu1 %160 }
 0x247   :  { %v172_v13 = vmul.f32 %v161_v37, %v151_v35 }
 0x249   :  { %v1433_v36 = vpop.eup %1432  ;;  %v173_v14 = vadd.f32 %v172_v13, %v170_v41 }
 0x24a   :  { %154 = vrot.lane.b32.xlu1 %v1433_v36, %s1518_s16 }
 0x2bc   :  { %v155_v39 = vpop.permute.xlu1 %154 }
 0x2bd   :  { %v157_v40 = vmul.f32 %v1431_v30, %v155_v39  ;;  %v319_v30 = vrot.slane %v1729_v29, 6 }
 0x2bf   :  { %v1669_v42 = vmul.f32 %v161_v37, %v157_v40  ;;  %v321_v32 = vsel %vm36_vm1, %v1735_v31, %v319_v30  ;;  %v1762_v40 = vld [vmem:[%s1967_s1 + $0xa] sm:$0x3] }
 0x2c1   :  { %v171_v43 = vadd.f32 %v170_v41, %v1669_v42  ;;  %v327_v41 = vrot.slane %v1762_v40, 6 }
 0x2c3   :  { %191 = vrot.lane.b32.xlu1 %v171_v43, %s1519_s17 }
 0x335   :  { %v192_v48 = vpop.permute.xlu1 %191 }
 0x336   :  { %v194_v49 = vsel %vm45_vm2, %v181_v47, %v192_v48 }
 0x337   :  { %1322 = vmatmul.mubr.msk.f32.vlgmr.msra.gmra.mxu1 %vm53_vm3, %v194_v49 }
 0x338   :  { %1340 = vmatpush3.msra.mxu1 %v1555_v0  ;;  %1351 = vmatprep.mubr.msk.f32.mxu1 %vm1513_vm0, %v1512_v1 }
 0x339   :  { %1341 = vmatprep.subr.mxu1 %v1512_v1 }
 0x33a   :  { %1342 = vmatpush3.msra.mxu1 %v1561_v2 }
 0x33b   :  { %1343 = vmatprep.subr.mxu1 %v1512_v1 }
 0x33c   :  { %1344 = vmatpush3.msra.mxu1 %v1576_v4 }
 0x33d   :  { %1345 = vmatprep.subr.mxu1 %v1512_v1 }
 0x33e   :  { %1346 = vmatpush3.msra.mxu1 %v1591_v7 }
 0x33f   :  { %1347 = vmatprep.subr.mxu1 %v1512_v1 }
 0x340   :  { %1348 = vmatpush3.msra.mxu1 %v1600_v8 }
 0x341   :  { %1349 = vmatprep.subr.mxu1 %v1512_v1 }
 0x342   :  { %1350 = vmatpush3.msra.mxu1 %v1611_v10 }
 0x343   :  { %1369 = vmatprep.subr.mxu1 %v1512_v1 }
 0x3f7   :  { %v264_v50 = vpop.f32.mrf.mxu1 }
 0x3f8   :  { %v265_v51 = vadd.f32 %v1644_v12, %v264_v50 }
 0x3f9   :  { %v1323_v52 = vpop.f32.mrf.mxu1 }
 0x3fa   :  { %269 = vrot.lane.b32.xlu0 %v265_v51, %s1514_s10 }
 0x46c   :  { %v270_v53 = vpop.permute.xlu0 %269 }
 0x46d   :  { %v272_v54 = vsel %vm29_vm4, %v265_v51, %v270_v53 }
 0x46e   :  { %1434 = vtanh.f32 %v272_v54  ;;  %v1217_v60 = vmul.f32 -1.442695, %v272_v54 }
 0x470   :  { %1436 = vpow2.f32 %v1217_v60 }
 0x47b   :  { %v1435_v58 = vpop.eup %1434 }
 0x47c   :  { %282 = vrot.lane.b32.xlu1 %v1435_v58, %s1516_s14 }
 0x47d   :  { %v1437_v61 = vpop.eup %1436 }
 0x47e   :  { %v276_v62 = vadd.f32 1.0, %v1437_v61 }
 0x480   :  { %299 = vperm.xlu1 %1424, %v189_v59   ;;  %1438 = vrcp.f32 %v276_v62 }
 0x48d   :  { %v1439_v63 = vpop.eup %1438 }
 0x48e   :  { %v280_v15 = vmul.f32 %v1439_v63, %v173_v14 }
 0x4ee   :  { %v283_v5 = vpop.permute.xlu1 %282 }
 0x4ef   :  { %v285_v9 = vmul.f32 %v1439_v63, %v283_v5 }
 0x4f1   :  { %287 = vrot.lane.b32.xlu0 %v285_v9, %s1517_s15 }
 0x4f5   :  { %306 = vperm.xlu0 %1425, %v303_v11  }
 0x4fb   :  { %v300_v20 = vpop.permute.xlu1 %299 }
 0x563   :  { %v288_v16 = vpop.permute.xlu0 %287 }
 0x564   :  { %v290_v18 = vadd.f32 %v288_v16, %v280_v15 }
 0x566   :  { %1440 = vtanh.f32 %v290_v18  ;;  %v311_v58 = vmul.f32 %v300_v20, %v290_v18 }
 0x570   :  { %v307_v22 = vpop.permute.xlu0 %306 }
 0x571   :  { %v309_v26 = vmul.f32 %v307_v22, %v171_v43  ;;  %v1768_v43 = vld [vmem:[%s1967_s1 + $0x4] sm:$0x3]  ;;  %v312_v56 = vmul.f32 %v307_v22, %v173_v14  ;;  %v1782_v14 = vld [vmem:[%s1966_s0 + $0x8] sm:$0x3] }
 0x572   :  { %v329_v47 = vsel %vm36_vm1, %v1768_v43, %v327_v41  ;;  %v459_v18 = vrot.slane %v1782_v14, 6 }
 0x573   :  { %v1441_v19 = vpop.eup %1440  ;;  %v443_v54 = vsub.f32 1.0, %v329_v47  ;;  %v313_v59 = vadd.f32 %v312_v56, %v311_v58 }
 0x574   :  { %293 = vrot.lane.b32.xlu1 %v1441_v19, %s1518_s16 }
 0x5e6   :  { %v294_v24 = vpop.permute.xlu1 %293 }
 0x5e7   :  { %v296_v25 = vmul.f32 %v1439_v63, %v294_v24 }
 0x5e9   :  { %v1722_v27 = vmul.f32 %v300_v20, %v296_v25  ;;  %v1788_v20 = vld [vmem:[%s1966_s0 + $0x6] sm:$0x3] }
 0x5ea   :  { %v461_v22 = vsel %vm36_vm1, %v1788_v20, %v459_v18 }
 0x5eb   :  { %v310_v28 = vadd.f32 %v309_v26, %v1722_v27 }
 0x5ed   :  { %331 = vrot.lane.b32.xlu0 %v310_v28, %s1519_s17 }
 0x65f   :  { %v332_v33 = vpop.permute.xlu0 %331 }
 0x660   :  { %v334_v34 = vsel %vm45_vm2, %v321_v32, %v332_v33 }
 0x661   :  { %1337 = vmatmul.mubr.msk.f32.vlgmr.msra.gmra.mxu0 %vm53_vm3, %v334_v34  ;;  %v1815_v34 = vld [vmem:[%s1967_s1 + $0x8] sm:$0x3] }
 0x662   :  { %1355 = vmatpush3.msra.mxu0 %v1555_v0  ;;  %1366 = vmatprep.mubr.msk.f32.mxu0 %vm1513_vm0, %v1512_v1 }
 0x663   :  { %1356 = vmatprep.subr.mxu0 %v1512_v1 }
 0x664   :  { %1357 = vmatpush3.msra.mxu0 %v1561_v2 }
 0x665   :  { %1358 = vmatprep.subr.mxu0 %v1512_v1 }
 0x666   :  { %1359 = vmatpush3.msra.mxu0 %v1576_v4 }
 0x667   :  { %1360 = vmatprep.subr.mxu0 %v1512_v1 }
 0x668   :  { %1361 = vmatpush3.msra.mxu0 %v1591_v7 }
 0x669   :  { %1362 = vmatprep.subr.mxu0 %v1512_v1 }
 0x66a   :  { %1363 = vmatpush3.msra.mxu0 %v1600_v8 }
 0x66b   :  { %1364 = vmatprep.subr.mxu0 %v1512_v1 }
 0x66c   :  { %1365 = vmatpush3.msra.mxu0 %v1611_v10 }
 0x66d   :  { %1384 = vmatprep.subr.mxu0 %v1512_v1 }
 0x721   :  { %v404_v35 = vpop.f32.mrf.mxu0 }
 0x722   :  { %v405_v36 = vadd.f32 %v1644_v12, %v404_v35  ;;  %v467_v35 = vrot.slane %v1815_v34, 6 }
 0x723   :  { %v1338_v37 = vpop.f32.mrf.mxu0 }
 0x724   :  { %409 = vrot.lane.b32.xlu1 %v405_v36, %s1514_s10 }
 0x796   :  { %v410_v38 = vpop.permute.xlu1 %409 }
 0x797   :  { %v412_v39 = vsel %vm29_vm4, %v405_v36, %v410_v38  ;;  %v1226_v36 = vld [vmem:[%s1967_s1 + $0x6] sm:$0x3]  ;;  %s1520_s1 = smov 80  }
 0x798   :  { %1442 = vtanh.f32 %v412_v39  ;;  %v1223_v48 = vmul.f32 -1.442695, %v412_v39  ;;  %v469_v38 = vsel %vm36_vm1, %v1226_v36, %v467_v35 }
 0x79a   :  { %1444 = vpow2.f32 %v1223_v48 }
 0x7a5   :  { %v1443_v45 = vpop.eup %1442 }
 0x7a6   :  { %422 = vrot.lane.b32.xlu0 %v1443_v45, %s1516_s14 }
 0x7a7   :  { %v1445_v49 = vpop.eup %1444 }
 0x7a8   :  { %v416_v50 = vadd.f32 1.0, %v1445_v49 }
 0x7aa   :  { %439 = vperm.xlu0 %1425, %v329_v47   ;;  %1446 = vrcp.f32 %v416_v50  ;;  %v583_v50 = vsub.f32 1.0, %v469_v38 }
 0x7b7   :  { %v1447_v51 = vpop.eup %1446 }
 0x7b8   :  { %v420_v60 = vmul.f32 %v1447_v51, %v313_v59 }
 0x818   :  { %v423_v52 = vpop.permute.xlu0 %422 }
 0x819   :  { %v425_v53 = vmul.f32 %v1447_v51, %v423_v52 }
 0x81b   :  { %427 = vrot.lane.b32.xlu1 %v425_v53, %s1517_s15 }
 0x81f   :  { %446 = vperm.xlu1 %1424, %v443_v54  }
 0x825   :  { %v440_v5 = vpop.permute.xlu0 %439 }
 0x88d   :  { %v428_v61 = vpop.permute.xlu1 %427 }
 0x88e   :  { %v430_v62 = vadd.f32 %v428_v61, %v420_v60 }
 0x890   :  { %1448 = vtanh.f32 %v430_v62  ;;  %v451_v52 = vmul.f32 %v440_v5, %v430_v62 }
 0x89a   :  { %v447_v9 = vpop.permute.xlu1 %446 }
 0x89b   :  { %v449_v15 = vmul.f32 %v447_v9, %v310_v28 }
 0x89d   :  { %v1449_v63 = vpop.eup %1448 }
 0x89e   :  { %433 = vrot.lane.b32.xlu0 %v1449_v63, %s1518_s16 }
 0x910   :  { %v434_v11 = vpop.permute.xlu0 %433 }
 0x911   :  { %v436_v13 = vmul.f32 %v1447_v51, %v434_v11  ;;  %v452_v51 = vmul.f32 %v447_v9, %v313_v59  ;;  %v595_v59 = vrot.slane %v1788_v20, 6 }
 0x913   :  { %v1775_v16 = vmul.f32 %v440_v5, %v436_v13  ;;  %v453_v53 = vadd.f32 %v452_v51, %v451_v52  ;;  %v597_v62 = vsel %vm36_vm1, %v1782_v14, %v595_v59 }
 0x915   :  { %v450_v19 = vadd.f32 %v449_v15, %v1775_v16 }
 0x917   :  { %471 = vrot.lane.b32.xlu1 %v450_v19, %s1519_s17 }
 0x989   :  { %v472_v24 = vpop.permute.xlu1 %471 }
 0x98a   :  { %v474_v25 = vsel %vm45_vm2, %v461_v22, %v472_v24 }
 0x98b   :  { %1352 = vmatmul.mubr.msk.f32.vlgmr.msra.gmra.mxu1 %vm53_vm3, %v474_v25 }
 0x98c   :  { %1370 = vmatpush3.msra.mxu1 %v1555_v0  ;;  %1381 = vmatprep.mubr.msk.f32.mxu1 %vm1513_vm0, %v1512_v1 }
 0x98d   :  { %1371 = vmatprep.subr.mxu1 %v1512_v1 }
 0x98e   :  { %1372 = vmatpush3.msra.mxu1 %v1561_v2 }
 0x98f   :  { %1373 = vmatprep.subr.mxu1 %v1512_v1 }
 0x990   :  { %1374 = vmatpush3.msra.mxu1 %v1576_v4 }
 0x991   :  { %1375 = vmatprep.subr.mxu1 %v1512_v1 }
 0x992   :  { %1376 = vmatpush3.msra.mxu1 %v1591_v7 }
 0x993   :  { %1377 = vmatprep.subr.mxu1 %v1512_v1 }
 0x994   :  { %1378 = vmatpush3.msra.mxu1 %v1600_v8 }
 0x995   :  { %1379 = vmatprep.subr.mxu1 %v1512_v1 }
 0x996   :  { %1380 = vmatpush3.msra.mxu1 %v1611_v10 }
 0x997   :  { %1399 = vmatprep.subr.mxu1 %v1512_v1 }
 0xa4b   :  { %v544_v26 = vpop.f32.mrf.mxu1 }
 0xa4c   :  { %v545_v28 = vadd.f32 %v1644_v12, %v544_v26  ;;  %v599_v26 = vrot.slane %v1226_v36, 6 }
 0xa4d   :  { %v1353_v30 = vpop.f32.mrf.mxu1 }
 0xa4e   :  { %549 = vrot.lane.b32.xlu0 %v545_v28, %s1514_s10  ;;  %v601_v30 = vsel %vm36_vm1, %v1815_v34, %v599_v26 }
 0xac0   :  { %v550_v32 = vpop.permute.xlu0 %549 }
 0xac1   :  { %v552_v33 = vsel %vm29_vm4, %v545_v28, %v550_v32 }
 0xac2   :  { %1450 = vtanh.f32 %v552_v33  ;;  %v1229_v39 = vmul.f32 -1.442695, %v552_v33 }
 0xac4   :  { %1452 = vpow2.f32 %v1229_v39 }
 0xacf   :  { %v1451_v37 = vpop.eup %1450 }
 0xad0   :  { %562 = vrot.lane.b32.xlu1 %v1451_v37, %s1516_s14 }
 0xad1   :  { %v1453_v41 = vpop.eup %1452 }
 0xad2   :  { %v556_v45 = vadd.f32 1.0, %v1453_v41  ;;  %v715_v41 = vsub.f32 1.0, %v601_v30 }
 0xad4   :  { %579 = vperm.xlu1 %1424, %v469_v38   ;;  %1454 = vrcp.f32 %v556_v45 }
 0xae1   :  { %v1455_v47 = vpop.eup %1454 }
 0xae2   :  { %v560_v54 = vmul.f32 %v1455_v47, %v453_v53 }
 0xb42   :  { %v563_v48 = vpop.permute.xlu1 %562 }
 0xb43   :  { %v565_v49 = vmul.f32 %v1455_v47, %v563_v48 }
 0xb45   :  { %567 = vrot.lane.b32.xlu0 %v565_v49, %s1517_s15 }
 0xb49   :  { %586 = vperm.xlu0 %1425, %v583_v50  }
 0xb4f   :  { %v580_v61 = vpop.permute.xlu1 %579 }
 0xbb7   :  { %v568_v56 = vpop.permute.xlu0 %567 }
 0xbb8   :  { %v570_v58 = vadd.f32 %v568_v56, %v560_v54 }
 0xbba   :  { %1456 = vtanh.f32 %v570_v58  ;;  %v591_v45 = vmul.f32 %v580_v61, %v570_v58 }
 0xbc4   :  { %v587_v63 = vpop.permute.xlu0 %586 }
 0xbc5   :  { %v589_v15 = vmul.f32 %v587_v63, %v450_v19  ;;  %v592_v36 = vmul.f32 %v587_v63, %v453_v53  ;;  %v727_v53 = vrot.slane %v1735_v31, 6 }
 0xbc7   :  { %v1457_v60 = vpop.eup %1456  ;;  %v729_v58 = vsel %vm36_vm1, %v1729_v29, %v727_v53 }
 0xbc8   :  { %573 = vrot.lane.b32.xlu1 %v1457_v60, %s1518_s16 }
 0xc3a   :  { %v574_v11 = vpop.permute.xlu1 %573 }
 0xc3b   :  { %v576_v13 = vmul.f32 %v1455_v47, %v574_v11  ;;  %v593_v47 = vadd.f32 %v592_v36, %v591_v45 }
 0xc3d   :  { %v1825_v18 = vmul.f32 %v580_v61, %v576_v13 }
 0xc3f   :  { %v590_v22 = vadd.f32 %v589_v15, %v1825_v18 }
 0xc41   :  { %603 = vrot.lane.b32.xlu0 %v590_v22, %s1519_s17 }
 0xcb3   :  { %v604_v5 = vpop.permute.xlu0 %603 }
 0xcb4   :  { %v606_v9 = vsel %vm45_vm2, %v597_v62, %v604_v5 }
 0xcb5   :  { %1367 = vmatmul.mubr.msk.f32.vlgmr.msra.gmra.mxu0 %vm53_vm3, %v606_v9 }
 0xcb6   :  { %1385 = vmatpush3.msra.mxu0 %v1555_v0  ;;  %1396 = vmatprep.mubr.msk.f32.mxu0 %vm1513_vm0, %v1512_v1 }
 0xcb7   :  { %1386 = vmatprep.subr.mxu0 %v1512_v1 }
 0xcb8   :  { %1387 = vmatpush3.msra.mxu0 %v1561_v2 }
 0xcb9   :  { %1388 = vmatprep.subr.mxu0 %v1512_v1 }
 0xcba   :  { %1389 = vmatpush3.msra.mxu0 %v1576_v4 }
 0xcbb   :  { %1390 = vmatprep.subr.mxu0 %v1512_v1 }
 0xcbc   :  { %1391 = vmatpush3.msra.mxu0 %v1591_v7 }
 0xcbd   :  { %1392 = vmatprep.subr.mxu0 %v1512_v1 }
 0xcbe   :  { %1393 = vmatpush3.msra.mxu0 %v1600_v8 }
 0xcbf   :  { %1394 = vmatprep.subr.mxu0 %v1512_v1 }
 0xcc0   :  { %1395 = vmatpush3.msra.mxu0 %v1611_v10 }
 0xd75   :  { %v676_v19 = vpop.f32.mrf.mxu0 }
 0xd76   :  { %v677_v14 = vadd.f32 %v1644_v12, %v676_v19 }
 0xd77   :  { %v1368_v20 = vpop.f32.mrf.mxu0 }
 0xd78   :  { %681 = vrot.lane.b32.xlu1 %v677_v14, %s1514_s10 }
 0xdea   :  { %v682_v24 = vpop.permute.xlu1 %681 }
 0xdeb   :  { %v684_v25 = vsel %vm29_vm4, %v677_v14, %v682_v24 }
 0xdec   :  { %1458 = vtanh.f32 %v684_v25  ;;  %v1231_v32 = vmul.f32 -1.442695, %v684_v25 }
 0xdee   :  { %1460 = vpow2.f32 %v1231_v32 }
 0xdf9   :  { %v1459_v28 = vpop.eup %1458 }
 0xdfa   :  { %694 = vrot.lane.b32.xlu0 %v1459_v28, %s1516_s14 }
 0xdfb   :  { %v1461_v33 = vpop.eup %1460 }
 0xdfc   :  { %v688_v35 = vadd.f32 1.0, %v1461_v33 }
 0xdfe   :  { %711 = vperm.xlu0 %1425, %v601_v30   ;;  %1462 = vrcp.f32 %v688_v35 }
 0xe0b   :  { %v1463_v37 = vpop.eup %1462 }
 0xe0c   :  { %v692_v48 = vmul.f32 %v1463_v37, %v593_v47 }
 0xe6c   :  { %v695_v38 = vpop.permute.xlu0 %694 }
 0xe6d   :  { %v697_v39 = vmul.f32 %v1463_v37, %v695_v38  ;;  %v859_v38 = vrot.slane %v1682_v46, 6  ;;  %v863_v46 = vrot.slane %v1715_v57, 6 }
 0xe6f   :  { %699 = vrot.lane.b32.xlu1 %v697_v39, %s1517_s15  ;;  %v861_v39 = vsel %vm36_vm1, %v1676_v44, %v859_v38  ;;  %v865_v44 = vsel %vm36_vm1, %v1709_v55, %v863_v46 }
 0xe70   :  { %v979_v53 = vsub.f32 1.0, %v865_v44 }
 0xe73   :  { %718 = vperm.xlu1 %1424, %v715_v41  }
 0xe79   :  { %v712_v51 = vpop.permute.xlu0 %711 }
 0xee1   :  { %v700_v49 = vpop.permute.xlu1 %699 }
 0xee2   :  { %v702_v50 = vadd.f32 %v700_v49, %v692_v48 }
 0xee4   :  { %1464 = vtanh.f32 %v702_v50  ;;  %v723_v19 = vmul.f32 %v712_v51, %v702_v50 }
 0xeee   :  { %v719_v52 = vpop.permute.xlu1 %718 }
 0xeef   :  { %v721_v60 = vmul.f32 %v719_v52, %v590_v22 }
 0xef1   :  { %v1465_v34 = vpop.eup %1464 }
 0xef2   :  { %705 = vrot.lane.b32.xlu0 %v1465_v34, %s1518_s16 }
 0xf64   :  { %v706_v54 = vpop.permute.xlu0 %705 }
 0xf65   :  { %v708_v56 = vmul.f32 %v1463_v37, %v706_v54 }
 0xf67   :  { %v1856_v11 = vmul.f32 %v712_v51, %v708_v56 }
 0xf69   :  { %v722_v13 = vadd.f32 %v721_v60, %v1856_v11 }
 0xf6b   :  { %735 = vrot.lane.b32.xlu1 %v722_v13, %s1519_s17 }
 0xfdd   :  { %v736_v61 = vpop.permute.xlu1 %735 }
 0xfde   :  { %v738_v63 = vsel %vm45_vm2, %v729_v58, %v736_v61 }
 0xfdf   :  { %1382 = vmatmul.mubr.msk.f32.vlgmr.msra.gmra.mxu1 %vm53_vm3, %v738_v63 }
 0xfe0   :  { %1400 = vmatpush3.msra.mxu1 %v1555_v0  ;;  %1411 = vmatprep.mubr.msk.f32.mxu1 %vm1513_vm0, %v1512_v1 }
 0xfe1   :  { %1401 = vmatprep.subr.mxu1 %v1512_v1 }
 0xfe2   :  { %1402 = vmatpush3.msra.mxu1 %v1561_v2 }
 0xfe3   :  { %1403 = vmatprep.subr.mxu1 %v1512_v1 }
 0xfe4   :  { %1404 = vmatpush3.msra.mxu1 %v1576_v4 }
 0xfe5   :  { %1405 = vmatprep.subr.mxu1 %v1512_v1 }
 0xfe6   :  { %1406 = vmatpush3.msra.mxu1 %v1591_v7  ;;  %v731_v7 = vrot.slane %v1768_v43, 6  ;;  %v724_v43 = vmul.f32 %v719_v52, %v593_v47 }
 0xfe7   :  { %1407 = vmatprep.subr.mxu1 %v1512_v1 }
 0xfe8   :  { %1408 = vmatpush3.msra.mxu1 %v1600_v8  ;;  %v725_v14 = vadd.f32 %v724_v43, %v723_v19 }
 0xfe9   :  { %1409 = vmatprep.subr.mxu1 %v1512_v1  ;;  %v733_v1 = vsel %vm36_vm1, %v1762_v40, %v731_v7 }
 0xfea   :  { %1410 = vmatpush3.msra.mxu1 %v1611_v10  ;;  %v847_v9 = vsub.f32 1.0, %v733_v1 }
0x109f   :  { %v808_v0 = vpop.f32.mrf.mxu1 }
0x10a0   :  { %v809_v29 = vadd.f32 %v1644_v12, %v808_v0 }
0x10a1   :  { %v1383_v2 = vpop.f32.mrf.mxu1 }
0x10a2   :  { %813 = vrot.lane.b32.xlu0 %v809_v29, %s1514_s10 }
0x1114   :  { %v814_v31 = vpop.permute.xlu0 %813 }
0x1115   :  { %v816_v4 = vsel %vm29_vm4, %v809_v29, %v814_v31 }
0x1116   :  { %1466 = vtanh.f32 %v816_v4  ;;  %v1233_v8 = vmul.f32 -1.442695, %v816_v4 }
0x1118   :  { %1468 = vpow2.f32 %v1233_v8 }
0x1123   :  { %v1467_v15 = vpop.eup %1466 }
0x1124   :  { %826 = vrot.lane.b32.xlu1 %v1467_v15, %s1516_s14 }
0x1125   :  { %v1469_v10 = vpop.eup %1468 }
0x1126   :  { %v820_v22 = vadd.f32 1.0, %v1469_v10  ;;  %v991_v10 = vrot.slane %v1584_v6, 6  ;;  %v995_v6 = vrot.slane %v1662_v23, 6  ;;  %v1120_v23 = vrot.slane %v1722_v27, 6 }
0x1128   :  { %843 = vperm.xlu1 %1424, %v733_v1   ;;  %1470 = vrcp.f32 %v820_v22  ;;  %v993_v22 = vsel %vm36_vm1, %v1569_v3, %v991_v10  ;;  %v997_v3 = vsel %vm36_vm1, %v1656_v21, %v995_v6  ;;  %v1137_v21 = vsel %vm36_vm1, %v1669_v42, %v1120_v23 }
0x1129   :  { %v1111_v17 = vsub.f32 1.0, %v997_v3 }
0x1135   :  { %v1471_v59 = vpop.eup %1470 }
0x1136   :  { %v824_v20 = vmul.f32 %v1471_v59, %v725_v14 }
0x1196   :  { %v827_v62 = vpop.permute.xlu1 %826 }
0x1197   :  { %v829_v5 = vmul.f32 %v1471_v59, %v827_v62 }
0x1199   :  { %831 = vrot.lane.b32.xlu0 %v829_v5, %s1517_s15 }
0x119d   :  { %850 = vperm.xlu0 %1425, %v847_v9  }
0x11a3   :  { %v844_v26 = vpop.permute.xlu1 %843 }
0x120b   :  { %v832_v24 = vpop.permute.xlu0 %831 }
0x120c   :  { %v834_v25 = vadd.f32 %v832_v24, %v824_v20 }
0x120e   :  { %1472 = vtanh.f32 %v834_v25  ;;  %v855_v58 = vmul.f32 %v844_v26, %v834_v25 }
0x1218   :  { %v851_v28 = vpop.permute.xlu0 %850 }
0x1219   :  { %v853_v33 = vmul.f32 %v851_v28, %v722_v13  ;;  %v856_v57 = vmul.f32 %v851_v28, %v725_v14 }
0x121b   :  { %v1473_v40 = vpop.eup %1472  ;;  %v857_v61 = vadd.f32 %v856_v57, %v855_v58 }
0x121c   :  { %837 = vrot.lane.b32.xlu1 %v1473_v40, %s1518_s16 }
0x128e   :  { %v838_v30 = vpop.permute.xlu1 %837 }
0x128f   :  { %v840_v32 = vmul.f32 %v1471_v59, %v838_v30  ;;  %v1123_v30 = vrot.slane %v1775_v16, 4 }
0x1291   :  { %v1888_v35 = vmul.f32 %v844_v26, %v840_v32  ;;  %v1126_v32 = vrot.slane %v1825_v18, 2 }
0x1293   :  { %v854_v37 = vadd.f32 %v853_v33, %v1888_v35  ;;  %v1139_v33 = vsel %vm1138_vm5, %v1137_v21, %v1123_v30 }
0x1295   :  { %867 = vrot.lane.b32.xlu0 %v854_v37, %s1519_s17 }
0x1307   :  { %v868_v41 = vpop.permute.xlu0 %867 }
0x1308   :  { %v870_v36 = vsel %vm45_vm2, %v861_v39, %v868_v41 }
0x1309   :  { %1397 = vmatmul.mubr.msk.f32.vlgmr.msra.gmra.mxu0 %vm53_vm3, %v870_v36 }
0x13c9   :  { %v940_v45 = vpop.f32.mrf.mxu0 }
0x13ca   :  { %v941_v47 = vadd.f32 %v1644_v12, %v940_v45 }
0x13cb   :  { %v1398_v48 = vpop.f32.mrf.mxu0 }
0x13cc   :  { %945 = vrot.lane.b32.xlu1 %v941_v47, %s1514_s10 }
0x143e   :  { %v946_v49 = vpop.permute.xlu1 %945 }
0x143f   :  { %v948_v50 = vsel %vm29_vm4, %v941_v47, %v946_v49 }
0x1440   :  { %1474 = vtanh.f32 %v948_v50  ;;  %v1235_v51 = vmul.f32 -1.442695, %v948_v50  ;;  %v1129_v50 = vrot.slane %v1888_v35, 6 }
0x1442   :  { %1476 = vpow2.f32 %v1235_v51 }
0x144d   :  { %v1475_v34 = vpop.eup %1474 }
0x144e   :  { %958 = vrot.lane.b32.xlu0 %v1475_v34, %s1516_s14 }
0x144f   :  { %v1477_v52 = vpop.eup %1476 }
0x1450   :  { %v952_v54 = vadd.f32 1.0, %v1477_v52 }
0x1452   :  { %975 = vperm.xlu0 %1425, %v865_v44   ;;  %1478 = vrcp.f32 %v952_v54 }
0x145f   :  { %v1479_v56 = vpop.eup %1478 }
0x1460   :  { %v956_v63 = vmul.f32 %v1479_v56, %v857_v61 }
0x14c0   :  { %v959_v60 = vpop.permute.xlu0 %958 }
0x14c1   :  { %v961_v13 = vmul.f32 %v1479_v56, %v959_v60 }
0x14c3   :  { %963 = vrot.lane.b32.xlu1 %v961_v13, %s1517_s15 }
0x14c7   :  { %982 = vperm.xlu1 %1424, %v979_v53   ;;  %v1146_v53 = vrot.slane %v1856_v11, 4 }
0x14cd   :  { %v976_v2 = vpop.permute.xlu0 %975 }
0x1535   :  { %v964_v0 = vpop.permute.xlu1 %963 }
0x1536   :  { %v966_v29 = vadd.f32 %v964_v0, %v956_v63 }
0x1538   :  { %1480 = vtanh.f32 %v966_v29  ;;  %v987_v39 = vmul.f32 %v976_v2, %v966_v29 }
0x1542   :  { %v983_v31 = vpop.permute.xlu1 %982 }
0x1543   :  { %v985_v15 = vmul.f32 %v983_v31, %v854_v37  ;;  %v1141_v37 = vsel %vm1140_vm6, %v1139_v33, %v1126_v32  ;;  %v988_v38 = vmul.f32 %v983_v31, %v857_v61  ;;  %v1154_v61 = vsel %vm36_vm1, %v1126_v32, %v1775_v16 }
0x1544   :  { %v1155_v0 = vsel %vm1138_vm5, %v1154_v61, %v1120_v23 }
0x1545   :  { %v1481_v55 = vpop.eup %1480  ;;  %v989_v41 = vadd.f32 %v988_v38, %v987_v39 }
0x1546   :  { %969 = vrot.lane.b32.xlu0 %v1481_v55, %s1518_s16 }
0x15b8   :  { %v970_v4 = vpop.permute.xlu0 %969 }
0x15b9   :  { %v972_v7 = vmul.f32 %v1479_v56, %v970_v4  ;;  %v1142_v56 = vsel %vm36_vm1, %v1856_v11, %v1129_v50  ;;  %v1149_v11 = vrot.slane %v1669_v42, 4 }
0x15bb   :  { %v1907_v1 = vmul.f32 %v976_v2, %v972_v7  ;;  %v1156_v29 = vsel %vm1140_vm6, %v1155_v0, %v1149_v11 }
0x15bd   :  { %v986_v8 = vadd.f32 %v985_v15, %v1907_v1  ;;  %v1132_v34 = vrot.slane %v1907_v1, 4 }
0x15bf   :  { %999 = vrot.lane.b32.xlu1 %v986_v8, %s1519_s17  ;;  %v1143_v60 = vsel %vm1138_vm5, %v1142_v56, %v1132_v34 }
0x1631   :  { %v1000_v59 = vpop.permute.xlu1 %999 }
0x1632   :  { %v1002_v62 = vsel %vm45_vm2, %v993_v22, %v1000_v59 }
0x1633   :  { %1412 = vmatmul.mubr.msk.f32.vlgmr.msra.gmra.mxu1 %vm53_vm3, %v1002_v62 }
0x16f3   :  { %v1072_v5 = vpop.f32.mrf.mxu1 }
0x16f4   :  { %v1073_v9 = vadd.f32 %v1644_v12, %v1072_v5 }
0x16f5   :  { %v1413_v43 = vpop.f32.mrf.mxu1 }
0x16f6   :  { %1077 = vrot.lane.b32.xlu0 %v1073_v9, %s1514_s10  ;;  %s1521_s10 = smov [#allocation2]  }
0x1768   :  { %v1078_v19 = vpop.permute.xlu0 %1077 }
0x1769   :  { %v1080_v14 = vsel %vm29_vm4, %v1073_v9, %v1078_v19 }
0x176a   :  { %1482 = vtanh.f32 %v1080_v14  ;;  %v1237_v24 = vmul.f32 -1.442695, %v1080_v14 }
0x176c   :  { %1484 = vpow2.f32 %v1237_v24 }
0x1777   :  { %v1483_v20 = vpop.eup %1482 }
0x1778   :  { %1090 = vrot.lane.b32.xlu1 %v1483_v20, %s1516_s14 }
0x1779   :  { %v1485_v12 = vpop.eup %1484 }
0x177a   :  { %v1084_v25 = vadd.f32 1.0, %v1485_v12 }
0x177c   :  { %1107 = vperm.xlu1 %1424, %v997_v3   ;;  %1486 = vrcp.f32 %v1084_v25 }
0x1789   :  { %v1487_v40 = vpop.eup %1486 }
0x178a   :  { %v1088_v27 = vmul.f32 %v1487_v40, %v989_v41 }
0x17ea   :  { %v1091_v26 = vpop.permute.xlu1 %1090 }
0x17eb   :  { %v1093_v28 = vmul.f32 %v1487_v40, %v1091_v26 }
0x17ed   :  { %1095 = vrot.lane.b32.xlu0 %v1093_v28, %s1517_s15  ;;  %s1197_s15 = sshll.u32 %s1521_s10, 4  ;;  %s1198_s15 = int_to_ptr.vmem [resolvable:$true] %s1197_s15 }
0x17ee   :  { %p1495_p1 = scmp.lt.s32.totalorder %s1198_s15, %s1198_s15 }
0x17f1   :  { %1114 = vperm.xlu0 %1425, %v1111_v17  }
0x17f5   :  { %1159 = vrot.lane.b32.xlu0 %v1141_v37, %s1520_s1 }
0x17f7   :  { %v1108_v47 = vpop.permute.xlu1 %1107 }
0x185f   :  { %v1096_v36 = vpop.permute.xlu0 %1095 }
0x1860   :  { %v1098_v45 = vadd.f32 %v1096_v36, %v1088_v27 }
0x1862   :  { %1488 = vtanh.f32 %v1098_v45 }
0x186c   :  { %v1115_v48 = vpop.permute.xlu0 %1114 }
0x186d   :  { %v1117_v44 = vmul.f32 %v1115_v48, %v986_v8 }
0x186f   :  { %v1489_v18 = vpop.eup %1488 }
0x1870   :  { %1101 = vrot.lane.b32.xlu1 %v1489_v18, %s1518_s16  ;;  %v1160_v55 = vpop.permute.xlu0 %1159 }
0x18e2   :  { %v1102_v49 = vpop.permute.xlu1 %1101 }
0x18e3   :  { %v1104_v46 = vmul.f32 %v1487_v40, %v1102_v49 }
0x18e5   :  { %v1110_v51 = vmul.f32 %v1108_v47, %v1104_v46 }
0x18e7   :  { %v1135_v52 = vrot.slane %v1110_v51, 2  ;;  %v1118_v54 = vadd.f32 %v1117_v44, %v1110_v51 }
0x18e9   :  { %1179 = vrot.lane.b32.xlu0 %v1118_v54, %s1520_s1  ;;  %v1144_v13 = vsel %vm1140_vm6, %v1143_v60, %v1135_v52  ;;  %v1151_v35 = vsel %vm36_vm1, %v1135_v52, %v1907_v1  ;;  %v1182_v63 = vrot.slane %v1118_v54, 2 }
0x18ea   :  { %1161 = vrot.lane.b32.xlu1 %v1144_v13, %s1520_s1  ;;  %v1152_v57 = vsel %vm1138_vm5, %v1151_v35, %v1129_v50 }
0x18eb   :  { %v1153_v58 = vsel %vm1140_vm6, %v1152_v57, %v1146_v53 }
0x18ed   :  { %1167 = vrot.lane.b32.xlu0 %v1153_v58, %s1516_s14 }
0x18ee   :  { %1183 = vrot.lane.b32.xlu1 %v1182_v63, %s1516_s14 }
0x18f2   :  { %1169 = vrot.lane.b32.xlu1 %v1156_v29, %s1516_s14  ;;  %s1490_s14 = scalar_lea.vmem %s1198_s15, 32 }
0x18f3   :  { %p1491_p0 = scmp.ne.s32.totalorder %s1198_s15, %s1490_s14  ;;  %p1496_p2 = scmp.lt.s32.totalorder %s1490_s14, %s1490_s14 }
0x18f5   :  { %p1497_p3 = por %p1496_p2, %p1495_p1 }
0x18f7   :  { %p1498_p4 = pnand %p1497_p3, %p1491_p0 }
0x195b   :  { %v1180_v2 = vpop.permute.xlu0 %1179 }
0x195c   :  { %v1162_v31 = vpop.permute.xlu1 %1161 }
0x195f   :  { %v1168_v16 = vpop.permute.xlu0 %1167 }
0x1960   :  { %v1174_v4 = vsel %vm1173_vm7, %v1160_v55, %v1168_v16  ;;  %v1184_v7 = vpop.permute.xlu1 %1183 }
0x1961   :  { %1176 = vst.msk [vmem:[%s1970_s4] sm:$0xff] %vm45_vm2, %v1174_v4  ;;  %v1186_v42 = vsel %vm1173_vm7, %v1180_v2, %v1184_v7 }
0x1962   :  { %1188 = vst.msk [vmem:[#allocation2] sm:$0x3] %vm1187_vm8, %v1186_v42 }
0x1963   :  { %1501 = shalt.err (!%p1498_p4)
}
0x1964   :  { %1200 = dma.vmem_to_hbm [thread:$0]  %s1198_s15, 32, %s1971_s5, [#allocation3]   ;;  %v1170_v15 = vpop.permute.xlu1 %1169 }
0x1965   :  { %v1175_v1 = vsel %vm1173_vm7, %v1162_v31, %v1170_v15 }
0x1966   :  { %1177 = vst.msk [vmem:[%s1970_s4 + $0x8] sm:$0xff] %vm45_vm2, %v1175_v1 }
0x1967   :  { %1510 = dma.done.wait [#allocation3], 32  }
0x1968   :  { %1511 = vsyncadd [#allocation3], 4294967264 }
0x1969   :  { %1206 = vsyncpa [#allocation3], 1 }

// kernel: forward.4
= control target key start
LH: loop header
LB: loop body
LE: loop exit
PB: predicated region body
PF: predicated region fallthrough
CT: control target
= control target key end

     0   :  { %vm39_vm0 = vcmask 64512   ;;  %vm50_vm1 = vcmask 130048   ;;  %s2115_s28 = smov 96   ;;  %s2116_s29 = smov 112   ;;  %v2117_v29 = vmov 0   ;;  %s2929_s2 = inlined_call_operand.vmem [shape: f32[16,64], index: 2, kind: input, shape index: {}]   ;;  %s2930_s0 = inlined_call_operand.vmem [shape: f32[6,16,8], index: 0, kind: input, shape index: {}]   ;;  %s2931_s3 = inlined_call_operand.vmem [shape: f32[1,64], index: 3, kind: input, shape index: {}]   ;;  %s2932_s1 = inlined_call_operand.vmem [shape: f32[6,16,1], index: 1, kind: input, shape index: {}]   ;;  %s2933_s4 = inlined_call_operand.vmem [shape: f32[16,16], index: 4, kind: output, shape index: {}]  }
   0x1   :  { %v2149_v0 = vld [vmem:[%s2929_s2 + $0x8] sm:$0xff]  ;;  %v2154_v1 = vld [vmem:[%s2929_s2] sm:$0xff]  ;;  %v1745_v5 = vld [vmem:[%s2930_s0 + $0x50] sm:$0xff]  ;;  %1916 = vset.pattern.permute.xlu0 %v2117_v29  ;;  %1917 = vset.pattern.permute.xlu1 %v2117_v29  ;;  %s2118_s30 = smov 8   ;;  %s2119_s13 = smov 16  }
   0x2   :  { %v29_v2 = vld [vmem:[%s2930_s0] sm:$0xff]  ;;  %1850 = vmatprep.subr.mxu0 %v2149_v0  ;;  %v30_v4 = vld [vmem:[%s2930_s0 + $0x8] sm:$0xff]  ;;  %1860 = vmatprep.subr.mxu1 %v2149_v0  ;;  %v42_v7 = vsel %vm39_vm0, %v1745_v5, 0.0  ;;  %v1746_v8 = vld [vmem:[%s2930_s0 + $0x58] sm:$0xff] }
   0x3   :  { %v40_v3 = vsel %vm39_vm0, %v29_v2, 0.0  ;;  %1851 = vmatpush3.msra.mxu0 %v2149_v0  ;;  %v41_v6 = vsel %vm39_vm0, %v30_v4, 0.0  ;;  %1861 = vmatpush3.msra.mxu1 %v2149_v0  ;;  %v43_v9 = vsel %vm39_vm0, %v1746_v8, 0.0  ;;  %v2193_v11 = vld [vmem:[%s2931_s3] ss:$0 sm:$0xff]  ;;  %v35_v50 = vld [vmem:[%s2932_s1 + $0x8] sm:$0xff] }
   0x4   :  { %1854 = vmatprep.mubr.msk.f32.mxu0 %vm50_vm1, %v40_v3  ;;  %1852 = vmatprep.subr.mxu0 %v2154_v1  ;;  %v34_v49 = vld [vmem:[%s2932_s1] sm:$0xff]  ;;  %v297_v56 = vsub.f32 1.0, %v35_v50  ;;  %v1747_v58 = vld [vmem:[%s2932_s1 + $0x50] sm:$0xff]  ;;  %v1748_v62 = vld [vmem:[%s2932_s1 + $0x58] sm:$0xff] }
   0x5   :  { %1853 = vmatpush3.msra.mxu0 %v2154_v1  ;;  %1862 = vmatprep.subr.mxu1 %v2154_v1  ;;  %v296_v54 = vsub.f32 1.0, %v34_v49  ;;  %v298_v61 = vsub.f32 1.0, %v1747_v58  ;;  %v299_v63 = vsub.f32 1.0, %v1748_v62 }
   0x6   :  { %1855 = vmatmul.mubr.msk.f32.vlgmr.msra.gmra.mxu0 %vm50_vm1, %v41_v6  ;;  %1863 = vmatpush3.msra.mxu1 %v2154_v1 }
   0x7   :  { %1857 = vmatprep.mubr.msk.f32.mxu0 %vm50_vm1, %v42_v7  ;;  %1870 = vmatprep.subr.mxu0 %v2149_v0 }
   0x8   :  { %1871 = vmatpush3.msra.mxu0 %v2149_v0  ;;  %1880 = vmatprep.subr.mxu1 %v2149_v0 }
   0x9   :  { %1872 = vmatprep.subr.mxu0 %v2154_v1 }
   0xa   :  { %1858 = vmatmul.mubr.msk.f32.gmra.mxu0 %vm50_vm1, %v43_v9 }
   0xb   :  { %1873 = vmatpush3.msra.mxu0 %v2154_v1 }
   0xc   :  { %1890 = vmatprep.subr.mxu0 %v2149_v0 }
  0xc6   :  { %v1856_v10 = vpop.f32.mrf.mxu0 }
  0xc7   :  { %v135_v15 = vadd.f32 %v1856_v10, %v2193_v11 }
  0xc8   :  { %v129_v12 = vpop.f32.mrf.mxu0 }
  0xc9   :  { %v130_v13 = vadd.f32 %v2193_v11, %v129_v12  ;;  %v1755_v22 = vmul.f32 -1.442695, %v135_v15 }
  0xca   :  { %v1859_v14 = vpop.f32.mrf.mxu0 }
  0xcb   :  { %1918 = vtanh.f32 %v130_v13  ;;  %v145_v18 = vadd.f32 %v1859_v14, %v2193_v11  ;;  %v1754_v21 = vmul.f32 -1.442695, %v130_v13 }
  0xcc   :  { %v139_v16 = vpop.f32.mrf.mxu0  ;;  %1920 = vtanh.f32 %v135_v15 }
  0xcd   :  { %v140_v17 = vadd.f32 %v2193_v11, %v139_v16  ;;  %1922 = vpow2.f32 %v1754_v21 }
  0xce   :  { %1924 = vpow2.f32 %v1755_v22 }
  0xcf   :  { %164 = vrot.lane.b32.xlu0 %v140_v17, %s2115_s28 }
  0xd3   :  { %166 = vrot.lane.b32.xlu0 %v145_v18, %s2115_s28 }
  0xd8   :  { %v1919_v19 = vpop.eup %1918 }
  0xd9   :  { %212 = vrot.lane.b32.xlu1 %v1919_v19, %s2116_s29  ;;  %v1921_v20 = vpop.eup %1920 }
  0xda   :  { %v1923_v23 = vpop.eup %1922 }
  0xdb   :  { %v188_v24 = vadd.f32 1.0, %v1923_v23  ;;  %v1925_v25 = vpop.eup %1924 }
  0xdc   :  { %v189_v27 = vadd.f32 1.0, %v1925_v25 }
  0xdd   :  { %214 = vrot.lane.b32.xlu1 %v1921_v20, %s2116_s29 }
 0x141   :  { %v165_v26 = vpop.permute.xlu0 %164 }
 0x142   :  { %1926 = vtanh.f32 %v165_v26  ;;  %v1756_v38 = vmul.f32 -1.442695, %v165_v26 }
 0x143   :  { %1928 = vrcp.f32 %v188_v24 }
 0x145   :  { %v167_v28 = vpop.permute.xlu0 %166 }
 0x146   :  { %1930 = vtanh.f32 %v167_v28  ;;  %v1757_v39 = vmul.f32 -1.442695, %v167_v28 }
 0x147   :  { %1932 = vrcp.f32 %v189_v27 }
 0x148   :  { %1934 = vpow2.f32 %v1756_v38 }
 0x149   :  { %1936 = vpow2.f32 %v1757_v39 }
 0x14b   :  { %v213_v30 = vpop.permute.xlu1 %212 }
 0x14f   :  { %v1927_v31 = vpop.eup %1926  ;;  %v215_v35 = vpop.permute.xlu1 %214 }
 0x150   :  { %216 = vrot.lane.b32.xlu0 %v1927_v31, %s2116_s29  ;;  %v2204_v32 = vpop.eup %1928 }
 0x151   :  { %v224_v33 = vmul.f32 %v2204_v32, %v213_v30  ;;  %v204_v53 = vmul.f32 0.0, %v2204_v32 }
 0x153   :  { %v1931_v34 = vpop.eup %1930 }
 0x154   :  { %218 = vrot.lane.b32.xlu1 %v1931_v34, %s2116_s29  ;;  %232 = vrot.lane.b32.xlu0 %v224_v33, %s2118_s30  ;;  %v2209_v36 = vpop.eup %1932 }
 0x155   :  { %v225_v37 = vmul.f32 %v2209_v36, %v215_v35  ;;  %v1935_v40 = vpop.eup %1934  ;;  %v205_v55 = vmul.f32 0.0, %v2209_v36 }
 0x156   :  { %v190_v41 = vadd.f32 1.0, %v1935_v40  ;;  %v1937_v42 = vpop.eup %1936 }
 0x157   :  { %v191_v43 = vadd.f32 1.0, %v1937_v42  ;;  %v2317_v42 = vld [vmem:[%s2930_s0 + $0x18] sm:$0xff] }
 0x158   :  { %234 = vrot.lane.b32.xlu1 %v225_v37, %s2118_s30  ;;  %1938 = vrcp.f32 %v190_v41  ;;  %v2312_v41 = vld [vmem:[%s2930_s0 + $0x10] sm:$0xff] }
 0x159   :  { %1940 = vrcp.f32 %v191_v43 }
 0x165   :  { %v2213_v44 = vpop.eup %1938 }
 0x166   :  { %v2217_v47 = vpop.eup %1940  ;;  %v206_v4 = vmul.f32 0.0, %v2213_v44 }
 0x167   :  { %v207_v7 = vmul.f32 0.0, %v2217_v47 }
 0x1c2   :  { %v217_v45 = vpop.permute.xlu0 %216 }
 0x1c3   :  { %v226_v46 = vmul.f32 %v2213_v44, %v217_v45 }
 0x1c5   :  { %236 = vrot.lane.b32.xlu0 %v226_v46, %s2118_s30 }
 0x1c6   :  { %v219_v48 = vpop.permute.xlu1 %218  ;;  %v233_v52 = vpop.permute.xlu0 %232 }
 0x1c7   :  { %v227_v51 = vmul.f32 %v2217_v47, %v219_v48  ;;  %v2232_v59 = vadd.f32 %v233_v52, %v204_v53 }
 0x1c9   :  { %238 = vrot.lane.b32.xlu1 %v227_v51, %s2118_s30  ;;  %274 = vperm.xlu0 %1916, %v34_v49  }
 0x1ca   :  { %v235_v57 = vpop.permute.xlu1 %234 }
 0x1cb   :  { %v2234_v60 = vadd.f32 %v235_v57, %v205_v55 }
 0x1cd   :  { %1942 = vtanh.f32 %v2234_v60  ;;  %302 = vperm.xlu1 %1917, %v296_v54   ;;  %307 = vperm.xlu0 %1916, %v297_v56  }
 0x1ce   :  { %1944 = vtanh.f32 %v2232_v59 }
 0x1d1   :  { %279 = vperm.xlu1 %1917, %v35_v50   ;;  %312 = vperm.xlu0 %1916, %v298_v61   ;;  %v2340_v50 = vld [vmem:[%s2930_s0 + $0x48] sm:$0xff] }
 0x1d5   :  { %284 = vperm.xlu1 %1917, %v1747_v58   ;;  %317 = vperm.xlu0 %1916, %v299_v63  }
 0x1d9   :  { %289 = vperm.xlu1 %1917, %v1748_v62  }
 0x1da   :  { %v1943_v2 = vpop.eup %1942 }
 0x1db   :  { %258 = vrot.lane.b32.xlu0 %v1943_v2, %s2119_s13  ;;  %v1945_v3 = vpop.eup %1944 }
 0x1dd   :  { %256 = vrot.lane.b32.xlu1 %v1945_v3, %s2119_s13 }
 0x237   :  { %v237_v5 = vpop.permute.xlu0 %236 }
 0x238   :  { %v2244_v6 = vadd.f32 %v237_v5, %v206_v4 }
 0x23a   :  { %1946 = vtanh.f32 %v2244_v6 }
 0x23b   :  { %v239_v8 = vpop.permute.xlu1 %238 }
 0x23c   :  { %v2248_v9 = vadd.f32 %v239_v8, %v207_v7 }
 0x23e   :  { %1948 = vtanh.f32 %v2248_v9 }
 0x244   :  { %v2251_v10 = vpop.permute.xlu0 %274 }
 0x247   :  { %v1947_v12 = vpop.eup %1946 }
 0x248   :  { %v2253_v13 = vpop.permute.xlu1 %302  ;;  %v2255_v14 = vpop.permute.xlu0 %307  ;;  %260 = vrot.lane.b32.xlu1 %v1947_v12, %s2119_s13 }
 0x249   :  { %v2271_v23 = vmul.f32 0.0, %v2255_v14  ;;  %v2279_v28 = vmul.f32 0.0, %v2253_v13 }
 0x24b   :  { %v1949_v15 = vpop.eup %1948 }
 0x24c   :  { %v2258_v16 = vpop.permute.xlu1 %279  ;;  %262 = vrot.lane.b32.xlu0 %v1949_v15, %s2119_s13  ;;  %v2261_v17 = vpop.permute.xlu0 %312 }
 0x24d   :  { %v2291_v33 = vmul.f32 0.0, %v2261_v17 }
 0x250   :  { %v2263_v18 = vpop.permute.xlu1 %284  ;;  %v2265_v19 = vpop.permute.xlu0 %317 }
 0x251   :  { %v2299_v38 = vmul.f32 0.0, %v2265_v19 }
 0x254   :  { %v2267_v20 = vpop.permute.xlu1 %289  ;;  %v259_v21 = vpop.permute.xlu0 %258 }
 0x255   :  { %v269_v22 = vmul.f32 %v2209_v36, %v259_v21 }
 0x257   :  { %v293_v24 = vmul.f32 %v2258_v16, %v269_v22 }
 0x258   :  { %v257_v25 = vpop.permute.xlu1 %256 }
 0x259   :  { %v268_v26 = vmul.f32 %v2204_v32, %v257_v25  ;;  %v2276_v27 = vadd.f32 %v2271_v23, %v293_v24 }
 0x25b   :  { %v292_v29 = vmul.f32 %v2251_v10, %v268_v26  ;;  %354 = vrot.lane.b32.xlu0 %v2276_v27, %s2116_s29 }
 0x25d   :  { %v2285_v30 = vadd.f32 %v2279_v28, %v292_v29 }
 0x25f   :  { %352 = vrot.lane.b32.xlu1 %v2285_v30, %s2116_s29 }
 0x2ba   :  { %v261_v31 = vpop.permute.xlu1 %260 }
 0x2bb   :  { %v270_v32 = vmul.f32 %v2213_v44, %v261_v31 }
 0x2bd   :  { %v294_v34 = vmul.f32 %v2263_v18, %v270_v32 }
 0x2be   :  { %v263_v35 = vpop.permute.xlu0 %262 }
 0x2bf   :  { %v271_v36 = vmul.f32 %v2217_v47, %v263_v35  ;;  %v2296_v37 = vadd.f32 %v2291_v33, %v294_v34  ;;  %v2332_v47 = vld [vmem:[%s2930_s0 + $0x40] sm:$0xff] }
 0x2c1   :  { %v295_v39 = vmul.f32 %v2267_v20, %v271_v36  ;;  %356 = vrot.lane.b32.xlu1 %v2296_v37, %s2116_s29 }
 0x2c3   :  { %v2305_v40 = vadd.f32 %v2299_v38, %v295_v39 }
 0x2c5   :  { %358 = vrot.lane.b32.xlu0 %v2305_v40, %s2116_s29 }
 0x2cd   :  { %v355_v43 = vpop.permute.xlu0 %354 }
 0x2ce   :  { %v365_v46 = vsel %vm39_vm0, %v2317_v42, %v355_v43 }
 0x2d1   :  { %v353_v44 = vpop.permute.xlu1 %352 }
 0x2d2   :  { %v364_v45 = vsel %vm39_vm0, %v2312_v41, %v353_v44 }
 0x2d3   :  { %1864 = vmatprep.mubr.msk.f32.mxu1 %vm50_vm1, %v364_v45 }
 0x2d4   :  { %1865 = vmatmul.mubr.msk.f32.vlgmr.msra.gmra.mxu1 %vm50_vm1, %v365_v46  ;;  %v329_v46 = vmul.f32 %v2258_v16, %v2234_v60 }
 0x2d5   :  { %1881 = vmatpush3.msra.mxu1 %v2149_v0 }
 0x2d6   :  { %1882 = vmatprep.subr.mxu1 %v2154_v1 }
 0x2d7   :  { %1883 = vmatpush3.msra.mxu1 %v2154_v1 }
 0x2d8   :  { %1900 = vmatprep.subr.mxu1 %v2149_v0 }
 0x333   :  { %v357_v48 = vpop.permute.xlu1 %356 }
 0x334   :  { %v366_v49 = vsel %vm39_vm0, %v2332_v47, %v357_v48 }
 0x335   :  { %1867 = vmatprep.mubr.msk.f32.mxu1 %vm50_vm1, %v366_v49 }
 0x337   :  { %v359_v51 = vpop.permute.xlu0 %358 }
 0x338   :  { %v367_v52 = vsel %vm39_vm0, %v2340_v50, %v359_v51  ;;  %v1762_v51 = vld [vmem:[%s2932_s1 + $0x10] sm:$0xff] }
 0x339   :  { %1868 = vmatmul.mubr.msk.f32.gmra.mxu1 %vm50_vm1, %v367_v52 }
 0x394   :  { %v1866_v53 = vpop.f32.mrf.mxu1 }
 0x395   :  { %v452_v55 = vadd.f32 %v1866_v53, %v2193_v11  ;;  %v2372_v53 = vadd.f32 %v329_v46, %v2271_v23  ;;  %v1763_v23 = vld [vmem:[%s2932_s1 + $0x18] sm:$0xff] }
 0x396   :  { %v446_v54 = vpop.f32.mrf.mxu1 }
 0x397   :  { %v447_v56 = vadd.f32 %v2193_v11, %v446_v54  ;;  %1950 = vtanh.f32 %v452_v55  ;;  %v1771_v3 = vmul.f32 -1.442695, %v452_v55  ;;  %v328_v54 = vmul.f32 %v2251_v10, %v2232_v59 }
 0x399   :  { %1952 = vtanh.f32 %v447_v56  ;;  %v1770_v4 = vmul.f32 -1.442695, %v447_v56 }
 0x39a   :  { %1954 = vpow2.f32 %v1771_v3 }
 0x39b   :  { %1956 = vpow2.f32 %v1770_v4  ;;  %v1764_v4 = vld [vmem:[%s2932_s1 + $0x40] sm:$0xff] }
 0x3a4   :  { %v1951_v63 = vpop.eup %1950 }
 0x3a6   :  { %v1953_v2 = vpop.eup %1952 }
 0x3a7   :  { %v1955_v5 = vpop.eup %1954 }
 0x3a8   :  { %v1957_v7 = vpop.eup %1956  ;;  %v498_v8 = vadd.f32 1.0, %v1955_v5 }
 0x3a9   :  { %v497_v15 = vadd.f32 1.0, %v1957_v7  ;;  %v607_v7 = vsub.f32 1.0, %v1764_v4 }
 0x3f9   :  { %v1869_v57 = vpop.f32.mrf.mxu1 }
 0x3fa   :  { %v462_v58 = vadd.f32 %v1869_v57, %v2193_v11  ;;  %v605_v57 = vsub.f32 1.0, %v1762_v51 }
 0x3fb   :  { %v456_v61 = vpop.f32.mrf.mxu1 }
 0x3fc   :  { %v457_v62 = vadd.f32 %v2193_v11, %v456_v61  ;;  %475 = vrot.lane.b32.xlu0 %v462_v58, %s2115_s28  ;;  %v2382_v58 = vadd.f32 %v328_v54, %v2279_v28  ;;  %v606_v28 = vsub.f32 1.0, %v1763_v23 }
 0x3fe   :  { %473 = vrot.lane.b32.xlu1 %v457_v62, %s2115_s28 }
 0x400   :  { %523 = vrot.lane.b32.xlu0 %v1951_v63, %s2116_s29 }
 0x402   :  { %521 = vrot.lane.b32.xlu1 %v1953_v2, %s2116_s29 }
 0x46e   :  { %v476_v12 = vpop.permute.xlu0 %475 }
 0x46f   :  { %1958 = vtanh.f32 %v476_v12  ;;  %v1773_v35 = vmul.f32 -1.442695, %v476_v12 }
 0x470   :  { %v474_v21 = vpop.permute.xlu1 %473  ;;  %1960 = vrcp.f32 %v498_v8  ;;  %v1765_v8 = vld [vmem:[%s2932_s1 + $0x48] sm:$0xff] }
 0x471   :  { %1962 = vtanh.f32 %v474_v21  ;;  %v1772_v36 = vmul.f32 -1.442695, %v474_v21  ;;  %v331_v21 = vmul.f32 %v2267_v20, %v2248_v9 }
 0x472   :  { %1964 = vrcp.f32 %v497_v15  ;;  %v524_v24 = vpop.permute.xlu0 %523  ;;  %v608_v15 = vsub.f32 1.0, %v1765_v8 }
 0x473   :  { %1966 = vpow2.f32 %v1773_v35 }
 0x474   :  { %v522_v31 = vpop.permute.xlu1 %521  ;;  %1968 = vpow2.f32 %v1772_v36 }
 0x47c   :  { %v1959_v22 = vpop.eup %1958 }
 0x47d   :  { %527 = vrot.lane.b32.xlu0 %v1959_v22, %s2116_s29  ;;  %v2354_v25 = vpop.eup %1960  ;;  %v330_v22 = vmul.f32 %v2263_v18, %v2244_v6 }
 0x47e   :  { %v1963_v26 = vpop.eup %1962  ;;  %v534_v29 = vmul.f32 %v2354_v25, %v524_v24  ;;  %v514_v60 = vmul.f32 %v2354_v25, %v2372_v53  ;;  %v2410_v24 = vadd.f32 %v331_v21, %v2299_v38 }
 0x47f   :  { %525 = vrot.lane.b32.xlu1 %v1963_v26, %s2116_s29  ;;  %v2358_v32 = vpop.eup %1964 }
 0x480   :  { %v533_v34 = vmul.f32 %v2358_v32, %v522_v31  ;;  %v1967_v39 = vpop.eup %1966  ;;  %v513_v63 = vmul.f32 %v2358_v32, %v2382_v58  ;;  %v2415_v31 = vadd.f32 %v330_v22, %v2291_v33  ;;  %v2497_v22 = vld [vmem:[%s2930_s0 + $0x30] sm:$0xff] }
 0x481   :  { %543 = vrot.lane.b32.xlu0 %v534_v29, %s2118_s30  ;;  %v1969_v43 = vpop.eup %1968  ;;  %v500_v44 = vadd.f32 1.0, %v1967_v39 }
 0x482   :  { %v499_v45 = vadd.f32 1.0, %v1969_v43 }
 0x483   :  { %541 = vrot.lane.b32.xlu1 %v533_v34, %s2118_s30  ;;  %1970 = vrcp.f32 %v500_v44 }
 0x484   :  { %1972 = vrcp.f32 %v499_v45 }
 0x490   :  { %v2365_v48 = vpop.eup %1970 }
 0x491   :  { %v2376_v55 = vpop.eup %1972  ;;  %v516_v26 = vmul.f32 %v2365_v48, %v2410_v24 }
 0x492   :  { %v515_v35 = vmul.f32 %v2376_v55, %v2415_v31 }
 0x4ef   :  { %v528_v49 = vpop.permute.xlu0 %527 }
 0x4f0   :  { %v536_v52 = vmul.f32 %v2365_v48, %v528_v49 }
 0x4f1   :  { %v526_v56 = vpop.permute.xlu1 %525 }
 0x4f2   :  { %547 = vrot.lane.b32.xlu0 %v536_v52, %s2118_s30  ;;  %v535_v61 = vmul.f32 %v2376_v55, %v526_v56 }
 0x4f3   :  { %v544_v62 = vpop.permute.xlu0 %543 }
 0x4f4   :  { %v2388_v59 = vadd.f32 %v544_v62, %v514_v60  ;;  %545 = vrot.lane.b32.xlu1 %v535_v61, %s2118_s30 }
 0x4f5   :  { %v542_v2 = vpop.permute.xlu1 %541 }
 0x4f6   :  { %1974 = vtanh.f32 %v2388_v59  ;;  %611 = vperm.xlu0 %1916, %v605_v57   ;;  %v2394_v3 = vadd.f32 %v542_v2, %v513_v63 }
 0x4f8   :  { %1976 = vtanh.f32 %v2394_v3  ;;  %583 = vperm.xlu1 %1917, %v1762_v51  }
 0x4fa   :  { %616 = vperm.xlu0 %1916, %v606_v28  }
 0x4fc   :  { %588 = vperm.xlu1 %1917, %v1763_v23  }
 0x503   :  { %v1975_v5 = vpop.eup %1974 }
 0x504   :  { %567 = vrot.lane.b32.xlu0 %v1975_v5, %s2119_s13 }
 0x505   :  { %v1977_v12 = vpop.eup %1976 }
 0x506   :  { %565 = vrot.lane.b32.xlu1 %v1977_v12, %s2119_s13 }
 0x508   :  { %621 = vperm.xlu0 %1916, %v607_v7  }
 0x50a   :  { %593 = vperm.xlu1 %1917, %v1764_v4  }
 0x50c   :  { %626 = vperm.xlu0 %1916, %v608_v15  }
 0x50e   :  { %598 = vperm.xlu1 %1917, %v1765_v8  }
 0x564   :  { %v548_v29 = vpop.permute.xlu0 %547 }
 0x565   :  { %v2417_v34 = vadd.f32 %v548_v29, %v516_v26  ;;  %v2502_v26 = vld [vmem:[%s2930_s0 + $0x38] sm:$0xff] }
 0x566   :  { %v546_v9 = vpop.permute.xlu1 %545 }
 0x567   :  { %1978 = vtanh.f32 %v2417_v34  ;;  %v2422_v36 = vadd.f32 %v546_v9, %v515_v35 }
 0x569   :  { %1980 = vtanh.f32 %v2422_v36 }
 0x571   :  { %v2425_v6 = vpop.permute.xlu0 %611 }
 0x572   :  { %v629_v60 = vmul.f32 %v2425_v6, %v2285_v30 }
 0x573   :  { %v2427_v39 = vpop.permute.xlu1 %583 }
 0x574   :  { %v1979_v38 = vpop.eup %1978 }
 0x575   :  { %571 = vrot.lane.b32.xlu0 %v1979_v38, %s2119_s13  ;;  %v2430_v33 = vpop.permute.xlu0 %616 }
 0x576   :  { %v1981_v43 = vpop.eup %1980  ;;  %v630_v49 = vmul.f32 %v2430_v33, %v2276_v27 }
 0x577   :  { %569 = vrot.lane.b32.xlu1 %v1981_v43, %s2119_s13  ;;  %v2433_v44 = vpop.permute.xlu1 %588 }
 0x579   :  { %v568_v45 = vpop.permute.xlu0 %567 }
 0x57a   :  { %v578_v46 = vmul.f32 %v2354_v25, %v568_v45 }
 0x57b   :  { %v566_v52 = vpop.permute.xlu1 %565 }
 0x57c   :  { %v602_v51 = vmul.f32 %v2433_v44, %v578_v46  ;;  %v577_v54 = vmul.f32 %v2358_v32, %v566_v52 }
 0x57e   :  { %v2440_v56 = vadd.f32 %v630_v49, %v602_v51  ;;  %v601_v57 = vmul.f32 %v2427_v39, %v577_v54 }
 0x580   :  { %667 = vrot.lane.b32.xlu0 %v2440_v56, %s2116_s29  ;;  %v2447_v61 = vadd.f32 %v629_v60, %v601_v57 }
 0x582   :  { %665 = vrot.lane.b32.xlu1 %v2447_v61, %s2116_s29 }
 0x583   :  { %v2451_v27 = vpop.permute.xlu0 %621 }
 0x584   :  { %v631_v7 = vmul.f32 %v2451_v27, %v2296_v37 }
 0x585   :  { %v2453_v25 = vpop.permute.xlu1 %593 }
 0x587   :  { %v2455_v32 = vpop.permute.xlu0 %626 }
 0x588   :  { %v632_v63 = vmul.f32 %v2455_v32, %v2305_v40  ;;  %v2478_v40 = vld [vmem:[%s2930_s0 + $0x20] sm:$0xff] }
 0x589   :  { %v2457_v62 = vpop.permute.xlu1 %598 }
 0x5e7   :  { %v572_v23 = vpop.permute.xlu0 %571 }
 0x5e8   :  { %v580_v30 = vmul.f32 %v2365_v48, %v572_v23  ;;  %v2483_v48 = vld [vmem:[%s2930_s0 + $0x28] sm:$0xff] }
 0x5e9   :  { %v570_v28 = vpop.permute.xlu1 %569 }
 0x5ea   :  { %v604_v2 = vmul.f32 %v2457_v62, %v580_v30  ;;  %v579_v4 = vmul.f32 %v2376_v55, %v570_v28 }
 0x5ec   :  { %v2464_v5 = vadd.f32 %v632_v63, %v604_v2  ;;  %v603_v8 = vmul.f32 %v2453_v25, %v579_v4 }
 0x5ee   :  { %671 = vrot.lane.b32.xlu0 %v2464_v5, %s2116_s29  ;;  %v2471_v12 = vadd.f32 %v631_v7, %v603_v8 }
 0x5f0   :  { %669 = vrot.lane.b32.xlu1 %v2471_v12, %s2116_s29 }
 0x5f2   :  { %v668_v37 = vpop.permute.xlu0 %667 }
 0x5f3   :  { %v678_v21 = vsel %vm39_vm0, %v2483_v48, %v668_v37 }
 0x5f4   :  { %v666_v55 = vpop.permute.xlu1 %665 }
 0x5f5   :  { %v677_v15 = vsel %vm39_vm0, %v2478_v40, %v666_v55 }
 0x5f6   :  { %1874 = vmatprep.mubr.msk.f32.mxu0 %vm50_vm1, %v677_v15 }
 0x5f7   :  { %1875 = vmatmul.mubr.msk.f32.vlgmr.msra.gmra.mxu0 %vm50_vm1, %v678_v21 }
 0x5f8   :  { %1891 = vmatpush3.msra.mxu0 %v2149_v0 }
 0x5f9   :  { %1892 = vmatprep.subr.mxu0 %v2154_v1 }
 0x5fa   :  { %1893 = vmatpush3.msra.mxu0 %v2154_v1 }
 0x660   :  { %v672_v29 = vpop.permute.xlu0 %671 }
 0x661   :  { %v680_v38 = vsel %vm39_vm0, %v2502_v26, %v672_v29 }
 0x662   :  { %v670_v35 = vpop.permute.xlu1 %669 }
 0x663   :  { %v679_v9 = vsel %vm39_vm0, %v2497_v22, %v670_v35 }
 0x664   :  { %1877 = vmatprep.mubr.msk.f32.mxu0 %vm50_vm1, %v679_v9 }
 0x665   :  { %1878 = vmatmul.mubr.msk.f32.gmra.mxu0 %vm50_vm1, %v680_v38 }
 0x6b7   :  { %v1876_v43 = vpop.f32.mrf.mxu0 }
 0x6b8   :  { %v765_v46 = vadd.f32 %v1876_v43, %v2193_v11 }
 0x6b9   :  { %v759_v45 = vpop.f32.mrf.mxu0 }
 0x6ba   :  { %v760_v49 = vadd.f32 %v2193_v11, %v759_v45  ;;  %1982 = vtanh.f32 %v765_v46  ;;  %v1787_v30 = vmul.f32 -1.442695, %v765_v46 }
 0x6bc   :  { %1984 = vtanh.f32 %v760_v49  ;;  %v1786_v63 = vmul.f32 -1.442695, %v760_v49 }
 0x6bd   :  { %1986 = vpow2.f32 %v1787_v30  ;;  %v637_v30 = vmul.f32 %v2427_v39, %v2394_v3 }
 0x6be   :  { %1988 = vpow2.f32 %v1786_v63 }
 0x6c7   :  { %v1983_v57 = vpop.eup %1982 }
 0x6c9   :  { %v1985_v23 = vpop.eup %1984 }
 0x6ca   :  { %v1987_v2 = vpop.eup %1986 }
 0x6cb   :  { %v1989_v28 = vpop.eup %1988  ;;  %v811_v4 = vadd.f32 1.0, %v1987_v2  ;;  %v1778_v2 = vld [vmem:[%s2932_s1 + $0x20] sm:$0xff] }
 0x6cc   :  { %v810_v8 = vadd.f32 1.0, %v1989_v28 }
 0x725   :  { %v1879_v51 = vpop.f32.mrf.mxu0 }
 0x726   :  { %v775_v52 = vadd.f32 %v1879_v51, %v2193_v11 }
 0x727   :  { %v769_v54 = vpop.f32.mrf.mxu0 }
 0x728   :  { %v770_v60 = vadd.f32 %v2193_v11, %v769_v54  ;;  %788 = vrot.lane.b32.xlu0 %v775_v52, %s2115_s28 }
 0x72a   :  { %786 = vrot.lane.b32.xlu1 %v770_v60, %s2115_s28  ;;  %v638_v60 = vmul.f32 %v2433_v44, %v2388_v59  ;;  %v641_v59 = vmul.f32 %v2425_v6, %v2382_v58 }
 0x72c   :  { %836 = vrot.lane.b32.xlu0 %v1983_v57, %s2116_s29  ;;  %v642_v57 = vmul.f32 %v2430_v33, %v2372_v53 }
 0x72e   :  { %834 = vrot.lane.b32.xlu1 %v1985_v23, %s2116_s29 }
 0x79a   :  { %v789_v7 = vpop.permute.xlu0 %788 }
 0x79b   :  { %1990 = vtanh.f32 %v789_v7  ;;  %v1789_v45 = vmul.f32 -1.442695, %v789_v7 }
 0x79c   :  { %v787_v37 = vpop.permute.xlu1 %786  ;;  %1992 = vrcp.f32 %v811_v4  ;;  %v2540_v4 = vadd.f32 %v642_v57, %v638_v60  ;;  %v640_v57 = vmul.f32 %v2457_v62, %v2417_v34 }
 0x79d   :  { %1994 = vtanh.f32 %v787_v37  ;;  %v1788_v46 = vmul.f32 -1.442695, %v787_v37 }
 0x79e   :  { %1996 = vrcp.f32 %v810_v8  ;;  %v837_v15 = vpop.permute.xlu0 %836  ;;  %v918_v8 = vsub.f32 1.0, %v1778_v2 }
 0x79f   :  { %1998 = vpow2.f32 %v1789_v45 }
 0x7a0   :  { %v835_v9 = vpop.permute.xlu1 %834  ;;  %2000 = vpow2.f32 %v1788_v46  ;;  %v1780_v46 = vld [vmem:[%s2932_s1 + $0x30] sm:$0xff] }
 0x7a8   :  { %v1991_v55 = vpop.eup %1990 }
 0x7a9   :  { %840 = vrot.lane.b32.xlu0 %v1991_v55, %s2116_s29  ;;  %v2519_v21 = vpop.eup %1992 }
 0x7aa   :  { %v1995_v29 = vpop.eup %1994  ;;  %v847_v35 = vmul.f32 %v2519_v21, %v837_v15  ;;  %v827_v3 = vmul.f32 %v2519_v21, %v2540_v4  ;;  %v2550_v15 = vadd.f32 %v641_v59, %v637_v30  ;;  %v644_v30 = vmul.f32 %v2455_v32, %v2410_v24 }
 0x7ab   :  { %838 = vrot.lane.b32.xlu1 %v1995_v29, %s2116_s29  ;;  %v2523_v38 = vpop.eup %1996  ;;  %v1779_v29 = vld [vmem:[%s2932_s1 + $0x28] sm:$0xff] }
 0x7ac   :  { %v846_v43 = vmul.f32 %v2523_v38, %v835_v9  ;;  %v1999_v49 = vpop.eup %1998  ;;  %v826_v58 = vmul.f32 %v2523_v38, %v2550_v15 }
 0x7ad   :  { %856 = vrot.lane.b32.xlu0 %v847_v35, %s2118_s30  ;;  %v2001_v51 = vpop.eup %2000  ;;  %v813_v52 = vadd.f32 1.0, %v1999_v49 }
 0x7ae   :  { %v812_v54 = vadd.f32 1.0, %v2001_v51  ;;  %v920_v51 = vsub.f32 1.0, %v1780_v46 }
 0x7af   :  { %854 = vrot.lane.b32.xlu1 %v846_v43, %s2118_s30  ;;  %2002 = vrcp.f32 %v813_v52  ;;  %v919_v43 = vsub.f32 1.0, %v1779_v29  ;;  %v1781_v52 = vld [vmem:[%s2932_s1 + $0x38] sm:$0xff] }
 0x7b0   :  { %2004 = vrcp.f32 %v812_v54  ;;  %v921_v60 = vsub.f32 1.0, %v1781_v52 }
 0x7bc   :  { %v2532_v23 = vpop.eup %2002 }
 0x7bd   :  { %v2544_v7 = vpop.eup %2004 }
 0x81b   :  { %v841_v63 = vpop.permute.xlu0 %840 }
 0x81c   :  { %v849_v28 = vmul.f32 %v2532_v23, %v841_v63  ;;  %v639_v63 = vmul.f32 %v2453_v25, %v2422_v36 }
 0x81d   :  { %v839_v53 = vpop.permute.xlu1 %838 }
 0x81e   :  { %860 = vrot.lane.b32.xlu0 %v849_v28, %s2118_s30  ;;  %v848_v37 = vmul.f32 %v2544_v7, %v839_v53  ;;  %v643_v28 = vmul.f32 %v2451_v27, %v2415_v31 }
 0x81f   :  { %v857_v55 = vpop.permute.xlu0 %856 }
 0x820   :  { %v2555_v35 = vadd.f32 %v857_v55, %v827_v3  ;;  %858 = vrot.lane.b32.xlu1 %v848_v37, %s2118_s30  ;;  %v647_v3 = vadd.f32 %v643_v28, %v639_v63 }
 0x821   :  { %v855_v9 = vpop.permute.xlu1 %854 }
 0x822   :  { %2006 = vtanh.f32 %v2555_v35  ;;  %924 = vperm.xlu0 %1916, %v918_v8   ;;  %v2561_v45 = vadd.f32 %v855_v9, %v826_v58  ;;  %v828_v34 = vmul.f32 %v2544_v7, %v647_v3 }
 0x824   :  { %2008 = vtanh.f32 %v2561_v45  ;;  %896 = vperm.xlu1 %1917, %v1778_v2   ;;  %v2578_v2 = vadd.f32 %v644_v30, %v640_v57 }
 0x826   :  { %929 = vperm.xlu0 %1916, %v919_v43   ;;  %v829_v59 = vmul.f32 %v2532_v23, %v2578_v2 }
 0x828   :  { %901 = vperm.xlu1 %1917, %v1779_v29  }
 0x82f   :  { %v2007_v49 = vpop.eup %2006 }
 0x830   :  { %880 = vrot.lane.b32.xlu0 %v2007_v49, %s2119_s13 }
 0x831   :  { %v2009_v54 = vpop.eup %2008 }
 0x832   :  { %878 = vrot.lane.b32.xlu1 %v2009_v54, %s2119_s13 }
 0x834   :  { %934 = vperm.xlu0 %1916, %v920_v51  }
 0x836   :  { %906 = vperm.xlu1 %1917, %v1780_v46  }
 0x838   :  { %939 = vperm.xlu0 %1916, %v921_v60  }
 0x83a   :  { %911 = vperm.xlu1 %1917, %v1781_v52  }
 0x890   :  { %v861_v53 = vpop.permute.xlu0 %860 }
 0x891   :  { %v2584_v8 = vadd.f32 %v861_v53, %v829_v59 }
 0x892   :  { %v859_v24 = vpop.permute.xlu1 %858 }
 0x893   :  { %2010 = vtanh.f32 %v2584_v8  ;;  %v868_v37 = vadd.f32 %v859_v24, %v828_v34 }
 0x895   :  { %2012 = vtanh.f32 %v868_v37 }
 0x89d   :  { %v2588_v36 = vpop.permute.xlu0 %924 }
 0x89e   :  { %v942_v57 = vmul.f32 %v2588_v36, %v2447_v61 }
 0x89f   :  { %v2590_v29 = vpop.permute.xlu1 %896 }
 0x8a0   :  { %v2011_v55 = vpop.eup %2010 }
 0x8a1   :  { %884 = vrot.lane.b32.xlu0 %v2011_v55, %s2119_s13  ;;  %v2593_v31 = vpop.permute.xlu0 %929 }
 0x8a2   :  { %v2013_v58 = vpop.eup %2012  ;;  %v943_v49 = vmul.f32 %v2593_v31, %v2440_v56 }
 0x8a3   :  { %882 = vrot.lane.b32.xlu1 %v2013_v58, %s2119_s13  ;;  %v2596_v9 = vpop.permute.xlu1 %901 }
 0x8a5   :  { %v881_v43 = vpop.permute.xlu0 %880 }
 0x8a6   :  { %v891_v46 = vmul.f32 %v2519_v21, %v881_v43 }
 0x8a7   :  { %v879_v52 = vpop.permute.xlu1 %878 }
 0x8a8   :  { %v915_v51 = vmul.f32 %v2596_v9, %v891_v46  ;;  %v890_v54 = vmul.f32 %v2523_v38, %v879_v52 }
 0x8aa   :  { %v2603_v60 = vadd.f32 %v943_v49, %v915_v51  ;;  %v914_v30 = vmul.f32 %v2590_v29, %v890_v54 }
 0x8ac   :  { %968 = vrot.lane.b32.xlu0 %v2603_v60, %s2116_s29  ;;  %v946_v63 = vadd.f32 %v942_v57, %v914_v30 }
 0x8ae   :  { %966 = vrot.lane.b32.xlu1 %v946_v63, %s2116_s29 }
 0x8af   :  { %v2611_v21 = vpop.permute.xlu0 %934 }
 0x8b0   :  { %v2614_v56 = vmul.f32 %v946_v63, %v2611_v21  ;;  %v956_v38 = vmul.f32 %v2611_v21, %v647_v3 }
 0x8b1   :  { %v2616_v28 = vpop.permute.xlu1 %906 }
 0x8b2   :  { %v952_v59 = vmul.f32 %v2616_v28, %v868_v37  ;;  %v944_v37 = vmul.f32 %v2611_v21, %v2471_v12 }
 0x8b3   :  { %v2622_v53 = vpop.permute.xlu0 %939 }
 0x8b4   :  { %v2620_v61 = vadd.f32 %v956_v38, %v952_v59  ;;  %v945_v58 = vmul.f32 %v2622_v53, %v2464_v5 }
 0x8b5   :  { %v2624_v34 = vpop.permute.xlu1 %911 }
 0x913   :  { %v885_v24 = vpop.permute.xlu0 %884 }
 0x914   :  { %v893_v55 = vmul.f32 %v2532_v23, %v885_v24 }
 0x915   :  { %v883_v46 = vpop.permute.xlu1 %882 }
 0x916   :  { %v917_v43 = vmul.f32 %v2624_v34, %v893_v55  ;;  %v892_v49 = vmul.f32 %v2544_v7, %v883_v46 }
 0x918   :  { %v2631_v3 = vadd.f32 %v945_v58, %v917_v43  ;;  %v916_v51 = vmul.f32 %v2616_v28, %v892_v49 }
 0x91a   :  { %972 = vrot.lane.b32.xlu0 %v2631_v3, %s2116_s29  ;;  %v2638_v52 = vadd.f32 %v944_v37, %v916_v51 }
 0x91c   :  { %970 = vrot.lane.b32.xlu1 %v2638_v52, %s2116_s29 }
 0x91e   :  { %v969_v5 = vpop.permute.xlu0 %968 }
 0x91f   :  { %v979_v54 = vsel %vm39_vm0, %v2502_v26, %v969_v5 }
 0x920   :  { %v967_v23 = vpop.permute.xlu1 %966 }
 0x921   :  { %v978_v7 = vsel %vm39_vm0, %v2497_v22, %v967_v23 }
 0x922   :  { %1884 = vmatprep.mubr.msk.f32.mxu1 %vm50_vm1, %v978_v7 }
 0x923   :  { %1885 = vmatmul.mubr.msk.f32.vlgmr.msra.gmra.mxu1 %vm50_vm1, %v979_v54 }
 0x924   :  { %1901 = vmatpush3.msra.mxu1 %v2149_v0 }
 0x925   :  { %1902 = vmatprep.subr.mxu1 %v2154_v1 }
 0x926   :  { %1903 = vmatpush3.msra.mxu1 %v2154_v1 }
 0x98c   :  { %v973_v12 = vpop.permute.xlu0 %972 }
 0x98d   :  { %v981_v22 = vsel %vm39_vm0, %v2483_v48, %v973_v12 }
 0x98e   :  { %v971_v57 = vpop.permute.xlu1 %970 }
 0x98f   :  { %v980_v30 = vsel %vm39_vm0, %v2478_v40, %v971_v57 }
 0x990   :  { %1887 = vmatprep.mubr.msk.f32.mxu1 %vm50_vm1, %v980_v30 }
 0x991   :  { %1888 = vmatmul.mubr.msk.f32.gmra.mxu1 %vm50_vm1, %v981_v22 }
 0x9e3   :  { %v1886_v26 = vpop.f32.mrf.mxu1 }
 0x9e4   :  { %v1066_v0 = vadd.f32 %v1886_v26, %v2193_v11 }
 0x9e5   :  { %v1060_v63 = vpop.f32.mrf.mxu1 }
 0x9e6   :  { %v1061_v38 = vadd.f32 %v2193_v11, %v1060_v63  ;;  %2014 = vtanh.f32 %v1066_v0  ;;  %v1795_v58 = vmul.f32 -1.442695, %v1066_v0 }
 0x9e8   :  { %2016 = vtanh.f32 %v1061_v38  ;;  %v1794_v43 = vmul.f32 -1.442695, %v1061_v38 }
 0x9e9   :  { %2018 = vpow2.f32 %v1795_v58  ;;  %v950_v58 = vmul.f32 %v2590_v29, %v2561_v45 }
 0x9ea   :  { %2020 = vpow2.f32 %v1794_v43 }
 0x9f3   :  { %v2015_v48 = vpop.eup %2014 }
 0x9f5   :  { %v2017_v55 = vpop.eup %2016 }
 0x9f6   :  { %v2019_v46 = vpop.eup %2018 }
 0x9f7   :  { %v2021_v49 = vpop.eup %2020  ;;  %v1112_v37 = vadd.f32 1.0, %v2019_v46 }
 0xa51   :  { %v1889_v1 = vpop.f32.mrf.mxu1 }
 0xa52   :  { %v1076_v59 = vadd.f32 %v1889_v1, %v2193_v11 }
 0xa53   :  { %v1070_v24 = vpop.f32.mrf.mxu1 }
 0xa54   :  { %v1071_v40 = vadd.f32 %v2193_v11, %v1070_v24  ;;  %1089 = vrot.lane.b32.xlu0 %v1076_v59, %s2115_s28  ;;  %v1111_v11 = vadd.f32 1.0, %v2021_v49 }
 0xa56   :  { %1087 = vrot.lane.b32.xlu1 %v1071_v40, %s2115_s28  ;;  %v951_v40 = vmul.f32 %v2596_v9, %v2555_v35 }
 0xa58   :  { %1137 = vrot.lane.b32.xlu0 %v2015_v48, %s2116_s29  ;;  %v955_v48 = vmul.f32 %v2593_v31, %v2540_v4 }
 0xa5a   :  { %1135 = vrot.lane.b32.xlu1 %v2017_v55, %s2116_s29  ;;  %v2681_v49 = vadd.f32 %v955_v48, %v951_v40 }
 0xac6   :  { %v1090_v51 = vpop.permute.xlu0 %1089 }
 0xac7   :  { %2022 = vtanh.f32 %v1090_v51  ;;  %v1797_v63 = vmul.f32 -1.442695, %v1090_v51 }
 0xac8   :  { %v1088_v5 = vpop.permute.xlu1 %1087  ;;  %2024 = vrcp.f32 %v1112_v37  ;;  %v954_v37 = vmul.f32 %v2588_v36, %v2550_v15 }
 0xac9   :  { %2026 = vtanh.f32 %v1088_v5  ;;  %v1796_v0 = vmul.f32 -1.442695, %v1088_v5 }
 0xaca   :  { %2028 = vrcp.f32 %v1111_v11  ;;  %v1138_v7 = vpop.permute.xlu0 %1137 }
 0xacb   :  { %2030 = vpow2.f32 %v1797_v63 }
 0xacc   :  { %v1136_v30 = vpop.permute.xlu1 %1135  ;;  %2032 = vpow2.f32 %v1796_v0 }
 0xad4   :  { %v2023_v23 = vpop.eup %2022 }
 0xad5   :  { %1141 = vrot.lane.b32.xlu0 %v2023_v23, %s2116_s29  ;;  %v2666_v54 = vpop.eup %2024  ;;  %v958_v23 = vadd.f32 %v954_v37, %v950_v58 }
 0xad6   :  { %v2027_v12 = vpop.eup %2026  ;;  %v1148_v57 = vmul.f32 %v2666_v54, %v1138_v7  ;;  %v1128_v35 = vmul.f32 %v2666_v54, %v2681_v49 }
 0xad7   :  { %1139 = vrot.lane.b32.xlu1 %v2027_v12, %s2116_s29  ;;  %v2670_v22 = vpop.eup %2028 }
 0xad8   :  { %v1147_v26 = vmul.f32 %v2670_v22, %v1136_v30  ;;  %v2031_v38 = vpop.eup %2030  ;;  %v1127_v45 = vmul.f32 %v2670_v22, %v958_v23  ;;  %v1211_v30 = vmul.f32 %v958_v23, %v2611_v21 }
 0xad9   :  { %1157 = vrot.lane.b32.xlu0 %v1148_v57, %s2118_s30  ;;  %v2033_v1 = vpop.eup %2032  ;;  %v1114_v59 = vadd.f32 1.0, %v2031_v38  ;;  %v953_v38 = vmul.f32 %v2624_v34, %v2584_v8 }
 0xada   :  { %v1113_v24 = vadd.f32 1.0, %v2033_v1  ;;  %v957_v1 = vmul.f32 %v2622_v53, %v2578_v2 }
 0xadb   :  { %1155 = vrot.lane.b32.xlu1 %v1147_v26, %s2118_s30  ;;  %2034 = vrcp.f32 %v1114_v59 }
 0xadc   :  { %2036 = vrcp.f32 %v1113_v24  ;;  %v2703_v59 = vadd.f32 %v957_v1, %v953_v38 }
 0xae8   :  { %v2035_v55 = vpop.eup %2034 }
 0xae9   :  { %v2037_v51 = vpop.eup %2036  ;;  %v1130_v24 = vmul.f32 %v2035_v55, %v2703_v59 }
 0xaea   :  { %v1129_v48 = vmul.f32 %v2037_v51, %v2620_v61 }
 0xb47   :  { %v1142_v43 = vpop.permute.xlu0 %1141 }
 0xb48   :  { %v1150_v46 = vmul.f32 %v2035_v55, %v1142_v43 }
 0xb49   :  { %v1140_v11 = vpop.permute.xlu1 %1139 }
 0xb4a   :  { %1161 = vrot.lane.b32.xlu0 %v1150_v46, %s2118_s30  ;;  %v1149_v5 = vmul.f32 %v2037_v51, %v1140_v11  ;;  %v1200_v11 = vmul.f32 %v2603_v60, %v2622_v53 }
 0xb4b   :  { %v1158_v4 = vpop.permute.xlu0 %1157 }
 0xb4c   :  { %v2688_v7 = vadd.f32 %v1158_v4, %v1128_v35  ;;  %1159 = vrot.lane.b32.xlu1 %v1149_v5, %s2118_s30 }
 0xb4d   :  { %v1156_v12 = vpop.permute.xlu1 %1155 }
 0xb4e   :  { %2038 = vtanh.f32 %v2688_v7  ;;  %v1167_v15 = vadd.f32 %v1156_v12, %v1127_v45 }
 0xb50   :  { %2040 = vtanh.f32 %v1167_v15  ;;  %v1207_v57 = vmul.f32 %v1167_v15, %v2616_v28 }
 0xb52   :  { %v2695_v26 = vadd.f32 %v1211_v30, %v1207_v57 }
 0xb5b   :  { %v2039_v63 = vpop.eup %2038 }
 0xb5c   :  { %1181 = vrot.lane.b32.xlu0 %v2039_v63, %s2119_s13 }
 0xb5d   :  { %v2041_v0 = vpop.eup %2040 }
 0xb5e   :  { %1179 = vrot.lane.b32.xlu1 %v2041_v0, %s2119_s13 }
 0xbbc   :  { %v1162_v40 = vpop.permute.xlu0 %1161 }
 0xbbd   :  { %v2706_v21 = vadd.f32 %v1162_v40, %v1130_v24 }
 0xbbe   :  { %v1160_v58 = vpop.permute.xlu1 %1159 }
 0xbbf   :  { %2042 = vtanh.f32 %v2706_v21  ;;  %v2710_v43 = vadd.f32 %v1160_v58, %v1129_v48 }
 0xbc1   :  { %2044 = vtanh.f32 %v2710_v43 }
 0xbcc   :  { %v2043_v8 = vpop.eup %2042 }
 0xbcd   :  { %1185 = vrot.lane.b32.xlu0 %v2043_v8, %s2119_s13 }
 0xbce   :  { %v1182_v2 = vpop.permute.xlu0 %1181  ;;  %v2045_v46 = vpop.eup %2044 }
 0xbcf   :  { %v1192_v37 = vmul.f32 %v2666_v54, %v1182_v2  ;;  %1183 = vrot.lane.b32.xlu1 %v2045_v46, %s2119_s13 }
 0xbd0   :  { %v1180_v5 = vpop.permute.xlu1 %1179 }
 0xbd1   :  { %v1196_v35 = vmul.f32 %v1192_v37, %v2624_v34  ;;  %v1191_v4 = vmul.f32 %v2670_v22, %v1180_v5  ;;  %v1202_v22 = vmul.f32 %v2631_v3, %v2593_v31 }
 0xbd3   :  { %v2720_v23 = vadd.f32 %v1200_v11, %v1196_v35  ;;  %v1195_v45 = vmul.f32 %v1191_v4, %v2616_v28 }
 0xbd5   :  { %1225 = vrot.lane.b32.xlu0 %v2720_v23, %s2116_s29  ;;  %v2726_v12 = vadd.f32 %v2614_v56, %v1195_v45  ;;  %v1201_v56 = vmul.f32 %v2638_v52, %v2588_v36 }
 0xbd7   :  { %1223 = vrot.lane.b32.xlu1 %v2726_v12, %s2116_s29 }
 0xc3f   :  { %v1186_v54 = vpop.permute.xlu0 %1185 }
 0xc40   :  { %v1194_v60 = vmul.f32 %v2035_v55, %v1186_v54 }
 0xc41   :  { %v1184_v57 = vpop.permute.xlu1 %1183 }
 0xc42   :  { %v1198_v15 = vmul.f32 %v1194_v60, %v2596_v9  ;;  %v1193_v30 = vmul.f32 %v2037_v51, %v1184_v57 }
 0xc44   :  { %v2733_v63 = vadd.f32 %v1202_v22, %v1198_v15  ;;  %v1197_v28 = vmul.f32 %v1193_v30, %v2590_v29 }
 0xc46   :  { %1229 = vrot.lane.b32.xlu0 %v2733_v63, %s2116_s29  ;;  %v2740_v0 = vadd.f32 %v1201_v56, %v1197_v28 }
 0xc47   :  { %v1226_v55 = vpop.permute.xlu0 %1225 }
 0xc48   :  { %1227 = vrot.lane.b32.xlu1 %v2740_v0, %s2116_s29  ;;  %v1236_v51 = vsel %vm39_vm0, %v2340_v50, %v1226_v55  ;;  %v2759_v50 = vld [vmem:[%s2931_s3] ss:$0 sm:$0xff] }
 0xc49   :  { %v1224_v38 = vpop.permute.xlu1 %1223 }
 0xc4a   :  { %v1235_v3 = vsel %vm39_vm0, %v2332_v47, %v1224_v38 }
 0xc4b   :  { %1894 = vmatprep.mubr.msk.f32.mxu0 %vm50_vm1, %v1235_v3 }
 0xc4c   :  { %1895 = vmatmul.mubr.msk.f32.vlgmr.msra.gmra.mxu0 %vm50_vm1, %v1236_v51 }
 0xcb8   :  { %v1230_v52 = vpop.permute.xlu0 %1229 }
 0xcb9   :  { %v1238_v40 = vsel %vm39_vm0, %v2317_v42, %v1230_v52 }
 0xcba   :  { %v1228_v1 = vpop.permute.xlu1 %1227 }
 0xcbb   :  { %v1237_v24 = vsel %vm39_vm0, %v2312_v41, %v1228_v1 }
 0xcbc   :  { %1897 = vmatprep.mubr.msk.f32.mxu0 %vm50_vm1, %v1237_v24 }
 0xcbd   :  { %1898 = vmatmul.mubr.msk.f32.gmra.mxu0 %vm50_vm1, %v1238_v40 }
 0xd0c   :  { %v1896_v47 = vpop.f32.mrf.mxu0 }
 0xd0d   :  { %v1323_v58 = vadd.f32 %v2759_v50, %v1896_v47 }
 0xd0e   :  { %v1317_v48 = vpop.f32.mrf.mxu0 }
 0xd0f   :  { %v1318_v8 = vadd.f32 %v2759_v50, %v1317_v48  ;;  %2046 = vtanh.f32 %v1323_v58  ;;  %v1803_v35 = vmul.f32 -1.442695, %v1323_v58  ;;  %v1208_v58 = vmul.f32 %v2688_v7, %v2624_v34 }
 0xd11   :  { %2048 = vtanh.f32 %v1318_v8  ;;  %v1802_v5 = vmul.f32 -1.442695, %v1318_v8  ;;  %v1212_v8 = vmul.f32 %v2681_v49, %v2622_v53 }
 0xd12   :  { %2050 = vpow2.f32 %v1803_v35 }
 0xd13   :  { %2052 = vpow2.f32 %v1802_v5 }
 0xd1c   :  { %v2047_v37 = vpop.eup %2046 }
 0xd1e   :  { %v2049_v11 = vpop.eup %2048 }
 0xd1f   :  { %v2051_v4 = vpop.eup %2050 }
 0xd20   :  { %v2053_v45 = vpop.eup %2052  ;;  %v1369_v54 = vadd.f32 1.0, %v2051_v4 }
 0xd21   :  { %v1368_v15 = vadd.f32 1.0, %v2053_v45 }
 0xd7d   :  { %v1899_v41 = vpop.f32.mrf.mxu0 }
 0xd7e   :  { %v1333_v42 = vadd.f32 %v2759_v50, %v1899_v41 }
 0xd7f   :  { %v1327_v2 = vpop.f32.mrf.mxu0 }
 0xd80   :  { %v1328_v46 = vadd.f32 %v2759_v50, %v1327_v2  ;;  %1346 = vrot.lane.b32.xlu0 %v1333_v42, %s2115_s28 }
 0xd82   :  { %1344 = vrot.lane.b32.xlu1 %v1328_v46, %s2115_s28  ;;  %v2777_v46 = vadd.f32 %v1212_v8, %v1208_v58 }
 0xd84   :  { %1394 = vrot.lane.b32.xlu0 %v2047_v37, %s2116_s29 }
 0xd86   :  { %1392 = vrot.lane.b32.xlu1 %v2049_v11, %s2116_s29 }
 0xdf2   :  { %v1347_v60 = vpop.permute.xlu0 %1346 }
 0xdf3   :  { %2054 = vtanh.f32 %v1347_v60  ;;  %v1805_v52 = vmul.f32 -1.442695, %v1347_v60  ;;  %v1210_v60 = vmul.f32 %v2706_v21, %v2596_v9 }
 0xdf4   :  { %v1345_v57 = vpop.permute.xlu1 %1344  ;;  %2056 = vrcp.f32 %v1369_v54 }
 0xdf5   :  { %2058 = vtanh.f32 %v1345_v57  ;;  %v1804_v1 = vmul.f32 -1.442695, %v1345_v57  ;;  %v1209_v57 = vmul.f32 %v2710_v43, %v2590_v29  ;;  %v1457_v43 = vmul.f32 %v2720_v23, %v2455_v32 }
 0xdf6   :  { %2060 = vrcp.f32 %v1368_v15  ;;  %v1395_v30 = vpop.permute.xlu0 %1394  ;;  %v1214_v15 = vmul.f32 %v2703_v59, %v2593_v31 }
 0xdf7   :  { %2062 = vpow2.f32 %v1805_v52 }
 0xdf8   :  { %v1393_v38 = vpop.permute.xlu1 %1392  ;;  %2064 = vpow2.f32 %v1804_v1 }
 0xe00   :  { %v2055_v22 = vpop.eup %2054 }
 0xe01   :  { %1398 = vrot.lane.b32.xlu0 %v2055_v22, %s2116_s29  ;;  %v2057_v28 = vpop.eup %2056  ;;  %v2797_v22 = vadd.f32 %v1214_v15, %v1210_v60  ;;  %v2114_v15 = vld [vmem:[%s2930_s0 + $0x8] sm:$0xff] }
 0xe02   :  { %v2059_v56 = vpop.eup %2058  ;;  %v1405_v55 = vmul.f32 %v2057_v28, %v1395_v30  ;;  %v1385_v35 = vmul.f32 %v2057_v28, %v2777_v46  ;;  %v1213_v30 = vmul.f32 %v2620_v61, %v2588_v36 }
 0xe03   :  { %1396 = vrot.lane.b32.xlu1 %v2059_v56, %s2116_s29  ;;  %v2061_v3 = vpop.eup %2060 }
 0xe04   :  { %v1404_v51 = vmul.f32 %v2061_v3, %v1393_v38  ;;  %v2063_v24 = vpop.eup %2062  ;;  %v1384_v34 = vmul.f32 %v2061_v3, %v2695_v26  ;;  %v2802_v38 = vadd.f32 %v1213_v30, %v1209_v57 }
 0xe05   :  { %1414 = vrot.lane.b32.xlu0 %v1405_v55, %s2118_s30  ;;  %v2065_v40 = vpop.eup %2064  ;;  %v1371_v47 = vadd.f32 1.0, %v2063_v24 }
 0xe06   :  { %v1370_v48 = vadd.f32 1.0, %v2065_v40 }
 0xe07   :  { %1412 = vrot.lane.b32.xlu1 %v1404_v51, %s2118_s30  ;;  %2066 = vrcp.f32 %v1371_v47  ;;  %v1456_v47 = vmul.f32 %v2726_v12, %v2451_v27 }
 0xe08   :  { %2068 = vrcp.f32 %v1370_v48 }
 0xe14   :  { %v2067_v41 = vpop.eup %2066 }
 0xe15   :  { %v2069_v37 = vpop.eup %2068  ;;  %v1387_v56 = vmul.f32 %v2067_v41, %v2797_v22 }
 0xe16   :  { %v1386_v9 = vmul.f32 %v2069_v37, %v2802_v38 }
 0xe73   :  { %v1399_v42 = vpop.permute.xlu0 %1398 }
 0xe74   :  { %v1407_v2 = vmul.f32 %v2067_v41, %v1399_v42 }
 0xe75   :  { %v1397_v11 = vpop.permute.xlu1 %1396 }
 0xe76   :  { %1418 = vrot.lane.b32.xlu0 %v1407_v2, %s2118_s30  ;;  %v1406_v5 = vmul.f32 %v2069_v37, %v1397_v11  ;;  %v1458_v11 = vmul.f32 %v2740_v0, %v2425_v6  ;;  %v2112_v0 = vld [vmem:[%s2930_s0 + $0x58] sm:$0xff] }
 0xe77   :  { %v1415_v4 = vpop.permute.xlu0 %1414 }
 0xe78   :  { %v2781_v45 = vadd.f32 %v1415_v4, %v1385_v35  ;;  %1416 = vrot.lane.b32.xlu1 %v1406_v5, %s2118_s30 }
 0xe79   :  { %v1413_v53 = vpop.permute.xlu1 %1412 }
 0xe7a   :  { %2070 = vtanh.f32 %v2781_v45  ;;  %v2786_v49 = vadd.f32 %v1413_v53, %v1384_v34 }
 0xe7c   :  { %2072 = vtanh.f32 %v2786_v49 }
 0xe87   :  { %v2071_v7 = vpop.eup %2070 }
 0xe88   :  { %1438 = vrot.lane.b32.xlu0 %v2071_v7, %s2119_s13 }
 0xe89   :  { %v2073_v54 = vpop.eup %2072 }
 0xe8a   :  { %1436 = vrot.lane.b32.xlu1 %v2073_v54, %s2119_s13  ;;  %v2113_v54 = vld [vmem:[%s2930_s0] sm:$0xff] }
 0xee8   :  { %v1419_v55 = vpop.permute.xlu0 %1418 }
 0xee9   :  { %v2804_v51 = vadd.f32 %v1419_v55, %v1387_v56 }
 0xeea   :  { %v1417_v31 = vpop.permute.xlu1 %1416 }
 0xeeb   :  { %2074 = vtanh.f32 %v2804_v51  ;;  %v2808_v59 = vadd.f32 %v1417_v31, %v1386_v9 }
 0xeed   :  { %2076 = vtanh.f32 %v2808_v59 }
 0xef8   :  { %v2075_v29 = vpop.eup %2074 }
 0xef9   :  { %1442 = vrot.lane.b32.xlu0 %v2075_v29, %s2119_s13 }
 0xefa   :  { %v1439_v36 = vpop.permute.xlu0 %1438  ;;  %v2077_v61 = vpop.eup %2076 }
 0xefb   :  { %v1449_v21 = vmul.f32 %v2057_v28, %v1439_v36  ;;  %1440 = vrot.lane.b32.xlu1 %v2077_v61, %s2119_s13 }
 0xefc   :  { %v1437_v1 = vpop.permute.xlu1 %1436 }
 0xefd   :  { %v1453_v52 = vmul.f32 %v1449_v21, %v2457_v62  ;;  %v1448_v24 = vmul.f32 %v2061_v3, %v1437_v1  ;;  %v1459_v3 = vmul.f32 %v2733_v63, %v2430_v33 }
 0xeff   :  { %v2816_v40 = vadd.f32 %v1457_v43, %v1453_v52  ;;  %v1452_v48 = vmul.f32 %v1448_v24, %v2453_v25 }
 0xf01   :  { %1482 = vrot.lane.b32.xlu0 %v2816_v40, %s2116_s29  ;;  %v2823_v28 = vadd.f32 %v1456_v47, %v1452_v48 }
 0xf03   :  { %1480 = vrot.lane.b32.xlu1 %v2823_v28, %s2116_s29 }
 0xf6b   :  { %v1443_v23 = vpop.permute.xlu0 %1442 }
 0xf6c   :  { %v1451_v58 = vmul.f32 %v2067_v41, %v1443_v23 }
 0xf6d   :  { %v1441_v42 = vpop.permute.xlu1 %1440 }
 0xf6e   :  { %v1455_v8 = vmul.f32 %v1451_v58, %v2433_v44  ;;  %v1450_v2 = vmul.f32 %v2069_v37, %v1441_v42  ;;  %v2111_v37 = vld [vmem:[%s2930_s0 + $0x50] sm:$0xff]  ;;  %s2120_s0 = smov 104  }
 0xf70   :  { %v2830_v12 = vadd.f32 %v1459_v3, %v1455_v8  ;;  %v1454_v35 = vmul.f32 %v1450_v2, %v2427_v39 }
 0xf72   :  { %1486 = vrot.lane.b32.xlu0 %v2830_v12, %s2116_s29  ;;  %v2837_v5 = vadd.f32 %v1458_v11, %v1454_v35 }
 0xf73   :  { %v1483_v41 = vpop.permute.xlu0 %1482 }
 0xf74   :  { %1484 = vrot.lane.b32.xlu1 %v2837_v5, %s2116_s29  ;;  %v1493_v34 = vsel %vm39_vm0, %v2112_v0, %v1483_v41 }
 0xf75   :  { %v1481_v63 = vpop.permute.xlu1 %1480 }
 0xf76   :  { %v1492_v4 = vsel %vm39_vm0, %v2111_v37, %v1481_v63 }
 0xf77   :  { %1904 = vmatprep.mubr.msk.f32.mxu1 %vm50_vm1, %v1492_v4 }
 0xf78   :  { %1905 = vmatmul.mubr.msk.f32.vlgmr.msra.gmra.mxu1 %vm50_vm1, %v1493_v34 }
 0xfe4   :  { %v1487_v53 = vpop.permute.xlu0 %1486 }
 0xfe5   :  { %v1495_v57 = vsel %vm39_vm0, %v2114_v15, %v1487_v53 }
 0xfe6   :  { %v1485_v7 = vpop.permute.xlu1 %1484 }
 0xfe7   :  { %v1494_v60 = vsel %vm39_vm0, %v2113_v54, %v1485_v7  ;;  %v1465_v54 = vmul.f32 %v2781_v45, %v2457_v62 }
 0xfe8   :  { %1907 = vmatprep.mubr.msk.f32.mxu1 %vm50_vm1, %v1494_v60  ;;  %v1469_v60 = vmul.f32 %v2777_v46, %v2455_v32 }
 0xfe9   :  { %1908 = vmatmul.mubr.msk.f32.gmra.mxu1 %vm50_vm1, %v1495_v57  ;;  %v1464_v57 = vmul.f32 %v2786_v49, %v2453_v25 }
0x1038   :  { %v1906_v30 = vpop.f32.mrf.mxu1 }
0x1039   :  { %v1580_v55 = vadd.f32 %v2759_v50, %v1906_v30 }
0x103a   :  { %v1574_v56 = vpop.f32.mrf.mxu1 }
0x103b   :  { %v1575_v9 = vadd.f32 %v2759_v50, %v1574_v56  ;;  %2078 = vtanh.f32 %v1580_v55  ;;  %v1811_v52 = vmul.f32 -1.442695, %v1580_v55  ;;  %v1473_v55 = vadd.f32 %v1469_v60, %v1465_v54 }
0x103d   :  { %2080 = vtanh.f32 %v1575_v9  ;;  %v1810_v1 = vmul.f32 -1.442695, %v1575_v9  ;;  %v1468_v9 = vmul.f32 %v2695_v26, %v2451_v27  ;;  %v1467_v26 = vmul.f32 %v2804_v51, %v2433_v44 }
0x103e   :  { %2082 = vpow2.f32 %v1811_v52  ;;  %v1466_v52 = vmul.f32 %v2808_v59, %v2427_v39 }
0x103f   :  { %2084 = vpow2.f32 %v1810_v1 }
0x1048   :  { %v2079_v21 = vpop.eup %2078 }
0x104a   :  { %v2081_v43 = vpop.eup %2080 }
0x104b   :  { %v2083_v24 = vpop.eup %2082 }
0x104c   :  { %v2085_v47 = vpop.eup %2084  ;;  %v1626_v48 = vadd.f32 1.0, %v2083_v24  ;;  %v1470_v24 = vmul.f32 %v2802_v38, %v2425_v6  ;;  %v1714_v6 = vmul.f32 %v2816_v40, %v2265_v19  ;;  %v1716_v19 = vmul.f32 %v2830_v12, %v2255_v14 }
0x10a9   :  { %v1909_v31 = vpop.f32.mrf.mxu1 }
0x10aa   :  { %v1590_v29 = vadd.f32 %v2759_v50, %v1909_v31 }
0x10ab   :  { %v1584_v36 = vpop.f32.mrf.mxu1 }
0x10ac   :  { %v1585_v61 = vadd.f32 %v2759_v50, %v1584_v36  ;;  %1603 = vrot.lane.b32.xlu0 %v1590_v29, %s2115_s28  ;;  %v1625_v50 = vadd.f32 1.0, %v2085_v47 }
0x10ae   :  { %1601 = vrot.lane.b32.xlu1 %v1585_v61, %s2115_s28  ;;  %v1472_v61 = vadd.f32 %v1468_v9, %v1464_v57 }
0x10b0   :  { %1651 = vrot.lane.b32.xlu0 %v2079_v21, %s2116_s29 }
0x10b2   :  { %1649 = vrot.lane.b32.xlu1 %v2081_v43, %s2116_s29  ;;  %v1471_v43 = vmul.f32 %v2797_v22, %v2430_v33 }
0x10b4   :  { %v1475_v1 = vadd.f32 %v1471_v43, %v1467_v26 }
0x111e   :  { %v1604_v23 = vpop.permute.xlu0 %1603 }
0x111f   :  { %2086 = vtanh.f32 %v1604_v23  ;;  %v1813_v37 = vmul.f32 -1.442695, %v1604_v23  ;;  %v1474_v23 = vadd.f32 %v1470_v24, %v1466_v52 }
0x1120   :  { %v1602_v58 = vpop.permute.xlu1 %1601  ;;  %2088 = vrcp.f32 %v1626_v48 }
0x1121   :  { %2090 = vtanh.f32 %v1602_v58  ;;  %v1812_v4 = vmul.f32 -1.442695, %v1602_v58 }
0x1122   :  { %2092 = vrcp.f32 %v1625_v50  ;;  %v1652_v8 = vpop.permute.xlu0 %1651 }
0x1123   :  { %2094 = vpow2.f32 %v1813_v37 }
0x1124   :  { %v1650_v35 = vpop.permute.xlu1 %1649  ;;  %2096 = vpow2.f32 %v1812_v4 }
0x112c   :  { %v2087_v3 = vpop.eup %2086 }
0x112d   :  { %1655 = vrot.lane.b32.xlu0 %v2087_v3, %s2116_s29  ;;  %v2870_v42 = vpop.eup %2088 }
0x112e   :  { %v2091_v2 = vpop.eup %2090  ;;  %v1662_v11 = vmul.f32 %v2870_v42, %v1652_v8  ;;  %v1642_v36 = vmul.f32 %v2870_v42, %v1473_v55 }
0x112f   :  { %1653 = vrot.lane.b32.xlu1 %v2091_v2, %s2116_s29  ;;  %v2874_v41 = vpop.eup %2092 }
0x1130   :  { %v1661_v63 = vmul.f32 %v2874_v41, %v1650_v35  ;;  %v2095_v0 = vpop.eup %2094  ;;  %v1641_v25 = vmul.f32 %v2874_v41, %v1472_v61 }
0x1131   :  { %1671 = vrot.lane.b32.xlu0 %v1662_v11, %s2118_s30  ;;  %v2097_v34 = vpop.eup %2096  ;;  %v1628_v53 = vadd.f32 1.0, %v2095_v0  ;;  %v1713_v11 = vmul.f32 %v2823_v28, %v2261_v17  ;;  %v1715_v0 = vmul.f32 %v2837_v5, %v2253_v13 }
0x1132   :  { %v1627_v7 = vadd.f32 1.0, %v2097_v34 }
0x1133   :  { %1669 = vrot.lane.b32.xlu1 %v1661_v63, %s2118_s30  ;;  %2098 = vrcp.f32 %v1628_v53 }
0x1134   :  { %2100 = vrcp.f32 %v1627_v7 }
0x1140   :  { %v2099_v15 = vpop.eup %2098 }
0x1141   :  { %v2101_v31 = vpop.eup %2100  ;;  %v1644_v47 = vmul.f32 %v2099_v15, %v1475_v1 }
0x1142   :  { %v1643_v58 = vmul.f32 %v2101_v31, %v1474_v23 }
0x119f   :  { %v1656_v30 = vpop.permute.xlu0 %1655 }
0x11a0   :  { %v1664_v56 = vmul.f32 %v2099_v15, %v1656_v30 }
0x11a1   :  { %v1654_v29 = vpop.permute.xlu1 %1653 }
0x11a2   :  { %1675 = vrot.lane.b32.xlu0 %v1664_v56, %s2118_s30  ;;  %v1663_v62 = vmul.f32 %v2101_v31, %v1654_v29 }
0x11a3   :  { %v1672_v45 = vpop.permute.xlu0 %1671 }
0x11a4   :  { %v1682_v32 = vadd.f32 %v1672_v45, %v1642_v36  ;;  %1673 = vrot.lane.b32.xlu1 %v1663_v62, %s2118_s30 }
0x11a5   :  { %v1670_v46 = vpop.permute.xlu1 %1669 }
0x11a6   :  { %2102 = vtanh.f32 %v1682_v32  ;;  %v1681_v49 = vadd.f32 %v1670_v46, %v1641_v25 }
0x11a8   :  { %2104 = vtanh.f32 %v1681_v49 }
0x11b3   :  { %v2103_v21 = vpop.eup %2102 }
0x11b4   :  { %1695 = vrot.lane.b32.xlu0 %v2103_v21, %s2119_s13 }
0x11b5   :  { %v2105_v27 = vpop.eup %2104 }
0x11b6   :  { %1693 = vrot.lane.b32.xlu1 %v2105_v27, %s2119_s13 }
0x1214   :  { %v1676_v48 = vpop.permute.xlu0 %1675 }
0x1215   :  { %v1684_v50 = vadd.f32 %v1676_v48, %v1644_v47 }
0x1216   :  { %v1674_v3 = vpop.permute.xlu1 %1673 }
0x1217   :  { %2106 = vtanh.f32 %v1684_v50  ;;  %v1683_v8 = vadd.f32 %v1674_v3, %v1643_v58 }
0x1219   :  { %2108 = vtanh.f32 %v1683_v8 }
0x1224   :  { %v2107_v44 = vpop.eup %2106 }
0x1225   :  { %1699 = vrot.lane.b32.xlu0 %v2107_v44, %s2119_s13 }
0x1226   :  { %v1696_v33 = vpop.permute.xlu0 %1695  ;;  %v2109_v22 = vpop.eup %2108 }
0x1227   :  { %v1706_v39 = vmul.f32 %v2870_v42, %v1696_v33  ;;  %1697 = vrot.lane.b32.xlu1 %v2109_v22, %s2119_s13 }
0x1228   :  { %v1694_v51 = vpop.permute.xlu1 %1693 }
0x1229   :  { %v1710_v38 = vmul.f32 %v1706_v39, %v2267_v20  ;;  %v1705_v59 = vmul.f32 %v2874_v41, %v1694_v51 }
0x122b   :  { %v1718_v2 = vadd.f32 %v1714_v6, %v1710_v38  ;;  %v1709_v35 = vmul.f32 %v1705_v59, %v2263_v18 }
0x122d   :  { %1725 = vrot.lane.b32.xlu0 %v1718_v2, %s2120_s0  ;;  %v1717_v63 = vadd.f32 %v1713_v11, %v1709_v35 }
0x122f   :  { %1723 = vrot.lane.b32.xlu1 %v1717_v63, %s2120_s0 }
0x1297   :  { %v1700_v42 = vpop.permute.xlu0 %1699 }
0x1298   :  { %v1708_v37 = vmul.f32 %v2099_v15, %v1700_v42 }
0x1299   :  { %v1698_v40 = vpop.permute.xlu1 %1697 }
0x129a   :  { %v1712_v20 = vmul.f32 %v1708_v37, %v2258_v16  ;;  %v1707_v4 = vmul.f32 %v2101_v31, %v1698_v40 }
0x129c   :  { %v1720_v41 = vadd.f32 %v1716_v19, %v1712_v20  ;;  %v1711_v17 = vmul.f32 %v1707_v4, %v2251_v10 }
0x129e   :  { %1733 = vrot.lane.b32.xlu0 %v1720_v41, %s2116_s29  ;;  %v1719_v18 = vadd.f32 %v1715_v0, %v1711_v17 }
0x129f   :  { %v1726_v28 = vpop.permute.xlu0 %1725 }
0x12a0   :  { %1731 = vrot.lane.b32.xlu1 %v1719_v18, %s2116_s29 }
0x12a1   :  { %v1724_v34 = vpop.permute.xlu1 %1723 }
0x1310   :  { %v1734_v53 = vpop.permute.xlu0 %1733 }
0x1311   :  { %v1738_v14 = vsel %vm39_vm0, %v1726_v28, %v1734_v53 }
0x1312   :  { %1740 = vst.msk [vmem:[%s2933_s4 + $0x8] sm:$0xff] %vm50_vm1, %v1738_v14  ;;  %v1732_v16 = vpop.permute.xlu1 %1731 }
0x1313   :  { %v1737_v13 = vsel %vm39_vm0, %v1724_v34, %v1732_v16 }
0x1314   :  { %1739 = vst.msk [vmem:[%s2933_s4] sm:$0xff] %vm50_vm1, %v1737_v13 }

// kernel: forward.7
= control target key start
LH: loop header
LB: loop body
LE: loop exit
PB: predicated region body
PF: predicated region fallthrough
CT: control target
= control target key end

     0   :  { %v19_v1 = vlaneseq  ;;  %s1503_s0 = inlined_call_operand.vmem [shape: f32[2,8,8], index: 0, kind: input, shape index: {}]   ;;  %s1504_s1 = inlined_call_operand.vmem [shape: f32[8,8], index: 1, kind: input, shape index: {}]   ;;  %s1505_s2 = inlined_call_operand.vmem [shape: f32[2,8], index: 2, kind: input, shape index: {}]   ;;  %s1506_s3 = inlined_call_operand.vmem [shape: f32[2,8], index: 3, kind: input, shape index: {}]   ;;  %s1507_s4 = inlined_call_operand.hbm [shape: s32[2,8], index: 4, kind: output, shape index: {}]  }
   0x1   :  { %v939_v0 = vld [vmem:[%s1504_s1] sm:$0xff]  ;;  %v949_v3 = vld [vmem:[%s1503_s0 + $0x8] sm:$0xff] }
   0x2   :  { %v944_v2 = vld [vmem:[%s1503_s0] sm:$0xff]  ;;  %v30_v4 = vrot.slane %v939_v0, 6 }
   0x3   :  { %9 = vsyncpa [#allocation3], 0  ;;  %v952_v5 = vshrl.u32 %v19_v1, 7  ;;  %v954_v6 = vand.u32 127, %v19_v1  ;;  %vm38_vm1 = vcmask 64512   ;;  %v902_v44 = vmov 2  }
   0x4   :  { %v957_v7 = vadd.f32 %v30_v4, %v944_v2  ;;  %v960_v8 = vadd.f32 %v949_v3, %v30_v4  ;;  %840 = vset.pattern.permute.xlu1 %v902_v44 }
   0x5   :  { %v963_v9 = vsub.s32 0, %v952_v5  ;;  %vm967_vm0 = vcmp.eq.s32.totalorder %v952_v5, %v954_v6  ;;  %v45_v17 = vsub.s32 1, %v952_v5  ;;  %v78_v45 = vsub.s32 2, %v952_v5 }
   0x7   :  { %v36_v11 = vrot.slane %v957_v7, %v963_v9  ;;  %v433_v12 = vrot.slane %v960_v8, %v963_v9  ;;  %v46_v18 = vrot.slane %v944_v2, %v45_v17  ;;  %v442_v22 = vrot.slane %v949_v3, %v45_v17  ;;  %v27_v17 = vld [vmem:[%s1505_s2] sm:$0x1] }
   0x8   :  { %v79_v46 = vrot.slane %v944_v2, %v78_v45  ;;  %v475_v50 = vrot.slane %v949_v3, %v78_v45  ;;  %vm64_vm2 = vcmp.gt.f32.partialorder %v27_v17, 0.5 }
   0x9   :  { %v37_v13 = vsel %vm967_vm0, %v36_v11, 0.0  ;;  %v434_v14 = vsel %vm967_vm0, %v433_v12, 0.0 }
   0xa   :  { %v39_v15 = vsel %vm38_vm1, %v37_v13, 0.0  ;;  %v435_v16 = vsel %vm38_vm1, %v434_v14, 0.0 }
   0xb   :  { %40 = vadd.xlane.f32.xlu0 %v39_v15 }
   0xf   :  { %436 = vadd.xlane.f32.xlu0 %v435_v16 }
  0x94   :  { %v41_v19 = vpop.xlane.xlu0 %40 }
  0x95   :  { %v42_v20 = vadd.f32 %v41_v19, %v939_v0 }
  0x97   :  { %v984_v21 = vadd.f32 %v46_v18, %v42_v20  ;;  %v903_v18 = vmov 0   ;;  %v904_v20 = vmov 3  }
  0x98   :  { %v437_v23 = vpop.xlane.xlu0 %436  ;;  %v1033_v19 = vsel %vm64_vm2, 1, %v903_v18 }
  0x99   :  { %v48_v24 = vsel %vm38_vm1, %v984_v21, -inf  ;;  %v438_v25 = vadd.f32 %v437_v23, %v939_v0  ;;  %v1041_v23 = vcvt.s32.f32 %v952_v5 }
  0x9a   :  { %v49_v26 = vrot.slane %v48_v24, 4 }
  0x9b   :  { %v990_v27 = vadd.f32 %v442_v22, %v438_v25  ;;  %v1508_v22 = vmov 5  }
  0x9c   :  { %v50_v28 = vmax.f32 %v48_v24, %v49_v26 }
  0x9d   :  { %v444_v29 = vsel %vm38_vm1, %v990_v27, -inf }
  0x9e   :  { %v51_v30 = vrot.slane %v50_v28, 2  ;;  %v445_v31 = vrot.slane %v444_v29, 4 }
  0xa0   :  { %v52_v32 = vmax.f32 %v50_v28, %v51_v30  ;;  %v446_v33 = vmax.f32 %v444_v29, %v445_v31  ;;  %v109_v29 = vsub.s32 3, %v952_v5 }
  0xa2   :  { %v53_v34 = vrot.slane %v52_v32, 1  ;;  %v447_v35 = vrot.slane %v446_v33, 2  ;;  %v110_v31 = vrot.slane %v944_v2, %v109_v29 }
  0xa4   :  { %v994_v36 = vmax.f32 %v52_v32, %v53_v34  ;;  %v448_v37 = vmax.f32 %v446_v33, %v447_v35 }
  0xa6   :  { %v449_v38 = vrot.slane %v448_v37, 1  ;;  %v71_v39 = vsel %vm967_vm0, %v994_v36, 0.0  ;;  %vm55_vm6 = vcmp.ge.f32.partialorder %v984_v21, %v994_v36 }
  0xa7   :  { %v72_v40 = vsel %vm38_vm1, %v71_v39, 0.0 }
  0xa8   :  { %v1000_v41 = vmax.f32 %v448_v37, %v449_v38  ;;  %73 = vadd.xlane.f32.xlu1 %v72_v40  ;;  %v506_v37 = vrot.slane %v949_v3, %v109_v29 }
  0xaa   :  { %v467_v42 = vsel %vm967_vm0, %v1000_v41, 0.0  ;;  %vm451_vm2 = vcmp.ge.f32.partialorder %v990_v27, %v1000_v41 }
  0xab   :  { %v468_v43 = vsel %vm38_vm1, %v467_v42, 0.0 }
  0xac   :  { %469 = vadd.xlane.f32.xlu1 %v468_v43 }
 0x131   :  { %v74_v47 = vpop.xlane.xlu1 %73 }
 0x132   :  { %v75_v48 = vadd.f32 %v74_v47, %v939_v0 }
 0x134   :  { %v80_v49 = vadd.f32 %v79_v46, %v75_v48 }
 0x135   :  { %v470_v51 = vpop.xlane.xlu1 %469 }
 0x136   :  { %v81_v52 = vsel %vm38_vm1, %v80_v49, -inf  ;;  %v471_v53 = vadd.f32 %v470_v51, %v939_v0 }
 0x137   :  { %v82_v54 = vrot.slane %v81_v52, 4 }
 0x138   :  { %v1013_v55 = vadd.f32 %v475_v50, %v471_v53 }
 0x139   :  { %v83_v56 = vmax.f32 %v81_v52, %v82_v54 }
 0x13a   :  { %v477_v57 = vsel %vm38_vm1, %v1013_v55, -inf }
 0x13b   :  { %v84_v58 = vrot.slane %v83_v56, 2  ;;  %v478_v59 = vrot.slane %v477_v57, 4 }
 0x13d   :  { %v85_v60 = vmax.f32 %v83_v56, %v84_v58  ;;  %v479_v61 = vmax.f32 %v477_v57, %v478_v59 }
 0x13f   :  { %v86_v62 = vrot.slane %v85_v60, 1  ;;  %v480_v63 = vrot.slane %v479_v61, 2 }
 0x141   :  { %v1017_v1 = vmax.f32 %v85_v60, %v86_v62  ;;  %v481_v4 = vmax.f32 %v479_v61, %v480_v63 }
 0x143   :  { %v482_v11 = vrot.slane %v481_v4, 1  ;;  %v102_v12 = vsel %vm967_vm0, %v1017_v1, 0.0  ;;  %vm88_vm3 = vcmp.ge.f32.partialorder %v80_v49, %v1017_v1 }
 0x144   :  { %v103_v13 = vsel %vm38_vm1, %v102_v12, 0.0  ;;  %v89_v24 = vsel %vm88_vm3, %v1041_v23, 8.0  ;;  %v1514_v12 = vmov 7  }
 0x145   :  { %v1023_v14 = vmax.f32 %v481_v4, %v482_v11  ;;  %104 = vadd.xlane.f32.xlu0 %v103_v13  ;;  %v90_v25 = vsel %vm38_vm1, %v89_v24, inf  ;;  %v1515_v13 = vmov 1  }
 0x146   :  { %v91_v26 = vrot.slane %v90_v25, 4  ;;  %842 = vset.pattern.permute.xlu0 %v1515_v13 }
 0x147   :  { %v498_v15 = vsel %vm967_vm0, %v1023_v14, 0.0  ;;  %vm484_vm3 = vcmp.ge.f32.partialorder %v1013_v55, %v1023_v14 }
 0x148   :  { %v499_v16 = vsel %vm38_vm1, %v498_v15, 0.0  ;;  %v92_v28 = vmin.f32 %v90_v25, %v91_v26  ;;  %v140_v15 = vsub.s32 4, %v952_v5 }
 0x149   :  { %500 = vadd.xlane.f32.xlu1 %v499_v16 }
 0x14a   :  { %v93_v30 = vrot.slane %v92_v28, 2  ;;  %v141_v17 = vrot.slane %v944_v2, %v140_v15 }
 0x14c   :  { %v94_v33 = vmin.f32 %v92_v28, %v93_v30  ;;  %v537_v28 = vrot.slane %v949_v3, %v140_v15 }
 0x14e   :  { %v95_v39 = vrot.slane %v94_v33, 1 }
 0x150   :  { %v96_v47 = vmin.f32 %v94_v33, %v95_v39 }
 0x15a   :  { %98 = vperm.xlu1 %840, %v1033_v19  }
 0x15e   :  { %841 = vset.pattern.permute.xlu1 %v904_v20 }
 0x15f   :  { %129 = vperm.xlu1 %841, %v1033_v19  }
 0x163   :  { %843 = vset.pattern.permute.xlu1 %v1508_v22 }
 0x1ce   :  { %v105_v32 = vpop.xlane.xlu0 %104 }
 0x1cf   :  { %v106_v34 = vadd.f32 %v105_v32, %v939_v0 }
 0x1d1   :  { %v1048_v35 = vadd.f32 %v110_v31, %v106_v34 }
 0x1d2   :  { %v501_v38 = vpop.xlane.xlu1 %500 }
 0x1d3   :  { %v112_v40 = vsel %vm38_vm1, %v1048_v35, -inf  ;;  %v502_v42 = vadd.f32 %v501_v38, %v939_v0 }
 0x1d4   :  { %v113_v43 = vrot.slane %v112_v40, 4 }
 0x1d5   :  { %v1054_v45 = vadd.f32 %v506_v37, %v502_v42 }
 0x1d6   :  { %v114_v46 = vmax.f32 %v112_v40, %v113_v43  ;;  %v99_v48 = vpop.permute.xlu1 %98 }
 0x1d7   :  { %v508_v49 = vsel %vm38_vm1, %v1054_v45, -inf  ;;  %vm100_vm4 = vcmp.eq.s32.totalorder %v99_v48, 1 }
 0x1d8   :  { %v115_v50 = vrot.slane %v114_v46, 2  ;;  %v509_v51 = vrot.slane %v508_v49, 4  ;;  %v1058_v52 = vsel %vm100_vm4, %v96_v47, 0.0 }
 0x1da   :  { %v116_v53 = vmax.f32 %v114_v46, %v115_v50  ;;  %v510_v54 = vmax.f32 %v508_v49, %v509_v51  ;;  %v1076_v16 = vpop.permute.xlu1 %129 }
 0x1dc   :  { %v117_v56 = vrot.slane %v116_v53, 1  ;;  %v511_v57 = vrot.slane %v510_v54, 2 }
 0x1de   :  { %v1060_v58 = vmax.f32 %v116_v53, %v117_v56  ;;  %v512_v59 = vmax.f32 %v510_v54, %v511_v57  ;;  %v28_v57 = vld [vmem:[%s1506_s3] sm:$0x1] }
 0x1df   :  { %vm336_vm5 = vcmp.gt.f32.partialorder %v28_v57, 0.5 }
 0x1e0   :  { %v513_v60 = vrot.slane %v512_v59, 1  ;;  %v133_v61 = vsel %vm967_vm0, %v1060_v58, 0.0 }
 0x1e1   :  { %v134_v62 = vsel %vm38_vm1, %v133_v61, 0.0  ;;  %v1115_v61 = vsel %vm336_vm5, 1, %v903_v18 }
 0x1e2   :  { %v1066_v63 = vmax.f32 %v512_v59, %v513_v60  ;;  %135 = vadd.xlane.f32.xlu1 %v134_v62  ;;  %v1510_v59 = vmov 4   ;;  %v1512_v60 = vmov 6   ;;  %v1125_v62 = vld [vmem:[%s1506_s3 + $0x1] sm:$0x1] }
 0x1e3   :  { %vm731_vm15 = vcmp.gt.f32.partialorder %v1125_v62, 0.5 }
 0x1e4   :  { %v529_v4 = vsel %vm967_vm0, %v1066_v63, 0.0 }
 0x1e5   :  { %v530_v11 = vsel %vm38_vm1, %v529_v4, 0.0  ;;  %v56_v4 = vsel %vm55_vm6, %v1041_v23, 8.0 }
 0x1e6   :  { %531 = vadd.xlane.f32.xlu1 %v530_v11  ;;  %v57_v11 = vsel %vm38_vm1, %v56_v4, inf }
 0x1e7   :  { %v58_v15 = vrot.slane %v57_v11, 4 }
 0x1f7   :  { %191 = vperm.xlu1 %843, %v1033_v19  }
 0x1fb   :  { %844 = vset.pattern.permute.xlu1 %v1514_v12 }
 0x26b   :  { %v136_v24 = vpop.xlane.xlu1 %135 }
 0x26c   :  { %v137_v25 = vadd.f32 %v136_v24, %v939_v0  ;;  %v171_v24 = vsub.s32 5, %v952_v5 }
 0x26e   :  { %v1080_v26 = vadd.f32 %v141_v17, %v137_v25  ;;  %v59_v17 = vmin.f32 %v57_v11, %v58_v15  ;;  %v568_v21 = vrot.slane %v949_v3, %v171_v24 }
 0x26f   :  { %v532_v29 = vpop.xlane.xlu1 %531 }
 0x270   :  { %v143_v30 = vsel %vm38_vm1, %v1080_v26, -inf  ;;  %v533_v31 = vadd.f32 %v532_v29, %v939_v0  ;;  %v60_v25 = vrot.slane %v59_v17, 2  ;;  %v172_v29 = vrot.slane %v944_v2, %v171_v24 }
 0x271   :  { %v144_v32 = vrot.slane %v143_v30, 4 }
 0x272   :  { %v1086_v33 = vadd.f32 %v537_v28, %v533_v31  ;;  %v61_v31 = vmin.f32 %v59_v17, %v60_v25 }
 0x273   :  { %v145_v34 = vmax.f32 %v143_v30, %v144_v32  ;;  %v1134_v28 = vpop.permute.xlu1 %191 }
 0x274   :  { %v539_v37 = vsel %vm38_vm1, %v1086_v33, -inf }
 0x275   :  { %v146_v38 = vrot.slane %v145_v34, 2  ;;  %v540_v39 = vrot.slane %v539_v37, 4 }
 0x277   :  { %v147_v40 = vmax.f32 %v145_v34, %v146_v38  ;;  %v541_v42 = vmax.f32 %v539_v37, %v540_v39  ;;  %v62_v38 = vrot.slane %v61_v31, 1 }
 0x279   :  { %v148_v43 = vrot.slane %v147_v40, 1  ;;  %v542_v46 = vrot.slane %v541_v42, 2 }
 0x27b   :  { %v1090_v47 = vmax.f32 %v147_v40, %v148_v43  ;;  %v543_v48 = vmax.f32 %v541_v42, %v542_v46 }
 0x27d   :  { %v544_v49 = vrot.slane %v543_v48, 1  ;;  %v164_v50 = vsel %vm967_vm0, %v1090_v47, 0.0 }
 0x27e   :  { %v165_v51 = vsel %vm38_vm1, %v164_v50, 0.0 }
 0x27f   :  { %v1096_v53 = vmax.f32 %v543_v48, %v544_v49  ;;  %166 = vadd.xlane.f32.xlu0 %v165_v51  ;;  %v63_v48 = vmin.f32 %v61_v31, %v62_v38 }
 0x281   :  { %v560_v54 = vsel %vm967_vm0, %v1096_v53, 0.0  ;;  %vm546_vm4 = vcmp.ge.f32.partialorder %v1086_v33, %v1096_v53 }
 0x282   :  { %v561_v56 = vsel %vm38_vm1, %v560_v54, 0.0 }
 0x283   :  { %562 = vadd.xlane.f32.xlu1 %v561_v56 }
 0x294   :  { %253 = vperm.xlu1 %844, %v1033_v19  }
 0x295   :  { %67 = vperm.xlu0 %842, %v1033_v19  }
 0x298   :  { %845 = vset.pattern.permute.xlu1 %v902_v44 }
 0x299   :  { %264 = vperm.xlu0 %842, %v28_v57   ;;  %270 = vperm.xlu1 %845, %v28_v57  }
 0x29d   :  { %846 = vset.pattern.permute.xlu0 %v904_v20  ;;  %848 = vset.pattern.permute.xlu1 %v1510_v59 }
 0x29e   :  { %276 = vperm.xlu0 %846, %v28_v57   ;;  %282 = vperm.xlu1 %848, %v28_v57  }
 0x2a2   :  { %847 = vset.pattern.permute.xlu0 %v1512_v60  ;;  %849 = vset.pattern.permute.xlu1 %v1508_v22 }
 0x2a3   :  { %222 = vperm.xlu0 %847, %v1033_v19   ;;  %288 = vperm.xlu1 %849, %v28_v57  }
 0x2a7   :  { %294 = vperm.xlu0 %847, %v28_v57   ;;  %850 = vset.pattern.permute.xlu1 %v1514_v12 }
 0x2a8   :  { %300 = vperm.xlu1 %850, %v28_v57  }
 0x2ab   :  { %339 = vperm.xlu0 %847, %v1115_v61  }
 0x2ac   :  { %852 = vset.pattern.permute.xlu1 %v1508_v22 }
 0x2ad   :  { %352 = vperm.xlu1 %852, %v1115_v61  }
 0x2af   :  { %851 = vset.pattern.permute.xlu0 %v903_v18 }
 0x2b0   :  { %259 = vperm.xlu0 %851, %v28_v57  }
 0x2b1   :  { %853 = vset.pattern.permute.xlu1 %v1510_v59 }
 0x2b4   :  { %655 = vperm.xlu0 %851, %v1125_v62  }
 0x2b8   :  { %860 = vset.pattern.permute.xlu0 %v1514_v12 }
 0x308   :  { %v167_v30 = vpop.xlane.xlu0 %166 }
 0x309   :  { %v168_v32 = vadd.f32 %v167_v30, %v939_v0 }
 0x30b   :  { %v1138_v34 = vadd.f32 %v172_v29, %v168_v32 }
 0x30c   :  { %v563_v37 = vpop.xlane.xlu1 %562 }
 0x30d   :  { %v174_v39 = vsel %vm38_vm1, %v1138_v34, -inf  ;;  %v564_v40 = vadd.f32 %v563_v37, %v939_v0 }
 0x30e   :  { %v175_v42 = vrot.slane %v174_v39, 4 }
 0x30f   :  { %v1144_v43 = vadd.f32 %v568_v21, %v564_v40 }
 0x310   :  { %v176_v46 = vmax.f32 %v174_v39, %v175_v42  ;;  %v68_v49 = vpop.permute.xlu0 %67  ;;  %v1146_v50 = vpop.permute.xlu1 %253 }
 0x311   :  { %v570_v51 = vsel %vm38_vm1, %v1144_v43, -inf  ;;  %vm69_vm7 = vcmp.eq.s32.totalorder %v68_v49, 1  ;;  %vm255_vm13 = vcmp.eq.s32.totalorder %v1146_v50, 1  ;;  %v1520_v50 = vmov 7  }
 0x312   :  { %v177_v54 = vrot.slane %v176_v46, 2  ;;  %v571_v56 = vrot.slane %v570_v51, 4  ;;  %v1150_v57 = vsel %vm69_vm7, %v63_v48, 0.0 }
 0x314   :  { %v178_v4 = vmax.f32 %v176_v46, %v177_v54  ;;  %v572_v11 = vmax.f32 %v570_v51, %v571_v56  ;;  %v265_v15 = vpop.permute.xlu0 %264  ;;  %v271_v17 = vpop.permute.xlu1 %270 }
 0x316   :  { %v179_v24 = vrot.slane %v178_v4, 1  ;;  %v573_v25 = vrot.slane %v572_v11, 2 }
 0x318   :  { %v1152_v29 = vmax.f32 %v178_v4, %v179_v24  ;;  %v574_v30 = vmax.f32 %v572_v11, %v573_v25  ;;  %v267_v4 = vmul.f32 %v265_v15, %v994_v36  ;;  %v273_v24 = vmul.f32 %v271_v17, %v1017_v1 }
 0x319   :  { %v283_v31 = vpop.permute.xlu1 %282  ;;  %v277_v21 = vpop.permute.xlu0 %276  ;;  %v202_v36 = vsub.s32 6, %v952_v5 }
 0x31a   :  { %vm181_vm8 = vcmp.ge.f32.partialorder %v1138_v34, %v1152_v29  ;;  %v575_v32 = vrot.slane %v574_v30, 1  ;;  %v195_v37 = vsel %vm967_vm0, %v1152_v29, 0.0 }
 0x31b   :  { %v196_v39 = vsel %vm38_vm1, %v195_v37, 0.0  ;;  %v285_v37 = vmul.f32 %v283_v31, %v1090_v47  ;;  %v203_v15 = vrot.slane %v944_v2, %v202_v36 }
 0x31c   :  { %v1159_v38 = vmax.f32 %v574_v30, %v575_v32  ;;  %197 = vadd.xlane.f32.xlu1 %v196_v39  ;;  %v279_v30 = vmul.f32 %v277_v21, %v1060_v58 }
 0x31e   :  { %v289_v40 = vpop.permute.xlu1 %288  ;;  %v1162_v42 = vpop.permute.xlu0 %222  ;;  %v591_v46 = vsel %vm967_vm0, %v1159_v38, 0.0  ;;  %vm577_vm5 = vcmp.ge.f32.partialorder %v1144_v43, %v1159_v38 }
 0x31f   :  { %v291_v48 = vmul.f32 %v289_v40, %v1152_v29  ;;  %v592_v49 = vsel %vm38_vm1, %v591_v46, 0.0  ;;  %vm224_vm10 = vcmp.eq.s32.totalorder %v1162_v42, 1 }
 0x320   :  { %593 = vadd.xlane.f32.xlu1 %v592_v49 }
 0x322   :  { %v295_v51 = vpop.permute.xlu0 %294 }
 0x326   :  { %v1169_v54 = vpop.permute.xlu0 %339 }
 0x32b   :  { %v260_v56 = vpop.permute.xlu0 %259 }
 0x32c   :  { %v262_v11 = vmul.f32 %v260_v56, %v957_v7  ;;  %v1188_v7 = vpop.permute.xlu1 %300 }
 0x32e   :  { %v268_v25 = vadd.f32 %v267_v4, %v262_v11 }
 0x330   :  { %v274_v32 = vadd.f32 %v273_v24, %v268_v25  ;;  %v1191_v1 = vpop.permute.xlu1 %352 }
 0x331   :  { %364 = vperm.xlu1 %853, %v1115_v61  }
 0x332   :  { %v280_v39 = vadd.f32 %v279_v30, %v274_v32 }
 0x334   :  { %v286_v40 = vadd.f32 %v285_v37, %v280_v39 }
 0x335   :  { %854 = vset.pattern.permute.xlu1 %v1515_v13 }
 0x336   :  { %v292_v46 = vadd.f32 %v291_v48, %v286_v40  ;;  %660 = vperm.xlu1 %854, %v1125_v62   ;;  %v599_v48 = vrot.slane %v949_v3, %v202_v36  ;;  %v656_v40 = vpop.permute.xlu0 %655 }
 0x33a   :  { %855 = vset.pattern.permute.xlu1 %v902_v44 }
 0x33b   :  { %666 = vperm.xlu1 %855, %v1125_v62  }
 0x33f   :  { %856 = vset.pattern.permute.xlu1 %v904_v20 }
 0x340   :  { %672 = vperm.xlu1 %856, %v1125_v62  }
 0x344   :  { %857 = vset.pattern.permute.xlu1 %v1510_v59 }
 0x345   :  { %678 = vperm.xlu1 %857, %v1125_v62  }
 0x349   :  { %858 = vset.pattern.permute.xlu1 %v1508_v22 }
 0x34a   :  { %684 = vperm.xlu1 %858, %v1125_v62  }
 0x34e   :  { %859 = vset.pattern.permute.xlu1 %v1512_v60 }
 0x3a5   :  { %v198_v17 = vpop.xlane.xlu1 %197 }
 0x3a6   :  { %v199_v31 = vadd.f32 %v198_v17, %v939_v0 }
 0x3a8   :  { %v204_v21 = vadd.f32 %v203_v15, %v199_v31  ;;  %v658_v31 = vmul.f32 %v656_v40, %v960_v8 }
 0x3a9   :  { %v594_v49 = vpop.xlane.xlu1 %593 }
 0x3aa   :  { %v205_v56 = vsel %vm38_vm1, %v204_v21, -inf  ;;  %v595_v4 = vadd.f32 %v594_v49, %v939_v0 }
 0x3ab   :  { %v206_v11 = vrot.slane %v205_v56, 4 }
 0x3ac   :  { %v1198_v24 = vadd.f32 %v599_v48, %v595_v4 }
 0x3ad   :  { %v207_v25 = vmax.f32 %v205_v56, %v206_v11  ;;  %v1200_v30 = vpop.permute.xlu1 %364 }
 0x3ae   :  { %v601_v32 = vsel %vm38_vm1, %v1198_v24, -inf }
 0x3af   :  { %v208_v37 = vrot.slane %v207_v25, 2  ;;  %v602_v39 = vrot.slane %v601_v32, 4 }
 0x3b1   :  { %v209_v15 = vmax.f32 %v207_v25, %v208_v37  ;;  %v603_v17 = vmax.f32 %v601_v32, %v602_v39  ;;  %v661_v36 = vpop.permute.xlu1 %660 }
 0x3b2   :  { %v663_v22 = vmul.f32 %v661_v36, %v1000_v41  ;;  %v485_v41 = vsel %vm484_vm3, %v1041_v23, 8.0  ;;  %vm515_vm3 = vcmp.ge.f32.partialorder %v1054_v45, %v1066_v63 }
 0x3b3   :  { %v210_v49 = vrot.slane %v209_v15, 1  ;;  %v604_v59 = vrot.slane %v603_v17, 2 }
 0x3b4   :  { %v664_v56 = vadd.f32 %v663_v22, %v658_v31 }
 0x3b5   :  { %v211_v48 = vmax.f32 %v209_v15, %v210_v49  ;;  %v605_v4 = vmax.f32 %v603_v17, %v604_v59 }
 0x3b6   :  { %v667_v11 = vpop.permute.xlu1 %666 }
 0x3b7   :  { %vm212_vm9 = vcmp.ge.f32.partialorder %v204_v21, %v211_v48  ;;  %v606_v60 = vrot.slane %v605_v4, 1  ;;  %v669_v12 = vmul.f32 %v667_v11, %v1023_v14  ;;  %v226_v13 = vsel %vm967_vm0, %v211_v48, 0.0 }
 0x3b8   :  { %v213_v25 = vsel %vm212_vm9, %v1041_v23, 8.0  ;;  %v227_v32 = vsel %vm38_vm1, %v226_v13, 0.0  ;;  %v297_v8 = vmul.f32 %v295_v51, %v211_v48  ;;  %v233_v11 = vsub.s32 7, %v952_v5 }
 0x3b9   :  { %v214_v37 = vsel %vm38_vm1, %v213_v25, inf  ;;  %v1212_v39 = vmax.f32 %v605_v4, %v606_v60  ;;  %v670_v40 = vadd.f32 %v669_v12, %v664_v56  ;;  %228 = vadd.xlane.f32.xlu1 %v227_v32  ;;  %v486_v14 = vsel %vm38_vm1, %v485_v41, inf }
 0x3ba   :  { %v215_v22 = vrot.slane %v214_v37, 4  ;;  %v298_v59 = vadd.f32 %v297_v8, %v292_v46  ;;  %v234_v32 = vrot.slane %v944_v2, %v233_v11 }
 0x3bb   :  { %v673_v21 = vpop.permute.xlu1 %672  ;;  %v622_v15 = vsel %vm967_vm0, %v1212_v39, 0.0 }
 0x3bc   :  { %v216_v17 = vmin.f32 %v214_v37, %v215_v22  ;;  %v675_v36 = vmul.f32 %v673_v21, %v1066_v63  ;;  %v623_v31 = vsel %vm38_vm1, %v622_v15, 0.0 }
 0x3bd   :  { %624 = vadd.xlane.f32.xlu0 %v623_v31 }
 0x3be   :  { %v217_v13 = vrot.slane %v216_v17, 2  ;;  %v676_v51 = vadd.f32 %v675_v36, %v670_v40  ;;  %v630_v40 = vrot.slane %v949_v3, %v233_v11 }
 0x3c0   :  { %v679_v49 = vpop.permute.xlu1 %678  ;;  %v218_v60 = vmin.f32 %v216_v17, %v217_v13 }
 0x3c1   :  { %v681_v12 = vmul.f32 %v679_v49, %v1096_v53 }
 0x3c2   :  { %v219_v48 = vrot.slane %v218_v60, 1 }
 0x3c3   :  { %v1221_v46 = vadd.f32 %v681_v12, %v676_v51 }
 0x3c4   :  { %v220_v4 = vmin.f32 %v218_v60, %v219_v48 }
 0x3c5   :  { %v1230_v25 = vpop.permute.xlu1 %684 }
 0x3c6   :  { %v1223_v56 = vsel %vm224_vm10, %v220_v4, 0.0 }
 0x3d3   :  { %696 = vperm.xlu0 %860, %v1125_v62  }
 0x3d7   :  { %862 = vset.pattern.permute.xlu0 %v902_v44 }
 0x3d8   :  { %388 = vperm.xlu0 %862, %v1115_v61  }
 0x3dc   :  { %864 = vset.pattern.permute.xlu0 %v903_v18 }
 0x442   :  { %v229_v42 = vpop.xlane.xlu1 %228 }
 0x443   :  { %v230_v8 = vadd.f32 %v229_v42, %v939_v0 }
 0x445   :  { %v235_v37 = vadd.f32 %v234_v32, %v230_v8 }
 0x446   :  { %v625_v22 = vpop.xlane.xlu0 %624 }
 0x447   :  { %v236_v21 = vsel %vm38_vm1, %v235_v37, -inf  ;;  %v626_v15 = vadd.f32 %v625_v22, %v939_v0 }
 0x448   :  { %v237_v17 = vrot.slane %v236_v21, 4 }
 0x449   :  { %v1237_v36 = vadd.f32 %v630_v40, %v626_v15 }
 0x44a   :  { %v238_v31 = vmax.f32 %v236_v21, %v237_v17 }
 0x44b   :  { %v632_v5 = vsel %vm38_vm1, %v1237_v36, -inf }
 0x44c   :  { %v239_v13 = vrot.slane %v238_v31, 2  ;;  %v633_v2 = vrot.slane %v632_v5, 4 }
 0x44e   :  { %v240_v51 = vmax.f32 %v238_v31, %v239_v13  ;;  %v634_v49 = vmax.f32 %v632_v5, %v633_v2  ;;  %v427_v2 = vld [vmem:[%s1505_s2 + $0x1] sm:$0x1]  ;;  %s910_s2 = smov [#allocation2]  }
 0x44f   :  { %vm460_vm14 = vcmp.gt.f32.partialorder %v427_v2, 0.5  ;;  %s818_s26 = sshll.u32 %s910_s2, 4  ;;  %s819_s26 = int_to_ptr.vmem [resolvable:$true] %s818_s26 }
 0x450   :  { %v241_v60 = vrot.slane %v240_v51, 1  ;;  %v635_v12 = vrot.slane %v634_v49, 2  ;;  %s880_s27 = scalar_lea.vmem %s819_s26, 32  ;;  %p885_p1 = scmp.lt.s32.totalorder %s819_s26, %s819_s26 }
 0x451   :  { %p881_p0 = scmp.ne.s32.totalorder %s819_s26, %s880_s27  ;;  %p886_p2 = scmp.lt.s32.totalorder %s880_s27, %s880_s27 }
 0x452   :  { %v242_v48 = vmax.f32 %v240_v51, %v241_v60  ;;  %v636_v3 = vmax.f32 %v634_v49, %v635_v12  ;;  %v1519_v51 = vmov 1   ;;  %v1264_v49 = vsel %vm460_vm14, 1, %v903_v18 }
 0x453   :  { %v1270_v60 = vsel %vm731_vm15, 1, %v903_v18  ;;  %v1521_v12 = vmov 6   ;;  %vm341_vm14 = vcmp.eq.s32.totalorder %v1169_v54, 1  ;;  %vm345_vm15 = vcmask 57344   ;;  %p887_p3 = por %p886_p2, %p885_p1 }
 0x454   :  { %vm243_vm11 = vcmp.ge.f32.partialorder %v235_v37, %v242_v48  ;;  %v303_v4 = vmul.f32 %v1188_v7, %v242_v48  ;;  %v637_v11 = vrot.slane %v636_v3, 1  ;;  %v1522_v48 = vmov 4  }
 0x455   :  { %v244_v32 = vsel %vm243_vm11, %v1041_v23, 8.0  ;;  %p888_p4 = pnand %p887_p3, %p881_p0 }
 0x456   :  { %v245_v42 = vsel %vm38_vm1, %v244_v32, inf  ;;  %v304_v8 = vadd.f32 %v303_v4, %v298_v59  ;;  %v1244_v40 = vmax.f32 %v636_v3, %v637_v11  ;;  %v687_v4 = vmul.f32 %v1230_v25, %v1159_v38 }
 0x457   :  { %v246_v22 = vrot.slane %v245_v42, 4  ;;  %v452_v32 = vsel %vm451_vm2, %v1041_v23, 8.0 }
 0x458   :  { %v308_v21 = vrot.slane %v304_v8, %v963_v9  ;;  %vm639_vm12 = vcmp.ge.f32.partialorder %v1237_v36, %v1244_v40 }
 0x459   :  { %v247_v15 = vmin.f32 %v245_v42, %v246_v22  ;;  %v697_v42 = vpop.permute.xlu0 %696  ;;  %v640_v54 = vsel %vm639_vm12, %v1041_v23, 8.0 }
 0x45a   :  { %v309_v37 = vsel %vm967_vm0, %v308_v21, 0.0  ;;  %v453_v21 = vsel %vm38_vm1, %v452_v32, inf  ;;  %v699_v25 = vmul.f32 %v697_v42, %v1244_v40 }
 0x45b   :  { %v248_v17 = vrot.slane %v247_v15, 2  ;;  %v310_v7 = vsel %vm38_vm1, %v309_v37, 0.0 }
 0x45c   :  { %311 = vadd.xlane.f32.xlu1 %v310_v7  ;;  %v454_v7 = vrot.slane %v453_v21, 4 }
 0x45d   :  { %v249_v31 = vmin.f32 %v247_v15, %v248_v17  ;;  %v688_v15 = vadd.f32 %v687_v4, %v1221_v46 }
 0x45e   :  { %v455_v2 = vmin.f32 %v453_v21, %v454_v7 }
 0x45f   :  { %v250_v5 = vrot.slane %v249_v31, 1 }
 0x460   :  { %v456_v32 = vrot.slane %v455_v2, 2 }
 0x461   :  { %v251_v13 = vmin.f32 %v249_v31, %v250_v5 }
 0x463   :  { %v1253_v59 = vsel %vm255_vm13, %v251_v13, 0.0  ;;  %v547_v13 = vsel %vm546_vm4, %v1041_v23, 8.0 }
 0x464   :  { %v548_v53 = vsel %vm38_vm1, %v547_v13, inf }
 0x46d   :  { %690 = vperm.xlu1 %859, %v1125_v62   ;;  %v1523_v62 = vmov 5  }
 0x471   :  { %861 = vset.pattern.permute.xlu1 %v904_v20 }
 0x472   :  { %376 = vperm.xlu1 %861, %v1115_v61  }
 0x476   :  { %863 = vset.pattern.permute.xlu1 %v1519_v51 }
 0x477   :  { %400 = vperm.xlu1 %863, %v1115_v61  }
 0x47b   :  { %865 = vset.pattern.permute.xlu1 %v1520_v50  ;;  %v487_v50 = vrot.slane %v486_v14, 4 }
 0x47c   :  { %649 = vperm.xlu1 %865, %v1264_v49  }
 0x47d   :  { %v488_v42 = vmin.f32 %v486_v14, %v487_v50 }
 0x480   :  { %866 = vset.pattern.permute.xlu1 %v1521_v12 }
 0x481   :  { %734 = vperm.xlu1 %866, %v1270_v60  }
 0x485   :  { %867 = vset.pattern.permute.xlu1 %v1519_v51 }
 0x486   :  { %463 = vperm.xlu1 %867, %v1264_v49  }
 0x48a   :  { %868 = vset.pattern.permute.xlu1 %v902_v44 }
 0x48b   :  { %494 = vperm.xlu1 %868, %v1264_v49  }
 0x48f   :  { %870 = vset.pattern.permute.xlu1 %v1522_v48 }
 0x490   :  { %556 = vperm.xlu1 %870, %v1264_v49  }
 0x494   :  { %871 = vset.pattern.permute.xlu1 %v1523_v62 }
 0x495   :  { %587 = vperm.xlu1 %871, %v1264_v49  }
 0x499   :  { %872 = vset.pattern.permute.xlu1 %v1521_v12 }
 0x49a   :  { %618 = vperm.xlu1 %872, %v1264_v49  }
 0x49e   :  { %875 = vset.pattern.permute.xlu1 %v904_v20 }
 0x4e5   :  { %v312_v3 = vpop.xlane.xlu1 %311 }
 0x4e6   :  { %v313_v11 = vadd.f32 %v312_v3, %v939_v0 }
 0x4e8   :  { %v314_v8 = vsel %vm38_vm1, %v313_v11, -inf }
 0x4e9   :  { %v691_v22 = vpop.permute.xlu1 %690  ;;  %v315_v37 = vrot.slane %v314_v8, 4 }
 0x4ea   :  { %v693_v27 = vmul.f32 %v691_v22, %v1212_v39 }
 0x4eb   :  { %v316_v5 = vmax.f32 %v314_v8, %v315_v37  ;;  %v549_v8 = vrot.slane %v548_v53, 4 }
 0x4ec   :  { %v694_v17 = vadd.f32 %v693_v27, %v688_v15  ;;  %v457_v15 = vmin.f32 %v455_v2, %v456_v32  ;;  %v489_v27 = vrot.slane %v488_v42, 2 }
 0x4ed   :  { %v1299_v31 = vpop.permute.xlu1 %376  ;;  %v317_v4 = vrot.slane %v316_v5, 2  ;;  %v550_v41 = vmin.f32 %v548_v53, %v549_v8 }
 0x4ee   :  { %v700_v55 = vadd.f32 %v699_v25, %v694_v17  ;;  %v458_v37 = vrot.slane %v457_v15, 1  ;;  %v490_v17 = vmin.f32 %v488_v42, %v489_v27 }
 0x4ef   :  { %v318_v22 = vmax.f32 %v316_v5, %v317_v4  ;;  %v551_v7 = vrot.slane %v550_v41, 2 }
 0x4f0   :  { %v704_v46 = vrot.slane %v700_v55, %v963_v9  ;;  %v578_v9 = vsel %vm577_vm5, %v1041_v23, 8.0  ;;  %v459_v13 = vmin.f32 %v457_v15, %v458_v37  ;;  %v491_v5 = vrot.slane %v490_v17, 1 }
 0x4f1   :  { %v579_v10 = vsel %vm38_vm1, %v578_v9, inf  ;;  %v319_v38 = vrot.slane %v318_v22, 1 }
 0x4f2   :  { %v1306_v12 = vpop.permute.xlu1 %400  ;;  %v705_v3 = vsel %vm967_vm0, %v704_v46, 0.0  ;;  %v580_v43 = vrot.slane %v579_v10, 4 }
 0x4f3   :  { %v706_v33 = vsel %vm38_vm1, %v705_v3, 0.0  ;;  %v320_v55 = vmax.f32 %v318_v22, %v319_v38  ;;  %v552_v3 = vmin.f32 %v550_v41, %v551_v7 }
 0x4f4   :  { %707 = vadd.xlane.f32.xlu0 %v706_v33  ;;  %v581_v46 = vmin.f32 %v579_v10, %v580_v43  ;;  %v492_v33 = vmin.f32 %v490_v17, %v491_v5 }
 0x4f5   :  { %vm321_vm6 = vcmp.ge.f32.partialorder %v313_v11, %v320_v55  ;;  %v553_v32 = vrot.slane %v552_v3, 1 }
 0x4f6   :  { %v582_v2 = vrot.slane %v581_v46, 2  ;;  %v322_v4 = vsel %vm321_vm6, %v1041_v23, 8.0  ;;  %vm354_vm6 = vcmp.eq.s32.totalorder %v1191_v1, 1 }
 0x4f7   :  { %v1315_v21 = vpop.permute.xlu1 %649  ;;  %v323_v8 = vsel %vm38_vm1, %v322_v4, inf  ;;  %v554_v22 = vmin.f32 %v552_v3, %v553_v32 }
 0x4f8   :  { %v583_v42 = vmin.f32 %v581_v46, %v582_v2  ;;  %v324_v27 = vrot.slane %v323_v8, 4  ;;  %vm651_vm4 = vcmp.eq.s32.totalorder %v1315_v21, 1 }
 0x4fa   :  { %v584_v15 = vrot.slane %v583_v42, 1  ;;  %v325_v38 = vmin.f32 %v323_v8, %v324_v27 }
 0x4fc   :  { %v1318_v25 = vpop.permute.xlu1 %734  ;;  %v585_v41 = vmin.f32 %v583_v42, %v584_v15  ;;  %v326_v17 = vrot.slane %v325_v38, 2 }
 0x4fd   :  { %vm736_vm12 = vcmp.eq.s32.totalorder %v1318_v25, 1 }
 0x4fe   :  { %v327_v7 = vmin.f32 %v325_v38, %v326_v17 }
 0x500   :  { %v328_v55 = vrot.slane %v327_v7, 1 }
 0x501   :  { %v464_v14 = vpop.permute.xlu1 %463 }
 0x502   :  { %vm465_vm0 = vcmp.eq.s32.totalorder %v464_v14, 1  ;;  %v329_v46 = vmin.f32 %v327_v7, %v328_v55  ;;  %v1339_v14 = vpop.permute.xlu0 %388 }
 0x503   :  { %v1320_v50 = vsel %vm465_vm0, %v459_v13, 0.0 }
 0x506   :  { %v495_v53 = vpop.permute.xlu1 %494 }
 0x507   :  { %vm496_vm7 = vcmp.eq.s32.totalorder %v495_v53, 1 }
 0x508   :  { %v1323_v9 = vsel %vm496_vm7, %v492_v33, 0.0 }
 0x50a   :  { %412 = vperm.xlu0 %864, %v1115_v61   ;;  %v1333_v61 = vcvt.s32.f32 %v954_v6 }
 0x50b   :  { %v557_v10 = vpop.permute.xlu1 %556 }
 0x50c   :  { %vm558_vm9 = vcmp.eq.s32.totalorder %v557_v10, 1  ;;  %vm330_vm11 = vcmp.eq.f32.partialorder %v1333_v61, 7.0 }
 0x50d   :  { %v1327_v11 = vsel %vm558_vm9, %v554_v22, 0.0  ;;  %v331_v13 = vsel %vm330_vm11, %v329_v46, 0.0  ;;  %vm608_vm9 = vcmp.ge.f32.partialorder %v1198_v24, %v1212_v39 }
 0x50e   :  { %869 = vset.pattern.permute.xlu0 %v904_v20  ;;  %v332_v20 = vsel %vm38_vm1, %v331_v13, 0.0  ;;  %v609_v1 = vsel %vm608_vm9, %v1041_v23, 8.0  ;;  %vm378_vm9 = vcmp.eq.s32.totalorder %v1299_v31, 1 }
 0x510   :  { %v588_v43 = vpop.permute.xlu1 %587 }
 0x511   :  { %vm589_vm10 = vcmp.eq.s32.totalorder %v588_v43, 1 }
 0x512   :  { %v1330_v37 = vsel %vm589_vm10, %v585_v41, 0.0 }
 0x529   :  { %333 = vadd.xlane.f32.xlu0 %v332_v20 }
 0x57d   :  { %v708_v5 = vpop.xlane.xlu0 %707 }
 0x57e   :  { %v709_v3 = vadd.f32 %v708_v5, %v939_v0  ;;  %v516_v5 = vsel %vm515_vm3, %v1041_v23, 8.0 }
 0x580   :  { %v710_v2 = vsel %vm38_vm1, %v709_v3, -inf }
 0x581   :  { %v711_v33 = vrot.slane %v710_v2, 4 }
 0x583   :  { %v712_v53 = vmax.f32 %v710_v2, %v711_v33 }
 0x585   :  { %v713_v6 = vrot.slane %v712_v53, 2  ;;  %v1348_v7 = vpop.permute.xlu0 %412 }
 0x587   :  { %v714_v4 = vmax.f32 %v712_v53, %v713_v6 }
 0x589   :  { %v715_v32 = vrot.slane %v714_v4, 1 }
 0x58b   :  { %v716_v42 = vmax.f32 %v714_v4, %v715_v32 }
 0x58d   :  { %vm717_vm13 = vcmp.ge.f32.partialorder %v709_v3, %v716_v42  ;;  %v517_v3 = vsel %vm38_vm1, %v516_v5, inf }
 0x58e   :  { %v718_v8 = vsel %vm717_vm13, %v1041_v23, 8.0 }
 0x58f   :  { %v719_v22 = vsel %vm38_vm1, %v718_v8, inf }
 0x590   :  { %v720_v10 = vrot.slane %v719_v22, 4 }
 0x592   :  { %v721_v15 = vmin.f32 %v719_v22, %v720_v10 }
 0x594   :  { %v722_v27 = vrot.slane %v721_v15, 2 }
 0x596   :  { %v723_v41 = vmin.f32 %v721_v15, %v722_v27  ;;  %v619_v15 = vpop.permute.xlu1 %618 }
 0x597   :  { %vm620_vm10 = vcmp.eq.s32.totalorder %v619_v15, 1 }
 0x598   :  { %v724_v43 = vrot.slane %v723_v41, 1 }
 0x59a   :  { %v725_v38 = vmin.f32 %v723_v41, %v724_v43 }
 0x59c   :  { %v726_v0 = vsel %vm330_vm11, %v725_v38, 0.0  ;;  %v610_v38 = vsel %vm38_vm1, %v609_v1, inf }
 0x59d   :  { %v727_v17 = vsel %vm38_vm1, %v726_v0, 0.0  ;;  %v611_v0 = vrot.slane %v610_v38, 4 }
 0x59e   :  { %728 = vadd.xlane.f32.xlu0 %v727_v17 }
 0x5b2   :  { %v1351_v55 = vpop.xlane.xlu0 %333 }
 0x5b3   :  { %v342_v46 = vsel %vm341_vm14, %v1351_v55, %v1253_v59  ;;  %vm343_vm2 = vcmp.eq.f32.partialorder %v1333_v61, %v1351_v55  ;;  %v641_v59 = vsel %vm38_vm1, %v640_v54, inf }
 0x5b4   :  { %525 = vperm.xlu0 %869, %v1264_v49   ;;  %v344_v13 = vsel %vm343_vm2, %v342_v46, 0.0  ;;  %v642_v49 = vrot.slane %v641_v59, 4  ;;  %vm366_vm2 = vcmp.eq.s32.totalorder %v1200_v30, 1 }
 0x5b5   :  { %v346_v20 = vsel %vm345_vm15, %v344_v13, 0.0  ;;  %v182_v13 = vsel %vm181_vm8, %v1041_v23, 8.0  ;;  %vm193_vm8 = vcmp.eq.s32.totalorder %v1134_v28, 1 }
 0x5b6   :  { %347 = vadd.xlane.f32.xlu1 %v346_v20  ;;  %v183_v54 = vsel %vm38_vm1, %v182_v13, inf }
 0x5b7   :  { %v184_v24 = vrot.slane %v183_v54, 4 }
 0x5b8   :  { %873 = vset.pattern.permute.xlu0 %v1523_v62  ;;  %v643_v62 = vmin.f32 %v641_v59, %v642_v49 }
 0x5b9   :  { %745 = vperm.xlu0 %873, %v1270_v60  }
 0x5ba   :  { %v644_v2 = vrot.slane %v643_v62, 2 }
 0x5bc   :  { %v645_v33 = vmin.f32 %v643_v62, %v644_v2  ;;  %v185_v2 = vmin.f32 %v183_v54, %v184_v24 }
 0x5bd   :  { %874 = vset.pattern.permute.xlu0 %v1522_v48  ;;  %v518_v48 = vrot.slane %v517_v3, 4 }
 0x5be   :  { %160 = vperm.xlu0 %874, %v1033_v19   ;;  %v646_v53 = vrot.slane %v645_v33, 1  ;;  %v186_v34 = vrot.slane %v185_v2, 2 }
 0x5bf   :  { %v519_v19 = vmin.f32 %v517_v3, %v518_v48 }
 0x5c0   :  { %v647_v36 = vmin.f32 %v645_v33, %v646_v53  ;;  %v187_v29 = vmin.f32 %v185_v2, %v186_v34 }
 0x5c1   :  { %v520_v6 = vrot.slane %v519_v19, 2 }
 0x5c2   :  { %v652_v40 = vsel %vm651_vm4, %v647_v36, 0.0  ;;  %v188_v48 = vrot.slane %v187_v29, 1  ;;  %vm150_vm4 = vcmp.ge.f32.partialorder %v1080_v26, %v1090_v47 }
 0x5c3   :  { %v521_v45 = vmin.f32 %v519_v19, %v520_v6 }
 0x5c4   :  { %v189_v33 = vmin.f32 %v187_v29, %v188_v48 }
 0x5c5   :  { %v522_v8 = vrot.slane %v521_v45, 1 }
 0x5c6   :  { %v194_v53 = vsel %vm193_vm8, %v189_v33, 0.0 }
 0x5c7   :  { %v523_v22 = vmin.f32 %v521_v45, %v522_v8 }
 0x627   :  { %v1374_v4 = vpop.xlane.xlu0 %728 }
 0x628   :  { %v737_v63 = vsel %vm736_vm12, %v1374_v4, %v652_v40  ;;  %vm738_vm5 = vcmp.eq.f32.partialorder %v1333_v61, %v1374_v4  ;;  %v730_v30 = vsel %vm330_vm11, %v1374_v4, 0.0  ;;  %vm349_vm12 = vcmp.eq.f32.partialorder %v1333_v61, 6.0 }
 0x629   :  { %v739_v32 = vsel %vm738_vm5, %v737_v63, 0.0  ;;  %v151_v63 = vsel %vm150_vm4, %v1041_v23, 8.0  ;;  %vm361_vm5 = vcmp.eq.f32.partialorder %v1333_v61, 5.0  ;;  %vm385_vm4 = vcmp.eq.f32.partialorder %v1333_v61, 3.0 }
 0x62a   :  { %v740_v42 = vsel %vm345_vm15, %v739_v32, 0.0  ;;  %v152_v32 = vsel %vm38_vm1, %v151_v63, inf }
 0x62b   :  { %741 = vadd.xlane.f32.xlu1 %v740_v42 }
 0x62f   :  { %v526_v10 = vpop.permute.xlu0 %525 }
 0x630   :  { %vm527_vm0 = vcmp.eq.s32.totalorder %v526_v10, 1 }
 0x631   :  { %v1380_v21 = vsel %vm527_vm0, %v523_v22, 0.0  ;;  %v153_v22 = vrot.slane %v152_v32, 4 }
 0x633   :  { %v154_v15 = vmin.f32 %v152_v32, %v153_v22 }
 0x63f   :  { %v1383_v25 = vpop.xlane.xlu1 %347 }
 0x640   :  { %v355_v27 = vsel %vm354_vm6, %v1383_v25, %v1223_v56  ;;  %vm356_vm7 = vcmp.eq.f32.partialorder %v1333_v61, %v1383_v25  ;;  %v612_v56 = vmin.f32 %v610_v38, %v611_v0 }
 0x641   :  { %v357_v41 = vsel %vm356_vm7, %v355_v27, 0.0  ;;  %v155_v27 = vrot.slane %v154_v15, 2 }
 0x642   :  { %v358_v43 = vsel %vm345_vm15, %v357_v41, 0.0  ;;  %v613_v17 = vrot.slane %v612_v56, 2 }
 0x643   :  { %359 = vadd.xlane.f32.xlu0 %v358_v43  ;;  %v156_v41 = vmin.f32 %v154_v15, %v155_v27 }
 0x644   :  { %v614_v46 = vmin.f32 %v612_v56, %v613_v17 }
 0x645   :  { %v157_v43 = vrot.slane %v156_v41, 1 }
 0x646   :  { %v615_v20 = vrot.slane %v614_v46, 1 }
 0x647   :  { %v158_v1 = vmin.f32 %v156_v41, %v157_v43 }
 0x648   :  { %v616_v59 = vmin.f32 %v614_v46, %v615_v20 }
 0x64a   :  { %v621_v39 = vsel %vm620_vm10, %v616_v59, 0.0 }
 0x659   :  { %756 = vperm.xlu0 %874, %v1270_v60  }
 0x65d   :  { %877 = vset.pattern.permute.xlu0 %v1519_v51  ;;  %v746_v51 = vpop.permute.xlu0 %745 }
 0x65e   :  { %vm747_vm13 = vcmp.eq.s32.totalorder %v746_v51, 1 }
 0x661   :  { %v161_v19 = vpop.permute.xlu0 %160 }
 0x662   :  { %vm162_vm7 = vcmp.eq.s32.totalorder %v161_v19, 1 }
 0x663   :  { %v163_v38 = vsel %vm162_vm7, %v158_v1, 0.0  ;;  %vm397_vm7 = vcmp.eq.f32.partialorder %v1333_v61, 2.0 }
 0x6b4   :  { %v742_v49 = vpop.xlane.xlu1 %741 }
 0x6b5   :  { %v748_v5 = vsel %vm747_vm13, %v742_v49, %v621_v39  ;;  %vm749_vm14 = vcmp.eq.f32.partialorder %v1333_v61, %v742_v49  ;;  %v743_v42 = vsel %vm349_vm12, %v742_v49, %v730_v30  ;;  %vm373_vm13 = vcmp.eq.f32.partialorder %v1333_v61, 4.0 }
 0x6b6   :  { %v750_v62 = vsel %vm749_vm14, %v748_v5, 0.0 }
 0x6b7   :  { %v751_v3 = vsel %vm345_vm15, %v750_v62, 0.0 }
 0x6b8   :  { %752 = vadd.xlane.f32.xlu1 %v751_v3 }
 0x6cc   :  { %v1405_v6 = vpop.xlane.xlu0 %359 }
 0x6cd   :  { %v367_v36 = vsel %vm366_vm2, %v1405_v6, %v194_v53  ;;  %vm368_vm3 = vcmp.eq.f32.partialorder %v1333_v61, %v1405_v6  ;;  %vm119_vm2 = vcmp.ge.f32.partialorder %v1048_v35, %v1060_v58 }
 0x6ce   :  { %v369_v40 = vsel %vm368_vm3, %v367_v36, 0.0  ;;  %v120_v51 = vsel %vm119_vm2, %v1041_v23, 8.0  ;;  %vm131_vm3 = vcmp.eq.s32.totalorder %v1076_v16, 1  ;;  %vm421_vm2 = vcmp.eq.f32.partialorder %v1333_v61, 0.0 }
 0x6cf   :  { %v370_v45 = vsel %vm345_vm15, %v369_v40, 0.0  ;;  %v121_v59 = vsel %vm38_vm1, %v120_v51, inf  ;;  %vm390_vm1 = vcmp.eq.s32.totalorder %v1339_v14, 1 }
 0x6d0   :  { %371 = vadd.xlane.f32.xlu1 %v370_v45  ;;  %v122_v24 = vrot.slane %v121_v59, 4 }
 0x6d2   :  { %v123_v39 = vmin.f32 %v121_v59, %v122_v24 }
 0x6d4   :  { %v757_v28 = vpop.permute.xlu0 %756  ;;  %v124_v49 = vrot.slane %v123_v39, 2 }
 0x6d5   :  { %vm758_vm0 = vcmp.eq.s32.totalorder %v757_v28, 1 }
 0x6d6   :  { %v125_v5 = vmin.f32 %v123_v39, %v124_v49 }
 0x6d8   :  { %v126_v62 = vrot.slane %v125_v5, 1 }
 0x6da   :  { %v127_v3 = vmin.f32 %v125_v5, %v126_v62 }
 0x6dc   :  { %v132_v58 = vsel %vm131_vm3, %v127_v3, 0.0 }
 0x741   :  { %v753_v8 = vpop.xlane.xlu1 %752 }
 0x742   :  { %v754_v26 = vsel %vm361_vm5, %v753_v8, %v743_v42  ;;  %v759_v47 = vsel %vm758_vm0, %v753_v8, %v1330_v37  ;;  %vm760_vm6 = vcmp.eq.f32.partialorder %v1333_v61, %v753_v8  ;;  %vm402_vm0 = vcmp.eq.s32.totalorder %v1306_v12, 1 }
 0x743   :  { %v761_v10 = vsel %vm760_vm6, %v759_v47, 0.0 }
 0x744   :  { %v762_v4 = vsel %vm345_vm15, %v761_v10, 0.0 }
 0x745   :  { %763 = vadd.xlane.f32.xlu1 %v762_v4 }
 0x756   :  { %767 = vperm.xlu1 %875, %v1270_v60  }
 0x759   :  { %v372_v0 = vpop.xlane.xlu1 %371 }
 0x75a   :  { %v379_v37 = vsel %vm378_vm9, %v372_v0, %v163_v38  ;;  %876 = vset.pattern.permute.xlu1 %v902_v44  ;;  %vm380_vm10 = vcmp.eq.f32.partialorder %v1333_v61, %v372_v0  ;;  %vm409_vm9 = vcmp.eq.f32.partialorder %v1333_v61, 1.0 }
 0x75b   :  { %v381_v56 = vsel %vm380_vm10, %v379_v37, 0.0  ;;  %vm414_vm10 = vcmp.eq.s32.totalorder %v1348_v7, 1 }
 0x75c   :  { %v382_v17 = vsel %vm345_vm15, %v381_v56, 0.0 }
 0x77a   :  { %383 = vadd.xlane.f32.xlu1 %v382_v17 }
 0x78b   :  { %778 = vperm.xlu1 %876, %v1270_v60  }
 0x78f   :  { %878 = vset.pattern.permute.xlu1 %v903_v18 }
 0x7ce   :  { %v764_v46 = vpop.xlane.xlu1 %763 }
 0x7cf   :  { %v1437_v31 = vsel %vm373_vm13, %v764_v46, %v754_v26  ;;  %vm771_vm8 = vcmp.eq.f32.partialorder %v1333_v61, %v764_v46 }
 0x7d2   :  { %v768_v13 = vpop.permute.xlu1 %767 }
 0x7d3   :  { %vm769_vm14 = vcmp.eq.s32.totalorder %v768_v13, 1 }
 0x7d4   :  { %v770_v44 = vsel %vm769_vm14, %v764_v46, %v1327_v11  ;;  %v335_v11 = vsel %vm330_vm11, %v1351_v55, 0.0 }
 0x7d5   :  { %v772_v20 = vsel %vm771_vm8, %v770_v44, 0.0  ;;  %v350_v35 = vsel %vm349_vm12, %v1383_v25, %v335_v11 }
 0x7d6   :  { %v773_v54 = vsel %vm345_vm15, %v772_v20, 0.0  ;;  %v362_v23 = vsel %vm361_vm5, %v1405_v6, %v350_v35 }
 0x7d7   :  { %774 = vadd.xlane.f32.xlu0 %v773_v54  ;;  %v374_v16 = vsel %vm373_vm13, %v372_v0, %v362_v23 }
 0x803   :  { %v384_v2 = vpop.xlane.xlu1 %383 }
 0x804   :  { %v386_v55 = vsel %vm385_vm4, %v384_v2, %v374_v16  ;;  %v391_v34 = vsel %vm390_vm1, %v384_v2, %v132_v58  ;;  %vm392_vm11 = vcmp.eq.f32.partialorder %v1333_v61, %v384_v2 }
 0x805   :  { %v393_v25 = vsel %vm392_vm11, %v391_v34, 0.0 }
 0x806   :  { %v394_v29 = vsel %vm345_vm15, %v393_v25, 0.0 }
 0x807   :  { %395 = vadd.xlane.f32.xlu1 %v394_v29  ;;  %v779_v48 = vpop.permute.xlu1 %778 }
 0x808   :  { %vm780_vm12 = vcmp.eq.s32.totalorder %v779_v48, 1 }
 0x860   :  { %v775_v33 = vpop.xlane.xlu0 %774 }
 0x861   :  { %v781_v19 = vsel %vm780_vm12, %v775_v33, %v1380_v21  ;;  %vm782_vm5 = vcmp.eq.f32.partialorder %v1333_v61, %v775_v33 }
 0x862   :  { %v783_v14 = vsel %vm782_vm5, %v781_v19, 0.0 }
 0x863   :  { %v784_v53 = vsel %vm345_vm15, %v783_v14, 0.0 }
 0x864   :  { %785 = vadd.xlane.f32.xlu1 %v784_v53 }
 0x890   :  { %v396_v6 = vpop.xlane.xlu1 %395 }
 0x891   :  { %v403_v36 = vsel %vm402_vm0, %v396_v6, %v1058_v52  ;;  %vm404_vm6 = vcmp.eq.f32.partialorder %v1333_v61, %v396_v6  ;;  %v398_v12 = vsel %vm397_vm7, %v396_v6, %v386_v55 }
 0x892   :  { %v405_v40 = vsel %vm404_vm6, %v403_v36, 0.0 }
 0x893   :  { %v406_v45 = vsel %vm345_vm15, %v405_v40, 0.0 }
 0x894   :  { %407 = vadd.xlane.f32.xlu0 %v406_v45 }
 0x8aa   :  { %789 = vperm.xlu0 %877, %v1270_v60  }
 0x8ae   :  { %879 = vset.pattern.permute.xlu0 %v903_v18 }
 0x8ed   :  { %v786_v28 = vpop.xlane.xlu1 %785 }
 0x8ee   :  { %vm793_vm14 = vcmp.eq.f32.partialorder %v1333_v61, %v786_v28 }
 0x91d   :  { %v408_v52 = vpop.xlane.xlu0 %407 }
 0x91e   :  { %v410_v21 = vsel %vm409_vm9, %v408_v52, %v398_v12  ;;  %v415_v63 = vsel %vm414_vm10, %v408_v52, %v1150_v57  ;;  %vm416_vm8 = vcmp.eq.f32.partialorder %v1333_v61, %v408_v52  ;;  %v776_v57 = vsel %vm385_vm4, %v775_v33, %v1437_v31 }
 0x91f   :  { %v417_v42 = vsel %vm416_vm8, %v415_v63, 0.0 }
 0x920   :  { %v418_v8 = vsel %vm345_vm15, %v417_v42, 0.0 }
 0x925   :  { %v790_v32 = vpop.permute.xlu0 %789 }
 0x926   :  { %vm791_vm13 = vcmp.eq.s32.totalorder %v790_v32, 1 }
 0x927   :  { %v792_v18 = vsel %vm791_vm13, %v786_v28, %v1323_v9  ;;  %v787_v9 = vsel %vm397_vm7, %v786_v28, %v776_v57 }
 0x928   :  { %v794_v30 = vsel %vm793_vm14, %v792_v18, 0.0 }
 0x929   :  { %v795_v7 = vsel %vm345_vm15, %v794_v30, 0.0 }
 0x92a   :  { %796 = vadd.xlane.f32.xlu1 %v795_v7 }
 0x92e   :  { %419 = vadd.xlane.f32.xlu1 %v418_v8 }
 0x93f   :  { %800 = vperm.xlu1 %878, %v1270_v60  }
 0x9b3   :  { %v797_v26 = vpop.xlane.xlu1 %796 }
 0x9b4   :  { %v798_v47 = vsel %vm409_vm9, %v797_v26, %v787_v9  ;;  %vm804_vm4 = vcmp.eq.f32.partialorder %v1333_v61, %v797_v26 }
 0x9b7   :  { %v420_v22 = vpop.xlane.xlu1 %419 }
 0x9b8   :  { %v422_v10 = vsel %vm421_vm2, %v420_v22, %v410_v21 }
 0x9b9   :  { %v827_v4 = vtrunc.f32 %v422_v10 }
 0x9bb   :  { %v828_v15 = vcvt.f32.s32 %v827_v4  ;;  %v801_v27 = vpop.permute.xlu1 %800 }
 0x9bc   :  { %vm802_vm3 = vcmp.eq.s32.totalorder %v801_v27, 1 }
 0x9bd   :  { %424 = vst.msk [vmem:[#allocation2] sm:$0x1] %vm345_vm15, %v828_v15  ;;  %v803_v60 = vsel %vm802_vm3, %v797_v26, %v1320_v50 }
 0x9be   :  { %v805_v41 = vsel %vm804_vm4, %v803_v60, 0.0 }
 0x9bf   :  { %v806_v43 = vsel %vm345_vm15, %v805_v41, 0.0 }
 0x9c0   :  { %807 = vadd.xlane.f32.xlu0 %v806_v43 }
 0xa49   :  { %v808_v1 = vpop.xlane.xlu0 %807 }
 0xa4a   :  { %v809_v38 = vsel %vm421_vm2, %v808_v1, %v798_v47 }
 0xa4b   :  { %v829_v0 = vtrunc.f32 %v809_v38 }
 0xa4d   :  { %v830_v37 = vcvt.f32.s32 %v829_v0 }
 0xa4f   :  { %811 = vst.msk [vmem:[#allocation2 + $0x1] sm:$0x1] %vm345_vm15, %v830_v37 }
 0xa50   :  { %891 = shalt.err (!%p888_p4)
}
 0xa51   :  { %821 = dma.vmem_to_hbm [thread:$0]  %s819_s26, 32, %s1507_s4, [#allocation3]  }
 0xa52   :  { %900 = dma.done.wait [#allocation3], 32  }
 0xa53   :  { %901 = vsyncadd [#allocation3], 4294967264 }
 0xa54   :  { %825 = vsyncpa [#allocation3], 1 }

// kernel: forward.6
= control target key start
LH: loop header
LB: loop body
LE: loop exit
PB: predicated region body
PF: predicated region fallthrough
CT: control target
= control target key end

     0   :  { %s5426_s6 = smov 1   ;;  %s5427_s10 = smov 2   ;;  %s6403_s0 = inlined_call_operand.smem [shape: u32[48], index: -1, kind: input, shape index: {}] }
   0x1   :  { %s5488_s5 = sld [smem:[%s6403_s0]]   ;;  %s5428_s14 = smov 3  }
   0x2   :  { %s5493_s9 = sld [smem:[%s6403_s0 + %s5426_s6]]   ;;  %s5429_s18 = smov 4  }
   0x3   :  { %s5498_s13 = sld [smem:[%s6403_s0 + %s5427_s10]]   ;;  %s5430_s22 = smov 5  }
   0x4   :  { %s5503_s17 = sld [smem:[%s6403_s0 + %s5428_s14]]   ;;  %s5431_s26 = smov 6  }
   0x5   :  { %s5508_s21 = sld [smem:[%s6403_s0 + %s5429_s18]]   ;;  %s5432_s30 = smov 7  }
   0x6   :  { %s5513_s25 = sld [smem:[%s6403_s0 + %s5430_s22]]   ;;  %s5433_s4 = smov 8  }
   0x7   :  { %s5518_s29 = sld [smem:[%s6403_s0 + %s5431_s26]]   ;;  %s5434_s10 = smov 9  }
   0x8   :  { %6415 = sst [smem:[#allocation12_spill]] %s5493_s9  ;;  %s5435_s15 = smov 10  }
   0x9   :  { %s5523_s3 = sld [smem:[%s6403_s0 + %s5432_s30]]   ;;  %s5436_s20 = smov 11  }
   0xa   :  { %6416 = sst [smem:[#allocation13_spill]] %s5503_s17  ;;  %s5437_s26 = smov 12  }
   0xb   :  { %6417 = sst [smem:[#allocation14_spill]] %s5508_s21  ;;  %s5438_s1 = smov 13  }
   0xc   :  { %s5528_s8 = sld [smem:[%s6403_s0 + %s5433_s4]]   ;;  %s5439_s7 = smov 14  }
   0xd   :  { %6418 = sst [smem:[#allocation15_spill]] %s5518_s29  ;;  %s5441_s22 = smov 16  }
   0xe   :  { %s5533_s14 = sld [smem:[%s6403_s0 + %s5434_s10]]   ;;  %s5442_s28 = smov 17  }
   0xf   :  { %s5538_s19 = sld [smem:[%s6403_s0 + %s5435_s15]]   ;;  %s5440_s15 = smov 15  }
  0x10   :  { %s5543_s24 = sld [smem:[%s6403_s0 + %s5436_s20]]   ;;  %s5469_s23 = smov 44  }
  0x11   :  { %s5548_s30 = sld [smem:[%s6403_s0 + %s5437_s26]]   ;;  %s5471_s10 = smov 46  }
  0x12   :  { %s5553_s6 = sld [smem:[%s6403_s0 + %s5438_s1]]   ;;  %s5470_s1 = smov 45  }
  0x13   :  { %s5558_s12 = sld [smem:[%s6403_s0 + %s5439_s7]]   ;;  %s5443_s7 = smov 18  }
  0x14   :  { %s5563_s20 = sld [smem:[%s6403_s0 + %s5440_s15]]   ;;  %s5444_s15 = smov 19  }
  0x15   :  { %s5568_s27 = sld [smem:[%s6403_s0 + %s5441_s22]]   ;;  %s5445_s22 = smov 20  }
  0x16   :  { %s5573_s4 = sld [smem:[%s6403_s0 + %s5442_s28]]   ;;  %s5446_s28 = smov 21  }
  0x17   :  { %s5578_s21 = sld [smem:[%s6403_s0 + %s5443_s7]]   ;;  %s5447_s7 = smov 22  }
  0x18   :  { %s5583_s17 = sld [smem:[%s6403_s0 + %s5444_s15]]   ;;  %s5448_s15 = smov 23  }
  0x19   :  { %6419 = sst [smem:[#allocation16_spill]] %s5558_s12  ;;  %s5472_s16 = smov 47  }
  0x1a   :  { %s5588_s29 = sld [smem:[%s6403_s0 + %s5445_s22]]   ;;  %s5449_s22 = smov 24  }
  0x1b   :  { %6420 = sst [smem:[#allocation17_spill]] %s5568_s27 }
  0x1c   :  { %s5593_s27 = sld [smem:[%s6403_s0 + %s5446_s28]]   ;;  %s5450_s28 = smov 25  }
  0x1d   :  { %6421 = sst [smem:[#allocation18_spill]] %s5578_s21 }
  0x1e   :  { %6422 = sst [smem:[#allocation19_spill]] %s5583_s17 }
  0x1f   :  { %s5598_s21 = sld [smem:[%s6403_s0 + %s5447_s7]]   ;;  %s5451_s7 = smov 26  }
  0x20   :  { %6423 = sst [smem:[#allocation20_spill]] %s5588_s29 }
  0x21   :  { %s5603_s17 = sld [smem:[%s6403_s0 + %s5448_s15]]   ;;  %s5452_s15 = smov 27  }
  0x22   :  { %6424 = sst [smem:[#allocation21_spill]] %s5593_s27 }
  0x23   :  { %s5608_s29 = sld [smem:[%s6403_s0 + %s5449_s22]]   ;;  %s5453_s22 = smov 28  }
  0x24   :  { %s5613_s27 = sld [smem:[%s6403_s0 + %s5450_s28]]   ;;  %s5454_s28 = smov 29  }
  0x25   :  { %6425 = sst [smem:[#allocation22_spill]] %s5598_s21 }
  0x26   :  { %s5618_s21 = sld [smem:[%s6403_s0 + %s5451_s7]]   ;;  %s5455_s7 = smov 30  }
  0x27   :  { %6426 = sst [smem:[#allocation23_spill]] %s5603_s17 }
  0x28   :  { %s5623_s17 = sld [smem:[%s6403_s0 + %s5452_s15]]   ;;  %s5456_s15 = smov 31  }
  0x29   :  { %6427 = sst [smem:[#allocation24_spill]] %s5608_s29 }
  0x2a   :  { %6428 = sst [smem:[#allocation25_spill]] %s5613_s27 }
  0x2b   :  { %s5628_s29 = sld [smem:[%s6403_s0 + %s5453_s22]]   ;;  %s5457_s22 = smov 32  }
  0x2c   :  { %6429 = sst [smem:[#allocation26_spill]] %s5618_s21 }
  0x2d   :  { %s5633_s27 = sld [smem:[%s6403_s0 + %s5454_s28]]   ;;  %s5458_s28 = smov 33  }
  0x2e   :  { %6430 = sst [smem:[#allocation27_spill]] %s5623_s17 }
  0x2f   :  { %s5638_s21 = sld [smem:[%s6403_s0 + %s5455_s7]]   ;;  %s5459_s7 = smov 34  }
  0x30   :  { %s5643_s17 = sld [smem:[%s6403_s0 + %s5456_s15]]   ;;  %s5460_s15 = smov 35  }
  0x31   :  { %6431 = sst [smem:[#allocation28_spill]] %s5628_s29 }
  0x32   :  { %s5648_s29 = sld [smem:[%s6403_s0 + %s5457_s22]]   ;;  %s5461_s22 = smov 36  }
  0x33   :  { %6432 = sst [smem:[#allocation29_spill]] %s5633_s27 }
  0x34   :  { %s5653_s27 = sld [smem:[%s6403_s0 + %s5458_s28]]   ;;  %s5462_s28 = smov 37  }
  0x35   :  { %6433 = sst [smem:[#allocation30_spill]] %s5638_s21 }
  0x36   :  { %6434 = sst [smem:[#allocation31_spill]] %s5643_s17 }
  0x37   :  { %s5658_s21 = sld [smem:[%s6403_s0 + %s5459_s7]]   ;;  %s5463_s7 = smov 38  }
  0x38   :  { %6435 = sst [smem:[#allocation32_spill]] %s5648_s29 }
  0x39   :  { %s5663_s17 = sld [smem:[%s6403_s0 + %s5460_s15]]   ;;  %s5464_s15 = smov 39  }
  0x3a   :  { %6436 = sst [smem:[#allocation33_spill]] %s5653_s27 }
  0x3b   :  { %s5668_s29 = sld [smem:[%s6403_s0 + %s5461_s22]]   ;;  %s5465_s22 = smov 40  }
  0x3c   :  { %s5673_s27 = sld [smem:[%s6403_s0 + %s5462_s28]]   ;;  %s5466_s28 = smov 41  }
  0x3d   :  { %6437 = sst [smem:[#allocation34_spill]] %s5658_s21 }
  0x3e   :  { %s5678_s21 = sld [smem:[%s6403_s0 + %s5463_s7]]   ;;  %s5467_s7 = smov 42  }
  0x3f   :  { %6438 = sst [smem:[#allocation35_spill]] %s5663_s17 }
  0x40   :  { %s5683_s17 = sld [smem:[%s6403_s0 + %s5464_s15]]   ;;  %s5468_s15 = smov 43  }
  0x41   :  { %6439 = sst [smem:[#allocation36_spill]] %s5668_s29 }
  0x42   :  { %6440 = sst [smem:[#allocation37_spill]] %s5673_s27 }
  0x43   :  { %s5688_s29 = sld [smem:[%s6403_s0 + %s5465_s22]]  }
  0x44   :  { %6441 = sst [smem:[#allocation38_spill]] %s5678_s21 }
  0x45   :  { %s5693_s27 = sld [smem:[%s6403_s0 + %s5466_s28]]  }
  0x46   :  { %6442 = sst [smem:[#allocation39_spill]] %s5683_s17 }
  0x47   :  { %s5698_s21 = sld [smem:[%s6403_s0 + %s5467_s7]]  }
  0x48   :  { %s4446_s17 = sld [smem:[%s6403_s0 + %s5468_s15]]  }
  0x49   :  { %6443 = sst [smem:[#allocation40_spill]] %s5688_s29 }
  0x4a   :  { %s5706_s29 = sld [smem:[%s6403_s0 + %s5469_s23]]  }
  0x4b   :  { %6444 = sst [smem:[#allocation41_spill]] %s5693_s27 }
  0x4c   :  { %s5711_s27 = sld [smem:[%s6403_s0 + %s5470_s1]]  }
  0x4d   :  { %s5716_s9 = sld [smem:[%s6403_s0 + %s5471_s10]]  }
  0x4e   :  { %s5721_s12 = sld [smem:[%s6403_s0 + %s5472_s16]]  }
  0x4f   :  { %100 = vsyncpa [#allocation3], 0 }
  0x50   :  { %101 = vsyncpa [#allocation5], 0 }
  0x51   :  { %102 = vsyncpa [#allocation8], 0  ;;  %s5473_s23 = smov [#allocation4]   ;;  %s5474_s26 = smov [#allocation2]  }
  0x52   :  { %s203_s22 = sshll.u32 %s5473_s23, 4  ;;  %s193_s1 = sshll.u32 %s5474_s26, 4  ;;  %s204_s22 = int_to_ptr.vmem [resolvable:$true] %s203_s22  ;;  %s194_s1 = int_to_ptr.vmem [resolvable:$true] %s193_s1 }
  0x53   :  { %s5348_s28 = scalar_lea.vmem %s204_s22, 16  ;;  %s5352_s2 = scalar_lea.vmem %s204_s22, 32 }
  0x54   :  { %p5349_p0 = scmp.ne.s32.totalorder %s204_s22, %s5348_s28  ;;  %p5353_p1 = scmp.lt.s32.totalorder %s204_s22, %s204_s22 }
  0x55   :  { %p5354_p2 = scmp.lt.s32.totalorder %s5352_s2, %s5348_s28 }
  0x57   :  { %p5355_p3 = por %p5354_p2, %p5353_p1 }
  0x59   :  { %p5356_p4 = pnand %p5355_p3, %p5349_p0 }
  0x5b   :  { %5359 = shalt.err (!%p5356_p4)
}
  0x5c   :  { %206 = dma.hbm_to_vmem [thread:$0]  %s4446_s17, 16, %s204_s22, [#allocation5]  }
  0x5d   :  { %s5368_s0 = scalar_lea.vmem %s194_s1, 16  ;;  %s5372_s10 = scalar_lea.vmem %s194_s1, 32 }
  0x5e   :  { %p5369_p5 = scmp.ne.s32.totalorder %s194_s1, %s5368_s0  ;;  %p5373_p6 = scmp.lt.s32.totalorder %s194_s1, %s194_s1 }
  0x5f   :  { %p5374_p7 = scmp.lt.s32.totalorder %s5372_s10, %s5368_s0 }
  0x61   :  { %p5375_p8 = por %p5374_p7, %p5373_p6 }
  0x63   :  { %p5376_p9 = pnand %p5375_p8, %p5369_p5 }
  0x65   :  { %5379 = shalt.err (!%p5376_p9)
}
  0x66   :  { %196 = dma.hbm_to_vmem [thread:$0]  %s5698_s21, 16, %s194_s1, [#allocation3]  }
  0x67   :  { %s5475_s7 = smov [#allocation6]   ;;  %s5476_s16 = smov [#allocation7]  }
  0x68   :  { %s213_s11 = sshll.u32 %s5475_s7, 4  ;;  %s225_s15 = sshll.u32 %s5476_s16, 4  ;;  %s214_s11 = int_to_ptr.vmem [resolvable:$true] %s213_s11  ;;  %s226_s15 = int_to_ptr.vmem [resolvable:$true] %s225_s15 }
  0x69   :  { %s5388_s18 = scalar_lea.vmem %s214_s11, 16  ;;  %s5392_s23 = scalar_lea.vmem %s214_s11, 32 }
  0x6a   :  { %p5389_p10 = scmp.ne.s32.totalorder %s214_s11, %s5388_s18  ;;  %p5393_p11 = scmp.lt.s32.totalorder %s214_s11, %s214_s11 }
  0x6b   :  { %p5394_p12 = scmp.lt.s32.totalorder %s5392_s23, %s5388_s18 }
  0x6d   :  { %p5395_p13 = por %p5394_p12, %p5393_p11 }
  0x6f   :  { %p5396_p0 = pnand %p5395_p13, %p5389_p10 }
  0x71   :  { %5399 = shalt.err (!%p5396_p0)
}
  0x72   :  { %216 = dma.hbm_to_vmem [thread:$0]  %s5706_s29, 16, %s214_s11, [#allocation5]  }
  0x73   :  { %s5408_s17 = scalar_lea.vmem %s226_s15, 16  ;;  %s5412_s22 = scalar_lea.vmem %s226_s15, 32 }
  0x74   :  { %p5409_p1 = scmp.ne.s32.totalorder %s226_s15, %s5408_s17  ;;  %p5413_p2 = scmp.lt.s32.totalorder %s226_s15, %s226_s15 }
  0x75   :  { %p5414_p3 = scmp.lt.s32.totalorder %s5412_s22, %s5408_s17 }
  0x77   :  { %p5415_p4 = por %p5414_p3, %p5413_p2 }
  0x79   :  { %p5416_p5 = pnand %p5415_p4, %p5409_p1 }
  0x7b   :  { %5419 = shalt.err (!%p5416_p5)
}
  0x7c   :  { %228 = dma.hbm_to_vmem [thread:$0]  %s5716_s9, 16, %s226_s15, [#allocation8]  }
  0x7d   :  { %5420 = dma.done.wait [#allocation3], 16  }
  0x7e   :  { %5421 = vsyncadd [#allocation3], 4294967280 }
  0x7f   :  { %5422 = dma.done.wait [#allocation5], 32  }
  0x80   :  { %5423 = vsyncadd [#allocation5], 4294967264 }
  0x81   :  { %5424 = dma.done.wait [#allocation8], 16  }
  0x82   :  { %5425 = vsyncadd [#allocation8], 4294967280  ;;  %v241_v0 = vlaneseq  ;;  %vm294_vm6 = vcmask 261120   ;;  %v5477_v2 = vmov 0.0   ;;  %v274_v5 = vld [vmem:[%s5523_s3 + $0x18] sm:$0xff]  ;;  %v273_v6 = vld [vmem:[%s5523_s3 + $0x10] sm:$0xff] }
  0x83   :  { %s5478_s9 = smov 32   ;;  %4789 = vmatprep.subr.mxu0 %v274_v5  ;;  %v5737_v8 = vld [vmem:[%s5488_s5] sm:$0xff]  ;;  %v272_v9 = vld [vmem:[%s5523_s3 + $0x8] sm:$0xff]  ;;  %v279_v13 = vld [vmem:[%s5533_s14 + $0x18] sm:$0xff]  ;;  %vm552_vm13 = vcmask 130048   ;;  %vm1674_vm14 = vcmask 1043456  }
  0x84   :  { %v242_v1 = vand.u32 127, %v241_v0  ;;  %4790 = vmatpush3.msra.mxu0 %v274_v5  ;;  %4797 = vmatprep.mubr.msk.f32.mxu0 %vm294_vm6, %v5737_v8  ;;  %v271_v10 = vld [vmem:[%s5523_s3] sm:$0xff]  ;;  %v5746_v12 = vld [vmem:[%s5488_s5 + $0x8] sm:$0xff]  ;;  %v278_v14 = vld [vmem:[%s5533_s14 + $0x10] sm:$0xff]  ;;  %s6445_s21 = sld [smem:[#allocation16_spill]]  ;;  %vm1667_vm15 = vcmask 97280  }
  0x85   :  { %4791 = vmatprep.subr.mxu0 %v273_v6  ;;  %v277_v15 = vld [vmem:[%s5533_s14 + $0x8] sm:$0xff]  ;;  %v276_v16 = vld [vmem:[%s5533_s14] sm:$0xff]  ;;  %s6446_s29 = sld [smem:[#allocation12_spill]] }
  0x86   :  { %vm248_vm0 = vcmp.ge.s32.totalorder %v242_v1, 8  ;;  %vm249_vm1 = vcmp.lt.s32.totalorder %v242_v1, 16  ;;  %vm258_vm2 = vcmp.ge.s32.totalorder %v242_v1, 24  ;;  %vm259_vm3 = vcmp.lt.s32.totalorder %v242_v1, 32  ;;  %4792 = vmatpush3.msra.mxu0 %v273_v6  ;;  %v4455_v18 = vld [vmem:[%s5528_s8] ss:$0 sm:$0xff] }
  0x87   :  { %vm250_vm4 = vmand %vm248_vm0, %vm249_vm1  ;;  %vm244_vm5 = vcmp.lt.s32.totalorder %v242_v1, 8  ;;  %vm253_vm8 = vcmp.ge.s32.totalorder %v242_v1, 16  ;;  %vm254_vm9 = vcmp.lt.s32.totalorder %v242_v1, 24  ;;  %4793 = vmatprep.subr.mxu0 %v272_v9  ;;  %v4458_v23 = vld [vmem:[%s5538_s19] ss:$0 sm:$0xff]  ;;  %v5800_v33 = vld [vmem:[%s5498_s13 + $0x8] sm:$0xff] }
  0x88   :  { %v5726_v3 = vsel %vm250_vm4, 1.0, %v5477_v2  ;;  %vm260_vm7 = vmand %vm258_vm2, %vm259_vm3  ;;  %v5728_v4 = vsel %vm244_vm5, 1.0, %v5477_v2  ;;  %4794 = vmatpush3.msra.mxu0 %v272_v9  ;;  %v5797_v31 = vld [vmem:[%s5498_s13] sm:$0xff]  ;;  %vm549_vm12 = vcmp.gt.f32.partialorder %v5800_v33, 0.5  ;;  %s5479_s13 = smov 96   ;;  %s6447_s3 = sld [smem:[#allocation21_spill]] }
  0x89   :  { %v5732_v7 = vsel %vm260_vm7, 1.0, %v5477_v2  ;;  %691 = vrot.lane.b32.xlu1 %v5726_v3, %s5478_s9  ;;  %vm255_vm10 = vmand %vm253_vm8, %vm254_vm9  ;;  %4795 = vmatprep.subr.mxu0 %v271_v10  ;;  %vm548_vm11 = vcmp.gt.f32.partialorder %v5797_v31, 0.5  ;;  %s6449_s8 = sld [smem:[#allocation17_spill]]  ;;  %vm4394_vm4 = vcmask 64512  }
  0x8a   :  { %v5743_v11 = vsel %vm255_vm10, 1.0, %v5477_v2  ;;  %4796 = vmatpush3.msra.mxu0 %v271_v10  ;;  %s6450_s14 = sld [smem:[#allocation15_spill]] }
  0x8b   :  { %4798 = vmatmul.mubr.msk.f32.vlgmr.msra.gmra.mxu0 %vm294_vm6, %v5746_v12  ;;  %4800 = vmatprep.subr.mxu0 %v279_v13  ;;  %s6451_s19 = sld [smem:[#allocation22_spill]] }
  0x8c   :  { %4801 = vmatpush3.msra.mxu0 %v279_v13  ;;  %4808 = vmatprep.mubr.msk.f32.mxu0 %vm294_vm6, %v5737_v8  ;;  %s6457_s26 = sld [smem:[#allocation31_spill]] }
  0x8d   :  { %4802 = vmatprep.subr.mxu0 %v278_v14  ;;  %s6458_s1 = sld [smem:[#allocation19_spill]] }
  0x8e   :  { %4803 = vmatpush3.msra.mxu0 %v278_v14  ;;  %s6459_s28 = sld [smem:[#allocation29_spill]] }
  0x8f   :  { %4804 = vmatprep.subr.mxu0 %v277_v15  ;;  %s6460_s2 = sld [smem:[#allocation20_spill]] }
  0x90   :  { %4805 = vmatpush3.msra.mxu0 %v277_v15  ;;  %s6461_s0 = sld [smem:[#allocation27_spill]] }
  0x91   :  { %4806 = vmatprep.subr.mxu0 %v276_v16  ;;  %s6462_s10 = sld [smem:[#allocation28_spill]] }
  0x92   :  { %4807 = vmatpush3.msra.mxu0 %v276_v16  ;;  %s6463_s7 = sld [smem:[#allocation32_spill]] }
  0x93   :  { %4809 = vmatmul.mubr.msk.f32.vlgmr.msra.gmra.mxu0 %vm294_vm6, %v5746_v12  ;;  %s6464_s11 = sld [smem:[#allocation30_spill]] }
  0x94   :  { %s6465_s16 = sld [smem:[#allocation14_spill]] }
  0x95   :  { %s6466_s15 = sld [smem:[#allocation33_spill]] }
  0x96   :  { %s6467_s18 = sld [smem:[#allocation34_spill]] }
  0x97   :  { %s6468_s23 = sld [smem:[#allocation37_spill]] }
  0x98   :  { %s6469_s17 = sld [smem:[#allocation39_spill]] }
  0x99   :  { %s6470_s22 = sld [smem:[#allocation35_spill]] }
  0xfb   :  { %v5815_v55 = vpop.permute.xlu1 %691 }
 0x14b   :  { %v4799_v17 = vpop.f32.mrf.mxu0 }
 0x14c   :  { %v5780_v28 = vadd.f32 %v4799_v17, %v4455_v18 }
 0x14d   :  { %v367_v19 = vpop.f32.mrf.mxu0 }
 0x14e   :  { %v5759_v20 = vadd.f32 %v4455_v18, %v367_v19  ;;  %v458_v29 = vmul.f32 %v5728_v4, %v5780_v28  ;;  %v582_v30 = vmul.f32 %v5726_v3, %v5780_v28  ;;  %v875_v18 = vmul.f32 %v5743_v11, %v5780_v28 }
 0x150   :  { %v457_v21 = vmul.f32 %v5728_v4, %v5759_v20  ;;  %v581_v22 = vmul.f32 %v5726_v3, %v5759_v20  ;;  %v874_v15 = vmul.f32 %v5743_v11, %v5759_v20 }
 0x152   :  { %4815 = vmatprep.mubr.msk.f32.mxu0 %vm294_vm6, %v457_v21  ;;  %4822 = vmatprep.mubr.msk.f32.mxu1 %vm294_vm6, %v581_v22 }
 0x153   :  { %v4810_v24 = vpop.f32.mrf.mxu0 }
 0x154   :  { %v5768_v25 = vadd.f32 %v4810_v24, %v4458_v23 }
 0x155   :  { %v448_v26 = vpop.f32.mrf.mxu0 }
 0x156   :  { %v5770_v27 = vadd.f32 %v4458_v23, %v448_v26  ;;  %4811 = vmatprep.subr.msk.mxu0 %vm294_vm6, %v5768_v25  ;;  %4818 = vmatprep.subr.msk.mxu1 %vm294_vm6, %v5768_v25  ;;  %v695_v56 = vmul.f32 %v5815_v55, %v5768_v25 }
 0x157   :  { %4812 = vmatpush3.xpose.msk.msra.mxu0 %vm294_vm6, %v5768_v25  ;;  %4819 = vmatpush3.xpose.msk.msra.mxu1 %vm294_vm6, %v5768_v25 }
 0x158   :  { %4813 = vmatprep.subr.msk.mxu0 %vm294_vm6, %v5770_v27  ;;  %4820 = vmatprep.subr.msk.mxu1 %vm294_vm6, %v5770_v27  ;;  %v694_v57 = vmul.f32 %v5815_v55, %v5770_v27 }
 0x15b   :  { %4814 = vmatpush3.xpose.msk.msra.mxu0 %vm294_vm6, %v5770_v27  ;;  %4821 = vmatpush3.xpose.msk.msra.mxu1 %vm294_vm6, %v5770_v27 }
 0x15e   :  { %4816 = vmatmul.mubr.msk.f32.vlgmr.msra.gmra.mxu0 %vm294_vm6, %v458_v29  ;;  %4823 = vmatmul.mubr.msk.f32.vlgmr.msra.gmra.mxu1 %vm294_vm6, %v582_v30 }
 0x21e   :  { %v4824_v32 = vpop.f32.mrf.mxu1  ;;  %v4817_v47 = vpop.f32.mrf.mxu0 }
 0x21f   :  { %v665_v35 = vmul.f32 0.35355338, %v4824_v32  ;;  %v547_v48 = vmul.f32 0.35355338, %v4817_v47 }
 0x220   :  { %v655_v34 = vpop.f32.mrf.mxu1  ;;  %v537_v58 = vpop.f32.mrf.mxu0 }
 0x221   :  { %v664_v36 = vmul.f32 0.35355338, %v655_v34  ;;  %v667_v39 = vsel %vm549_vm12, -1e+09, %v665_v35  ;;  %v551_v51 = vsel %vm549_vm12, -1e+09, %v547_v48 }
 0x222   :  { %v671_v40 = vsel %vm552_vm13, %v667_v39, -inf  ;;  %v556_v54 = vsel %vm552_vm13, %v551_v51, -inf  ;;  %v546_v59 = vmul.f32 0.35355338, %v537_v58 }
 0x223   :  { %v666_v37 = vsel %vm548_vm11, -1e+09, %v664_v36 }
 0x224   :  { %v668_v38 = vsel %vm552_vm13, %v666_v37, -inf  ;;  %v550_v60 = vsel %vm548_vm11, -1e+09, %v546_v59 }
 0x225   :  { %669 = vmax.xlane.f32.xlu0 %v668_v38  ;;  %v553_v61 = vsel %vm552_vm13, %v550_v60, -inf }
 0x229   :  { %672 = vmax.xlane.f32.xlu0 %v671_v40 }
 0x2ae   :  { %v670_v41 = vpop.xlane.xlu0 %669 }
 0x2af   :  { %v674_v42 = vsub.f32 %v666_v37, %v670_v41 }
 0x2b1   :  { %v676_v43 = vmul.f32 1.442695, %v674_v42 }
 0x2b2   :  { %v673_v44 = vpop.xlane.xlu0 %672 }
 0x2b3   :  { %5220 = vpow2.f32 %v676_v43  ;;  %v675_v45 = vsub.f32 %v667_v39, %v673_v44 }
 0x2b5   :  { %v678_v46 = vmul.f32 1.442695, %v675_v45 }
 0x2b7   :  { %5222 = vpow2.f32 %v678_v46 }
 0x2c0   :  { %v5221_v49 = vpop.eup %5220 }
 0x2c1   :  { %v680_v50 = vsel %vm552_vm13, %v5221_v49, 0.0 }
 0x2c2   :  { %681 = vadd.xlane.f32.xlu1 %v680_v50 }
 0x2c4   :  { %v5223_v52 = vpop.eup %5222 }
 0x2c5   :  { %v683_v53 = vsel %vm552_vm13, %v5223_v52, 0.0 }
 0x2c6   :  { %684 = vadd.xlane.f32.xlu0 %v683_v53  ;;  %557 = vmax.xlane.f32.xlu1 %v556_v54 }
 0x2dc   :  { %700 = vrot.lane.b32.xlu0 %v695_v56, %s5479_s13 }
 0x2e0   :  { %698 = vrot.lane.b32.xlu0 %v694_v57, %s5479_s13 }
 0x2ff   :  { %554 = vmax.xlane.f32.xlu0 %v553_v61 }
 0x315   :  { %984 = vrot.lane.b32.xlu0 %v5743_v11, %s5478_s9 }
 0x34b   :  { %v682_v62 = vpop.xlane.xlu1 %681 }
 0x34c   :  { %5224 = vrcp.f32 %v682_v62 }
 0x34f   :  { %v685_v63 = vpop.xlane.xlu0 %684  ;;  %v558_v0 = vpop.xlane.xlu1 %557 }
 0x350   :  { %5226 = vrcp.f32 %v685_v63  ;;  %v560_v1 = vsub.f32 %v551_v51, %v558_v0 }
 0x352   :  { %v563_v2 = vmul.f32 1.442695, %v560_v1 }
 0x353   :  { %v701_v5 = vpop.permute.xlu0 %700 }
 0x354   :  { %5228 = vpow2.f32 %v563_v2  ;;  %4825 = vmatprep.subr.mxu0 %v701_v5 }
 0x355   :  { %4826 = vmatpush3.msra.mxu0 %v701_v5 }
 0x357   :  { %v699_v6 = vpop.permute.xlu0 %698 }
 0x358   :  { %4827 = vmatprep.subr.mxu0 %v699_v6 }
 0x359   :  { %v5225_v9 = vpop.eup %5224  ;;  %4828 = vmatpush3.msra.mxu0 %v699_v6 }
 0x35a   :  { %4839 = vmatprep.subr.msk.mxu0 %vm294_vm6, %v5768_v25  ;;  %v687_v10 = vmul.f32 %v5225_v9, %v5221_v49 }
 0x35c   :  { %4829 = vmatprep.mubr.msk.f32.mxu0 %vm552_vm13, %v687_v10 }
 0x35d   :  { %v5227_v13 = vpop.eup %5226 }
 0x35e   :  { %v689_v14 = vmul.f32 %v5227_v13, %v5223_v52 }
 0x360   :  { %4830 = vmatmul.mubr.msk.f32.vlgmr.msra.gmra.mxu0 %vm552_vm13, %v689_v14 }
 0x361   :  { %v5834_v16 = vpop.eup %5228  ;;  %4840 = vmatpush3.xpose.msk.msra.mxu0 %vm294_vm6, %v5768_v25  ;;  %4843 = vmatprep.mubr.msk.f32.mxu0 %vm294_vm6, %v874_v15  ;;  %v1080_v15 = vmul.f32 %v5732_v7, %v5759_v20 }
 0x362   :  { %4841 = vmatprep.subr.msk.mxu0 %vm294_vm6, %v5770_v27  ;;  %v568_v17 = vsel %vm552_vm13, %v5834_v16, 0.0 }
 0x363   :  { %569 = vadd.xlane.f32.xlu0 %v568_v17 }
 0x365   :  { %4842 = vmatpush3.xpose.msk.msra.mxu0 %vm294_vm6, %v5770_v27 }
 0x368   :  { %4844 = vmatmul.mubr.msk.f32.vlgmr.msra.gmra.mxu0 %vm294_vm6, %v875_v18 }
 0x388   :  { %v555_v35 = vpop.xlane.xlu0 %554 }
 0x389   :  { %v559_v36 = vsub.f32 %v550_v60, %v555_v35 }
 0x38b   :  { %v561_v37 = vmul.f32 1.442695, %v559_v36 }
 0x38c   :  { %v5867_v45 = vpop.permute.xlu0 %984 }
 0x38d   :  { %5230 = vpow2.f32 %v561_v37  ;;  %v988_v46 = vmul.f32 %v5867_v45, %v5768_v25  ;;  %v987_v57 = vmul.f32 %v5867_v45, %v5770_v27 }
 0x39a   :  { %v5231_v38 = vpop.eup %5230 }
 0x39b   :  { %v565_v39 = vsel %vm552_vm13, %v5231_v38, 0.0 }
 0x3ec   :  { %v570_v60 = vpop.xlane.xlu0 %569 }
 0x420   :  { %v5848_v19 = vpop.f32.mrf.mxu0 }
 0x422   :  { %v5850_v21 = vpop.f32.mrf.mxu0 }
 0x428   :  { %v4845_v22 = vpop.f32.mrf.mxu0 }
 0x429   :  { %v958_v23 = vmul.f32 0.35355338, %v4845_v22 }
 0x42a   :  { %v948_v24 = vpop.f32.mrf.mxu0 }
 0x42b   :  { %v957_v26 = vmul.f32 0.35355338, %v948_v24  ;;  %v960_v29 = vsel %vm549_vm12, -1e+09, %v958_v23 }
 0x42c   :  { %v964_v30 = vsel %vm552_vm13, %v960_v29, -inf }
 0x42d   :  { %965 = vmax.xlane.f32.xlu1 %v964_v30  ;;  %v959_v32 = vsel %vm548_vm11, -1e+09, %v957_v26 }
 0x42e   :  { %v961_v34 = vsel %vm552_vm13, %v959_v32, -inf }
 0x431   :  { %962 = vmax.xlane.f32.xlu1 %v961_v34 }
 0x442   :  { %576 = vrot.lane.b32.xlu1 %v5728_v4, %s5478_s9 }
 0x466   :  { %566 = vadd.xlane.f32.xlu1 %v565_v39 }
 0x4b6   :  { %v966_v40 = vpop.xlane.xlu1 %965 }
 0x4b7   :  { %v968_v47 = vsub.f32 %v960_v29, %v966_v40 }
 0x4b9   :  { %v971_v48 = vmul.f32 1.442695, %v968_v47 }
 0x4ba   :  { %v963_v41 = vpop.xlane.xlu1 %962 }
 0x4bb   :  { %v967_v49 = vsub.f32 %v959_v32, %v963_v41  ;;  %5232 = vpow2.f32 %v971_v48 }
 0x4bd   :  { %v969_v50 = vmul.f32 1.442695, %v967_v49 }
 0x4be   :  { %v5861_v42 = vpop.permute.xlu1 %576 }
 0x4bf   :  { %v579_v43 = vmul.f32 %v5861_v42, %v5770_v27  ;;  %v580_v44 = vmul.f32 %v5861_v42, %v5768_v25  ;;  %5234 = vpow2.f32 %v969_v50 }
 0x4c1   :  { %787 = vrot.lane.b32.xlu0 %v579_v43, %s5479_s13  ;;  %789 = vrot.lane.b32.xlu1 %v580_v44, %s5479_s13 }
 0x4c5   :  { %993 = vrot.lane.b32.xlu1 %v988_v46, %s5479_s13 }
 0x4c8   :  { %v5233_v51 = vpop.eup %5232 }
 0x4c9   :  { %v976_v52 = vsel %vm552_vm13, %v5233_v51, 0.0 }
 0x4cc   :  { %v5235_v53 = vpop.eup %5234 }
 0x4cd   :  { %v973_v54 = vsel %vm552_vm13, %v5235_v53, 0.0 }
 0x4e9   :  { %977 = vadd.xlane.f32.xlu1 %v976_v52  ;;  %v284_v52 = vld [vmem:[%s5543_s24 + $0x18] sm:$0xff] }
 0x4ed   :  { %974 = vadd.xlane.f32.xlu1 %v973_v54 }
 0x4ef   :  { %v567_v56 = vpop.xlane.xlu1 %566 }
 0x4f0   :  { %5236 = vrcp.f32 %v567_v56 }
 0x4f1   :  { %5238 = vrcp.f32 %v570_v60 }
 0x4fd   :  { %v5237_v58 = vpop.eup %5236 }
 0x4fe   :  { %991 = vrot.lane.b32.xlu1 %v987_v57, %s5479_s13  ;;  %v572_v59 = vmul.f32 %v5237_v58, %v5231_v38  ;;  %v5239_v61 = vpop.eup %5238  ;;  %v283_v57 = vld [vmem:[%s5543_s24 + $0x10] sm:$0xff]  ;;  %v282_v58 = vld [vmem:[%s5543_s24 + $0x8] sm:$0xff] }
 0x4ff   :  { %v574_v0 = vmul.f32 %v5239_v61, %v5834_v16  ;;  %v1081_v16 = vmul.f32 %v5732_v7, %v5780_v28 }
 0x500   :  { %4836 = vmatprep.mubr.msk.f32.mxu1 %vm552_vm13, %v572_v59  ;;  %v281_v59 = vld [vmem:[%s5543_s24] sm:$0xff]  ;;  %s6452_s24 = sld [smem:[#allocation24_spill]] }
 0x533   :  { %v790_v62 = vpop.permute.xlu1 %789  ;;  %v788_v63 = vpop.permute.xlu0 %787 }
 0x534   :  { %4832 = vmatprep.subr.mxu1 %v790_v62 }
 0x535   :  { %4833 = vmatpush3.msra.mxu1 %v790_v62 }
 0x536   :  { %4834 = vmatprep.subr.mxu1 %v788_v63 }
 0x537   :  { %v994_v1 = vpop.permute.xlu1 %993  ;;  %4835 = vmatpush3.msra.mxu1 %v788_v63 }
 0x538   :  { %4837 = vmatmul.mubr.msk.f32.vlgmr.msra.gmra.mxu1 %vm552_vm13, %v574_v0  ;;  %4846 = vmatprep.subr.mxu1 %v994_v1 }
 0x539   :  { %4847 = vmatpush3.msra.mxu1 %v994_v1 }
 0x572   :  { %v978_v2 = vpop.xlane.xlu1 %977 }
 0x573   :  { %5240 = vrcp.f32 %v978_v2  ;;  %v4485_v2 = vld [vmem:[%s5548_s30] ss:$0 sm:$0xff]  ;;  %s6453_s30 = sld [smem:[#allocation13_spill]] }
 0x576   :  { %v975_v5 = vpop.xlane.xlu1 %974 }
 0x577   :  { %5242 = vrcp.f32 %v975_v5 }
 0x57a   :  { %v992_v6 = vpop.permute.xlu1 %991 }
 0x57b   :  { %4848 = vmatprep.subr.mxu1 %v992_v6 }
 0x57c   :  { %4849 = vmatpush3.msra.mxu1 %v992_v6 }
 0x57d   :  { %4853 = vmatprep.subr.msk.mxu1 %vm294_vm6, %v5768_v25 }
 0x580   :  { %v5241_v9 = vpop.eup %5240 }
 0x581   :  { %v982_v14 = vmul.f32 %v5241_v9, %v5233_v51 }
 0x584   :  { %v5243_v10 = vpop.eup %5242 }
 0x585   :  { %v980_v13 = vmul.f32 %v5243_v10, %v5235_v53 }
 0x587   :  { %4850 = vmatprep.mubr.msk.f32.mxu1 %vm552_vm13, %v980_v13 }
 0x588   :  { %4851 = vmatmul.mubr.msk.f32.vlgmr.msra.gmra.mxu1 %vm552_vm13, %v982_v14 }
 0x589   :  { %4854 = vmatpush3.xpose.msk.msra.mxu1 %vm294_vm6, %v5768_v25  ;;  %4857 = vmatprep.mubr.msk.f32.mxu1 %vm294_vm6, %v1080_v15 }
 0x58a   :  { %4855 = vmatprep.subr.msk.mxu1 %vm294_vm6, %v5770_v27 }
 0x58d   :  { %4856 = vmatpush3.xpose.msk.msra.mxu1 %vm294_vm6, %v5770_v27 }
 0x590   :  { %4858 = vmatmul.mubr.msk.f32.vlgmr.msra.gmra.mxu1 %vm294_vm6, %v1081_v16 }
 0x5f8   :  { %v4838_v17 = vpop.f32.mrf.mxu1 }
 0x5f9   :  { %v871_v18 = vadd.f32 %v4838_v17, %v5848_v19 }
 0x5fa   :  { %v5898_v20 = vpop.f32.mrf.mxu1 }
 0x5fb   :  { %v866_v60 = vadd.f32 %v5898_v20, %v5850_v21 }
 0x648   :  { %v4852_v22 = vpop.f32.mrf.mxu1 }
 0x649   :  { %v5901_v23 = vadd.f32 %v4852_v22, %v871_v18 }
 0x64a   :  { %v1069_v24 = vpop.f32.mrf.mxu1 }
 0x64b   :  { %v1078_v62 = vadd.f32 %v1069_v24, %v866_v60 }
 0x650   :  { %v4859_v26 = vpop.f32.mrf.mxu1 }
 0x651   :  { %v1164_v29 = vmul.f32 0.35355338, %v4859_v26 }
 0x652   :  { %v1154_v30 = vpop.f32.mrf.mxu1 }
 0x653   :  { %v1163_v32 = vmul.f32 0.35355338, %v1154_v30  ;;  %v1166_v34 = vsel %vm549_vm12, -1e+09, %v1164_v29  ;;  %v1421_v29 = vld [vmem:[%s5563_s20 + $0x18] sm:$0xff]  ;;  %v1420_v30 = vld [vmem:[%s5563_s20 + $0x10] sm:$0xff] }
 0x654   :  { %v1170_v28 = vsel %vm552_vm13, %v1166_v34, -inf  ;;  %4878 = vmatprep.subr.mxu1 %v1421_v29 }
 0x655   :  { %1171 = vmax.xlane.f32.xlu0 %v1170_v28  ;;  %v1165_v35 = vsel %vm548_vm11, -1e+09, %v1163_v32  ;;  %4879 = vmatpush3.msra.mxu1 %v1421_v29  ;;  %v1419_v32 = vld [vmem:[%s5563_s20 + $0x8] sm:$0xff] }
 0x656   :  { %v1167_v36 = vsel %vm552_vm13, %v1165_v35, -inf  ;;  %4880 = vmatprep.subr.mxu1 %v1420_v30  ;;  %v5952_v28 = vld [vmem:[%s5513_s25 + $0x8] sm:$0xf] }
 0x657   :  { %1168 = vmax.xlane.f32.xlu1 %v1167_v36  ;;  %4881 = vmatpush3.msra.mxu1 %v1420_v30  ;;  %v1437_v36 = vld [vmem:[%s5573_s4 + $0x70] sm:$0xff] }
 0x658   :  { %4882 = vmatprep.subr.mxu1 %v1419_v32 }
 0x659   :  { %4883 = vmatpush3.msra.mxu1 %v1419_v32 }
 0x668   :  { %1190 = vrot.lane.b32.xlu1 %v5732_v7, %s5478_s9  ;;  %s6471_s9 = sld [smem:[#allocation36_spill]] }
 0x6de   :  { %v1172_v19 = vpop.xlane.xlu0 %1171 }
 0x6df   :  { %v1174_v37 = vsub.f32 %v1166_v34, %v1172_v19  ;;  %v1418_v34 = vld [vmem:[%s5563_s20] sm:$0xff]  ;;  %v1436_v19 = vld [vmem:[%s5573_s4 + $0x68] sm:$0xff]  ;;  %s6455_s20 = sld [smem:[#allocation25_spill]] }
 0x6e0   :  { %v1169_v38 = vpop.xlane.xlu1 %1168  ;;  %4884 = vmatprep.subr.mxu1 %v1418_v34 }
 0x6e1   :  { %v1177_v39 = vmul.f32 1.442695, %v1174_v37  ;;  %v1173_v40 = vsub.f32 %v1165_v35, %v1169_v38  ;;  %4885 = vmatpush3.msra.mxu1 %v1418_v34  ;;  %v1438_v35 = vld [vmem:[%s5573_s4 + $0x78] sm:$0xff]  ;;  %v1435_v37 = vld [vmem:[%s5573_s4 + $0x60] sm:$0xff] }
 0x6e2   :  { %4924 = vmatprep.subr.msk.mxu1 %vm1674_vm14, %v5952_v28  ;;  %v1434_v38 = vld [vmem:[%s5573_s4 + $0x58] sm:$0xff] }
 0x6e3   :  { %5244 = vpow2.f32 %v1177_v39  ;;  %v1175_v33 = vmul.f32 1.442695, %v1173_v40  ;;  %v1433_v39 = vld [vmem:[%s5573_s4 + $0x50] sm:$0xff]  ;;  %v1432_v40 = vld [vmem:[%s5573_s4 + $0x48] sm:$0xff] }
 0x6e4   :  { %v5911_v41 = vpop.permute.xlu1 %1190 }
 0x6e5   :  { %5246 = vpow2.f32 %v1175_v33  ;;  %v1193_v31 = vmul.f32 %v5911_v41, %v5770_v27  ;;  %v1194_v48 = vmul.f32 %v5911_v41, %v5768_v25  ;;  %v1431_v33 = vld [vmem:[%s5573_s4 + $0x40] sm:$0xff] }
 0x6e7   :  { %1197 = vrot.lane.b32.xlu1 %v1193_v31, %s5479_s13  ;;  %v1430_v31 = vld [vmem:[%s5573_s4 + $0x38] sm:$0xff] }
 0x6f0   :  { %v5245_v43 = vpop.eup %5244 }
 0x6f1   :  { %v1182_v44 = vsel %vm552_vm13, %v5245_v43, 0.0 }
 0x6f2   :  { %v5247_v46 = vpop.eup %5246  ;;  %1183 = vadd.xlane.f32.xlu0 %v1182_v44  ;;  %v1428_v44 = vld [vmem:[%s5573_s4 + $0x28] sm:$0xff] }
 0x6f3   :  { %v1179_v47 = vsel %vm552_vm13, %v5247_v46, 0.0 }
 0x6f6   :  { %1180 = vadd.xlane.f32.xlu0 %v1179_v47 }
 0x70c   :  { %1199 = vrot.lane.b32.xlu0 %v1194_v48, %s5479_s13 }
 0x759   :  { %v1198_v51 = vpop.permute.xlu1 %1197 }
 0x77b   :  { %v1184_v49 = vpop.xlane.xlu0 %1183 }
 0x77c   :  { %5248 = vrcp.f32 %v1184_v49 }
 0x77f   :  { %v1181_v50 = vpop.xlane.xlu0 %1180 }
 0x780   :  { %5250 = vrcp.f32 %v1181_v50 }
 0x783   :  { %v1200_v27 = vpop.permute.xlu0 %1199 }
 0x784   :  { %4860 = vmatprep.subr.mxu0 %v1200_v27 }
 0x785   :  { %4861 = vmatpush3.msra.mxu0 %v1200_v27 }
 0x786   :  { %4862 = vmatprep.subr.mxu0 %v1198_v51 }
 0x787   :  { %4863 = vmatpush3.msra.mxu0 %v1198_v51 }
 0x788   :  { %4867 = vmatprep.subr.mxu0 %v284_v52 }
 0x789   :  { %v5249_v53 = vpop.eup %5248 }
 0x78a   :  { %v1188_v56 = vmul.f32 %v5249_v53, %v5245_v43  ;;  %v1429_v43 = vld [vmem:[%s5573_s4 + $0x30] sm:$0xff]  ;;  %v4488_v53 = vld [vmem:[%s5553_s6] ss:$0 sm:$0xff]  ;;  %s6454_s6 = sld [smem:[#allocation18_spill]] }
 0x78d   :  { %v5251_v54 = vpop.eup %5250 }
 0x78e   :  { %v1186_v25 = vmul.f32 %v5251_v54, %v5247_v46  ;;  %v1427_v46 = vld [vmem:[%s5573_s4 + $0x20] sm:$0xff] }
 0x790   :  { %4864 = vmatprep.mubr.msk.f32.mxu0 %vm552_vm13, %v1186_v25  ;;  %v4489_v25 = vld [vmem:[%s6445_s21] ss:$0 sm:$0xff]  ;;  %s6473_s21 = sld [smem:[#allocation40_spill]] }
 0x791   :  { %4865 = vmatmul.mubr.msk.f32.vlgmr.msra.gmra.mxu0 %vm552_vm13, %v1188_v56 }
 0x792   :  { %4868 = vmatpush3.msra.mxu0 %v284_v52 }
 0x793   :  { %4869 = vmatprep.subr.mxu0 %v283_v57 }
 0x794   :  { %4870 = vmatpush3.msra.mxu0 %v283_v57 }
 0x795   :  { %4871 = vmatprep.subr.mxu0 %v282_v58 }
 0x796   :  { %4872 = vmatpush3.msra.mxu0 %v282_v58 }
 0x797   :  { %4873 = vmatprep.subr.mxu0 %v281_v59 }
 0x798   :  { %4874 = vmatpush3.msra.mxu0 %v281_v59 }
 0x799   :  { %4889 = vmatprep.subr.mxu0 %v1438_v35 }
 0x851   :  { %v4866_v61 = vpop.f32.mrf.mxu0 }
 0x852   :  { %v1285_v1 = vadd.f32 %v4866_v61, %v5901_v23 }
 0x853   :  { %v1275_v63 = vpop.f32.mrf.mxu0 }
 0x854   :  { %v1284_v0 = vadd.f32 %v1275_v63, %v1078_v62  ;;  %v1656_v62 = vld [vmem:[%s6446_s29] sm:$0xff] }
 0x855   :  { %v1658_v63 = vld [vmem:[%s5513_s25] sm:$0xff]  ;;  %s6448_s25 = sld [smem:[#allocation23_spill]] }
 0x856   :  { %4875 = vmatprep.mubr.msk.f32.mxu0 %vm294_vm6, %v1284_v0  ;;  %v1657_v0 = vld [vmem:[%s6446_s29 + $0x8] sm:$0xff]  ;;  %s6474_s29 = sld [smem:[#allocation41_spill]] }
 0x857   :  { %4876 = vmatmul.mubr.msk.f32.vlgmr.msra.gmra.mxu0 %vm294_vm6, %v1285_v1  ;;  %v1426_v1 = vld [vmem:[%s5573_s4 + $0x18] sm:$0xff] }
 0x858   :  { %4890 = vmatpush3.msra.mxu0 %v1438_v35 }
 0x859   :  { %4891 = vmatprep.subr.mxu0 %v1437_v36 }
 0x85a   :  { %4892 = vmatpush3.msra.mxu0 %v1437_v36  ;;  %v4500_v36 = vld [vmem:[%s6451_s19] ss:$0 sm:$0xff] }
 0x85b   :  { %4893 = vmatprep.subr.mxu0 %v1436_v19  ;;  %v1760_v30 = vld [vmem:[%s6448_s25 + $0x10] sm:$0xff]  ;;  %v1759_v32 = vld [vmem:[%s6448_s25 + $0x8] sm:$0xff]  ;;  %v1758_v34 = vld [vmem:[%s6448_s25] sm:$0xff] }
 0x85c   :  { %4894 = vmatpush3.msra.mxu0 %v1436_v19 }
 0x85d   :  { %4895 = vmatprep.subr.mxu0 %v1435_v37 }
 0x85e   :  { %4896 = vmatpush3.msra.mxu0 %v1435_v37  ;;  %v4503_v37 = vld [vmem:[%s6452_s24] ss:$0 sm:$0xff] }
 0x85f   :  { %4897 = vmatprep.subr.mxu0 %v1434_v38 }
 0x860   :  { %4898 = vmatpush3.msra.mxu0 %v1434_v38 }
 0x861   :  { %4899 = vmatprep.subr.mxu0 %v1433_v39 }
 0x862   :  { %4900 = vmatpush3.msra.mxu0 %v1433_v39 }
 0x863   :  { %4901 = vmatprep.subr.mxu0 %v1432_v40 }
 0x864   :  { %4902 = vmatpush3.msra.mxu0 %v1432_v40 }
 0x865   :  { %4903 = vmatprep.subr.mxu0 %v1431_v33 }
 0x866   :  { %4904 = vmatpush3.msra.mxu0 %v1431_v33 }
 0x867   :  { %4905 = vmatprep.subr.mxu0 %v1430_v31 }
 0x868   :  { %4906 = vmatpush3.msra.mxu0 %v1430_v31 }
 0x869   :  { %4907 = vmatprep.subr.mxu0 %v1429_v43 }
 0x86a   :  { %4908 = vmatpush3.msra.mxu0 %v1429_v43 }
 0x86b   :  { %4909 = vmatprep.subr.mxu0 %v1428_v44 }
 0x86c   :  { %4910 = vmatpush3.msra.mxu0 %v1428_v44 }
 0x86d   :  { %4911 = vmatprep.subr.mxu0 %v1427_v46 }
 0x86e   :  { %4912 = vmatpush3.msra.mxu0 %v1427_v46 }
 0x86f   :  { %4913 = vmatprep.subr.mxu0 %v1426_v1 }
 0x870   :  { %4914 = vmatpush3.msra.mxu0 %v1426_v1 }
 0x917   :  { %v4877_v5 = vpop.f32.mrf.mxu0 }
 0x918   :  { %v1370_v6 = vadd.f32 %v4877_v5, %v4485_v2  ;;  %v1425_v5 = vld [vmem:[%s5573_s4 + $0x10] sm:$0xff] }
 0x919   :  { %v1364_v9 = vpop.f32.mrf.mxu0  ;;  %4915 = vmatprep.subr.mxu0 %v1425_v5 }
 0x91a   :  { %v1365_v10 = vadd.f32 %v4485_v2, %v1364_v9  ;;  %v1374_v13 = vadd.f32 %v1370_v6, %v5746_v12  ;;  %v1756_v2 = vld [vmem:[%s6447_s3 + $0x18] sm:$0xff]  ;;  %v1755_v6 = vld [vmem:[%s6447_s3 + $0x10] sm:$0xff]  ;;  %4916 = vmatpush3.msra.mxu0 %v1425_v5  ;;  %v1424_v9 = vld [vmem:[%s5573_s4 + $0x8] sm:$0xff] }
 0x91b   :  { %4917 = vmatprep.subr.mxu0 %v1424_v9 }
 0x91c   :  { %v1378_v14 = vsel %vm294_vm6, %v1374_v13, 0.0  ;;  %v1373_v21 = vadd.f32 %v1365_v10, %v5737_v8  ;;  %v1754_v10 = vld [vmem:[%s6447_s3 + $0x8] sm:$0xff]  ;;  %4918 = vmatpush3.msra.mxu0 %v1424_v9 }
 0x91d   :  { %1379 = vadd.xlane.f32.xlu0 %v1378_v14  ;;  %v1753_v14 = vld [vmem:[%s6447_s3] sm:$0xff] }
 0x91e   :  { %v1375_v15 = vsel %vm294_vm6, %v1373_v21, 0.0 }
 0x91f   :  { %1376 = vadd.xlane.f32.xlu1 %v1375_v15  ;;  %v4490_v15 = vld [vmem:[%s6449_s8] ss:$0 sm:$0xff] }
 0x9a6   :  { %v1380_v16 = vpop.xlane.xlu0 %1379 }
 0x9a7   :  { %v1383_v17 = vmul.f32 0.03125, %v1380_v16 }
 0x9a8   :  { %v1377_v20 = vpop.xlane.xlu1 %1376 }
 0x9a9   :  { %v1382_v18 = vmul.f32 0.03125, %v1377_v20  ;;  %v5937_v22 = vsub.f32 %v1374_v13, %v1383_v17  ;;  %v1423_v13 = vld [vmem:[%s5573_s4] sm:$0xff]  ;;  %s6456_s4 = sld [smem:[#allocation26_spill]] }
 0x9aa   :  { %4919 = vmatprep.subr.mxu0 %v1423_v13 }
 0x9ab   :  { %v5939_v23 = vsub.f32 %v1373_v21, %v1382_v18  ;;  %v1387_v24 = vmul.f32 %v5937_v22, %v5937_v22  ;;  %4920 = vmatpush3.msra.mxu0 %v1423_v13  ;;  %v1761_v21 = vld [vmem:[%s6448_s25 + $0x18] sm:$0xff] }
 0x9ad   :  { %v1386_v12 = vmul.f32 %v5939_v23, %v5939_v23  ;;  %v1391_v26 = vsel %vm294_vm6, %v1387_v24, 0.0 }
 0x9af   :  { %v1388_v8 = vsel %vm294_vm6, %v1386_v12, 0.0  ;;  %v4496_v12 = vld [vmem:[%s6450_s14] ss:$0 sm:$0xff] }
 0x9b0   :  { %1389 = vadd.xlane.f32.xlu1 %v1388_v8 }
 0x9b4   :  { %1392 = vadd.xlane.f32.xlu1 %v1391_v26 }
 0xa39   :  { %v1390_v47 = vpop.xlane.xlu1 %1389 }
 0xa3a   :  { %v1394_v48 = vmul.f32 0.03125, %v1390_v47 }
 0xa3c   :  { %v1396_v49 = vadd.f32 1e-06, %v1394_v48 }
 0xa3d   :  { %v1393_v50 = vpop.xlane.xlu1 %1392 }
 0xa3e   :  { %5252 = vrsqrt.f32 %v1396_v49  ;;  %v1395_v27 = vmul.f32 0.03125, %v1393_v50 }
 0xa40   :  { %v1397_v51 = vadd.f32 1e-06, %v1395_v27 }
 0xa42   :  { %5254 = vrsqrt.f32 %v1397_v51  ;;  %v6064_v51 = vld [vmem:[%s6453_s30 + $0x8] sm:$0xff] }
 0xa43   :  { %vm2030_vm0 = vcmp.gt.f32.partialorder %v6064_v51, 0.5 }
 0xa4b   :  { %v5253_v52 = vpop.eup %5252 }
 0xa4c   :  { %v1400_v54 = vmul.f32 %v5253_v52, %v5939_v23 }
 0xa4e   :  { %v1408_v56 = vmul.f32 %v4488_v53, %v1400_v54 }
 0xa4f   :  { %v5255_v57 = vpop.eup %5254 }
 0xa50   :  { %v1401_v58 = vmul.f32 %v5255_v57, %v5937_v22  ;;  %v5972_v59 = vadd.f32 %v4489_v25, %v1408_v56 }
 0xa52   :  { %v1409_v60 = vmul.f32 %v4488_v53, %v1401_v58  ;;  %4886 = vmatprep.mubr.msk.f32.mxu1 %vm294_vm6, %v5972_v59 }
 0xa54   :  { %v5976_v61 = vadd.f32 %v4489_v25, %v1409_v60  ;;  %v6067_v25 = vld [vmem:[%s6453_s30] sm:$0xff] }
 0xa55   :  { %vm2029_vm1 = vcmp.gt.f32.partialorder %v6067_v25, 0.5 }
 0xa56   :  { %4887 = vmatmul.mubr.msk.f32.vlgmr.msra.gmra.mxu1 %vm294_vm6, %v5976_v61 }
 0xa57   :  { %4925 = vmatpush3.msk.msra.mxu1 %vm1674_vm14, %v5952_v28  ;;  %4928 = vmatprep.mubr.msk.f32.mxu1 %vm1667_vm15, %v1656_v62 }
 0xa58   :  { %4926 = vmatprep.subr.mxu1 %v1658_v63 }
 0xa59   :  { %4927 = vmatpush3.msra.mxu1 %v1658_v63 }
 0xa5a   :  { %4929 = vmatmul.mubr.msk.f32.vlgmr.msra.gmra.mxu1 %vm1667_vm15, %v1657_v0  ;;  %4931 = vmatprep.subr.mxu1 %v1756_v2 }
 0xa5b   :  { %4932 = vmatpush3.msra.mxu1 %v1756_v2 }
 0xa5c   :  { %4933 = vmatprep.subr.mxu1 %v1755_v6 }
 0xa5d   :  { %4934 = vmatpush3.msra.mxu1 %v1755_v6 }
 0xa5e   :  { %4935 = vmatprep.subr.mxu1 %v1754_v10 }
 0xa5f   :  { %4936 = vmatpush3.msra.mxu1 %v1754_v10 }
 0xa60   :  { %4937 = vmatprep.subr.mxu1 %v1753_v14 }
 0xa61   :  { %4938 = vmatpush3.msra.mxu1 %v1753_v14 }
 0xa62   :  { %4942 = vmatprep.subr.mxu1 %v1761_v21 }
 0xb16   :  { %v4888_v16 = vpop.f32.mrf.mxu1 }
 0xb17   :  { %v1526_v17 = vadd.f32 %v4888_v16, %v4490_v15 }
 0xb18   :  { %v1520_v20 = vpop.f32.mrf.mxu1 }
 0xb19   :  { %v1521_v18 = vadd.f32 %v4490_v15, %v1520_v20  ;;  %v1530_v8 = vmax.f32 %v1526_v17, 0.0 }
 0xb1a   :  { %v4930_v22 = vpop.f32.mrf.mxu1 }
 0xb1b   :  { %v1529_v23 = vmax.f32 %v1521_v18, 0.0  ;;  %v5998_v29 = vadd.f32 %v4930_v22, %v4496_v12 }
 0xb1c   :  { %v1744_v24 = vpop.f32.mrf.mxu1 }
 0xb1d   :  { %v5996_v26 = vadd.f32 %v4496_v12, %v1744_v24  ;;  %4921 = vmatprep.mubr.f32.mxu0 %v1529_v23 }
 0xb1e   :  { %4922 = vmatmul.mubr.f32.vlgmr.msra.gmra.mxu0 %v1530_v8 }
 0xb1f   :  { %4939 = vmatprep.mubr.msk.f32.mxu1 %vm294_vm6, %v5996_v26 }
 0xb20   :  { %4940 = vmatmul.mubr.msk.f32.vlgmr.msra.gmra.mxu1 %vm294_vm6, %v5998_v29 }
 0xb21   :  { %4943 = vmatpush3.msra.mxu1 %v1761_v21  ;;  %4950 = vmatprep.mubr.msk.f32.mxu1 %vm294_vm6, %v5996_v26 }
 0xb22   :  { %4944 = vmatprep.subr.mxu1 %v1760_v30 }
 0xb23   :  { %4945 = vmatpush3.msra.mxu1 %v1760_v30 }
 0xb24   :  { %4946 = vmatprep.subr.mxu1 %v1759_v32 }
 0xb25   :  { %4947 = vmatpush3.msra.mxu1 %v1759_v32 }
 0xb26   :  { %4948 = vmatprep.subr.mxu1 %v1758_v34 }
 0xb27   :  { %4949 = vmatpush3.msra.mxu1 %v1758_v34 }
 0xb28   :  { %4951 = vmatmul.mubr.msk.f32.vlgmr.msra.gmra.mxu1 %vm294_vm6, %v5998_v29 }
 0xbe0   :  { %v4941_v28 = vpop.f32.mrf.mxu1 }
 0xbe1   :  { %v6026_v43 = vadd.f32 %v4941_v28, %v4500_v36 }
 0xbe2   :  { %v1848_v35 = vpop.f32.mrf.mxu1 }
 0xbe3   :  { %v6012_v19 = vadd.f32 %v4500_v36, %v1848_v35  ;;  %v1939_v44 = vmul.f32 %v5728_v4, %v6026_v43  ;;  %v2058_v47 = vmul.f32 %v5726_v3, %v6026_v43  ;;  %v2347_v49 = vmul.f32 %v5743_v11, %v6026_v43 }
 0xbe5   :  { %v1938_v38 = vmul.f32 %v5728_v4, %v6012_v19  ;;  %v2057_v46 = vmul.f32 %v5726_v3, %v6012_v19  ;;  %v2346_v48 = vmul.f32 %v5743_v11, %v6012_v19 }
 0xbe7   :  { %4957 = vmatprep.mubr.msk.f32.mxu1 %vm294_vm6, %v1938_v38 }
 0xbe8   :  { %v4952_v39 = vpop.f32.mrf.mxu1 }
 0xbe9   :  { %v6018_v40 = vadd.f32 %v4952_v39, %v4503_v37 }
 0xbea   :  { %v1929_v33 = vpop.f32.mrf.mxu1 }
 0xbeb   :  { %v6020_v31 = vadd.f32 %v4503_v37, %v1929_v33  ;;  %4953 = vmatprep.subr.msk.mxu1 %vm294_vm6, %v6018_v40  ;;  %v2056_v18 = vmul.f32 %v6018_v40, %v5861_v42  ;;  %v2167_v22 = vmul.f32 %v6018_v40, %v5815_v55 }
 0xbec   :  { %4954 = vmatpush3.xpose.msk.msra.mxu1 %vm294_vm6, %v6018_v40 }
 0xbed   :  { %4955 = vmatprep.subr.msk.mxu1 %vm294_vm6, %v6020_v31  ;;  %v2166_v20 = vmul.f32 %v6020_v31, %v5815_v55  ;;  %v2055_v23 = vmul.f32 %v6020_v31, %v5861_v42 }
 0xbf0   :  { %4956 = vmatpush3.xpose.msk.msra.mxu1 %vm294_vm6, %v6020_v31 }
 0xbf1   :  { %4960 = vmatprep.subr.msk.mxu1 %vm294_vm6, %v6018_v40 }
 0xbf3   :  { %4958 = vmatmul.mubr.msk.f32.vlgmr.msra.gmra.mxu1 %vm294_vm6, %v1939_v44 }
 0xbf4   :  { %4961 = vmatpush3.xpose.msk.msra.mxu1 %vm294_vm6, %v6018_v40  ;;  %4964 = vmatprep.mubr.msk.f32.mxu1 %vm294_vm6, %v2057_v46 }
 0xbf5   :  { %4962 = vmatprep.subr.msk.mxu1 %vm294_vm6, %v6020_v31 }
 0xbf8   :  { %4963 = vmatpush3.xpose.msk.msra.mxu1 %vm294_vm6, %v6020_v31 }
 0xbf9   :  { %4981 = vmatprep.subr.msk.mxu1 %vm294_vm6, %v6018_v40 }
 0xbfb   :  { %4965 = vmatmul.mubr.msk.f32.vlgmr.msra.gmra.mxu1 %vm294_vm6, %v2058_v47 }
 0xbfc   :  { %4982 = vmatpush3.xpose.msk.msra.mxu1 %vm294_vm6, %v6018_v40  ;;  %4985 = vmatprep.mubr.msk.f32.mxu1 %vm294_vm6, %v2346_v48 }
 0xbfd   :  { %4983 = vmatprep.subr.msk.mxu1 %vm294_vm6, %v6020_v31 }
 0xc00   :  { %4984 = vmatpush3.xpose.msk.msra.mxu1 %vm294_vm6, %v6020_v31 }
 0xc03   :  { %4986 = vmatmul.mubr.msk.f32.vlgmr.msra.gmra.mxu1 %vm294_vm6, %v2347_v49 }
 0xcb3   :  { %v4959_v50 = vpop.f32.mrf.mxu1 }
 0xcb4   :  { %v2028_v53 = vmul.f32 0.35355338, %v4959_v50 }
 0xcb5   :  { %v2018_v27 = vpop.f32.mrf.mxu1 }
 0xcb6   :  { %v2027_v57 = vmul.f32 0.35355338, %v2018_v27  ;;  %v2032_v0 = vsel %vm2030_vm0, -1e+09, %v2028_v53 }
 0xcb7   :  { %v2036_v6 = vsel %vm552_vm13, %v2032_v0, -inf }
 0xcb8   :  { %v2031_v2 = vsel %vm2029_vm1, -1e+09, %v2027_v57 }
 0xcb9   :  { %v2033_v13 = vsel %vm552_vm13, %v2031_v2, -inf }
 0xcbb   :  { %v4966_v52 = vpop.f32.mrf.mxu1 }
 0xcbc   :  { %v2141_v54 = vmul.f32 0.35355338, %v4966_v52 }
 0xcbd   :  { %v2131_v56 = vpop.f32.mrf.mxu1 }
 0xcbe   :  { %v2140_v58 = vmul.f32 0.35355338, %v2131_v56  ;;  %v2143_v60 = vsel %vm2030_vm0, -1e+09, %v2141_v54 }
 0xcbf   :  { %v2147_v62 = vsel %vm552_vm13, %v2143_v60, -inf }
 0xcc0   :  { %2148 = vmax.xlane.f32.xlu1 %v2147_v62  ;;  %v2142_v63 = vsel %vm2029_vm1, -1e+09, %v2140_v58 }
 0xcc1   :  { %v2144_v1 = vsel %vm552_vm13, %v2142_v63, -inf }
 0xcc2   :  { %2145 = vmax.xlane.f32.xlu0 %v2144_v1 }
 0xcc3   :  { %v4987_v5 = vpop.f32.mrf.mxu1 }
 0xcc4   :  { %v2430_v9 = vmul.f32 0.35355338, %v4987_v5  ;;  %2037 = vmax.xlane.f32.xlu1 %v2036_v6  ;;  %v2456_v6 = vmul.f32 %v6018_v40, %v5867_v45 }
 0xcc5   :  { %v2420_v10 = vpop.f32.mrf.mxu1 }
 0xcc6   :  { %v2429_v14 = vmul.f32 0.35355338, %v2420_v10  ;;  %2034 = vmax.xlane.f32.xlu0 %v2033_v13  ;;  %v2432_v21 = vsel %vm2030_vm0, -1e+09, %v2430_v9  ;;  %v2455_v9 = vmul.f32 %v6020_v31, %v5867_v45 }
 0xcc7   :  { %v2436_v15 = vsel %vm552_vm13, %v2432_v21, -inf }
 0xcc8   :  { %2437 = vmax.xlane.f32.xlu1 %v2436_v15  ;;  %v2431_v16 = vsel %vm2029_vm1, -1e+09, %v2429_v14 }
 0xcc9   :  { %v2433_v17 = vsel %vm552_vm13, %v2431_v16, -inf }
 0xcca   :  { %2434 = vmax.xlane.f32.xlu0 %v2433_v17 }
 0xcd9   :  { %2170 = vrot.lane.b32.xlu1 %v2166_v20, %s5479_s13 }
 0xcdd   :  { %2261 = vrot.lane.b32.xlu1 %v2056_v18, %s5479_s13 }
 0xce0   :  { %2172 = vrot.lane.b32.xlu0 %v2167_v22, %s5479_s13 }
 0xce4   :  { %2259 = vrot.lane.b32.xlu0 %v2055_v23, %s5479_s13 }
 0xd49   :  { %v2149_v12 = vpop.xlane.xlu1 %2148 }
 0xd4a   :  { %v2151_v8 = vsub.f32 %v2143_v60, %v2149_v12 }
 0xd4b   :  { %v2146_v24 = vpop.xlane.xlu0 %2145 }
 0xd4c   :  { %v2150_v32 = vsub.f32 %v2142_v63, %v2146_v24  ;;  %v2154_v28 = vmul.f32 1.442695, %v2151_v8 }
 0xd4d   :  { %v2038_v30 = vpop.xlane.xlu1 %2037 }
 0xd4e   :  { %v2040_v34 = vsub.f32 %v2032_v0, %v2038_v30  ;;  %v2152_v39 = vmul.f32 1.442695, %v2150_v32 }
 0xd4f   :  { %v2035_v35 = vpop.xlane.xlu0 %2034 }
 0xd50   :  { %v2043_v36 = vmul.f32 1.442695, %v2040_v34  ;;  %v2039_v37 = vsub.f32 %v2031_v2, %v2035_v35 }
 0xd51   :  { %v2438_v38 = vpop.xlane.xlu1 %2437 }
 0xd52   :  { %5256 = vpow2.f32 %v2043_v36  ;;  %v2041_v33 = vmul.f32 1.442695, %v2039_v37  ;;  %v2440_v44 = vsub.f32 %v2432_v21, %v2438_v38  ;;  %v2548_v38 = vmul.f32 %v5732_v7, %v6012_v19  ;;  %v4923_v19 = vpop.f32.mrf.mxu0 }
 0xd53   :  { %5258 = vpow2.f32 %v2154_v28  ;;  %v2435_v46 = vpop.xlane.xlu0 %2434 }
 0xd54   :  { %5260 = vpow2.f32 %v2041_v33  ;;  %v2443_v47 = vmul.f32 1.442695, %v2440_v44  ;;  %v2439_v48 = vsub.f32 %v2431_v16, %v2435_v46  ;;  %v1603_v33 = vpop.f32.mrf.mxu0 }
 0xd55   :  { %v2171_v49 = vpop.permute.xlu1 %2170  ;;  %5262 = vpow2.f32 %v2152_v39  ;;  %v2549_v39 = vmul.f32 %v5732_v7, %v6026_v43 }
 0xd56   :  { %v2441_v50 = vmul.f32 1.442695, %v2439_v48  ;;  %5264 = vpow2.f32 %v2443_v47 }
 0xd57   :  { %v2173_v27 = vpop.permute.xlu0 %2172 }
 0xd58   :  { %4967 = vmatprep.subr.mxu0 %v2173_v27  ;;  %5266 = vpow2.f32 %v2441_v50 }
 0xd59   :  { %4968 = vmatpush3.msra.mxu0 %v2173_v27  ;;  %v2262_v52 = vpop.permute.xlu1 %2261 }
 0xd5a   :  { %4969 = vmatprep.subr.mxu0 %v2171_v49 }
 0xd5b   :  { %4970 = vmatpush3.msra.mxu0 %v2171_v49  ;;  %v2260_v10 = vpop.permute.xlu0 %2259 }
 0xd5c   :  { %4974 = vmatprep.subr.mxu0 %v2262_v52 }
 0xd5f   :  { %v5257_v53 = vpop.eup %5256 }
 0xd60   :  { %v5259_v54 = vpop.eup %5258  ;;  %v2048_v56 = vsel %vm552_vm13, %v5257_v53, 0.0 }
 0xd61   :  { %v5261_v57 = vpop.eup %5260  ;;  %2049 = vadd.xlane.f32.xlu1 %v2048_v56  ;;  %v2159_v62 = vsel %vm552_vm13, %v5259_v54, 0.0 }
 0xd62   :  { %v2045_v58 = vsel %vm552_vm13, %v5261_v57, 0.0  ;;  %v5263_v60 = vpop.eup %5262 }
 0xd63   :  { %2046 = vadd.xlane.f32.xlu0 %v2045_v58  ;;  %v5265_v63 = vpop.eup %5264  ;;  %v2156_v0 = vsel %vm552_vm13, %v5263_v60, 0.0 }
 0xd64   :  { %v2448_v2 = vsel %vm552_vm13, %v5265_v63, 0.0 }
 0xd65   :  { %2160 = vadd.xlane.f32.xlu1 %v2159_v62  ;;  %v5267_v1 = vpop.eup %5266 }
 0xd66   :  { %v2445_v5 = vsel %vm552_vm13, %v5267_v1, 0.0 }
 0xd67   :  { %2157 = vadd.xlane.f32.xlu0 %v2156_v0 }
 0xd69   :  { %2449 = vadd.xlane.f32.xlu1 %v2448_v2 }
 0xd6b   :  { %2446 = vadd.xlane.f32.xlu0 %v2445_v5 }
 0xd7a   :  { %2461 = vrot.lane.b32.xlu1 %v2456_v6, %s5479_s13 }
 0xd81   :  { %2459 = vrot.lane.b32.xlu0 %v2455_v9, %s5479_s13 }
 0xdea   :  { %v2050_v13 = vpop.xlane.xlu1 %2049 }
 0xdec   :  { %v2047_v14 = vpop.xlane.xlu0 %2046 }
 0xded   :  { %5268 = vrcp.f32 %v2047_v14 }
 0xdee   :  { %v2161_v21 = vpop.xlane.xlu1 %2160 }
 0xdef   :  { %5270 = vrcp.f32 %v2161_v21  ;;  %v2657_v21 = vmul.f32 %v6020_v31, %v5911_v41 }
 0xdf0   :  { %v2158_v15 = vpop.xlane.xlu0 %2157 }
 0xdf1   :  { %5272 = vrcp.f32 %v2158_v15  ;;  %v2658_v15 = vmul.f32 %v6018_v40, %v5911_v41 }
 0xdf2   :  { %5274 = vrcp.f32 %v2050_v13  ;;  %v2450_v17 = vpop.xlane.xlu1 %2449 }
 0xdf4   :  { %v2447_v16 = vpop.xlane.xlu0 %2446 }
 0xdf5   :  { %5276 = vrcp.f32 %v2447_v16  ;;  %v4493_v16 = vld [vmem:[%s6454_s6] ss:$0 sm:$0xff] }
 0xdf6   :  { %5278 = vrcp.f32 %v2450_v17  ;;  %v2462_v28 = vpop.permute.xlu1 %2461  ;;  %v1604_v17 = vadd.f32 %v4493_v16, %v1603_v33 }
 0xdf8   :  { %v2460_v36 = vpop.permute.xlu0 %2459 }
 0xdfa   :  { %v5269_v20 = vpop.eup %5268 }
 0xdfb   :  { %v2052_v24 = vmul.f32 %v5269_v20, %v5261_v57  ;;  %v1609_v20 = vadd.f32 %v4923_v19, %v4493_v16 }
 0xdfc   :  { %v5271_v18 = vpop.eup %5270 }
 0xdfd   :  { %v2165_v12 = vmul.f32 %v5271_v18, %v5259_v54  ;;  %v1612_v18 = vadd.f32 %v1604_v17, %v5972_v59 }
 0xdfe   :  { %v5273_v22 = vpop.eup %5272 }
 0xdff   :  { %v2163_v23 = vmul.f32 %v5273_v22, %v5263_v60  ;;  %v5275_v8 = vpop.eup %5274  ;;  %v1613_v22 = vadd.f32 %v1609_v20, %v5976_v61 }
 0xe00   :  { %v2054_v32 = vmul.f32 %v5275_v8, %v5257_v53 }
 0xe01   :  { %4971 = vmatprep.mubr.msk.f32.mxu0 %vm552_vm13, %v2163_v23  ;;  %v1614_v23 = vsel %vm294_vm6, %v1612_v18, 0.0 }
 0xe02   :  { %v5277_v30 = vpop.eup %5276  ;;  %4972 = vmatmul.mubr.msk.f32.vlgmr.msra.gmra.mxu0 %vm552_vm13, %v2165_v12 }
 0xe03   :  { %4975 = vmatpush3.msra.mxu0 %v2262_v52  ;;  %4978 = vmatprep.mubr.msk.f32.mxu0 %vm552_vm13, %v2052_v24  ;;  %v5279_v34 = vpop.eup %5278  ;;  %v2452_v35 = vmul.f32 %v5277_v30, %v5267_v1  ;;  %v1766_v30 = vld [vmem:[%s6455_s20 + $0x18] sm:$0xff] }
 0xe04   :  { %4976 = vmatprep.subr.mxu0 %v2260_v10  ;;  %v2454_v37 = vmul.f32 %v5279_v34, %v5265_v63 }
 0xe05   :  { %4977 = vmatpush3.msra.mxu0 %v2260_v10 }
 0xe06   :  { %4988 = vmatprep.subr.mxu0 %v2462_v28  ;;  %4979 = vmatmul.mubr.msk.f32.vlgmr.msra.gmra.mxu0 %vm552_vm13, %v2054_v32 }
 0xe07   :  { %4989 = vmatpush3.msra.mxu0 %v2462_v28  ;;  %4992 = vmatprep.mubr.msk.f32.mxu0 %vm552_vm13, %v2452_v35  ;;  %v1765_v28 = vld [vmem:[%s6455_s20 + $0x10] sm:$0xff]  ;;  %v1764_v35 = vld [vmem:[%s6455_s20 + $0x8] sm:$0xff] }
 0xe08   :  { %4990 = vmatprep.subr.mxu0 %v2460_v36 }
 0xe09   :  { %4991 = vmatpush3.msra.mxu0 %v2460_v36  ;;  %v1763_v36 = vld [vmem:[%s6455_s20] sm:$0xff] }
 0xe0a   :  { %4995 = vmatprep.subr.msk.mxu0 %vm294_vm6, %v6018_v40  ;;  %4993 = vmatmul.mubr.msk.f32.vlgmr.msra.gmra.mxu0 %vm552_vm13, %v2454_v37 }
 0xe0b   :  { %4996 = vmatpush3.xpose.msk.msra.mxu0 %vm294_vm6, %v6018_v40  ;;  %4999 = vmatprep.mubr.msk.f32.mxu0 %vm294_vm6, %v2548_v38 }
 0xe0c   :  { %4997 = vmatprep.subr.msk.mxu0 %vm294_vm6, %v6020_v31 }
 0xe0f   :  { %4998 = vmatpush3.xpose.msk.msra.mxu0 %vm294_vm6, %v6020_v31  ;;  %v1617_v31 = vsel %vm294_vm6, %v1613_v22, 0.0 }
 0xe12   :  { %5000 = vmatmul.mubr.msk.f32.vlgmr.msra.gmra.mxu0 %vm294_vm6, %v2549_v39 }
 0xec2   :  { %v4973_v44 = vpop.f32.mrf.mxu0 }
 0xec4   :  { %v2248_v46 = vpop.f32.mrf.mxu0 }
 0xec6   :  { %v4980_v47 = vpop.f32.mrf.mxu0 }
 0xec7   :  { %v2343_v48 = vadd.f32 %v4980_v47, %v4973_v44  ;;  %v4530_v47 = vld [vmem:[%s6456_s4] ss:$0 sm:$0xff] }
 0xec8   :  { %v2337_v49 = vpop.f32.mrf.mxu0 }
 0xec9   :  { %v2338_v50 = vadd.f32 %v2337_v49, %v2248_v46 }
 0xeca   :  { %v4994_v27 = vpop.f32.mrf.mxu0 }
 0xecb   :  { %v6133_v52 = vadd.f32 %v4994_v27, %v2343_v48 }
 0xecc   :  { %v2537_v53 = vpop.f32.mrf.mxu0 }
 0xecd   :  { %v6135_v54 = vadd.f32 %v2537_v53, %v2338_v50 }
 0xed2   :  { %v5001_v56 = vpop.f32.mrf.mxu0 }
 0xed3   :  { %v2632_v57 = vmul.f32 0.35355338, %v5001_v56 }
 0xed4   :  { %v2622_v58 = vpop.f32.mrf.mxu0 }
 0xed5   :  { %v2631_v43 = vmul.f32 0.35355338, %v2622_v58  ;;  %v2634_v60 = vsel %vm2030_vm0, -1e+09, %v2632_v57 }
 0xed6   :  { %v2638_v62 = vsel %vm552_vm13, %v2634_v60, -inf }
 0xed7   :  { %2639 = vmax.xlane.f32.xlu0 %v2638_v62  ;;  %v2633_v63 = vsel %vm2029_vm1, -1e+09, %v2631_v43 }
 0xed8   :  { %v2635_v0 = vsel %vm552_vm13, %v2633_v63, -inf }
 0xed9   :  { %2636 = vmax.xlane.f32.xlu1 %v2635_v0 }
 0xf60   :  { %v2640_v1 = vpop.xlane.xlu0 %2639 }
 0xf61   :  { %v2642_v2 = vsub.f32 %v2634_v60, %v2640_v1  ;;  %v2889_v1 = vld [vmem:[%s6457_s26 + $0x18] sm:$0xff] }
 0xf62   :  { %v2637_v5 = vpop.xlane.xlu1 %2636 }
 0xf63   :  { %v2645_v6 = vmul.f32 1.442695, %v2642_v2  ;;  %v2641_v9 = vsub.f32 %v2633_v63, %v2637_v5  ;;  %v2887_v2 = vld [vmem:[%s6457_s26 + $0x8] sm:$0xff] }
 0xf65   :  { %5280 = vpow2.f32 %v2645_v6  ;;  %v2643_v10 = vmul.f32 1.442695, %v2641_v9 }
 0xf67   :  { %5282 = vpow2.f32 %v2643_v10 }
 0xf72   :  { %v5281_v51 = vpop.eup %5280 }
 0xf73   :  { %v2650_v13 = vsel %vm552_vm13, %v5281_v51, 0.0 }
 0xf74   :  { %v5283_v14 = vpop.eup %5282  ;;  %2651 = vadd.xlane.f32.xlu1 %v2650_v13 }
 0xf75   :  { %v2647_v25 = vsel %vm552_vm13, %v5283_v14, 0.0 }
 0xf76   :  { %2648 = vadd.xlane.f32.xlu0 %v2647_v25 }
 0xf85   :  { %2661 = vrot.lane.b32.xlu1 %v2657_v21, %s5479_s13 }
 0xf8c   :  { %2663 = vrot.lane.b32.xlu0 %v2658_v15, %s5479_s13 }
 0xfa9   :  { %1615 = vadd.xlane.f32.xlu1 %v1614_v23 }
 0xfab   :  { %1618 = vadd.xlane.f32.xlu0 %v1617_v31 }
 0xffd   :  { %v2652_v12 = vpop.xlane.xlu1 %2651 }
 0xffe   :  { %5284 = vrcp.f32 %v2652_v12  ;;  %v4494_v12 = vld [vmem:[%s6458_s1] ss:$0 sm:$0xff] }
 0xfff   :  { %v2649_v8 = vpop.xlane.xlu0 %2648 }
0x1000   :  { %5286 = vrcp.f32 %v2649_v8 }
0x1001   :  { %v2662_v24 = vpop.permute.xlu1 %2661 }
0x1003   :  { %v2664_v40 = vpop.permute.xlu0 %2663 }
0x1004   :  { %5002 = vmatprep.subr.mxu1 %v2664_v40 }
0x1005   :  { %5003 = vmatpush3.msra.mxu1 %v2664_v40 }
0x1006   :  { %5004 = vmatprep.subr.mxu1 %v2662_v24 }
0x1007   :  { %5005 = vmatpush3.msra.mxu1 %v2662_v24  ;;  %v2884_v24 = vld [vmem:[%s6459_s28 + $0x18] sm:$0xff] }
0x1008   :  { %5009 = vmatprep.subr.mxu1 %v1766_v30  ;;  %5020 = vmatprep.subr.mxu0 %v2884_v24 }
0x1009   :  { %5021 = vmatpush3.msra.mxu0 %v2884_v24 }
0x100b   :  { %v5285_v59 = vpop.eup %5284 }
0x100c   :  { %v2656_v34 = vmul.f32 %v5285_v59, %v5281_v51 }
0x100d   :  { %v5287_v61 = vpop.eup %5286 }
0x100e   :  { %v2654_v32 = vmul.f32 %v5287_v61, %v5283_v14 }
0x1010   :  { %5006 = vmatprep.mubr.msk.f32.mxu1 %vm552_vm13, %v2654_v32  ;;  %v2882_v32 = vld [vmem:[%s6459_s28 + $0x8] sm:$0xff] }
0x1011   :  { %5007 = vmatmul.mubr.msk.f32.vlgmr.msra.gmra.mxu1 %vm552_vm13, %v2656_v34  ;;  %v4495_v34 = vld [vmem:[%s6460_s2] ss:$0 sm:$0xff] }
0x1012   :  { %5010 = vmatpush3.msra.mxu1 %v1766_v30  ;;  %v2883_v30 = vld [vmem:[%s6459_s28 + $0x10] sm:$0xff] }
0x1013   :  { %5011 = vmatprep.subr.mxu1 %v1765_v28  ;;  %5022 = vmatprep.subr.mxu0 %v2883_v30 }
0x1014   :  { %5012 = vmatpush3.msra.mxu1 %v1765_v28  ;;  %5023 = vmatpush3.msra.mxu0 %v2883_v30 }
0x1015   :  { %5013 = vmatprep.subr.mxu1 %v1764_v35  ;;  %5024 = vmatprep.subr.mxu0 %v2882_v32 }
0x1016   :  { %5014 = vmatpush3.msra.mxu1 %v1764_v35  ;;  %v2881_v35 = vld [vmem:[%s6459_s28] sm:$0xff]  ;;  %5025 = vmatpush3.msra.mxu0 %v2882_v32 }
0x1017   :  { %5015 = vmatprep.subr.mxu1 %v1763_v36  ;;  %5026 = vmatprep.subr.mxu0 %v2881_v35 }
0x1018   :  { %5016 = vmatpush3.msra.mxu1 %v1763_v36  ;;  %5027 = vmatpush3.msra.mxu0 %v2881_v35 }
0x1019   :  { %5031 = vmatprep.subr.mxu1 %v2889_v1 }
0x1032   :  { %v1616_v44 = vpop.xlane.xlu1 %1615 }
0x1033   :  { %v1620_v48 = vmul.f32 0.03125, %v1616_v44 }
0x1034   :  { %v1619_v33 = vpop.xlane.xlu0 %1618 }
0x1035   :  { %v1621_v46 = vmul.f32 0.03125, %v1619_v33  ;;  %v1622_v56 = vsub.f32 %v1612_v18, %v1620_v48  ;;  %v4533_v48 = vld [vmem:[%s6461_s0] ss:$0 sm:$0xff] }
0x1037   :  { %v1623_v50 = vsub.f32 %v1613_v22, %v1621_v46  ;;  %v1624_v62 = vmul.f32 %v1622_v56, %v1622_v56 }
0x1039   :  { %v1625_v43 = vmul.f32 %v1623_v50, %v1623_v50  ;;  %v1626_v0 = vsel %vm294_vm6, %v1624_v62, 0.0 }
0x103b   :  { %v1629_v63 = vsel %vm294_vm6, %v1625_v43, 0.0 }
0x10d1   :  { %v5008_v37 = vpop.f32.mrf.mxu1 }
0x10d2   :  { %v2749_v19 = vadd.f32 %v5008_v37, %v6133_v52 }
0x10d3   :  { %v2739_v38 = vpop.f32.mrf.mxu1 }
0x10d4   :  { %v2748_v39 = vadd.f32 %v2739_v38, %v6135_v54 }
0x10d6   :  { %5017 = vmatprep.mubr.msk.f32.mxu1 %vm294_vm6, %v2748_v39 }
0x10d7   :  { %5018 = vmatmul.mubr.msk.f32.vlgmr.msra.gmra.mxu1 %vm294_vm6, %v2749_v19 }
0x10d8   :  { %5032 = vmatpush3.msra.mxu1 %v2889_v1  ;;  %v4535_v1 = vld [vmem:[%s6464_s11] ss:$0 sm:$0xff] }
0x1197   :  { %v5019_v49 = vpop.f32.mrf.mxu1 }
0x1198   :  { %v2834_v27 = vadd.f32 %v5019_v49, %v4530_v47 }
0x1199   :  { %v2828_v53 = vpop.f32.mrf.mxu1 }
0x119a   :  { %v2829_v57 = vadd.f32 %v4530_v47, %v2828_v53  ;;  %v2838_v54 = vadd.f32 %v2834_v27, %v5998_v29  ;;  %v2888_v29 = vld [vmem:[%s6457_s26 + $0x10] sm:$0xff] }
0x119b   :  { %5033 = vmatprep.subr.mxu1 %v2888_v29 }
0x119c   :  { %v2842_v52 = vsel %vm294_vm6, %v2838_v54, 0.0  ;;  %v2837_v58 = vadd.f32 %v2829_v57, %v5996_v26  ;;  %5034 = vmatpush3.msra.mxu1 %v2888_v29  ;;  %v2886_v26 = vld [vmem:[%s6457_s26] sm:$0xff] }
0x119d   :  { %2843 = vadd.xlane.f32.xlu1 %v2842_v52  ;;  %5035 = vmatprep.subr.mxu1 %v2887_v2 }
0x119e   :  { %v2839_v60 = vsel %vm294_vm6, %v2837_v58, 0.0  ;;  %5036 = vmatpush3.msra.mxu1 %v2887_v2 }
0x119f   :  { %2840 = vadd.xlane.f32.xlu0 %v2839_v60  ;;  %5037 = vmatprep.subr.mxu1 %v2886_v26 }
0x11a0   :  { %5038 = vmatpush3.msra.mxu1 %v2886_v26 }
0x11a1   :  { %1630 = vadd.xlane.f32.xlu1 %v1629_v63 }
0x11a3   :  { %1627 = vadd.xlane.f32.xlu0 %v1626_v0 }
0x1226   :  { %v2844_v5 = vpop.xlane.xlu1 %2843 }
0x1227   :  { %v2846_v6 = vmul.f32 0.03125, %v2844_v5 }
0x1228   :  { %v2841_v9 = vpop.xlane.xlu0 %2840 }
0x1229   :  { %v2848_v10 = vsub.f32 %v2838_v54, %v2846_v6  ;;  %v2845_v51 = vmul.f32 0.03125, %v2841_v9 }
0x122a   :  { %v1631_v13 = vpop.xlane.xlu1 %1630 }
0x122b   :  { %v2847_v14 = vsub.f32 %v2837_v58, %v2845_v51  ;;  %v1633_v25 = vmul.f32 0.03125, %v1631_v13  ;;  %v2850_v21 = vmul.f32 %v2848_v10, %v2848_v10  ;;  %v4538_v58 = vld [vmem:[%s6463_s7] ss:$0 sm:$0xff] }
0x122c   :  { %v1628_v15 = vpop.xlane.xlu0 %1627  ;;  %v6253_v13 = vld [vmem:[%s6465_s16] sm:$0xff] }
0x122d   :  { %v1635_v16 = vadd.f32 1e-06, %v1633_v25  ;;  %v1632_v17 = vmul.f32 0.03125, %v1628_v15  ;;  %v2854_v20 = vsel %vm294_vm6, %v2850_v21, 0.0  ;;  %v2849_v18 = vmul.f32 %v2847_v14, %v2847_v14 }
0x122e   :  { %2855 = vadd.xlane.f32.xlu1 %v2854_v20  ;;  %vm3163_vm3 = vcmp.gt.f32.partialorder %v6253_v13, 0.5 }
0x122f   :  { %5288 = vrsqrt.f32 %v1635_v16  ;;  %v1634_v22 = vadd.f32 1e-06, %v1632_v17  ;;  %v2851_v23 = vsel %vm294_vm6, %v2849_v18, 0.0 }
0x1230   :  { %2852 = vadd.xlane.f32.xlu0 %v2851_v23 }
0x1231   :  { %5290 = vrsqrt.f32 %v1634_v22 }
0x123c   :  { %v5289_v31 = vpop.eup %5288 }
0x123d   :  { %v1639_v8 = vmul.f32 %v5289_v31, %v1623_v50 }
0x123e   :  { %v5291_v40 = vpop.eup %5290 }
0x123f   :  { %v1638_v59 = vmul.f32 %v5291_v40, %v1622_v56  ;;  %v1647_v61 = vmul.f32 %v4494_v12, %v1639_v8  ;;  %v4534_v56 = vld [vmem:[%s6462_s10] ss:$0 sm:$0xff] }
0x1241   :  { %v1646_v28 = vmul.f32 %v4494_v12, %v1638_v59  ;;  %v1655_v37 = vadd.f32 %v4495_v34, %v1647_v61 }
0x1243   :  { %v1654_v36 = vadd.f32 %v4495_v34, %v1646_v28 }
0x1245   :  { %5039 = vmatprep.mubr.msk.f32.mxu1 %vm294_vm6, %v1654_v36 }
0x1246   :  { %5040 = vmatmul.mubr.msk.f32.vlgmr.msra.gmra.mxu1 %vm294_vm6, %v1655_v37 }
0x12b7   :  { %v2856_v38 = vpop.xlane.xlu1 %2855 }
0x12b8   :  { %v2858_v39 = vmul.f32 0.03125, %v2856_v38 }
0x12b9   :  { %v2853_v19 = vpop.xlane.xlu0 %2852 }
0x12ba   :  { %v2860_v33 = vadd.f32 1e-06, %v2858_v39  ;;  %v2857_v44 = vmul.f32 0.03125, %v2853_v19 }
0x12bc   :  { %5292 = vrsqrt.f32 %v2860_v33  ;;  %v2859_v46 = vadd.f32 1e-06, %v2857_v44 }
0x12be   :  { %5294 = vrsqrt.f32 %v2859_v46 }
0x12c9   :  { %v5293_v47 = vpop.eup %5292 }
0x12ca   :  { %v2864_v49 = vmul.f32 %v5293_v47, %v2848_v10 }
0x12cb   :  { %v5295_v50 = vpop.eup %5294 }
0x12cc   :  { %v2863_v27 = vmul.f32 %v5295_v50, %v2847_v14  ;;  %v2872_v53 = vmul.f32 %v4533_v48, %v2864_v49 }
0x12ce   :  { %v2871_v57 = vmul.f32 %v4533_v48, %v2863_v27  ;;  %v6191_v52 = vadd.f32 %v4534_v56, %v2872_v53 }
0x12d0   :  { %v6189_v54 = vadd.f32 %v4534_v56, %v2871_v57 }
0x12d2   :  { %5028 = vmatprep.mubr.msk.f32.mxu0 %vm294_vm6, %v6189_v54 }
0x12d3   :  { %5029 = vmatmul.mubr.msk.f32.vlgmr.msra.gmra.mxu0 %vm294_vm6, %v6191_v52 }
0x1306   :  { %v5041_v43 = vpop.f32.mrf.mxu1 }
0x1307   :  { %v6198_v60 = vadd.f32 %v5041_v43, %v4538_v58 }
0x1308   :  { %v3063_v62 = vpop.f32.mrf.mxu1 }
0x1309   :  { %v6200_v63 = vadd.f32 %v4538_v58, %v3063_v62  ;;  %5042 = vmatprep.subr.msk.mxu0 %vm294_vm6, %v6198_v60  ;;  %5049 = vmatprep.subr.msk.mxu1 %vm294_vm6, %v6198_v60  ;;  %v3190_v38 = vmul.f32 %v6198_v60, %v5861_v42  ;;  %v3301_v39 = vmul.f32 %v6198_v60, %v5815_v55 }
0x130a   :  { %5043 = vmatpush3.xpose.msk.msra.mxu0 %vm294_vm6, %v6198_v60  ;;  %5050 = vmatpush3.xpose.msk.msra.mxu1 %vm294_vm6, %v6198_v60 }
0x130b   :  { %5044 = vmatprep.subr.msk.mxu0 %vm294_vm6, %v6200_v63  ;;  %5051 = vmatprep.subr.msk.mxu1 %vm294_vm6, %v6200_v63  ;;  %v3300_v37 = vmul.f32 %v6200_v63, %v5815_v55  ;;  %v3189_v19 = vmul.f32 %v6200_v63, %v5861_v42 }
0x130e   :  { %5045 = vmatpush3.xpose.msk.msra.mxu0 %vm294_vm6, %v6200_v63  ;;  %5052 = vmatpush3.xpose.msk.msra.mxu1 %vm294_vm6, %v6200_v63 }
0x130f   :  { %5070 = vmatprep.subr.msk.mxu1 %vm294_vm6, %v6198_v60 }
0x1393   :  { %v5030_v0 = vpop.f32.mrf.mxu0 }
0x1394   :  { %v6221_v2 = vadd.f32 %v5030_v0, %v4535_v1 }
0x1395   :  { %v2976_v29 = vpop.f32.mrf.mxu0 }
0x1396   :  { %v6223_v26 = vadd.f32 %v4535_v1, %v2976_v29  ;;  %v3073_v9 = vmul.f32 %v5728_v4, %v6221_v2  ;;  %v3192_v10 = vmul.f32 %v5726_v3, %v6221_v2 }
0x1398   :  { %v3072_v5 = vmul.f32 %v5728_v4, %v6223_v26  ;;  %v3191_v6 = vmul.f32 %v5726_v3, %v6223_v26  ;;  %v3480_v51 = vmul.f32 %v5743_v11, %v6223_v26  ;;  %v3481_v3 = vmul.f32 %v5743_v11, %v6221_v2  ;;  %v6250_v4 = vld [vmem:[%s6465_s16 + $0x8] sm:$0xff] }
0x1399   :  { %vm3164_vm2 = vcmp.gt.f32.partialorder %v6250_v4, 0.5 }
0x139a   :  { %5046 = vmatprep.mubr.msk.f32.mxu0 %vm294_vm6, %v3072_v5  ;;  %5053 = vmatprep.mubr.msk.f32.mxu1 %vm294_vm6, %v3191_v6 }
0x139b   :  { %5047 = vmatmul.mubr.msk.f32.vlgmr.msra.gmra.mxu0 %vm294_vm6, %v3073_v9  ;;  %5054 = vmatmul.mubr.msk.f32.vlgmr.msra.gmra.mxu1 %vm294_vm6, %v3192_v10 }
0x139c   :  { %5071 = vmatpush3.xpose.msk.msra.mxu1 %vm294_vm6, %v6198_v60  ;;  %5074 = vmatprep.mubr.msk.f32.mxu1 %vm294_vm6, %v3480_v51 }
0x139d   :  { %5072 = vmatprep.subr.msk.mxu1 %vm294_vm6, %v6200_v63 }
0x13a0   :  { %5073 = vmatpush3.xpose.msk.msra.mxu1 %vm294_vm6, %v6200_v63 }
0x13a3   :  { %5075 = vmatmul.mubr.msk.f32.vlgmr.msra.gmra.mxu1 %vm294_vm6, %v3481_v3 }
0x145b   :  { %v5048_v14 = vpop.f32.mrf.mxu0  ;;  %v5055_v25 = vpop.f32.mrf.mxu1 }
0x145c   :  { %v3162_v21 = vmul.f32 0.35355338, %v5048_v14  ;;  %v3275_v15 = vmul.f32 0.35355338, %v5055_v25 }
0x145d   :  { %v3152_v16 = vpop.f32.mrf.mxu0  ;;  %v3265_v17 = vpop.f32.mrf.mxu1 }
0x145e   :  { %v3161_v20 = vmul.f32 0.35355338, %v3152_v16  ;;  %v3274_v18 = vmul.f32 0.35355338, %v3265_v17  ;;  %v3277_v11 = vsel %vm3164_vm2, -1e+09, %v3275_v15 }
0x145f   :  { %v3281_v22 = vsel %vm552_vm13, %v3277_v11, -inf  ;;  %v3166_v31 = vsel %vm3164_vm2, -1e+09, %v3162_v21 }
0x1460   :  { %3282 = vmax.xlane.f32.xlu1 %v3281_v22  ;;  %v3276_v23 = vsel %vm3163_vm3, -1e+09, %v3274_v18  ;;  %v3165_v8 = vsel %vm3163_vm3, -1e+09, %v3161_v20  ;;  %v3170_v24 = vsel %vm552_vm13, %v3166_v31, -inf  ;;  %v3589_v22 = vmul.f32 %v6200_v63, %v5867_v45 }
0x1461   :  { %v3278_v12 = vsel %vm552_vm13, %v3276_v23, -inf  ;;  %v3167_v61 = vsel %vm552_vm13, %v3165_v8, -inf }
0x1462   :  { %3279 = vmax.xlane.f32.xlu0 %v3278_v12 }
0x1463   :  { %v5076_v40 = vpop.f32.mrf.mxu1 }
0x1464   :  { %v3564_v30 = vmul.f32 0.35355338, %v5076_v40  ;;  %3171 = vmax.xlane.f32.xlu1 %v3170_v24 }
0x1465   :  { %v3554_v59 = vpop.f32.mrf.mxu1 }
0x1466   :  { %v3563_v32 = vmul.f32 0.35355338, %v3554_v59  ;;  %3168 = vmax.xlane.f32.xlu0 %v3167_v61  ;;  %v3566_v34 = vsel %vm3164_vm2, -1e+09, %v3564_v30 }
0x1467   :  { %v3570_v28 = vsel %vm552_vm13, %v3566_v34, -inf }
0x1468   :  { %3571 = vmax.xlane.f32.xlu1 %v3570_v28  ;;  %v3565_v35 = vsel %vm3163_vm3, -1e+09, %v3563_v32 }
0x1469   :  { %v3567_v36 = vsel %vm552_vm13, %v3565_v35, -inf }
0x146a   :  { %3568 = vmax.xlane.f32.xlu0 %v3567_v36 }
0x1479   :  { %3304 = vrot.lane.b32.xlu1 %v3300_v37, %s5479_s13 }
0x147d   :  { %3395 = vrot.lane.b32.xlu1 %v3190_v38, %s5479_s13 }
0x1480   :  { %3306 = vrot.lane.b32.xlu0 %v3301_v39, %s5479_s13 }
0x1484   :  { %3393 = vrot.lane.b32.xlu0 %v3189_v19, %s5479_s13 }
0x14e9   :  { %v3283_v33 = vpop.xlane.xlu1 %3282 }
0x14ea   :  { %v3285_v44 = vsub.f32 %v3277_v11, %v3283_v33  ;;  %v3590_v11 = vmul.f32 %v6198_v60, %v5867_v45 }
0x14eb   :  { %v3280_v46 = vpop.xlane.xlu0 %3279 }
0x14ec   :  { %v3288_v47 = vmul.f32 1.442695, %v3285_v44  ;;  %v3284_v48 = vsub.f32 %v3276_v23, %v3280_v46  ;;  %v3682_v46 = vmul.f32 %v5732_v7, %v6223_v26 }
0x14ed   :  { %v3172_v49 = vpop.xlane.xlu1 %3171 }
0x14ee   :  { %5296 = vpow2.f32 %v3288_v47  ;;  %v3286_v50 = vmul.f32 1.442695, %v3284_v48  ;;  %v3174_v27 = vsub.f32 %v3166_v31, %v3172_v49  ;;  %v3683_v47 = vmul.f32 %v5732_v7, %v6221_v2 }
0x14ef   :  { %v3169_v53 = vpop.xlane.xlu0 %3168 }
0x14f0   :  { %5298 = vpow2.f32 %v3286_v50  ;;  %v3177_v56 = vmul.f32 1.442695, %v3174_v27  ;;  %v3173_v55 = vsub.f32 %v3165_v8, %v3169_v53 }
0x14f1   :  { %v3572_v57 = vpop.xlane.xlu1 %3571 }
0x14f2   :  { %5300 = vpow2.f32 %v3177_v56  ;;  %v3175_v58 = vmul.f32 1.442695, %v3173_v55  ;;  %v3574_v43 = vsub.f32 %v3566_v34, %v3572_v57 }
0x14f3   :  { %v3569_v42 = vpop.xlane.xlu0 %3568 }
0x14f4   :  { %5302 = vpow2.f32 %v3175_v58  ;;  %v3577_v62 = vmul.f32 1.442695, %v3574_v43  ;;  %v3573_v0 = vsub.f32 %v3565_v35, %v3569_v42 }
0x14f5   :  { %v3305_v1 = vpop.permute.xlu1 %3304 }
0x14f6   :  { %5304 = vpow2.f32 %v3577_v62  ;;  %v3575_v29 = vmul.f32 1.442695, %v3573_v0 }
0x14f7   :  { %v3307_v5 = vpop.permute.xlu0 %3306 }
0x14f8   :  { %5306 = vpow2.f32 %v3575_v29  ;;  %5056 = vmatprep.subr.mxu0 %v3307_v5 }
0x14f9   :  { %5057 = vmatpush3.msra.mxu0 %v3307_v5  ;;  %v3396_v9 = vpop.permute.xlu1 %3395 }
0x14fa   :  { %5058 = vmatprep.subr.mxu0 %v3305_v1 }
0x14fb   :  { %v5297_v6 = vpop.eup %5296  ;;  %5059 = vmatpush3.msra.mxu0 %v3305_v1  ;;  %v3394_v23 = vpop.permute.xlu0 %3393 }
0x14fc   :  { %5063 = vmatprep.subr.mxu0 %v3396_v9  ;;  %v3293_v10 = vsel %vm552_vm13, %v5297_v6, 0.0 }
0x14fd   :  { %v5299_v51 = vpop.eup %5298  ;;  %3294 = vadd.xlane.f32.xlu1 %v3293_v10 }
0x14fe   :  { %v3290_v3 = vsel %vm552_vm13, %v5299_v51, 0.0 }
0x14ff   :  { %v5301_v14 = vpop.eup %5300  ;;  %3291 = vadd.xlane.f32.xlu0 %v3290_v3 }
0x1500   :  { %v3182_v25 = vsel %vm552_vm13, %v5301_v14, 0.0 }
0x1501   :  { %v5303_v21 = vpop.eup %5302  ;;  %3183 = vadd.xlane.f32.xlu1 %v3182_v25 }
0x1502   :  { %v3179_v15 = vsel %vm552_vm13, %v5303_v21, 0.0 }
0x1503   :  { %v5305_v16 = vpop.eup %5304  ;;  %3180 = vadd.xlane.f32.xlu0 %v3179_v15  ;;  %v3792_v15 = vmul.f32 %v6198_v60, %v5911_v41 }
0x1504   :  { %v3582_v17 = vsel %vm552_vm13, %v5305_v16, 0.0 }
0x1505   :  { %v5307_v20 = vpop.eup %5306  ;;  %3583 = vadd.xlane.f32.xlu1 %v3582_v17 }
0x1506   :  { %v3579_v18 = vsel %vm552_vm13, %v5307_v20, 0.0 }
0x1507   :  { %3580 = vadd.xlane.f32.xlu0 %v3579_v18 }
0x1516   :  { %3595 = vrot.lane.b32.xlu1 %v3590_v11, %s5479_s13  ;;  %v2894_v11 = vld [vmem:[%s6466_s15 + $0x18] sm:$0xff] }
0x151d   :  { %3593 = vrot.lane.b32.xlu0 %v3589_v22, %s5479_s13 }
0x1586   :  { %v3295_v31 = vpop.xlane.xlu1 %3294 }
0x1587   :  { %5308 = vrcp.f32 %v3295_v31  ;;  %v2892_v31 = vld [vmem:[%s6466_s15 + $0x8] sm:$0xff] }
0x1588   :  { %v3292_v12 = vpop.xlane.xlu0 %3291 }
0x1589   :  { %5310 = vrcp.f32 %v3292_v12  ;;  %v2891_v12 = vld [vmem:[%s6466_s15] sm:$0xff] }
0x158a   :  { %v3184_v8 = vpop.xlane.xlu1 %3183 }
0x158b   :  { %5312 = vrcp.f32 %v3184_v8 }
0x158c   :  { %v3181_v40 = vpop.xlane.xlu0 %3180 }
0x158d   :  { %5314 = vrcp.f32 %v3181_v40 }
0x158e   :  { %v3584_v24 = vpop.xlane.xlu1 %3583 }
0x158f   :  { %5316 = vrcp.f32 %v3584_v24 }
0x1590   :  { %v3581_v30 = vpop.xlane.xlu0 %3580 }
0x1591   :  { %5318 = vrcp.f32 %v3581_v30 }
0x1592   :  { %v3596_v38 = vpop.permute.xlu1 %3595 }
0x1594   :  { %v5309_v59 = vpop.eup %5308  ;;  %v3594_v19 = vpop.permute.xlu0 %3593 }
0x1595   :  { %v3299_v34 = vmul.f32 %v5309_v59, %v5297_v6  ;;  %v4565_v59 = vld [vmem:[%s6467_s18] ss:$0 sm:$0xff] }
0x1596   :  { %v5311_v61 = vpop.eup %5310 }
0x1597   :  { %v3297_v32 = vmul.f32 %v5311_v61, %v5299_v51 }
0x1598   :  { %v5313_v45 = vpop.eup %5312 }
0x1599   :  { %5060 = vmatprep.mubr.msk.f32.mxu0 %vm552_vm13, %v3297_v32  ;;  %v3188_v36 = vmul.f32 %v5313_v45, %v5301_v14 }
0x159a   :  { %v5315_v28 = vpop.eup %5314  ;;  %5061 = vmatmul.mubr.msk.f32.vlgmr.msra.gmra.mxu0 %vm552_vm13, %v3299_v34 }
0x159b   :  { %5064 = vmatpush3.msra.mxu0 %v3396_v9  ;;  %v3186_v35 = vmul.f32 %v5315_v28, %v5303_v21  ;;  %v3791_v21 = vmul.f32 %v6200_v63, %v5911_v41 }
0x159c   :  { %5065 = vmatprep.subr.mxu0 %v3394_v23  ;;  %v5317_v37 = vpop.eup %5316 }
0x159d   :  { %5066 = vmatpush3.msra.mxu0 %v3394_v23  ;;  %5067 = vmatprep.mubr.msk.f32.mxu0 %vm552_vm13, %v3186_v35  ;;  %v3588_v44 = vmul.f32 %v5317_v37, %v5305_v16  ;;  %v2893_v23 = vld [vmem:[%s6466_s15 + $0x10] sm:$0xff] }
0x159e   :  { %v5319_v39 = vpop.eup %5318  ;;  %5077 = vmatprep.subr.mxu0 %v3596_v38  ;;  %5068 = vmatmul.mubr.msk.f32.vlgmr.msra.gmra.mxu0 %vm552_vm13, %v3188_v36 }
0x159f   :  { %5078 = vmatpush3.msra.mxu0 %v3596_v38  ;;  %v3586_v33 = vmul.f32 %v5319_v39, %v5307_v20 }
0x15a0   :  { %5079 = vmatprep.subr.mxu0 %v3594_v19 }
0x15a1   :  { %5080 = vmatpush3.msra.mxu0 %v3594_v19  ;;  %5081 = vmatprep.mubr.msk.f32.mxu0 %vm552_vm13, %v3586_v33 }
0x15a2   :  { %5084 = vmatprep.subr.msk.mxu0 %vm294_vm6, %v6198_v60  ;;  %5082 = vmatmul.mubr.msk.f32.vlgmr.msra.gmra.mxu0 %vm552_vm13, %v3588_v44 }
0x15a3   :  { %5085 = vmatpush3.xpose.msk.msra.mxu0 %vm294_vm6, %v6198_v60  ;;  %5088 = vmatprep.mubr.msk.f32.mxu0 %vm294_vm6, %v3682_v46 }
0x15a4   :  { %5086 = vmatprep.subr.msk.mxu0 %vm294_vm6, %v6200_v63 }
0x15a7   :  { %5087 = vmatpush3.xpose.msk.msra.mxu0 %vm294_vm6, %v6200_v63 }
0x15aa   :  { %5089 = vmatmul.mubr.msk.f32.vlgmr.msra.gmra.mxu0 %vm294_vm6, %v3683_v47 }
0x165a   :  { %v5062_v26 = vpop.f32.mrf.mxu0 }
0x165c   :  { %v3382_v48 = vpop.f32.mrf.mxu0 }
0x165e   :  { %v5069_v49 = vpop.f32.mrf.mxu0 }
0x165f   :  { %v3477_v50 = vadd.f32 %v5069_v49, %v5062_v26  ;;  %v4017_v49 = vld [vmem:[%s6468_s23 + $0x10] sm:$0xff] }
0x1660   :  { %v3471_v27 = vpop.f32.mrf.mxu0 }
0x1661   :  { %v3472_v53 = vadd.f32 %v3471_v27, %v3382_v48  ;;  %v4018_v48 = vld [vmem:[%s6468_s23 + $0x18] sm:$0xff]  ;;  %v4015_v27 = vld [vmem:[%s6468_s23] sm:$0xff] }
0x1662   :  { %v5083_v56 = vpop.f32.mrf.mxu0  ;;  %5109 = vmatprep.subr.mxu0 %v4018_v48 }
0x1663   :  { %v3681_v55 = vadd.f32 %v5083_v56, %v3477_v50  ;;  %5110 = vmatpush3.msra.mxu0 %v4018_v48  ;;  %v4016_v50 = vld [vmem:[%s6468_s23 + $0x8] sm:$0xff]  ;;  %v4034_v56 = vld [vmem:[%s6469_s17 + $0x70] sm:$0xff] }
0x1664   :  { %v3671_v57 = vpop.f32.mrf.mxu0  ;;  %5111 = vmatprep.subr.mxu0 %v4017_v49  ;;  %v4303_v48 = vld [vmem:[%s5711_s27 + $0x8] sm:$0xff] }
0x1665   :  { %v3680_v58 = vadd.f32 %v3671_v57, %v3472_v53  ;;  %5112 = vmatpush3.msra.mxu0 %v4017_v49  ;;  %v4035_v53 = vld [vmem:[%s6469_s17 + $0x78] sm:$0xff]  ;;  %v4032_v57 = vld [vmem:[%s6469_s17 + $0x60] sm:$0xff] }
0x1666   :  { %5113 = vmatprep.subr.mxu0 %v4016_v50  ;;  %v4302_v49 = vld [vmem:[%s5711_s27] sm:$0xff] }
0x1667   :  { %5114 = vmatpush3.msra.mxu0 %v4016_v50 }
0x1668   :  { %5115 = vmatprep.subr.mxu0 %v4015_v27 }
0x1669   :  { %5116 = vmatpush3.msra.mxu0 %v4015_v27 }
0x166a   :  { %v5090_v43 = vpop.f32.mrf.mxu0 }
0x166b   :  { %v3766_v42 = vmul.f32 0.35355338, %v5090_v43  ;;  %v4030_v43 = vld [vmem:[%s6469_s17 + $0x50] sm:$0xff] }
0x166c   :  { %v3756_v62 = vpop.f32.mrf.mxu0 }
0x166d   :  { %v3765_v0 = vmul.f32 0.35355338, %v3756_v62  ;;  %v3768_v1 = vsel %vm3164_vm2, -1e+09, %v3766_v42  ;;  %v4029_v42 = vld [vmem:[%s6469_s17 + $0x48] sm:$0xff]  ;;  %v4028_v62 = vld [vmem:[%s6469_s17 + $0x40] sm:$0xff] }
0x166e   :  { %v3772_v7 = vsel %vm552_vm13, %v3768_v1, -inf }
0x166f   :  { %3773 = vmax.xlane.f32.xlu0 %v3772_v7  ;;  %v3767_v2 = vsel %vm3163_vm3, -1e+09, %v3765_v0  ;;  %v4027_v0 = vld [vmem:[%s6469_s17 + $0x38] sm:$0xff]  ;;  %v4025_v7 = vld [vmem:[%s6469_s17 + $0x28] sm:$0xff] }
0x1670   :  { %v3769_v29 = vsel %vm552_vm13, %v3767_v2, -inf }
0x1671   :  { %3770 = vmax.xlane.f32.xlu1 %v3769_v29 }
0x16f8   :  { %v3774_v5 = vpop.xlane.xlu0 %3773 }
0x16f9   :  { %v3776_v6 = vsub.f32 %v3768_v1, %v3774_v5  ;;  %v4026_v1 = vld [vmem:[%s6469_s17 + $0x30] sm:$0xff] }
0x16fa   :  { %v3771_v9 = vpop.xlane.xlu1 %3770 }
0x16fb   :  { %v3779_v10 = vmul.f32 1.442695, %v3776_v6  ;;  %v3775_v51 = vsub.f32 %v3767_v2, %v3771_v9  ;;  %v4024_v2 = vld [vmem:[%s6469_s17 + $0x20] sm:$0xff] }
0x16fd   :  { %5320 = vpow2.f32 %v3779_v10  ;;  %v3777_v3 = vmul.f32 1.442695, %v3775_v51 }
0x16ff   :  { %5322 = vpow2.f32 %v3777_v3 }
0x170a   :  { %v5321_v14 = vpop.eup %5320 }
0x170b   :  { %v3784_v4 = vsel %vm552_vm13, %v5321_v14, 0.0 }
0x170c   :  { %v5323_v25 = vpop.eup %5322  ;;  %3785 = vadd.xlane.f32.xlu1 %v3784_v4 }
0x170d   :  { %v3781_v13 = vsel %vm552_vm13, %v5323_v25, 0.0 }
0x170e   :  { %3782 = vadd.xlane.f32.xlu0 %v3781_v13 }
0x171d   :  { %3795 = vrot.lane.b32.xlu1 %v3791_v21, %s5479_s13 }
0x1724   :  { %3797 = vrot.lane.b32.xlu0 %v3792_v15, %s5479_s13  ;;  %v4569_v15 = vld [vmem:[%s6471_s9] ss:$0 sm:$0xff]  ;;  %s6472_s13 = sld [smem:[#allocation38_spill]] }
0x1795   :  { %v3786_v16 = vpop.xlane.xlu1 %3785 }
0x1796   :  { %5324 = vrcp.f32 %v3786_v16 }
0x1797   :  { %v3783_v17 = vpop.xlane.xlu0 %3782 }
0x1798   :  { %5326 = vrcp.f32 %v3783_v17 }
0x1799   :  { %v3796_v18 = vpop.permute.xlu1 %3795 }
0x179b   :  { %v3798_v20 = vpop.permute.xlu0 %3797 }
0x179c   :  { %5091 = vmatprep.subr.mxu1 %v3798_v20 }
0x179d   :  { %5092 = vmatpush3.msra.mxu1 %v3798_v20 }
0x179e   :  { %5093 = vmatprep.subr.mxu1 %v3796_v18 }
0x179f   :  { %5094 = vmatpush3.msra.mxu1 %v3796_v18  ;;  %v4023_v18 = vld [vmem:[%s6469_s17 + $0x18] sm:$0xff] }
0x17a0   :  { %5098 = vmatprep.subr.mxu1 %v2894_v11 }
0x17a3   :  { %v5325_v63 = vpop.eup %5324 }
0x17a4   :  { %v3790_v60 = vmul.f32 %v5325_v63, %v5321_v14  ;;  %v4568_v14 = vld [vmem:[%s6470_s22] ss:$0 sm:$0xff]  ;;  %v4021_v63 = vld [vmem:[%s6469_s17 + $0x8] sm:$0xff] }
0x17a5   :  { %v5327_v22 = vpop.eup %5326 }
0x17a6   :  { %v3788_v41 = vmul.f32 %v5327_v22, %v5323_v25  ;;  %v4020_v22 = vld [vmem:[%s6469_s17] sm:$0xff] }
0x17a8   :  { %5095 = vmatprep.mubr.msk.f32.mxu1 %vm552_vm13, %v3788_v41  ;;  %v4570_v41 = vld [vmem:[%s6472_s13] ss:$0 sm:$0xff] }
0x17a9   :  { %5096 = vmatmul.mubr.msk.f32.vlgmr.msra.gmra.mxu1 %vm552_vm13, %v3790_v60 }
0x17aa   :  { %5099 = vmatpush3.msra.mxu1 %v2894_v11  ;;  %v4022_v11 = vld [vmem:[%s6469_s17 + $0x10] sm:$0xff] }
0x17ab   :  { %5100 = vmatprep.subr.mxu1 %v2893_v23 }
0x17ac   :  { %5101 = vmatpush3.msra.mxu1 %v2893_v23 }
0x17ad   :  { %5102 = vmatprep.subr.mxu1 %v2892_v31 }
0x17ae   :  { %5103 = vmatpush3.msra.mxu1 %v2892_v31 }
0x17af   :  { %5104 = vmatprep.subr.mxu1 %v2891_v12 }
0x17b0   :  { %5105 = vmatpush3.msra.mxu1 %v2891_v12 }
0x17b1   :  { %5120 = vmatprep.subr.mxu1 %v4035_v53 }
0x1869   :  { %v5097_v8 = vpop.f32.mrf.mxu1 }
0x186a   :  { %v3883_v30 = vadd.f32 %v5097_v8, %v3681_v55  ;;  %v4033_v55 = vld [vmem:[%s6469_s17 + $0x68] sm:$0xff] }
0x186b   :  { %v3873_v40 = vpop.f32.mrf.mxu1 }
0x186c   :  { %v3882_v24 = vadd.f32 %v3873_v40, %v3680_v58  ;;  %v4031_v58 = vld [vmem:[%s6469_s17 + $0x58] sm:$0xff] }
0x186e   :  { %5106 = vmatprep.mubr.msk.f32.mxu1 %vm294_vm6, %v3882_v24  ;;  %v4573_v24 = vld [vmem:[%s6473_s21] ss:$0 sm:$0xff] }
0x186f   :  { %5107 = vmatmul.mubr.msk.f32.vlgmr.msra.gmra.mxu1 %vm294_vm6, %v3883_v30 }
0x1870   :  { %5121 = vmatpush3.msra.mxu1 %v4035_v53 }
0x1871   :  { %5122 = vmatprep.subr.mxu1 %v4034_v56 }
0x1872   :  { %5123 = vmatpush3.msra.mxu1 %v4034_v56 }
0x1873   :  { %5124 = vmatprep.subr.mxu1 %v4033_v55 }
0x1874   :  { %5125 = vmatpush3.msra.mxu1 %v4033_v55 }
0x1875   :  { %5126 = vmatprep.subr.mxu1 %v4032_v57 }
0x1876   :  { %5127 = vmatpush3.msra.mxu1 %v4032_v57 }
0x1877   :  { %5128 = vmatprep.subr.mxu1 %v4031_v58 }
0x1878   :  { %5129 = vmatpush3.msra.mxu1 %v4031_v58 }
0x1879   :  { %5130 = vmatprep.subr.mxu1 %v4030_v43 }
0x187a   :  { %5131 = vmatpush3.msra.mxu1 %v4030_v43  ;;  %v4574_v43 = vld [vmem:[%s6474_s29] ss:$0 sm:$0xff] }
0x187b   :  { %5132 = vmatprep.subr.mxu1 %v4029_v42 }
0x187c   :  { %5133 = vmatpush3.msra.mxu1 %v4029_v42 }
0x187d   :  { %5134 = vmatprep.subr.mxu1 %v4028_v62 }
0x187e   :  { %5135 = vmatpush3.msra.mxu1 %v4028_v62 }
0x187f   :  { %5136 = vmatprep.subr.mxu1 %v4027_v0 }
0x1880   :  { %5137 = vmatpush3.msra.mxu1 %v4027_v0  ;;  %v4575_v0 = vld [vmem:[#allocation2] ss:$0 sm:$0xff] }
0x1881   :  { %5138 = vmatprep.subr.mxu1 %v4026_v1 }
0x1882   :  { %5139 = vmatpush3.msra.mxu1 %v4026_v1 }
0x1883   :  { %5140 = vmatprep.subr.mxu1 %v4025_v7 }
0x1884   :  { %5141 = vmatpush3.msra.mxu1 %v4025_v7 }
0x1885   :  { %5142 = vmatprep.subr.mxu1 %v4024_v2 }
0x1886   :  { %5143 = vmatpush3.msra.mxu1 %v4024_v2 }
0x1887   :  { %5144 = vmatprep.subr.mxu1 %v4023_v18 }
0x1888   :  { %5145 = vmatpush3.msra.mxu1 %v4023_v18 }
0x1889   :  { %5146 = vmatprep.subr.mxu1 %v4022_v11 }
0x188a   :  { %5147 = vmatpush3.msra.mxu1 %v4022_v11 }
0x188b   :  { %5148 = vmatprep.subr.mxu1 %v4021_v63 }
0x188c   :  { %5149 = vmatpush3.msra.mxu1 %v4021_v63 }
0x188d   :  { %5150 = vmatprep.subr.mxu1 %v4020_v22 }
0x188e   :  { %5151 = vmatpush3.msra.mxu1 %v4020_v22 }
0x192f   :  { %v5108_v61 = vpop.f32.mrf.mxu1 }
0x1930   :  { %v3968_v32 = vadd.f32 %v5108_v61, %v4565_v59 }
0x1931   :  { %v3962_v34 = vpop.f32.mrf.mxu1 }
0x1932   :  { %v3963_v45 = vadd.f32 %v4565_v59, %v3962_v34  ;;  %v3972_v28 = vadd.f32 %v3968_v32, %v6191_v52 }
0x1934   :  { %v3976_v35 = vsel %vm294_vm6, %v3972_v28, 0.0  ;;  %v3971_v36 = vadd.f32 %v3963_v45, %v6189_v54 }
0x1935   :  { %3977 = vadd.xlane.f32.xlu0 %v3976_v35 }
0x1936   :  { %v3973_v37 = vsel %vm294_vm6, %v3971_v36, 0.0 }
0x1937   :  { %3974 = vadd.xlane.f32.xlu1 %v3973_v37 }
0x19be   :  { %v3978_v38 = vpop.xlane.xlu0 %3977 }
0x19bf   :  { %v3980_v39 = vmul.f32 0.03125, %v3978_v38 }
0x19c0   :  { %v3975_v19 = vpop.xlane.xlu1 %3974 }
0x19c1   :  { %v6346_v33 = vsub.f32 %v3972_v28, %v3980_v39  ;;  %v3979_v44 = vmul.f32 0.03125, %v3975_v19 }
0x19c3   :  { %v6348_v46 = vsub.f32 %v3971_v36, %v3979_v44  ;;  %v3984_v52 = vmul.f32 %v6346_v33, %v6346_v33 }
0x19c5   :  { %v3988_v54 = vsel %vm294_vm6, %v3984_v52, 0.0  ;;  %v3983_v47 = vmul.f32 %v6348_v46, %v6348_v46 }
0x19c6   :  { %3989 = vadd.xlane.f32.xlu1 %v3988_v54 }
0x19c7   :  { %v3985_v26 = vsel %vm294_vm6, %v3983_v47, 0.0  ;;  %v4305_v47 = vld [vmem:[%s5711_s27 + $0x18] sm:$0xff] }
0x19c8   :  { %3986 = vadd.xlane.f32.xlu0 %v3985_v26  ;;  %v4304_v26 = vld [vmem:[%s5711_s27 + $0x10] sm:$0xff]  ;;  %5155 = vmatprep.subr.mxu0 %v4305_v47 }
0x1a4f   :  { %v3990_v29 = vpop.xlane.xlu1 %3989 }
0x1a50   :  { %v3992_v5 = vmul.f32 0.03125, %v3990_v29 }
0x1a51   :  { %v3987_v6 = vpop.xlane.xlu0 %3986 }
0x1a52   :  { %v3994_v9 = vadd.f32 1e-06, %v3992_v5  ;;  %v3991_v10 = vmul.f32 0.03125, %v3987_v6  ;;  %v5338_v6 = vld [vmem:[%s5488_s5 + $0x8] sm:$0xff] }
0x1a54   :  { %5328 = vrsqrt.f32 %v3994_v9  ;;  %v3993_v51 = vadd.f32 1e-06, %v3991_v10  ;;  %v5339_v10 = vld [vmem:[%s5488_s5] sm:$0xff] }
0x1a56   :  { %5330 = vrsqrt.f32 %v3993_v51 }
0x1a61   :  { %v5329_v3 = vpop.eup %5328 }
0x1a62   :  { %v3998_v4 = vmul.f32 %v5329_v3, %v6346_v33 }
0x1a63   :  { %v5331_v25 = vpop.eup %5330 }
0x1a64   :  { %v3997_v13 = vmul.f32 %v5331_v25, %v6348_v46  ;;  %v4006_v21 = vmul.f32 %v4568_v14, %v3998_v4 }
0x1a66   :  { %v4005_v16 = vmul.f32 %v4568_v14, %v3997_v13  ;;  %v4014_v20 = vadd.f32 %v4569_v15, %v4006_v21 }
0x1a68   :  { %v4013_v17 = vadd.f32 %v4569_v15, %v4005_v16 }
0x1a6a   :  { %5117 = vmatprep.mubr.msk.f32.mxu0 %vm294_vm6, %v4013_v17 }
0x1a6b   :  { %5118 = vmatmul.mubr.msk.f32.vlgmr.msra.gmra.mxu0 %vm294_vm6, %v4014_v20 }
0x1a6c   :  { %5156 = vmatpush3.msra.mxu0 %v4305_v47 }
0x1a6d   :  { %5157 = vmatprep.subr.mxu0 %v4304_v26 }
0x1a6e   :  { %5158 = vmatpush3.msra.mxu0 %v4304_v26 }
0x1a6f   :  { %5159 = vmatprep.subr.mxu0 %v4303_v48 }
0x1a70   :  { %5160 = vmatpush3.msra.mxu0 %v4303_v48 }
0x1a71   :  { %5161 = vmatprep.subr.mxu0 %v4302_v49 }
0x1a72   :  { %5162 = vmatpush3.msra.mxu0 %v4302_v49 }
0x1b2b   :  { %v5119_v60 = vpop.f32.mrf.mxu0 }
0x1b2c   :  { %v4123_v23 = vadd.f32 %v5119_v60, %v4570_v41 }
0x1b2d   :  { %v4117_v31 = vpop.f32.mrf.mxu0 }
0x1b2e   :  { %v4118_v12 = vadd.f32 %v4570_v41, %v4117_v31  ;;  %v4127_v40 = vmax.f32 %v4123_v23, 0.0 }
0x1b30   :  { %v4126_v8 = vmax.f32 %v4118_v12, 0.0 }
0x1b32   :  { %5152 = vmatprep.mubr.f32.mxu1 %v4126_v8 }
0x1b33   :  { %5153 = vmatmul.mubr.f32.vlgmr.msra.gmra.mxu1 %v4127_v40 }
0x1bf3   :  { %v5154_v30 = vpop.f32.mrf.mxu1 }
0x1bf4   :  { %v4206_v59 = vadd.f32 %v5154_v30, %v4573_v24 }
0x1bf5   :  { %v4200_v61 = vpop.f32.mrf.mxu1 }
0x1bf6   :  { %v4201_v32 = vadd.f32 %v4573_v24, %v4200_v61  ;;  %v4210_v34 = vadd.f32 %v4206_v59, %v4014_v20 }
0x1bf8   :  { %v4214_v45 = vsel %vm294_vm6, %v4210_v34, 0.0  ;;  %v4209_v28 = vadd.f32 %v4201_v32, %v4013_v17 }
0x1bf9   :  { %4215 = vadd.xlane.f32.xlu1 %v4214_v45 }
0x1bfa   :  { %v4211_v35 = vsel %vm294_vm6, %v4209_v28, 0.0 }
0x1bfb   :  { %4212 = vadd.xlane.f32.xlu0 %v4211_v35  ;;  %v4577_v35 = vld [vmem:[#allocation6] ss:$0 sm:$0xff] }
0x1c82   :  { %v4216_v36 = vpop.xlane.xlu1 %4215 }
0x1c83   :  { %v4218_v37 = vmul.f32 0.03125, %v4216_v36 }
0x1c84   :  { %v4213_v38 = vpop.xlane.xlu0 %4212 }
0x1c85   :  { %v4220_v39 = vsub.f32 %v4210_v34, %v4218_v37  ;;  %v4217_v19 = vmul.f32 0.03125, %v4213_v38  ;;  %v4576_v34 = vld [vmem:[#allocation4] ss:$0 sm:$0xff] }
0x1c87   :  { %v4219_v33 = vsub.f32 %v4209_v28, %v4217_v19  ;;  %v4222_v44 = vmul.f32 %v4220_v39, %v4220_v39  ;;  %v4578_v19 = vld [vmem:[#allocation7] ss:$0 sm:$0xff] }
0x1c89   :  { %v4226_v46 = vsel %vm294_vm6, %v4222_v44, 0.0  ;;  %v4221_v52 = vmul.f32 %v4219_v33, %v4219_v33 }
0x1c8a   :  { %4227 = vadd.xlane.f32.xlu1 %v4226_v46 }
0x1c8b   :  { %v4223_v54 = vsel %vm294_vm6, %v4221_v52, 0.0 }
0x1c8c   :  { %4224 = vadd.xlane.f32.xlu0 %v4223_v54 }
0x1d13   :  { %v4228_v50 = vpop.xlane.xlu1 %4227 }
0x1d14   :  { %v4230_v27 = vmul.f32 0.03125, %v4228_v50 }
0x1d15   :  { %v4225_v53 = vpop.xlane.xlu0 %4224 }
0x1d16   :  { %v4232_v56 = vadd.f32 1e-06, %v4230_v27  ;;  %v4229_v55 = vmul.f32 0.03125, %v4225_v53 }
0x1d18   :  { %5332 = vrsqrt.f32 %v4232_v56  ;;  %v4231_v57 = vadd.f32 1e-06, %v4229_v55 }
0x1d1a   :  { %5334 = vrsqrt.f32 %v4231_v57 }
0x1d25   :  { %v5333_v58 = vpop.eup %5332 }
0x1d26   :  { %v4236_v42 = vmul.f32 %v5333_v58, %v4220_v39 }
0x1d27   :  { %v5335_v62 = vpop.eup %5334 }
0x1d28   :  { %v4244_v1 = vmul.f32 %v4574_v43, %v4236_v42  ;;  %v4235_v7 = vmul.f32 %v5335_v62, %v4219_v33 }
0x1d2a   :  { %v4243_v2 = vmul.f32 %v4574_v43, %v4235_v7  ;;  %v4252_v29 = vadd.f32 %v4575_v0, %v4244_v1 }
0x1d2c   :  { %v4251_v5 = vadd.f32 %v4575_v0, %v4243_v2  ;;  %v4254_v9 = vadd.f32 %v5338_v6, %v4252_v29 }
0x1d2e   :  { %v4253_v51 = vadd.f32 %v5339_v10, %v4251_v5  ;;  %v4256_v14 = vsel %vm294_vm6, %v4254_v9, 0.0 }
0x1d30   :  { %v4255_v3 = vsel %vm294_vm6, %v4253_v51, 0.0 }
0x1d31   :  { %v4257_v4 = vadd.f32 %v4256_v14, %v4255_v3 }
0x1d33   :  { %v4258_v25 = vrot.slane %v4257_v4, 4 }
0x1d35   :  { %v4259_v13 = vadd.f32 %v4258_v25, %v4257_v4 }
0x1d37   :  { %v4260_v21 = vrot.slane %v4259_v13, 2 }
0x1d39   :  { %v4261_v15 = vadd.f32 %v4260_v21, %v4259_v13 }
0x1d3b   :  { %v4262_v16 = vrot.slane %v4261_v15, 1 }
0x1d3d   :  { %v4263_v17 = vadd.f32 %v4262_v16, %v4261_v15 }
0x1d3f   :  { %v4265_v20 = vmul.f32 0.0625, %v4263_v17 }
0x1d41   :  { %v4266_v18 = vsub.f32 %v4253_v51, %v4265_v20  ;;  %v4267_v11 = vsub.f32 %v4254_v9, %v4265_v20 }
0x1d43   :  { %v4268_v63 = vmul.f32 %v4266_v18, %v4266_v18  ;;  %v4269_v22 = vmul.f32 %v4267_v11, %v4267_v11 }
0x1d45   :  { %v4270_v41 = vsel %vm294_vm6, %v4268_v63, 0.0  ;;  %v4271_v60 = vsel %vm294_vm6, %v4269_v22, 0.0 }
0x1d46   :  { %v4272_v23 = vadd.f32 %v4271_v60, %v4270_v41 }
0x1d48   :  { %v4273_v31 = vrot.slane %v4272_v23, 4 }
0x1d4a   :  { %v4274_v12 = vadd.f32 %v4273_v31, %v4272_v23 }
0x1d4c   :  { %v4275_v8 = vrot.slane %v4274_v12, 2 }
0x1d4e   :  { %v4276_v40 = vadd.f32 %v4275_v8, %v4274_v12 }
0x1d50   :  { %v4277_v24 = vrot.slane %v4276_v40, 1 }
0x1d52   :  { %v4278_v30 = vadd.f32 %v4277_v24, %v4276_v40 }
0x1d54   :  { %v4279_v59 = vmul.f32 0.0625, %v4278_v30 }
0x1d56   :  { %v4280_v61 = vadd.f32 1e-05, %v4279_v59 }
0x1d58   :  { %5336 = vrsqrt.f32 %v4280_v61 }
0x1d65   :  { %v5337_v32 = vpop.eup %5336 }
0x1d66   :  { %v4282_v45 = vmul.f32 %v5337_v32, %v4266_v18  ;;  %v4283_v28 = vmul.f32 %v5337_v32, %v4267_v11 }
0x1d68   :  { %v4291_v36 = vmul.f32 %v4576_v34, %v4282_v45  ;;  %v4292_v37 = vmul.f32 %v4576_v34, %v4283_v28 }
0x1d6a   :  { %v4300_v38 = vadd.f32 %v4577_v35, %v4291_v36  ;;  %v4301_v39 = vadd.f32 %v4577_v35, %v4292_v37 }
0x1d6c   :  { %5163 = vmatprep.mubr.msk.f32.mxu0 %vm294_vm6, %v4300_v38 }
0x1d6d   :  { %5164 = vmatmul.mubr.msk.f32.vlgmr.msra.gmra.mxu0 %vm294_vm6, %v4301_v39 }
0x1e2d   :  { %v5165_v33 = vpop.f32.mrf.mxu0 }
0x1e2e   :  { %v4391_v44 = vadd.f32 %v5165_v33, %v4578_v19 }
0x1e2f   :  { %v4385_v46 = vpop.f32.mrf.mxu0 }
0x1e30   :  { %4396 = vst.msk [vmem:[%s5721_s12 + $0x8] sm:$0xff] %vm4394_vm4, %v4391_v44  ;;  %v4386_v52 = vadd.f32 %v4578_v19, %v4385_v46 }
0x1e32   :  { %4395 = vst.msk [vmem:[%s5721_s12] sm:$0xff] %vm4394_vm4, %v4386_v52 }
0x1e33   :  { %4401 = vsyncpa [#allocation3], 1 }
0x1e34   :  { %4402 = vsyncpa [#allocation5], 1 }
0x1e35   :  { %4403 = vsyncpa [#allocation8], 1 }

</bundles_post_ra>
